<compile_context>
chip_gen: v5e
topology: v5e:2x2
jax: 0.10.0
libtpu: 0.0.40
codegen_flags: <defaults>
</compile_context>

<pallas_src>
import functools
import math

import jax
import jax.numpy as jnp
from jax import lax
from jax.experimental import pallas as pl
from jax.experimental.pallas import tpu as pltpu


# ---------------------------------------------------------------------------
# Fused kernel: one grid step per batch element, everything resident in VMEM.
# ---------------------------------------------------------------------------
def _fused_attention_kernel(x_ref, wqkv_ref, wo_ref, cos_ref, sin_ref, o_ref,
                            *, num_heads):
    S = x_ref.shape[1]
    D = x_ref.shape[2]
    H = num_heads
    Dh = D // H
    Dhh = Dh // 2

    x = x_ref[0]                                          # (S, D) f32

    # ---- fused QKV projection (bf16 MXU inputs, f32 accumulation) ---------
    qkv = jnp.dot(x.astype(jnp.bfloat16), wqkv_ref[...],
                  preferred_element_type=jnp.float32)     # (S, 3D) f32
    q = qkv[:, :D]          # already scaled by 1/sqrt(Dh) via the weights
    k = qkv[:, D:2 * D]
    v = qkv[:, 2 * D:]

    # ---- RoPE (interleaved-pair convention, evaluated in the permuted
    #      [evens | odds] per-head layout produced by prepare_fused_weights) -
    cos = cos_ref[...][:, None, :]                        # (S, 1, Dh//2)
    sin = sin_ref[...][:, None, :]

    def rope(t):
        t3 = t.reshape(S, H, Dh)                          # per head: [E | O]
        te = t3[..., :Dhh]                                # even pair elems
        to = t3[..., Dhh:]                                # odd pair elems
        return jnp.concatenate(
            [te * cos - to * sin, te * sin + to * cos], axis=-1)  # (S, H, Dh)

    qh = jnp.swapaxes(rope(q), 0, 1).astype(jnp.bfloat16)          # (H, S, Dh)
    kh = jnp.swapaxes(rope(k), 0, 1).astype(jnp.bfloat16)
    vh = jnp.swapaxes(v.reshape(S, H, Dh), 0, 1).astype(jnp.bfloat16)

    # ---- causal attention, all heads batched in one einsum -----------------
    s = jnp.einsum("hqd,hkd->hqk", qh, kh,
                   preferred_element_type=jnp.float32)    # (H, S, S), pre-scaled

    row = lax.broadcasted_iota(jnp.int32, (S, S), 0)
    col = lax.broadcasted_iota(jnp.int32, (S, S), 1)
    s = jnp.where((col <= row)[None, :, :], s, -jnp.inf)  # diagonal unmasked

    m = jnp.max(s, axis=-1, keepdims=True)                # softmax in f32
    p = jnp.exp(s - m)
    denom = jnp.sum(p, axis=-1, keepdims=True)
    p = p * pl.reciprocal(denom, approx=True)             # EUP reciprocal

    out = jnp.einsum("hqk,hkd->hqd", p.astype(jnp.bfloat16), vh,
                     preferred_element_type=jnp.float32)  # (H, S, Dh)

    # ---- back to a lane-dense (S, D) slab + output projection --------------
    out2 = jnp.swapaxes(out, 0, 1).reshape(S, D).astype(jnp.bfloat16)
    y = jnp.dot(out2, wo_ref[...], preferred_element_type=jnp.float32)
    o_ref[0] = y.astype(o_ref.dtype)
    # attn_dropout / res_dropout: identity in eval mode.
    # TODO(synk): for long sequences (v7x has 64 MiB VMEM) switch the (S,S)
    # score block to flash-style online-softmax tq x tk tiling and skip
    # fully-masked kv tiles with pl.when.


def attention_forward(x, w_qkv, w_o, cos, sin, num_heads):
    """x: (B, S, D) f32; w_qkv: (D, 3D) bf16; w_o: (D, D) bf16."""
    B, S, D = x.shape
    kernel = functools.partial(_fused_attention_kernel, num_heads=num_heads)
    xspec = pl.BlockSpec((1, S, D), lambda b: (b, 0, 0))

    def full(a):
        return pl.BlockSpec(a.shape, lambda b: (0, 0))

    return pl.pallas_call(
        kernel,
        out_shape=jax.ShapeDtypeStruct((B, S, D), x.dtype),
        grid=(B,),
        in_specs=[xspec, full(w_qkv), full(w_o), full(cos), full(sin)],
        out_specs=xspec,
        compiler_params=pltpu.CompilerParams(
            dimension_semantics=("parallel",)),
    )(x, w_qkv, w_o, cos, sin)


# ---------------------------------------------------------------------------
# One-time weight preparation (outside the kernel / per-call path)
# ---------------------------------------------------------------------------
def prepare_fused_weights(params, num_heads):
    """Concat q/k/v weights into (D, 3D), permute q/k output dims per head to
    [even pair elems | odd pair elems] so interleaved RoPE becomes a half-split
    rotation, fold the 1/sqrt(head_dim) softmax scale into the q weights
    (RoPE is a rotation, so pre-scaling q is exact), transpose once, cast to
    bf16.  Attention scores are invariant to the shared q/k permutation; v and
    wo are untouched."""
    D = params["wq"].shape[0]
    Dh = D // num_heads
    idx = jnp.arange(D).reshape(num_heads, Dh // 2, 2)    # [h, pair, parity]
    perm = jnp.concatenate([idx[..., 0], idx[..., 1]], axis=-1).reshape(-1)
    scale = 1.0 / math.sqrt(Dh)
    wq_p = params["wq"][perm, :] * scale
    wk_p = params["wk"][perm, :]
    w_qkv = jnp.concatenate([wq_p, wk_p, params["wv"]], axis=0).T  # (D, 3D)
    w_o = params["wo"].T                                           # (D, D)
    return w_qkv.astype(jnp.bfloat16), w_o.astype(jnp.bfloat16)


def precompute_freqs_cis(head_dim, seq_len, theta=10000.0):
    freqs = 1.0 / (theta ** (jnp.arange(0, head_dim, 2, dtype=jnp.float32)
                             / head_dim))
    t = jnp.arange(seq_len, dtype=jnp.float32)
    angles = jnp.outer(t, freqs)                          # (S, Dh//2)
    return jnp.cos(angles), jnp.sin(angles)


# ---------------------------------------------------------------------------
# Deterministic parameter init (nn.Linear default uniform(-1/sqrt(in), ...))
# ---------------------------------------------------------------------------
def init_params(key, d_model):
    ks = jax.random.split(key, 4)
    bound = 1.0 / math.sqrt(d_model)
    mk = lambda k: jax.random.uniform(
        k, (d_model, d_model), jnp.float32, minval=-bound, maxval=bound)
    return {"wq": mk(ks[0]), "wk": mk(ks[1]), "wv": mk(ks[2]), "wo": mk(ks[3])}


# ---------------------------------------------------------------------------
# Pure-JAX f32 reference (mirrors the PyTorch module) for a sanity check
# ---------------------------------------------------------------------------
def _ref_rope(t, cos, sin):
    B, S, H, Dh = t.shape
    t2 = t.reshape(B, S, H, Dh // 2, 2)
    te, to = t2[..., 0], t2[..., 1]
    c = cos[None, :, None, :]
    s = sin[None, :, None, :]
    return jnp.stack([te * c - to * s, te * s + to * c],
                     axis=-1).reshape(B, S, H, Dh)


def reference_forward(params, x, cos, sin, num_heads):
    B, S, D = x.shape
    Dh = D // num_heads
    q = (x @ params["wq"].T).reshape(B, S, num_heads, Dh)
    k = (x @ params["wk"].T).reshape(B, S, num_heads, Dh)
    v = (x @ params["wv"].T).reshape(B, S, num_heads, Dh)
    q = _ref_rope(q, cos, sin)
    k = _ref_rope(k, cos, sin)
    q = jnp.transpose(q, (0, 2, 1, 3))
    k = jnp.transpose(k, (0, 2, 1, 3))
    v = jnp.transpose(v, (0, 2, 1, 3))
    s = jnp.einsum("bhqd,bhkd->bhqk", q, k) / math.sqrt(Dh)
    mask = jnp.tril(jnp.ones((S, S), dtype=bool))
    s = jnp.where(mask, s, -jnp.inf)
    p = jax.nn.softmax(s, axis=-1)
    o = jnp.einsum("bhqk,bhkd->bhqd", p, v)
    o = jnp.transpose(o, (0, 2, 1, 3)).reshape(B, S, D)
    return o @ params["wo"].T


if __name__ == "__main__":
    # Shapes consistent with Config(d_model=128, num_heads=4, seq_len=64)
    batch, seq_len, d_model, num_heads = 2, 64, 128, 4
    head_dim = d_model // num_heads

    key = jax.random.PRNGKey(0)
    k_param, k_x = jax.random.split(key)
    params = init_params(k_param, d_model)
    x = jax.random.normal(k_x, (batch, seq_len, d_model), dtype=jnp.float32)
    cos, sin = precompute_freqs_cis(head_dim, seq_len)
    w_qkv, w_o = prepare_fused_weights(params, num_heads)

    fwd = jax.jit(functools.partial(attention_forward, num_heads=num_heads))
    out = jax.block_until_ready(fwd(x, w_qkv, w_o, cos, sin))

    assert out.shape == (batch, seq_len, d_model)
    assert bool(jnp.all(jnp.isfinite(out)))

    # bf16 MXU inputs with f32 accumulation -> small drift vs the f32 reference
    ref = reference_forward(params, x, cos, sin, num_heads)
    max_err = float(jnp.max(jnp.abs(out - ref)))
    assert max_err < 0.25, f"max abs err vs reference: {max_err}"
    print("KERNEL_OK")
</pallas_src>

<mosaic_0001>
module attributes {stable_mosaic.version = 11 : i64} {
  func.func @_fused_attention_kernel(%arg0: i32, %arg1: memref<1x64x128xf32, #tpu.memory_space<vmem>>, %arg2: memref<128x384xbf16, #tpu.memory_space<vmem>>, %arg3: memref<128x128xbf16, #tpu.memory_space<vmem>>, %arg4: memref<64x16xf32, #tpu.memory_space<vmem>>, %arg5: memref<64x16xf32, #tpu.memory_space<vmem>>, %arg6: memref<1x64x128xf32, #tpu.memory_space<vmem>>) attributes {dimension_semantics = [#tpu.dimension_semantics<parallel>], iteration_bounds = array<i64: 2>, scalar_prefetch = 0 : i64, scratch_operands = 0 : i64, tpu.core_type = #tpu.core_type<tc>, window_params = [{transform_indices = @transform_0, window_bounds = array<i64: 1, 64, 128>}, {pipeline_mode = #tpu.pipeline_mode<synchronous>, transform_indices = @transform_1, window_bounds = array<i64: 128, 384>}, {pipeline_mode = #tpu.pipeline_mode<synchronous>, transform_indices = @transform_2, window_bounds = array<i64: 128, 128>}, {pipeline_mode = #tpu.pipeline_mode<synchronous>, transform_indices = @transform_3, window_bounds = array<i64: 64, 16>}, {pipeline_mode = #tpu.pipeline_mode<synchronous>, transform_indices = @transform_4, window_bounds = array<i64: 64, 16>}, {transform_indices = @transform_5, window_bounds = array<i64: 1, 64, 128>}]} {
    %c0 = arith.constant 0 : index
    %c0_0 = arith.constant 0 : index
    %c0_1 = arith.constant 0 : index
    %0 = vector.load %arg1[%c0, %c0_0, %c0_1] : memref<1x64x128xf32, #tpu.memory_space<vmem>>, vector<1x64x128xf32>
    %1 = vector.shape_cast %0 : vector<1x64x128xf32> to vector<64x128xf32>
    %2 = arith.truncf %1 : vector<64x128xf32> to vector<64x128xbf16>
    %c0_2 = arith.constant 0 : index
    %c0_3 = arith.constant 0 : index
    %3 = vector.load %arg2[%c0_2, %c0_3] : memref<128x384xbf16, #tpu.memory_space<vmem>>, vector<128x384xbf16>
    %cst = arith.constant dense<0.000000e+00> : vector<64x384xf32>
    %4 = tpu.matmul %2, %3, %cst {dimension_numbers = #tpu.dot_dimension_numbers<[1], [0], [0], [1], [0, 0, 1, 1], [], []>} : vector<64x128xbf16>, vector<128x384xbf16>, vector<64x384xf32> -> vector<64x384xf32>
    %5 = vector.extract_strided_slice %4 {offsets = [0, 0], sizes = [64, 128], strides = [1, 1]} : vector<64x384xf32> to vector<64x128xf32>
    %6 = vector.extract_strided_slice %4 {offsets = [0, 128], sizes = [64, 128], strides = [1, 1]} : vector<64x384xf32> to vector<64x128xf32>
    %7 = vector.extract_strided_slice %4 {offsets = [0, 256], sizes = [64, 128], strides = [1, 1]} : vector<64x384xf32> to vector<64x128xf32>
    %c0_4 = arith.constant 0 : index
    %c0_5 = arith.constant 0 : index
    %8 = vector.load %arg4[%c0_4, %c0_5] : memref<64x16xf32, #tpu.memory_space<vmem>>, vector<64x16xf32>
    %9 = vector.shape_cast %8 : vector<64x16xf32> to vector<64x1x16xf32>
    %c0_6 = arith.constant 0 : index
    %c0_7 = arith.constant 0 : index
    %10 = vector.load %arg5[%c0_6, %c0_7] : memref<64x16xf32, #tpu.memory_space<vmem>>, vector<64x16xf32>
    %11 = vector.shape_cast %10 : vector<64x16xf32> to vector<64x1x16xf32>
    %12 = vector.shape_cast %5 : vector<64x128xf32> to vector<64x4x32xf32>
    %13 = vector.extract_strided_slice %12 {offsets = [0, 0, 0], sizes = [64, 4, 16], strides = [1, 1, 1]} : vector<64x4x32xf32> to vector<64x4x16xf32>
    %14 = vector.extract_strided_slice %12 {offsets = [0, 0, 16], sizes = [64, 4, 16], strides = [1, 1, 1]} : vector<64x4x32xf32> to vector<64x4x16xf32>
    %15 = vector.broadcast %9 : vector<64x1x16xf32> to vector<64x4x16xf32>
    %16 = arith.mulf %13, %15 : vector<64x4x16xf32>
    %17 = vector.broadcast %11 : vector<64x1x16xf32> to vector<64x4x16xf32>
    %18 = arith.mulf %14, %17 : vector<64x4x16xf32>
    %19 = arith.subf %16, %18 : vector<64x4x16xf32>
    %20 = vector.broadcast %11 : vector<64x1x16xf32> to vector<64x4x16xf32>
    %21 = arith.mulf %13, %20 : vector<64x4x16xf32>
    %22 = vector.broadcast %9 : vector<64x1x16xf32> to vector<64x4x16xf32>
    %23 = arith.mulf %14, %22 : vector<64x4x16xf32>
    %24 = arith.addf %21, %23 : vector<64x4x16xf32>
    %25 = tpu.concatenate %19, %24 in 2 : vector<64x4x16xf32>, vector<64x4x16xf32> -> vector<64x4x32xf32>
    %26 = tpu.transpose %25, [1, 0, 2] : vector<64x4x32xf32> -> vector<4x64x32xf32>
    %27 = arith.truncf %26 : vector<4x64x32xf32> to vector<4x64x32xbf16>
    %28 = vector.shape_cast %6 : vector<64x128xf32> to vector<64x4x32xf32>
    %29 = vector.extract_strided_slice %28 {offsets = [0, 0, 0], sizes = [64, 4, 16], strides = [1, 1, 1]} : vector<64x4x32xf32> to vector<64x4x16xf32>
    %30 = vector.extract_strided_slice %28 {offsets = [0, 0, 16], sizes = [64, 4, 16], strides = [1, 1, 1]} : vector<64x4x32xf32> to vector<64x4x16xf32>
    %31 = vector.broadcast %9 : vector<64x1x16xf32> to vector<64x4x16xf32>
    %32 = arith.mulf %29, %31 : vector<64x4x16xf32>
    %33 = vector.broadcast %11 : vector<64x1x16xf32> to vector<64x4x16xf32>
    %34 = arith.mulf %30, %33 : vector<64x4x16xf32>
    %35 = arith.subf %32, %34 : vector<64x4x16xf32>
    %36 = vector.broadcast %11 : vector<64x1x16xf32> to vector<64x4x16xf32>
    %37 = arith.mulf %29, %36 : vector<64x4x16xf32>
    %38 = vector.broadcast %9 : vector<64x1x16xf32> to vector<64x4x16xf32>
    %39 = arith.mulf %30, %38 : vector<64x4x16xf32>
    %40 = arith.addf %37, %39 : vector<64x4x16xf32>
    %41 = tpu.concatenate %35, %40 in 2 : vector<64x4x16xf32>, vector<64x4x16xf32> -> vector<64x4x32xf32>
    %42 = tpu.transpose %41, [1, 0, 2] : vector<64x4x32xf32> -> vector<4x64x32xf32>
    %43 = arith.truncf %42 : vector<4x64x32xf32> to vector<4x64x32xbf16>
    %44 = vector.shape_cast %7 : vector<64x128xf32> to vector<64x4x32xf32>
    %45 = tpu.transpose %44, [1, 0, 2] : vector<64x4x32xf32> -> vector<4x64x32xf32>
    %46 = arith.truncf %45 : vector<4x64x32xf32> to vector<4x64x32xbf16>
    "tpu.trace_start"() <{level = 10 : i32, message = "hqd,hkd->hqk"}> : () -> ()
    %cst_8 = arith.constant dense<0.000000e+00> : vector<4x64x64xf32>
    %47 = tpu.matmul %27, %43, %cst_8 {dimension_numbers = #tpu.dot_dimension_numbers<[2], [2], [1], [1], [0, 0, 0, 1, 1, 1], [0], [0]>} : vector<4x64x32xbf16>, vector<4x64x32xbf16>, vector<4x64x64xf32> -> vector<4x64x64xf32>
    "tpu.trace_stop"() : () -> ()
    %48 = tpu.iota {dimensions = array<i32: 0>} : vector<64x64xi32>
    %49 = tpu.iota {dimensions = array<i32: 1>} : vector<64x64xi32>
    %50 = arith.cmpi sle, %49, %48 : vector<64x64xi32>
    %51 = vector.shape_cast %50 : vector<64x64xi1> to vector<1x64x64xi1>
    %cst_9 = arith.constant 0xFF800000 : f32
    %52 = vector.shape_cast %51 : vector<1x64x64xi1> to vector<1x64x64xi1>
    %53 = vector.broadcast %52 : vector<1x64x64xi1> to vector<4x64x64xi1>
    %54 = vector.broadcast %cst_9 : f32 to vector<4x64x64xf32>
    %55 = arith.select %53, %47, %54 : vector<4x64x64xi1>, vector<4x64x64xf32>
    %cst_10 = arith.constant dense<0xFF800000> : vector<4x64xf32>
    %56 = vector.multi_reduction <maximumf>, %55, %cst_10 [2] : vector<4x64x64xf32> to vector<4x64xf32>
    %57 = vector.shape_cast %56 : vector<4x64xf32> to vector<4x64x1xf32>
    %58 = vector.broadcast %57 : vector<4x64x1xf32> to vector<4x64x64xf32>
    %59 = arith.subf %55, %58 : vector<4x64x64xf32>
    %60 = math.exp %59 : vector<4x64x64xf32>
    %cst_11 = arith.constant dense<0.000000e+00> : vector<4x64xf32>
    %61 = vector.multi_reduction <add>, %60, %cst_11 [2] : vector<4x64x64xf32> to vector<4x64xf32>
    %62 = vector.shape_cast %61 : vector<4x64xf32> to vector<4x64x1xf32>
    %63 = tpu.reciprocal %62 {approx = true} : vector<4x64x1xf32> -> vector<4x64x1xf32>
    %64 = vector.broadcast %63 : vector<4x64x1xf32> to vector<4x64x64xf32>
    %65 = arith.mulf %60, %64 : vector<4x64x64xf32>
    %66 = arith.truncf %65 : vector<4x64x64xf32> to vector<4x64x64xbf16>
    "tpu.trace_start"() <{level = 10 : i32, message = "hqk,hkd->hqd"}> : () -> ()
    %cst_12 = arith.constant dense<0.000000e+00> : vector<4x64x32xf32>
    %67 = tpu.matmul %66, %46, %cst_12 {dimension_numbers = #tpu.dot_dimension_numbers<[2], [1], [1], [2], [0, 0, 0, 1, 1, 2], [0], [0]>} : vector<4x64x64xbf16>, vector<4x64x32xbf16>, vector<4x64x32xf32> -> vector<4x64x32xf32>
    "tpu.trace_stop"() : () -> ()
    %68 = tpu.transpose %67, [1, 0, 2] : vector<4x64x32xf32> -> vector<64x4x32xf32>
    %69 = vector.shape_cast %68 : vector<64x4x32xf32> to vector<64x128xf32>
    %70 = arith.truncf %69 : vector<64x128xf32> to vector<64x128xbf16>
    %c0_13 = arith.constant 0 : index
    %c0_14 = arith.constant 0 : index
    %71 = vector.load %arg3[%c0_13, %c0_14] : memref<128x128xbf16, #tpu.memory_space<vmem>>, vector<128x128xbf16>
    %cst_15 = arith.constant dense<0.000000e+00> : vector<64x128xf32>
    %72 = tpu.matmul %70, %71, %cst_15 {dimension_numbers = #tpu.dot_dimension_numbers<[1], [0], [0], [1], [0, 0, 1, 1], [], []>} : vector<64x128xbf16>, vector<128x128xbf16>, vector<64x128xf32> -> vector<64x128xf32>
    %c0_16 = arith.constant 0 : index
    %c0_17 = arith.constant 0 : index
    %c0_18 = arith.constant 0 : index
    %73 = vector.load %arg6[%c0_16, %c0_17, %c0_18] : memref<1x64x128xf32, #tpu.memory_space<vmem>>, vector<1x64x128xf32>
    %74 = vector.shape_cast %73 : vector<1x64x128xf32> to vector<64x128xf32>
    %75 = vector.shape_cast %72 : vector<64x128xf32> to vector<1x64x128xf32>
    tpu.vector_store %arg6[%c0_16, %c0_17, %c0_18], %75 {strides = array<i32>} : memref<1x64x128xf32, #tpu.memory_space<vmem>>, vector<1x64x128xf32>,
    return
  }
  func.func @transform_0(%arg0: i32) -> (i32, i32, i32) {
    %c0_i32 = arith.constant 0 : i32
    %c0_i32_0 = arith.constant 0 : i32
    %c0_i32_1 = arith.constant 0 : i32
    return %arg0, %c0_i32, %c0_i32_0 : i32, i32, i32
  }
  func.func @transform_1(%arg0: i32) -> (i32, i32) {
    %c0_i32 = arith.constant 0 : i32
    %c0_i32_0 = arith.constant 0 : i32
    %c0_i32_1 = arith.constant 0 : i32
    return %c0_i32, %c0_i32_0 : i32, i32
  }
  func.func @transform_2(%arg0: i32) -> (i32, i32) {
    %c0_i32 = arith.constant 0 : i32
    %c0_i32_0 = arith.constant 0 : i32
    %c0_i32_1 = arith.constant 0 : i32
    return %c0_i32, %c0_i32_0 : i32, i32
  }
  func.func @transform_3(%arg0: i32) -> (i32, i32) {
    %c0_i32 = arith.constant 0 : i32
    %c0_i32_0 = arith.constant 0 : i32
    %c0_i32_1 = arith.constant 0 : i32
    return %c0_i32, %c0_i32_0 : i32, i32
  }
  func.func @transform_4(%arg0: i32) -> (i32, i32) {
    %c0_i32 = arith.constant 0 : i32
    %c0_i32_0 = arith.constant 0 : i32
    %c0_i32_1 = arith.constant 0 : i32
    return %c0_i32, %c0_i32_0 : i32, i32
  }
  func.func @transform_5(%arg0: i32) -> (i32, i32, i32) {
    %c0_i32 = arith.constant 0 : i32
    %c0_i32_0 = arith.constant 0 : i32
    %c0_i32_1 = arith.constant 0 : i32
    return %arg0, %c0_i32, %c0_i32_0 : i32, i32, i32
  }
}

</mosaic_0001>

<bundles_post_ra>
// kernel: attention_forward.1
= control target key start
LH: loop header
LB: loop body
LE: loop exit
PB: predicated region body
PF: predicated region fallthrough
CT: control target
= control target key end

     0   :  { %10 = vsyncpa [#allocation3], 0  ;;  %s17644_s0 = inlined_call_operand.vmem [shape: f32[2,64,128], index: 0, kind: input, shape index: {}]   ;;  %s17645_s1 = inlined_call_operand.hbm [shape: bf16[128,384], index: 1, kind: input, shape index: {}]   ;;  %s17646_s2 = inlined_call_operand.hbm [shape: bf16[128,128], index: 2, kind: input, shape index: {}]   ;;  %s17647_s3 = inlined_call_operand.vmem [shape: f32[64,16], index: 3, kind: input, shape index: {}]   ;;  %s17648_s4 = inlined_call_operand.vmem [shape: f32[64,16], index: 4, kind: input, shape index: {}]   ;;  %s17649_s5 = inlined_call_operand.hbm [shape: f32[2,64,128], index: 5, kind: output, shape index: {}]  }
   0x1   :  { %11 = vsyncpa [#allocation6], 0 }
   0x2   :  { %12 = vsyncpa [#allocation4], 0 }
   0x3   :  { %14 = vsyncpa [#allocation4 + $0x1], 0  ;;  %s10142_s18 = smov 0   ;;  %s10144_s19 = smov 0  }
   0x4   :  { %s10146_s20 = smov 0   ;;  %s10148_s21 = smov 0  }
   0x5 LB: > { %s10163_s22 = sadd.s32 4294967295, %s10095_s21   ;;  %s9114_s23 = sadd.s32 4294967294, %s10095_s21   ;;  %s10095_s21 = sphi %s10148_s21, %s20628_s21   ;;  %s10091_s20 = sphi %s10146_s20, %s20627_s20   ;;  %s10087_s19 = sphi %s10144_s19, %s20626_s19   ;;  %s10083_s18 = sphi %s10142_s18, %s20625_s18  }
   0x6   : > { %s10167_s24 = sadd.s32 1, %s10095_s21   ;;  %s137_s25 = sadd.s32 1, %s10091_s20 }
   0x7   : > { %s134_s26 = ssub.s32 %s10095_s21, %s10167_s24  ;;  %p147_p0 = scmp.ne.s32.totalorder %s10091_s20, %s10087_s19 }
   0x8   : > { %p135_p1 = scmp.eq.s32.totalorder %s134_s26, 0  ;;  %p148_p2 = scmp.eq.s32.totalorder %s10163_s22, 1 }
   0x9   : > { %p153_p3 = scmp.ne.s32.totalorder %s10087_s19, %s10083_s18  ;;  %p154_p4 = scmp.eq.s32.totalorder %s9114_s23, 1 }
   0xa   : > { %s10178_s27 = scalar_select %p135_p1, %s10091_s20, %s137_s25  }
   0xb   : > { %p10180_p5 = por %p148_p2, %p147_p0  ;;  %p10184_p6 = por %p154_p4, %p153_p3 }
   0xc   : > { %p9115_p7 = scmp.ge.s32.totalorder %s10095_s21, 1  ;;  %p161_p8 = scmp.lt.s32.totalorder %s10095_s21, 3 }
   0xd   : > { %p9345_p9 = scmp.eq.s32.totalorder %s10163_s22, 0  ;;  %s172_s8 = sshll.u32 %s17645_s1, 4  ;;  %s173_s8 = int_to_ptr.hbm [resolvable:$true] %s172_s8 }
   0xe   : > { %p10191_p10 = pnand %p9115_p7, %p161_p8  ;;  %s10097_s9 = smov [#allocation2]  }
   0xf   : > { %s174_s10 = sshll.u32 %s10097_s9, 4  ;;  %s186_s13 = sshll.u32 %s17646_s2, 4  ;;  %s175_s10 = int_to_ptr.vmem [resolvable:$true] %s174_s10  ;;  %s187_s13 = int_to_ptr.hbm [resolvable:$true] %s186_s13 }
  0x10   : > { %p9334_p11 = pneg %p10191_p10  ;;  %s10098_s14 = smov 192  }
  0x11   : > { %s10099_s15 = smov 12   ;;  %s10100_s16 = smov [#allocation5]  }
  0x12   : > { %p9335_p12 = pnand %p9345_p9, %p9334_p11  ;;  %s188_s17 = sshll.u32 %s10100_s16, 4  ;;  %s189_s17 = int_to_ptr.vmem [resolvable:$true] %s188_s17 }
  0x13   : > { %s10101_s23 = smov 64   ;;  %s10102_s25 = smov 4  }
  0x14   : > { %9337 = dma.hbm_to_vmem [thread:$0]  (!%p9335_p12), %s173_s8, 3072, %s175_s10, [#allocation3], %s10098_s14, %s10098_s14, %s10099_s15  }
  0x15   : > { %9340 = dma.hbm_to_vmem [thread:$0]  (!%p9335_p12), %s187_s13, 1024, %s189_s17, [#allocation6], %s10101_s23, %s10101_s23, %s10102_s25  }
  0x16   : > { %218 = sbr.rel (%p10191_p10) target bundleno = 2851 (0xb23), region = 40 }
  0x1b   : > { %10070 = dma.done.wait (%p9345_p9), [#allocation3], 3072  }
  0x1c   : > { %10072 = vsyncadd (%p9345_p9), [#allocation3], 4294964224 }
  0x1d   : > { %10074 = dma.done.wait (%p9345_p9), [#allocation6], 1024  }
  0x1e   : > { %10076 = vsyncadd (%p9345_p9), [#allocation6], 4294966272  ;;  %v9211_v0 = vld [vmem:[#allocation2 + $0xa8] sm:$0xf]  ;;  %v9313_v1 = vld [vmem:[#allocation2 + $0xb0] sm:$0xf0] }
  0x1f   : > { %v9199_v2 = vld [vmem:[#allocation2 + $0x90] sm:$0xf]  ;;  %v9212_v3 = vor.u32 %v9313_v1, %v9211_v0  ;;  %v9310_v4 = vld [vmem:[#allocation2 + $0x98] sm:$0xf0]  ;;  %v589_v5 = vld [vmem:[%s17648_s4] sm:$0xff]  ;;  %s10103_s6 = smov 16  }
  0x20   : > { %v10218_v6 = vperm.slane %v589_v5, 0  ;;  %v606_v7 = vrot.slane %v589_v5, 2  ;;  %v605_v8 = vrot.slane %v589_v5, 1  ;;  %v9200_v9 = vor.u32 %v9310_v4, %v9199_v2  ;;  %v9187_v10 = vld [vmem:[#allocation2 + $0x78] sm:$0xf]  ;;  %p252_p13 = scmp.lt.s32.totalorder %s10163_s22, 1 }
  0x21   : > { %430 = vmatpush.bf16.msra.mxu0 %v9212_v3  ;;  %v9307_v13 = vld [vmem:[#allocation2 + $0x80] sm:$0xf0]  ;;  %v607_v14 = vrot.slane %v589_v5, 3  ;;  %v609_v15 = vrot.slane %v589_v5, 5  ;;  %v608_v16 = vrot.slane %v589_v5, 4  ;;  %v610_v26 = vrot.slane %v589_v5, 6 }
  0x22   : > { %18611 = vst [vmem:[#allocation11_spill] sm:$0xff] %v10218_v6  ;;  %1510 = vrot.lane.b32.xlu0 %v10218_v6, %s10103_s6  ;;  %v10222_v11 = vperm.slane %v606_v7, 0  ;;  %v10224_v12 = vperm.slane %v605_v8, 0  ;;  %v9188_v17 = vor.u32 %v9307_v13, %v9187_v10  ;;  %v9175_v18 = vld [vmem:[#allocation2 + $0x60] sm:$0xf]  ;;  %v611_v27 = vrot.slane %v589_v5, 7 }
  0x23   : > { %v9304_v19 = vld [vmem:[#allocation2 + $0x68] sm:$0xf0]  ;;  %v10230_v20 = vperm.slane %v607_v14, 0  ;;  %v10232_v21 = vperm.slane %v609_v15, 0  ;;  %v10234_v22 = vperm.slane %v608_v16, 0  ;;  %v10246_v32 = vperm.slane %v610_v26, 0 }
  0x24   : > { %18612 = vst [vmem:[#allocation12_spill] sm:$0xff] %v10222_v11  ;;  %1514 = vrot.lane.b32.xlu2 %v10222_v11, %s10103_s6  ;;  %1512 = vrot.lane.b32.xlu1 %v10224_v12, %s10103_s6  ;;  %v9176_v23 = vor.u32 %v9304_v19, %v9175_v18  ;;  %v9163_v24 = vld [vmem:[#allocation2 + $0x48] sm:$0xf]  ;;  %v9301_v25 = vld [vmem:[#allocation2 + $0x50] sm:$0xf0]  ;;  %s253_s9 = scalar_select %p252_p13, %s10163_s22, 1 }
  0x25   : > { %18613 = vst [vmem:[#allocation13_spill] sm:$0xff] %v10224_v12  ;;  %431 = vmatpush.bf16.msra.mxu0 %v9200_v9  ;;  %v9164_v28 = vor.u32 %v9301_v25, %v9163_v24  ;;  %v590_v29 = vld [vmem:[%s17648_s4 + $0x8] sm:$0xff]  ;;  %v9151_v30 = vld [vmem:[#allocation2 + $0x30] sm:$0xf]  ;;  %v9298_v31 = vld [vmem:[#allocation2 + $0x38] sm:$0xf0] }
  0x26   : > { %18614 = vst [vmem:[#allocation14_spill] sm:$0xff] %v10230_v20  ;;  %v10249_v33 = vperm.slane %v590_v29, 0  ;;  %v10251_v34 = vperm.slane %v611_v27, 0  ;;  %v9152_v35 = vor.u32 %v9298_v31, %v9151_v30  ;;  %v9139_v36 = vld [vmem:[#allocation2 + $0x18] sm:$0xf]  ;;  %v612_v38 = vrot.slane %v590_v29, 1 }
  0x27   : > { %18615 = vst [vmem:[#allocation15_spill] sm:$0xff] %v10232_v21  ;;  %v9295_v37 = vld [vmem:[#allocation2 + $0x20] sm:$0xf0]  ;;  %s9290_s10 = sshll.u32 %s253_s9, 6  ;;  %v614_v39 = vrot.slane %v590_v29, 3  ;;  %v613_v40 = vrot.slane %v590_v29, 2 }
  0x28   : > { %18616 = vst [vmem:[#allocation16_spill] sm:$0xff] %v10234_v22  ;;  %v9140_v41 = vor.u32 %v9295_v37, %v9139_v36  ;;  %v9127_v42 = vld [vmem:[#allocation2] sm:$0xf]  ;;  %v9292_v43 = vld [vmem:[#allocation2 + $0x8] sm:$0xf0]  ;;  %v10259_v44 = vperm.slane %v612_v38, 0  ;;  %s10264_s13 = scalar_lea.vmem %s17644_s0, %s9290_s10 }
  0x29   : > { %432 = vmatpush.bf16.msra.mxu0 %v9188_v17  ;;  %18617 = vst [vmem:[#allocation17_spill] sm:$0xff] %v10246_v32  ;;  %v10266_v45 = vperm.slane %v614_v39, 0  ;;  %v10268_v46 = vperm.slane %v613_v40, 0  ;;  %v9128_v47 = vor.u32 %v9292_v43, %v9127_v42  ;;  %v258_v48 = vld [vmem:[%s10264_s13] sm:$0xff]  ;;  %v259_v49 = vld [vmem:[%s10264_s13 + $0x8] sm:$0xff]  ;;  %v615_v50 = vrot.slane %v590_v29, 4 }
  0x2a   : > { %1516 = vrot.lane.b32.xlu0 %v10230_v20, %s10103_s6  ;;  %18618 = vst [vmem:[#allocation18_spill] sm:$0xff] %v10249_v33  ;;  %v10278_v51 = vpack.c.bf16 %v259_v49, %v258_v48  ;;  %v617_v52 = vrot.slane %v590_v29, 6  ;;  %v616_v53 = vrot.slane %v590_v29, 5  ;;  %v591_v57 = vld [vmem:[%s17648_s4 + $0x10] sm:$0xff]  ;;  %v618_v58 = vrot.slane %v590_v29, 7  ;;  %v261_v0 = vld [vmem:[%s10264_s13 + $0x18] sm:$0xff] }
  0x2b   : > { %18619 = vst [vmem:[#allocation19_spill] sm:$0xff] %v10251_v34  ;;  %v10280_v54 = vperm.slane %v615_v50, 0  ;;  %v619_v59 = vrot.slane %v591_v57, 1  ;;  %v10300_v62 = vperm.slane %v591_v57, 0  ;;  %v260_v63 = vld [vmem:[%s10264_s13 + $0x10] sm:$0xff]  ;;  %v620_v1 = vrot.slane %v591_v57, 2 }
  0x2c   : > { %1520 = vrot.lane.b32.xlu2 %v10232_v21, %s10103_s6  ;;  %1518 = vrot.lane.b32.xlu1 %v10234_v22, %s10103_s6  ;;  %18620 = vst [vmem:[#allocation20_spill] sm:$0xff] %v10259_v44  ;;  %v10283_v55 = vperm.slane %v617_v52, 0  ;;  %v10285_v56 = vperm.slane %v616_v53, 0  ;;  %v10296_v60 = vperm.slane %v618_v58, 0  ;;  %v10310_v2 = vpack.c.bf16 %v261_v0, %v260_v63  ;;  %v592_v17 = vld [vmem:[%s17648_s4 + $0x18] sm:$0xff]  ;;  %v262_v18 = vld [vmem:[%s10264_s13 + $0x20] sm:$0xff] }
  0x2d   : > { %433 = vmatpush.bf16.msra.mxu0 %v9176_v23  ;;  %18621 = vst [vmem:[#allocation21_spill] sm:$0xff] %v10266_v45  ;;  %v10298_v61 = vperm.slane %v619_v59, 0  ;;  %v622_v3 = vrot.slane %v591_v57, 4  ;;  %v621_v4 = vrot.slane %v591_v57, 3  ;;  %v10312_v5 = vperm.slane %v620_v1, 0  ;;  %v263_v19 = vld [vmem:[%s10264_s13 + $0x28] sm:$0xff] }
  0x2e   : > { %18622 = vst [vmem:[#allocation22_spill] sm:$0xff] %v10268_v46  ;;  %v623_v9 = vrot.slane %v591_v57, 5  ;;  %v625_v10 = vrot.slane %v591_v57, 7  ;;  %v624_v13 = vrot.slane %v591_v57, 6  ;;  %v627_v23 = vrot.slane %v592_v17, 2  ;;  %v264_v38 = vld [vmem:[%s10264_s13 + $0x30] sm:$0xff] }
  0x2f   : > { %18623 = vst [vmem:[#allocation23_spill] sm:$0xff] %v10278_v51  ;;  %v10315_v7 = vperm.slane %v622_v3, 0  ;;  %v10317_v8 = vperm.slane %v621_v4, 0  ;;  %v626_v24 = vrot.slane %v592_v17, 1  ;;  %v10342_v25 = vpack.c.bf16 %v263_v19, %v262_v18  ;;  %v265_v39 = vld [vmem:[%s10264_s13 + $0x38] sm:$0xff]  ;;  %v593_v43 = vld [vmem:[%s17648_s4 + $0x20] sm:$0xff] }
  0x30   : > { %18624 = vst [vmem:[#allocation24_spill] sm:$0xff] %v10280_v54  ;;  %v10325_v14 = vperm.slane %v623_v9, 0  ;;  %v10327_v15 = vperm.slane %v625_v10, 0  ;;  %v10329_v16 = vperm.slane %v624_v13, 0  ;;  %v10344_v26 = vperm.slane %v592_v17, 0  ;;  %v594_v13 = vld [vmem:[%s17648_s4 + $0x28] sm:$0xff] }
  0x31   : > { %434 = vmatpush.bf16.msra.mxu0 %v9164_v28  ;;  %18625 = vst [vmem:[#allocation25_spill] sm:$0xff] %v10283_v55  ;;  %v10346_v27 = vperm.slane %v627_v23, 0  ;;  %v10348_v28 = vperm.slane %v626_v24, 0  ;;  %v628_v29 = vrot.slane %v592_v17, 3  ;;  %v630_v30 = vrot.slane %v592_v17, 5  ;;  %s10104_s11 = smov 32  }
  0x32   : > { %1522 = vrot.lane.b32.xlu0 %v10246_v32, %s10103_s6  ;;  %18626 = vst [vmem:[#allocation26_spill] sm:$0xff] %v10285_v56  ;;  %v629_v31 = vrot.slane %v592_v17, 4  ;;  %v631_v40 = vrot.slane %v592_v17, 6  ;;  %v10371_v42 = vpack.c.bf16 %v265_v39, %v264_v38  ;;  %v10378_v48 = vperm.slane %v593_v43, 0  ;;  %s10105_s12 = smov 64   ;;  %s10106_s13 = smov 96  }
  0x33   : > { %18627 = vst [vmem:[#allocation27_spill] sm:$0xff] %v10296_v60  ;;  %v10359_v36 = vperm.slane %v630_v30, 0  ;;  %v633_v50 = vrot.slane %v593_v43, 1  ;;  %v635_v52 = vrot.slane %v593_v43, 3  ;;  %v634_v53 = vrot.slane %v593_v43, 2  ;;  %s10109_s14 = smov 112  }
  0x34   : > { %1526 = vrot.lane.b32.xlu2 %v10249_v33, %s10103_s6  ;;  %1524 = vrot.lane.b32.xlu1 %v10251_v34, %s10103_s6  ;;  %18628 = vst [vmem:[#allocation28_spill] sm:$0xff] %v10298_v61  ;;  %v10361_v37 = vperm.slane %v629_v31, 0  ;;  %v636_v63 = vrot.slane %v593_v43, 4  ;;  %v638_v0 = vrot.slane %v593_v43, 6  ;;  %v637_v1 = vrot.slane %v593_v43, 5  ;;  %s10045_s17 = scalar_lea.hbm %s17649_s5, 128 }
  0x35   : > { %435 = vmatpush.bf16.msra.mxu0 %v9152_v35  ;;  %18629 = vst [vmem:[#allocation29_spill] sm:$0xff] %v10300_v62  ;;  %v10357_v35 = vperm.slane %v628_v29, 0  ;;  %v10389_v57 = vperm.slane %v633_v50, 0  ;;  %v10391_v58 = vperm.slane %v635_v52, 0  ;;  %v10393_v59 = vperm.slane %v634_v53, 0 }
  0x36   : > { %18630 = vst [vmem:[#allocation30_spill] sm:$0xff] %v10310_v2  ;;  %v10403_v4 = vperm.slane %v636_v63, 0  ;;  %v10405_v9 = vperm.slane %v638_v0, 0  ;;  %v10407_v10 = vperm.slane %v637_v1, 0  ;;  %v640_v18 = vrot.slane %v594_v13, 1 }
  0x37   : > { %18631 = vst [vmem:[#allocation31_spill] sm:$0xff] %v10312_v5  ;;  %v10424_v29 = vperm.slane %v594_v13, 0  ;;  %v641_v30 = vrot.slane %v594_v13, 2  ;;  %v643_v31 = vrot.slane %v594_v13, 4  ;;  %v642_v38 = vrot.slane %v594_v13, 3 }
  0x38   : > { %18632 = vst [vmem:[#allocation32_spill] sm:$0xff] %v10315_v7  ;;  %v10422_v24 = vperm.slane %v640_v18, 0  ;;  %v644_v50 = vrot.slane %v594_v13, 5  ;;  %v646_v53 = vrot.slane %v594_v13, 7  ;;  %v645_v63 = vrot.slane %v594_v13, 6 }
  0x39   : > { %436 = vmatpush.bf16.msra.mxu0 %v9140_v41  ;;  %18633 = vst [vmem:[#allocation33_spill] sm:$0xff] %v10317_v8  ;;  %v632_v41 = vrot.slane %v592_v17, 7  ;;  %v639_v17 = vrot.slane %v593_v43, 7  ;;  %v10438_v43 = vperm.slane %v642_v38, 0  ;;  %vm742_vm0 = vcmask 1047556  }
  0x3a   : > { %1528 = vrot.lane.b32.xlu0 %v10259_v44, %s10103_s6  ;;  %18634 = vst [vmem:[#allocation34_spill] sm:$0xff] %v10325_v14  ;;  %v10454_v18 = vperm.slane %v646_v53, 0  ;;  %vm2982_vm1 = vcmask 130048   ;;  %vm6783_vm2 = vcmask 261120   ;;  %vm7183_vm5 = vcmask 523264  }
  0x3b   : > { %18635 = vst [vmem:[#allocation35_spill] sm:$0xff] %v10327_v15  ;;  %v10380_v49 = vperm.slane %v632_v41, 0  ;;  %v10420_v23 = vperm.slane %v639_v17, 0  ;;  %v10436_v41 = vperm.slane %v643_v31, 0  ;;  %v10452_v17 = vperm.slane %v644_v50, 0  ;;  %v595_v31 = vld [vmem:[%s17648_s4 + $0x30] sm:$0xff] }
  0x3c   : > { %1532 = vrot.lane.b32.xlu2 %v10266_v45, %s10103_s6  ;;  %1530 = vrot.lane.b32.xlu1 %v10268_v46, %s10103_s6  ;;  %18636 = vst [vmem:[#allocation36_spill] sm:$0xff] %v10329_v16  ;;  %v648_v38 = vrot.slane %v595_v31, 2  ;;  %v647_v50 = vrot.slane %v595_v31, 1  ;;  %vm8900_vm12 = vcmask 785408  }
  0x3d   : > { %437 = vmatpush.bf16.msra.mxu0 %v9128_v47  ;;  %18637 = vst [vmem:[#allocation37_spill] sm:$0xff] %v10342_v25  ;;  %v10376_v47 = vperm.slane %v631_v40, 0  ;;  %v10434_v40 = vperm.slane %v641_v30, 0  ;;  %v10456_v30 = vperm.slane %v645_v63, 0 }
  0x3e   : > { %18638 = vst [vmem:[#allocation38_spill] sm:$0xff] %v10344_v26 }
  0x3f   : > { %18639 = vst [vmem:[#allocation39_spill] sm:$0xff] %v10346_v27 }
  0x40   : > { %438 = vmatmul.bf16.vlgmr.msra.gmra.mxu0 %v10278_v51  ;;  %18640 = vst [vmem:[#allocation40_spill] sm:$0xff] %v10348_v28 }
  0x41   : > { %18641 = vst [vmem:[#allocation41_spill] sm:$0xff] %v10357_v35 }
  0x42   : > { %1534 = vrot.lane.b32.xlu0 %v10280_v54, %s10103_s6  ;;  %18642 = vst [vmem:[#allocation42_spill] sm:$0xff] %v10359_v36 }
  0x43   : > { %18643 = vst [vmem:[#allocation43_spill] sm:$0xff] %v10361_v37 }
  0x44   : > { %1538 = vrot.lane.b32.xlu2 %v10283_v55, %s10103_s6  ;;  %1536 = vrot.lane.b32.xlu1 %v10285_v56, %s10103_s6  ;;  %18644 = vst [vmem:[#allocation44_spill] sm:$0xff] %v10371_v42 }
  0x45   : > { %18645 = vst [vmem:[#allocation45_spill] sm:$0xff] %v10376_v47 }
  0x46   : > { %18646 = vst [vmem:[#allocation46_spill] sm:$0xff] %v10378_v48 }
  0x47   : > { %18647 = vst [vmem:[#allocation47_spill] sm:$0xff] %v10380_v49 }
  0x48   : > { %18648 = vst [vmem:[#allocation48_spill] sm:$0xff] %v10389_v57 }
  0x49   : > { %18649 = vst [vmem:[#allocation49_spill] sm:$0xff] %v10391_v58 }
  0x4a   : > { %1540 = vrot.lane.b32.xlu0 %v10296_v60, %s10103_s6  ;;  %18650 = vst [vmem:[#allocation50_spill] sm:$0xff] %v10393_v59 }
  0x4b   : > { %18652 = vst [vmem:[#allocation52_spill] sm:$0xff] %v10403_v4 }
  0x4c   : > { %1544 = vrot.lane.b32.xlu2 %v10298_v61, %s10103_s6  ;;  %1542 = vrot.lane.b32.xlu1 %v10300_v62, %s10103_s6  ;;  %18653 = vst [vmem:[#allocation53_spill] sm:$0xff] %v10405_v9 }
  0x4d   : > { %18654 = vst [vmem:[#allocation54_spill] sm:$0xff] %v10407_v10 }
  0x4e   : > { %18656 = vst [vmem:[#allocation56_spill] sm:$0xff] %v10420_v23 }
  0x4f   : > { %18657 = vst [vmem:[#allocation57_spill] sm:$0xff] %v10422_v24 }
  0x50   : > { %443 = vmatmul.bf16.gmra.mxu0 %v10310_v2  ;;  %18658 = vst [vmem:[#allocation58_spill] sm:$0xff] %v10424_v29 }
  0x51   : > { %18660 = vst [vmem:[#allocation60_spill] sm:$0xff] %v10434_v40 }
  0x52   : > { %1546 = vrot.lane.b32.xlu0 %v10312_v5, %s10103_s6  ;;  %18661 = vst [vmem:[#allocation61_spill] sm:$0xff] %v10436_v41 }
  0x53   : > { %18662 = vst [vmem:[#allocation62_spill] sm:$0xff] %v10438_v43 }
  0x54   : > { %1550 = vrot.lane.b32.xlu2 %v10315_v7, %s10103_s6  ;;  %1548 = vrot.lane.b32.xlu1 %v10317_v8, %s10103_s6  ;;  %18666 = vst [vmem:[#allocation66_spill] sm:$0xff] %v10452_v17 }
  0x55   : > { %18667 = vst [vmem:[#allocation67_spill] sm:$0xff] %v10454_v18 }
  0x56   : > { %18668 = vst [vmem:[#allocation68_spill] sm:$0xff] %v10456_v30 }
  0x5a   : > { %1552 = vrot.lane.b32.xlu0 %v10325_v14, %s10103_s6 }
  0x5c   : > { %1556 = vrot.lane.b32.xlu2 %v10327_v15, %s10103_s6  ;;  %1554 = vrot.lane.b32.xlu1 %v10329_v16, %s10103_s6 }
  0x60   : > { %448 = vmatmul.bf16.gmra.mxu0 %v10342_v25 }
  0x62   : > { %1558 = vrot.lane.b32.xlu0 %v10344_v26, %s10103_s6 }
  0x64   : > { %1562 = vrot.lane.b32.xlu2 %v10346_v27, %s10103_s6  ;;  %1560 = vrot.lane.b32.xlu1 %v10348_v28, %s10103_s6 }
  0x6a   : > { %1564 = vrot.lane.b32.xlu0 %v10357_v35, %s10103_s6 }
  0x6c   : > { %1568 = vrot.lane.b32.xlu2 %v10359_v36, %s10103_s6  ;;  %1566 = vrot.lane.b32.xlu1 %v10361_v37, %s10103_s6 }
  0x70   : > { %453 = vmatmul.bf16.gmra.mxu0 %v10371_v42 }
  0x72   : > { %1570 = vrot.lane.b32.xlu0 %v10376_v47, %s10103_s6 }
  0x74   : > { %1574 = vrot.lane.b32.xlu2 %v10378_v48, %s10103_s6  ;;  %1572 = vrot.lane.b32.xlu1 %v10380_v49, %s10103_s6 }
  0x7a   : > { %1576 = vrot.lane.b32.xlu0 %v10389_v57, %s10103_s6 }
  0x7c   : > { %1580 = vrot.lane.b32.xlu2 %v10391_v58, %s10103_s6  ;;  %1578 = vrot.lane.b32.xlu1 %v10393_v59, %s10103_s6 }
  0x7e   : > { %v10401_v3 = vpop.permute.xlu2 %1514 }
  0x7f   : > { %18651 = vst [vmem:[#allocation51_spill] sm:$0xff] %v10401_v3 }
  0x82   : > { %1582 = vrot.lane.b32.xlu0 %v10403_v4, %s10103_s6 }
  0x84   : > { %1586 = vrot.lane.b32.xlu2 %v10405_v9, %s10103_s6  ;;  %1584 = vrot.lane.b32.xlu1 %v10407_v10, %s10103_s6  ;;  %v653_v9 = vrot.slane %v595_v31, 7 }
  0x86   : > { %v10418_v19 = vpop.permute.xlu2 %1520 }
  0x87   : > { %18655 = vst [vmem:[#allocation55_spill] sm:$0xff] %v10418_v19 }
  0x8a   : > { %1588 = vrot.lane.b32.xlu0 %v10420_v23, %s10103_s6 }
  0x8c   : > { %1592 = vrot.lane.b32.xlu2 %v10422_v24, %s10103_s6  ;;  %1590 = vrot.lane.b32.xlu1 %v10424_v29, %s10103_s6  ;;  %v650_v29 = vrot.slane %v595_v31, 4 }
  0x8e   : > { %v10432_v39 = vpop.permute.xlu2 %1526 }
  0x8f   : > { %18659 = vst [vmem:[#allocation59_spill] sm:$0xff] %v10432_v39 }
  0x92   : > { %1594 = vrot.lane.b32.xlu0 %v10434_v40, %s10103_s6  ;;  %v10477_v40 = vperm.slane %v647_v50, 0 }
  0x94   : > { %1598 = vrot.lane.b32.xlu2 %v10436_v41, %s10103_s6  ;;  %1596 = vrot.lane.b32.xlu1 %v10438_v43, %s10103_s6  ;;  %v10446_v52 = vpop.permute.xlu0 %1510  ;;  %v10473_v41 = vperm.slane %v595_v31, 0  ;;  %v10475_v43 = vperm.slane %v648_v38, 0  ;;  %18674 = vst [vmem:[#allocation74_spill] sm:$0xff] %v10477_v40 }
  0x95   : > { %18663 = vst [vmem:[#allocation63_spill] sm:$0xff] %v10446_v52 }
  0x96   : > { %v10448_v0 = vpop.permute.xlu2 %1532  ;;  %v10450_v1 = vpop.permute.xlu1 %1512  ;;  %18672 = vst [vmem:[#allocation72_spill] sm:$0xff] %v10473_v41 }
  0x97   : > { %18664 = vst [vmem:[#allocation64_spill] sm:$0xff] %v10448_v0 }
  0x98   : > { %18665 = vst [vmem:[#allocation65_spill] sm:$0xff] %v10450_v1 }
  0x99   : > { %18673 = vst [vmem:[#allocation73_spill] sm:$0xff] %v10475_v43 }
  0x9a   : > { %1600 = vrot.lane.b32.xlu0 %v10452_v17, %s10103_s6  ;;  %v651_v17 = vrot.slane %v595_v31, 5 }
  0x9c   : > { %1604 = vrot.lane.b32.xlu2 %v10454_v18, %s10103_s6  ;;  %1602 = vrot.lane.b32.xlu1 %v10456_v30, %s10103_s6  ;;  %v10467_v13 = vpop.permute.xlu0 %1516  ;;  %v649_v18 = vrot.slane %v595_v31, 3  ;;  %v10493_v23 = vperm.slane %v651_v17, 0  ;;  %v10508_v17 = vld [vmem:[%s17648_s4 + $0x38] sm:$0xff] }
  0x9d   : > { %18669 = vst [vmem:[#allocation69_spill] sm:$0xff] %v10467_v13  ;;  %v10517_v10 = vperm.slane %v10508_v17, 0  ;;  %v656_v28 = vrot.slane %v10508_v17, 3  ;;  %v654_v15 = vrot.slane %v10508_v17, 1  ;;  %v657_v34 = vrot.slane %v10508_v17, 4 }
  0x9e   : > { %v10469_v53 = vpop.permute.xlu2 %1538  ;;  %v10471_v63 = vpop.permute.xlu1 %1518  ;;  %v10491_v50 = vperm.slane %v649_v18, 0  ;;  %18679 = vst [vmem:[#allocation79_spill] sm:$0xff] %v10493_v23  ;;  %v658_v20 = vrot.slane %v10508_v17, 5  ;;  %v659_v6 = vrot.slane %v10508_v17, 6 }
  0x9f   : > { %18670 = vst [vmem:[#allocation70_spill] sm:$0xff] %v10469_v53  ;;  %v10587_v7 = vperm.slane %v656_v28, 0  ;;  %v10589_v16 = vperm.slane %v654_v15, 0  ;;  %v10661_v21 = vperm.slane %v657_v34, 0  ;;  %v660_v34 = vrot.slane %v10508_v17, 7 }
  0xa0   : > { %18671 = vst [vmem:[#allocation71_spill] sm:$0xff] %v10471_v63  ;;  %v10678_v42 = vperm.slane %v658_v20, 0  ;;  %v10680_v25 = vperm.slane %v659_v6, 0 }
  0xa1   : > { %18678 = vst [vmem:[#allocation78_spill] sm:$0xff] %v10491_v50  ;;  %v10682_v2 = vperm.slane %v660_v34, 0 }
  0xa2   : > { %1606 = vrot.lane.b32.xlu0 %v10473_v41, %s10103_s6  ;;  %v10495_v41 = vperm.slane %v650_v29, 0  ;;  %18685 = vst [vmem:[#allocation85_spill] sm:$0xff] %v10517_v10 }
  0xa3   : > { %18702 = vst [vmem:[#allocation102_spill] sm:$0xff] %v10587_v7 }
  0xa4   : > { %1610 = vrot.lane.b32.xlu2 %v10475_v43, %s10103_s6  ;;  %1608 = vrot.lane.b32.xlu1 %v10477_v40, %s10103_s6  ;;  %v10485_v30 = vpop.permute.xlu0 %1522  ;;  %18680 = vst [vmem:[#allocation80_spill] sm:$0xff] %v10495_v41  ;;  %v652_v43 = vrot.slane %v595_v31, 6 }
  0xa5   : > { %18675 = vst [vmem:[#allocation75_spill] sm:$0xff] %v10485_v30 }
  0xa6   : > { %v10487_v24 = vpop.permute.xlu2 %1544  ;;  %v10489_v38 = vpop.permute.xlu1 %1524  ;;  %18703 = vst [vmem:[#allocation103_spill] sm:$0xff] %v10589_v16 }
  0xa7   : > { %18676 = vst [vmem:[#allocation76_spill] sm:$0xff] %v10487_v24 }
  0xa8   : > { %18677 = vst [vmem:[#allocation77_spill] sm:$0xff] %v10489_v38 }
  0xa9   : > { %18721 = vst [vmem:[#allocation121_spill] sm:$0xff] %v10661_v21 }
  0xaa   : > { %1612 = vrot.lane.b32.xlu0 %v10491_v50, %s10103_s6  ;;  %v10514_v50 = vperm.slane %v652_v43, 0  ;;  %18725 = vst [vmem:[#allocation125_spill] sm:$0xff] %v10678_v42 }
  0xab   : > { %18726 = vst [vmem:[#allocation126_spill] sm:$0xff] %v10680_v25 }
  0xac   : > { %1616 = vrot.lane.b32.xlu2 %v10493_v23, %s10103_s6  ;;  %1614 = vrot.lane.b32.xlu1 %v10495_v41, %s10103_s6  ;;  %v10503_v40 = vpop.permute.xlu0 %1528  ;;  %18684 = vst [vmem:[#allocation84_spill] sm:$0xff] %v10514_v50  ;;  %v10519_v23 = vperm.slane %v653_v9, 0 }
  0xad   : > { %18681 = vst [vmem:[#allocation81_spill] sm:$0xff] %v10503_v40 }
  0xae   : > { %v10510_v29 = vpop.permute.xlu2 %1550  ;;  %v10512_v18 = vpop.permute.xlu1 %1530  ;;  %18686 = vst [vmem:[#allocation86_spill] sm:$0xff] %v10519_v23 }
  0xaf   : > { %18682 = vst [vmem:[#allocation82_spill] sm:$0xff] %v10510_v29 }
  0xb0   : > { %18683 = vst [vmem:[#allocation83_spill] sm:$0xff] %v10512_v18 }
  0xb1   : > { %18727 = vst [vmem:[#allocation127_spill] sm:$0xff] %v10682_v2 }
  0xb2   : > { %1618 = vrot.lane.b32.xlu0 %v10514_v50, %s10103_s6 }
  0xb4   : > { %1622 = vrot.lane.b32.xlu2 %v10517_v10, %s10103_s6  ;;  %1620 = vrot.lane.b32.xlu1 %v10519_v23, %s10103_s6  ;;  %v10527_v31 = vpop.permute.xlu0 %1534 }
  0xb5   : > { %18687 = vst [vmem:[#allocation87_spill] sm:$0xff] %v10527_v31 }
  0xb6   : > { %v10529_v41 = vpop.permute.xlu2 %1556  ;;  %v10531_v43 = vpop.permute.xlu1 %1536 }
  0xb7   : > { %18688 = vst [vmem:[#allocation88_spill] sm:$0xff] %v10529_v41 }
  0xb8   : > { %18689 = vst [vmem:[#allocation89_spill] sm:$0xff] %v10531_v43 }
  0xbc   : > { %v10533_v4 = vpop.permute.xlu0 %1540 }
  0xbd   : > { %18690 = vst [vmem:[#allocation90_spill] sm:$0xff] %v10533_v4  ;;  %v10535_v48 = vpop.f32.mrf.mxu0 }
  0xbe   : > { %717 = vrot.lane.b32.xlu1 %v10535_v48, %s10104_s11  ;;  %693 = vrot.lane.b32.xlu2 %v10535_v48, %s10105_s12  ;;  %v10541_v9 = vpop.permute.xlu2 %1562  ;;  %v10543_v10 = vpop.permute.xlu1 %1542 }
  0xbf   : > { %18691 = vst [vmem:[#allocation91_spill] sm:$0xff] %v10541_v9  ;;  %669 = vrot.lane.b32.xlu0 %v10535_v48, %s10106_s13 }
  0xc0   : > { %18692 = vst [vmem:[#allocation92_spill] sm:$0xff] %v10543_v10 }
  0xc4   : > { %v10547_v23 = vpop.permute.xlu0 %1546 }
  0xc5   : > { %18693 = vst [vmem:[#allocation93_spill] sm:$0xff] %v10547_v23  ;;  %v10549_v50 = vpop.f32.mrf.mxu0 }
  0xc6   : > { %719 = vrot.lane.b32.xlu2 %v10549_v50, %s10104_s11  ;;  %v10553_v58 = vpop.permute.xlu2 %1568  ;;  %v10555_v57 = vpop.permute.xlu1 %1548 }
  0xc7   : > { %18694 = vst [vmem:[#allocation94_spill] sm:$0xff] %v10553_v58  ;;  %671 = vrot.lane.b32.xlu0 %v10549_v50, %s10106_s13 }
  0xc8   : > { %18695 = vst [vmem:[#allocation95_spill] sm:$0xff] %v10555_v57 }
  0xcc   : > { %v10559_v47 = vpop.permute.xlu0 %1552 }
  0xcd   : > { %18696 = vst [vmem:[#allocation96_spill] sm:$0xff] %v10559_v47  ;;  %v10561_v59 = vpop.f32.mrf.mxu0 }
  0xce   : > { %673 = vrot.lane.b32.xlu1 %v10561_v59, %s10106_s13  ;;  %v10565_v49 = vpop.permute.xlu2 %1574  ;;  %v10567_v36 = vpop.permute.xlu1 %1554 }
  0xcf   : > { %18697 = vst [vmem:[#allocation97_spill] sm:$0xff] %v10565_v49  ;;  %695 = vrot.lane.b32.xlu0 %v10549_v50, %s10105_s12 }
  0xd0   : > { %18698 = vst [vmem:[#allocation98_spill] sm:$0xff] %v10567_v36 }
  0xd4   : > { %v10571_v27 = vpop.permute.xlu0 %1558 }
  0xd5   : > { %18699 = vst [vmem:[#allocation99_spill] sm:$0xff] %v10571_v27  ;;  %v10573_v37 = vpop.f32.mrf.mxu0 }
  0xd6   : > { %697 = vrot.lane.b32.xlu1 %v10561_v59, %s10105_s12  ;;  %699 = vrot.lane.b32.xlu2 %v10573_v37, %s10105_s12  ;;  %v10579_v35 = vpop.permute.xlu2 %1580  ;;  %v10581_v26 = vpop.permute.xlu1 %1560 }
  0xd7   : > { %18700 = vst [vmem:[#allocation100_spill] sm:$0xff] %v10579_v35  ;;  %721 = vrot.lane.b32.xlu0 %v10561_v59, %s10104_s11 }
  0xd8   : > { %18701 = vst [vmem:[#allocation101_spill] sm:$0xff] %v10581_v26 }
  0xdc   : > { %v10591_v14 = vpop.permute.xlu0 %1564 }
  0xdd   : > { %18704 = vst [vmem:[#allocation104_spill] sm:$0xff] %v10591_v14  ;;  %v10599_v8 = vpop.f32.mrf.mxu0 }
  0xde   : > { %1628 = vrot.lane.b32.xlu2 %v10587_v7, %s10103_s6  ;;  %675 = vrot.lane.b32.xlu1 %v10573_v37, %s10106_s13  ;;  %v10597_v5 = vpop.permute.xlu1 %1566  ;;  %v10603_v61 = vpop.permute.xlu2 %1586  ;;  %v655_v7 = vrot.slane %v10508_v17, 2 }
  0xdf   : > { %18705 = vst [vmem:[#allocation105_spill] sm:$0xff] %v10597_v5  ;;  %1624 = vrot.lane.b32.xlu0 %v10589_v16, %s10103_s6 }
  0xe0   : > { %18706 = vst [vmem:[#allocation106_spill] sm:$0xff] %v10603_v61  ;;  %v10620_v62 = vperm.slane %v655_v7, 0 }
  0xe2   : > { %18710 = vst [vmem:[#allocation110_spill] sm:$0xff] %v10620_v62 }
  0xe4   : > { %v10605_v28 = vpop.permute.xlu0 %1570 }
  0xe5   : > { %18707 = vst [vmem:[#allocation107_spill] sm:$0xff] %v10605_v28  ;;  %v10616_v55 = vpop.f32.mrf.mxu0 }
  0xe6   : > { %723 = vrot.lane.b32.xlu1 %v10573_v37, %s10104_s11  ;;  %677 = vrot.lane.b32.xlu2 %v10599_v8, %s10106_s13  ;;  %v10611_v15 = vpop.permute.xlu1 %1572  ;;  %v10618_v16 = vpop.permute.xlu2 %1592 }
  0xe7   : > { %18708 = vst [vmem:[#allocation108_spill] sm:$0xff] %v10611_v15  ;;  %701 = vrot.lane.b32.xlu0 %v10599_v8, %s10105_s12 }
  0xe8   : > { %18709 = vst [vmem:[#allocation109_spill] sm:$0xff] %v10618_v16 }
  0xec   : > { %v10622_v60 = vpop.permute.xlu0 %1576 }
  0xed   : > { %18711 = vst [vmem:[#allocation111_spill] sm:$0xff] %v10622_v60  ;;  %v10632_v56 = vpop.f32.mrf.mxu0 }
  0xee   : > { %1626 = vrot.lane.b32.xlu1 %v10620_v62, %s10103_s6  ;;  %725 = vrot.lane.b32.xlu2 %v10599_v8, %s10104_s11  ;;  %v10628_v54 = vpop.permute.xlu1 %1578  ;;  %18713 = vst [vmem:[#allocation113_spill] sm:$0xff] %v10632_v56  ;;  %v10634_v45 = vpop.permute.xlu2 %1598 }
  0xef   : > { %18712 = vst [vmem:[#allocation112_spill] sm:$0xff] %v10628_v54  ;;  %727 = vrot.lane.b32.xlu0 %v10616_v55, %s10104_s11 }
  0xf0   : > { %18714 = vst [vmem:[#allocation114_spill] sm:$0xff] %v10634_v45 }
  0xf4   : > { %v10636_v33 = vpop.permute.xlu0 %1582 }
  0xf5   : > { %18715 = vst [vmem:[#allocation115_spill] sm:$0xff] %v10636_v33  ;;  %v10646_v62 = vpop.f32.mrf.mxu0 }
  0xf6   : > { %703 = vrot.lane.b32.xlu1 %v10616_v55, %s10105_s12  ;;  %679 = vrot.lane.b32.xlu2 %v10616_v55, %s10106_s13  ;;  %v10642_v7 = vpop.permute.xlu1 %1584  ;;  %18717 = vst [vmem:[#allocation117_spill] sm:$0xff] %v10646_v62  ;;  %v10650_v44 = vpop.permute.xlu2 %1604 }
  0xf7   : > { %18716 = vst [vmem:[#allocation116_spill] sm:$0xff] %v10642_v7  ;;  %681 = vrot.lane.b32.xlu0 %v10632_v56, %s10106_s13 }
  0xf8   : > { %18719 = vst [vmem:[#allocation119_spill] sm:$0xff] %v10650_v44 }
  0xfc   : > { %v10648_v46 = vpop.permute.xlu0 %1588 }
  0xfd   : > { %18718 = vst [vmem:[#allocation118_spill] sm:$0xff] %v10648_v46 }
  0xfe   : > { %729 = vrot.lane.b32.xlu1 %v10632_v56, %s10104_s11  ;;  %705 = vrot.lane.b32.xlu2 %v10632_v56, %s10105_s12  ;;  %v10656_v32 = vpop.permute.xlu1 %1590  ;;  %v10676_v12 = vpop.permute.xlu2 %1610 }
  0xff   : > { %18720 = vst [vmem:[#allocation120_spill] sm:$0xff] %v10656_v32  ;;  %707 = vrot.lane.b32.xlu0 %v10646_v62, %s10105_s12 }
 0x100   : > { %18724 = vst [vmem:[#allocation124_spill] sm:$0xff] %v10676_v12 }
 0x104   : > { %v10663_v11 = vpop.permute.xlu0 %1594 }
 0x105   : > { %18722 = vst [vmem:[#allocation122_spill] sm:$0xff] %v10663_v11 }
 0x106   : > { %683 = vrot.lane.b32.xlu1 %v10646_v62, %s10106_s13  ;;  %v10667_v22 = vpop.permute.xlu1 %1596  ;;  %731 = vrot.lane.b32.xlu2 %v10646_v62, %s10104_s11  ;;  %v10694_v17 = vpop.permute.xlu2 %1616 }
 0x107   : > { %18723 = vst [vmem:[#allocation123_spill] sm:$0xff] %v10667_v22  ;;  %1630 = vrot.lane.b32.xlu0 %v10661_v21, %s10103_s6 }
 0x108   : > { %18730 = vst [vmem:[#allocation130_spill] sm:$0xff] %v10694_v17  ;;  %v744_v17 = vrot.slane %v10535_v48, 4 }
 0x10c   : > { %v10684_v51 = vpop.permute.xlu0 %1600 }
 0x10d   : > { %18728 = vst [vmem:[#allocation128_spill] sm:$0xff] %v10684_v51 }
 0x10e   : > { %v10686_v44 = vpop.permute.xlu1 %1602  ;;  %1632 = vrot.lane.b32.xlu1 %v10678_v42, %s10103_s6  ;;  %1634 = vrot.lane.b32.xlu2 %v10680_v25, %s10103_s6  ;;  %v10700_v34 = vpop.permute.xlu2 %1622  ;;  %v10107_v25 = vmov 1983009808  }
 0x10f   : > { %18729 = vst [vmem:[#allocation129_spill] sm:$0xff] %v10686_v44  ;;  %1636 = vrot.lane.b32.xlu0 %v10682_v2, %s10103_s6  ;;  %v747_v51 = vunpack.c.l.s4 %v10107_v25 }
 0x110   : > { %18733 = vst [vmem:[#allocation133_spill] sm:$0xff] %v10700_v34 }
 0x114   : > { %v10696_v20 = vpop.permute.xlu0 %1606 }
 0x115   : > { %18731 = vst [vmem:[#allocation131_spill] sm:$0xff] %v10696_v20  ;;  %v10711_v20 = vunpack.c.0.s8 %v747_v51 }
 0x116   : > { %v10698_v6 = vpop.permute.xlu1 %1608 }
 0x117   : > { %18732 = vst [vmem:[#allocation132_spill] sm:$0xff] %v10698_v6  ;;  %v10108_v6 = vmov 1934713408  }
 0x118   : > { %v694_v12 = vpop.permute.xlu2 %693  ;;  %18738 = vst [vmem:[#allocation138_spill] sm:$0xff] %v10711_v20 }
 0x119   : > { %v741_v2 = vrot.slane %v694_v12, 4 }
 0x11b   : > { %v743_v34 = vsel %vm742_vm0, %v741_v2, %v10535_v48 }
 0x11c   : > { %v10702_v21 = vpop.permute.xlu0 %1612  ;;  %v749_v45 = vperm.slane %v743_v34, %v10711_v20 }
 0x11d   : > { %18734 = vst [vmem:[#allocation134_spill] sm:$0xff] %v10702_v21  ;;  %v745_v21 = vsel %vm742_vm0, %v694_v12, %v744_v17 }
 0x11e   : > { %v10704_v62 = vpop.permute.xlu1 %1614  ;;  %v768_v16 = vrot.slane %v749_v45, 4 }
 0x11f   : > { %18735 = vst [vmem:[#allocation135_spill] sm:$0xff] %v10704_v62  ;;  %v771_v62 = vunpack.c.l.s4 %v10108_v6 }
 0x121   : > { %v10718_v56 = vunpack.c.0.s8 %v771_v62 }
 0x123   : > { %18739 = vst [vmem:[#allocation139_spill] sm:$0xff] %v10718_v56 }
 0x124   : > { %v10708_v44 = vpop.permute.xlu0 %1618 }
 0x125   : > { %18737 = vst [vmem:[#allocation137_spill] sm:$0xff] %v10708_v44  ;;  %v753_v44 = vperm.slane %v745_v21, %v10711_v20 }
 0x126   : > { %v10706_v42 = vpop.permute.xlu1 %1620 }
 0x127   : > { %18736 = vst [vmem:[#allocation136_spill] sm:$0xff] %v10706_v42  ;;  %v780_v12 = vrot.slane %v753_v44, 4 }
 0x130   : > { %v718_v42 = vpop.permute.xlu1 %717 }
 0x131   : > { %v754_v22 = vrot.slane %v718_v42, 4  ;;  %v670_v25 = vpop.permute.xlu0 %669 }
 0x132   : > { %v756_v11 = vrot.slane %v670_v25, 4 }
 0x133   : > { %v755_v51 = vsel %vm742_vm0, %v754_v22, %v670_v25 }
 0x134   : > { %v757_v32 = vsel %vm742_vm0, %v718_v42, %v756_v11  ;;  %v761_v2 = vperm.slane %v755_v51, %v10711_v20 }
 0x135   : > { %v765_v48 = vperm.slane %v757_v32, %v10711_v20 }
 0x136   : > { %v769_v17 = vsel %vm742_vm0, %v761_v2, %v768_v16  ;;  %v766_v6 = vrot.slane %v761_v2, 4 }
 0x137   : > { %v10726_v21 = vperm.slane %v769_v17, %v10718_v56  ;;  %v778_v34 = vrot.slane %v765_v48, 4  ;;  %v781_v62 = vsel %vm742_vm0, %v765_v48, %v780_v12  ;;  %v720_v12 = vpop.permute.xlu2 %719 }
 0x138   : > { %v10730_v46 = vperm.slane %v781_v62, %v10718_v56  ;;  %v767_v25 = vsel %vm742_vm0, %v766_v6, %v749_v45  ;;  %v800_v6 = vrot.slane %v10549_v50, 4 }
 0x139   : > { %18740 = vst [vmem:[#allocation140_spill] sm:$0xff] %v10726_v21  ;;  %v779_v22 = vsel %vm742_vm0, %v778_v34, %v753_v44  ;;  %v672_v11 = vpop.permute.xlu0 %671  ;;  %v1704_v42 = vmul.f32 %v10401_v3, %v10726_v21  ;;  %v10748_v48 = vperm.slane %v767_v25, %v10718_v56  ;;  %v810_v34 = vrot.slane %v720_v12, 4 }
 0x13a   : > { %18741 = vst [vmem:[#allocation141_spill] sm:$0xff] %v10730_v46  ;;  %v1708_v32 = vmul.f32 %v10485_v30, %v10730_v46  ;;  %v10738_v16 = vperm.slane %v779_v22, %v10718_v56  ;;  %v796_v2 = vrot.slane %v10730_v46, 4  ;;  %v812_v17 = vrot.slane %v672_v11, 4 }
 0x13b   : > { %1834 = vrot.lane.b32.xlu0 %v1704_v42, %s10109_s14  ;;  %18743 = vst [vmem:[#allocation143_spill] sm:$0xff] %v10748_v48  ;;  %v811_v3 = vsel %vm742_vm0, %v810_v34, %v672_v11 }
 0x13c   : > { %18742 = vst [vmem:[#allocation142_spill] sm:$0xff] %v10738_v16  ;;  %1842 = vrot.lane.b32.xlu1 %v1708_v32, %s10109_s14  ;;  %v1706_v44 = vmul.f32 %v10471_v63, %v10738_v16  ;;  %v794_v51 = vrot.slane %v10738_v16, 4  ;;  %v10758_v42 = vsel %vm742_vm0, 0.0, %v796_v2  ;;  %v813_v32 = vsel %vm742_vm0, %v720_v12, %v812_v17 }
 0x13d   : > { %18745 = vst [vmem:[#allocation145_spill] sm:$0xff] %v10758_v42  ;;  %v792_v63 = vrot.slane %v10726_v21, 4  ;;  %v1709_v12 = vmul.f32 %v10489_v38, %v10758_v42  ;;  %v821_v17 = vperm.slane %v813_v32, %v10711_v20 }
 0x13e   : > { %1838 = vrot.lane.b32.xlu2 %v1706_v44, %s10109_s14  ;;  %v10752_v45 = vsel %vm742_vm0, 0.0, %v794_v51  ;;  %v1702_v44 = vmul.f32 %v10446_v52, %v10748_v48 }
 0x13f   : > { %18744 = vst [vmem:[#allocation144_spill] sm:$0xff] %v10752_v45  ;;  %v1707_v22 = vmul.f32 %v10418_v19, %v10752_v45  ;;  %v10779_v34 = vsel %vm742_vm0, 0.0, %v792_v63 }
 0x140   : > { %18746 = vst [vmem:[#allocation146_spill] sm:$0xff] %v10779_v34 }
 0x141   : > { %v696_v62 = vpop.permute.xlu0 %695 }
 0x142   : > { %v798_v25 = vrot.slane %v696_v62, 4  ;;  %v801_v30 = vsel %vm742_vm0, %v696_v62, %v800_v6 }
 0x143   : > { %v809_v51 = vperm.slane %v801_v30, %v10711_v20  ;;  %1840 = vrot.lane.b32.xlu0 %v1707_v22, %s10109_s14  ;;  %v674_v30 = vpop.permute.xlu1 %673  ;;  %v790_v22 = vrot.slane %v10748_v48, 4 }
 0x144   : > { %v799_v2 = vsel %vm742_vm0, %v798_v25, %v10549_v50  ;;  %1830 = vrot.lane.b32.xlu1 %v1702_v44, %s10109_s14  ;;  %v817_v50 = vperm.slane %v811_v3, %v10711_v20  ;;  %v834_v25 = vrot.slane %v821_v17, 4 }
 0x145   : > { %v805_v6 = vperm.slane %v799_v2, %v10711_v20  ;;  %v836_v62 = vrot.slane %v809_v51, 4  ;;  %v10786_v32 = vsel %vm742_vm0, 0.0, %v790_v22  ;;  %v1705_v2 = vmul.f32 %v10467_v13, %v10779_v34 }
 0x146   : > { %1844 = vrot.lane.b32.xlu2 %v1709_v12, %s10109_s14  ;;  %18748 = vst [vmem:[#allocation148_spill] sm:$0xff] %v10786_v32  ;;  %v835_v12 = vsel %vm742_vm0, %v834_v25, %v809_v51  ;;  %v822_v19 = vrot.slane %v817_v50, 4  ;;  %v1703_v63 = vmul.f32 %v10450_v1, %v10786_v32  ;;  %v868_v51 = vrot.slane %v674_v30, 4 }
 0x147   : > { %v837_v11 = vsel %vm742_vm0, %v821_v17, %v836_v62  ;;  %v824_v44 = vrot.slane %v805_v6, 4  ;;  %v10797_v62 = vpop.permute.xlu2 %699  ;;  %v856_v13 = vrot.slane %v10561_v59, 4 }
 0x148   : > { %v10783_v38 = vperm.slane %v837_v11, %v10718_v56  ;;  %v823_v22 = vsel %vm742_vm0, %v822_v19, %v805_v6  ;;  %v10801_v11 = vperm.slane %v835_v12, %v10718_v56 }
 0x149   : > { %v825_v3 = vsel %vm742_vm0, %v817_v50, %v824_v44  ;;  %v10810_v44 = vperm.slane %v823_v22, %v10718_v56 }
 0x14a   : > { %18747 = vst [vmem:[#allocation147_spill] sm:$0xff] %v10783_v38  ;;  %v1716_v17 = vmul.f32 %v10469_v53, %v10783_v38  ;;  %v10807_v50 = vperm.slane %v825_v3, %v10718_v56  ;;  %v1714_v6 = vmul.f32 %v10527_v31, %v10801_v11 }
 0x14b   : > { %18749 = vst [vmem:[#allocation149_spill] sm:$0xff] %v10801_v11  ;;  %v698_v25 = vpop.permute.xlu1 %697  ;;  %v1710_v22 = vmul.f32 %v10432_v39, %v10810_v44  ;;  %v846_v52 = vrot.slane %v10810_v44, 4 }
 0x14c   : > { %1836 = vrot.lane.b32.xlu1 %v1705_v2, %s10109_s14  ;;  %1858 = vrot.lane.b32.xlu0 %v1716_v17, %s10109_s14  ;;  %v722_v2 = vpop.permute.xlu0 %721  ;;  %18750 = vst [vmem:[#allocation150_spill] sm:$0xff] %v10807_v50  ;;  %v857_v19 = vsel %vm742_vm0, %v698_v25, %v856_v13  ;;  %v854_v53 = vrot.slane %v698_v25, 4  ;;  %v1712_v17 = vmul.f32 %v10512_v18, %v10807_v50  ;;  %v850_v13 = vrot.slane %v10801_v11, 4 }
 0x14d   : > { %18751 = vst [vmem:[#allocation151_spill] sm:$0xff] %v10810_v44  ;;  %v869_v12 = vsel %vm742_vm0, %v722_v2, %v868_v51  ;;  %v865_v3 = vperm.slane %v857_v19, %v10711_v20  ;;  %v866_v1 = vrot.slane %v722_v2, 4  ;;  %v848_v51 = vrot.slane %v10807_v50, 4 }
 0x14e   : > { %1832 = vrot.lane.b32.xlu2 %v1703_v63, %s10109_s14  ;;  %v852_v63 = vrot.slane %v10783_v38, 4  ;;  %v877_v31 = vperm.slane %v869_v12, %v10711_v20  ;;  %v855_v19 = vsel %vm742_vm0, %v854_v53, %v10561_v59  ;;  %v10836_v39 = vsel %vm742_vm0, 0.0, %v850_v13 }
 0x14f   : > { %v892_v18 = vrot.slane %v865_v3, 4  ;;  %18754 = vst [vmem:[#allocation154_spill] sm:$0xff] %v10836_v39  ;;  %v867_v2 = vsel %vm742_vm0, %v866_v1, %v674_v30  ;;  %v1715_v59 = vmul.f32 %v10531_v43, %v10836_v39 }
 0x150   : > { %v10829_v25 = vsel %vm742_vm0, 0.0, %v852_v63  ;;  %v890_v12 = vrot.slane %v877_v31, 4  ;;  %v861_v63 = vperm.slane %v855_v19, %v10711_v20  ;;  %v873_v53 = vperm.slane %v867_v2, %v10711_v20 }
 0x151   : > { %18752 = vst [vmem:[#allocation152_spill] sm:$0xff] %v10829_v25  ;;  %v893_v1 = vsel %vm742_vm0, %v877_v31, %v892_v18 }
 0x152   : > { %v880_v19 = vrot.slane %v861_v63, 4  ;;  %v878_v2 = vrot.slane %v873_v53, 4 }
 0x153   : > { %v676_v30 = vpop.permute.xlu1 %675 }
 0x154   : > { %1854 = vrot.lane.b32.xlu1 %v1714_v6, %s10109_s14  ;;  %1846 = vrot.lane.b32.xlu0 %v1710_v22, %s10109_s14  ;;  %v10831_v6 = vpop.permute.xlu2 %1628  ;;  %v1717_v22 = vmul.f32 %v10533_v4, %v10829_v25  ;;  %v10860_v4 = vperm.slane %v893_v1, %v10718_v56 }
 0x155   : > { %18753 = vst [vmem:[#allocation153_spill] sm:$0xff] %v10831_v6 }
 0x156   : > { %1850 = vrot.lane.b32.xlu2 %v1712_v17, %s10109_s14  ;;  %v10840_v17 = vsel %vm742_vm0, 0.0, %v848_v51  ;;  %v891_v51 = vsel %vm742_vm0, %v890_v12, %v865_v3  ;;  %18757 = vst [vmem:[#allocation157_spill] sm:$0xff] %v10860_v4  ;;  %v881_v12 = vsel %vm742_vm0, %v873_v53, %v880_v19  ;;  %v912_v53 = vrot.slane %v10573_v37, 4 }
 0x157   : > { %18755 = vst [vmem:[#allocation155_spill] sm:$0xff] %v10840_v17  ;;  %v1713_v13 = vmul.f32 %v10448_v0, %v10840_v17  ;;  %v10863_v18 = vperm.slane %v891_v51, %v10718_v56  ;;  %v908_v51 = vrot.slane %v10860_v4, 4  ;;  %v10879_v43 = vperm.slane %v881_v12, %v10718_v56 }
 0x159   : > { %18758 = vst [vmem:[#allocation158_spill] sm:$0xff] %v10863_v18  ;;  %v1722_v1 = vmul.f32 %v10510_v29, %v10863_v18  ;;  %v1720_v12 = vmul.f32 %v10547_v23, %v10879_v43  ;;  %v10895_v29 = vpop.permute.xlu0 %1624 }
 0x15a   : > { %18759 = vst [vmem:[#allocation159_spill] sm:$0xff] %v10879_v43 }
 0x15b   : > { %v724_v19 = vpop.permute.xlu1 %723  ;;  %18762 = vst [vmem:[#allocation162_spill] sm:$0xff] %v10895_v29 }
 0x15c   : > { %1860 = vrot.lane.b32.xlu1 %v1717_v22, %s10109_s14  ;;  %1852 = vrot.lane.b32.xlu0 %v1713_v13, %s10109_s14  ;;  %v10857_v22 = vsel %vm742_vm0, 0.0, %v846_v52  ;;  %v10865_v31 = vpop.permute.xlu2 %677  ;;  %v1724_v52 = vmul.f32 %v10567_v36, %v10860_v4  ;;  %v924_v13 = vrot.slane %v676_v30, 4  ;;  %v10891_v36 = vsel %vm742_vm0, 0.0, %v908_v51 }
 0x15d   : > { %18756 = vst [vmem:[#allocation156_spill] sm:$0xff] %v10857_v22  ;;  %v1711_v3 = vmul.f32 %v10503_v40, %v10857_v22  ;;  %v922_v40 = vrot.slane %v724_v19, 4 }
 0x15e   : > { %1856 = vrot.lane.b32.xlu2 %v1715_v59, %s10109_s14  ;;  %v879_v59 = vsel %vm742_vm0, %v878_v2, %v861_v63  ;;  %v910_v63 = vrot.slane %v10797_v62, 4  ;;  %v913_v2 = vsel %vm742_vm0, %v10797_v62, %v912_v53  ;;  %18761 = vst [vmem:[#allocation161_spill] sm:$0xff] %v10891_v36  ;;  %v1725_v53 = vmul.f32 %v10529_v41, %v10891_v36 }
 0x15f   : > { %v923_v23 = vsel %vm742_vm0, %v922_v40, %v676_v30 }
 0x160   : > { %v929_v41 = vperm.slane %v923_v23, %v10711_v20 }
 0x164   : > { %1848 = vrot.lane.b32.xlu1 %v1711_v3, %s10109_s14  ;;  %1870 = vrot.lane.b32.xlu0 %v1722_v1, %s10109_s14  ;;  %v10884_v3 = vperm.slane %v879_v59, %v10718_v56  ;;  %v906_v1 = vrot.slane %v10863_v18, 4  ;;  %v921_v59 = vperm.slane %v913_v2, %v10711_v20  ;;  %v726_v0 = vpop.permute.xlu2 %725 }
 0x166   : > { %1874 = vrot.lane.b32.xlu2 %v1724_v52, %s10109_s14  ;;  %18760 = vst [vmem:[#allocation160_spill] sm:$0xff] %v10884_v3  ;;  %v925_v52 = vsel %vm742_vm0, %v724_v19, %v924_v13  ;;  %v1718_v62 = vmul.f32 %v10543_v10, %v10884_v3  ;;  %v911_v13 = vsel %vm742_vm0, %v910_v63, %v10573_v37  ;;  %v904_v19 = vrot.slane %v10879_v43, 4 }
 0x167   : > { %v933_v51 = vperm.slane %v925_v52, %v10711_v20  ;;  %v902_v2 = vrot.slane %v10884_v3, 4  ;;  %v917_v37 = vperm.slane %v911_v13, %v10711_v20  ;;  %v948_v63 = vrot.slane %v921_v59, 4 }
 0x168   : > { %v10917_v10 = vsel %vm742_vm0, 0.0, %v904_v19  ;;  %v702_v19 = vpop.permute.xlu0 %701 }
 0x169   : > { %v946_v52 = vrot.slane %v933_v51, 4  ;;  %18764 = vst [vmem:[#allocation164_spill] sm:$0xff] %v10917_v10  ;;  %v949_v30 = vsel %vm742_vm0, %v933_v51, %v948_v63  ;;  %v978_v51 = vrot.slane %v726_v0, 4  ;;  %v934_v63 = vrot.slane %v929_v41, 4 }
 0x16b   : > { %v947_v13 = vsel %vm742_vm0, %v946_v52, %v921_v59  ;;  %v966_v59 = vrot.slane %v702_v19, 4 }
 0x16c   : > { %1866 = vrot.lane.b32.xlu1 %v1720_v12, %s10109_s14  ;;  %1876 = vrot.lane.b32.xlu0 %v1725_v53, %s10109_s14  ;;  %v10913_v12 = vsel %vm742_vm0, 0.0, %v906_v1  ;;  %v936_v53 = vrot.slane %v917_v37, 4  ;;  %v1721_v1 = vmul.f32 %v10555_v57, %v10917_v10  ;;  %v10932_v36 = vpop.permute.xlu2 %679 }
 0x16d   : > { %18763 = vst [vmem:[#allocation163_spill] sm:$0xff] %v10913_v12  ;;  %v1723_v40 = vmul.f32 %v10559_v47, %v10913_v12  ;;  %v10936_v47 = vperm.slane %v949_v30, %v10718_v56  ;;  %v979_v30 = vsel %vm742_vm0, %v978_v51, %v10865_v31 }
 0x16e   : > { %1862 = vrot.lane.b32.xlu2 %v1718_v62, %s10109_s14  ;;  %v10921_v62 = vsel %vm742_vm0, 0.0, %v902_v2  ;;  %v937_v2 = vsel %vm742_vm0, %v929_v41, %v936_v53  ;;  %v935_v53 = vsel %vm742_vm0, %v934_v63, %v917_v37  ;;  %v967_v41 = vsel %vm742_vm0, %v966_v59, %v10599_v8 }
 0x16f   : > { %18765 = vst [vmem:[#allocation165_spill] sm:$0xff] %v10921_v62  ;;  %v1719_v23 = vmul.f32 %v10487_v24, %v10921_v62  ;;  %v10944_v52 = vperm.slane %v937_v2, %v10718_v56  ;;  %v1732_v57 = vmul.f32 %v10605_v28, %v10936_v47  ;;  %v964_v2 = vrot.slane %v10936_v47, 4 }
 0x170   : > { %18766 = vst [vmem:[#allocation166_spill] sm:$0xff] %v10936_v47  ;;  %v985_v28 = vperm.slane %v979_v30, %v10711_v20  ;;  %v973_v51 = vperm.slane %v967_v41, %v10711_v20  ;;  %v10969_v63 = vpop.permute.xlu0 %727 }
 0x171   : > { %18768 = vst [vmem:[#allocation168_spill] sm:$0xff] %v10944_v52  ;;  %v10976_v30 = vsel %vm742_vm0, 0.0, %v964_v2 }
 0x172   : > { %18771 = vst [vmem:[#allocation171_spill] sm:$0xff] %v10976_v30  ;;  %v992_v47 = vrot.slane %v973_v51, 4 }
 0x174   : > { %1872 = vrot.lane.b32.xlu1 %v1723_v40, %s10109_s14  ;;  %1864 = vrot.lane.b32.xlu0 %v1719_v23, %s10109_s14  ;;  %v10941_v40 = vperm.slane %v947_v13, %v10718_v56  ;;  %v1728_v23 = vmul.f32 %v10541_v9, %v10944_v52  ;;  %v968_v9 = vrot.slane %v10599_v8, 4 }
 0x176   : > { %1868 = vrot.lane.b32.xlu2 %v1721_v1, %s10109_s14  ;;  %18767 = vst [vmem:[#allocation167_spill] sm:$0xff] %v10941_v40  ;;  %v980_v1 = vrot.slane %v10865_v31, 4  ;;  %v1730_v13 = vmul.f32 %v10597_v5, %v10941_v40  ;;  %v962_v37 = vrot.slane %v10941_v40, 4  ;;  %v10964_v31 = vperm.slane %v935_v53, %v10718_v56  ;;  %v10973_v5 = vpop.permute.xlu2 %705 }
 0x177   : > { %v993_v40 = vsel %vm742_vm0, %v985_v28, %v992_v47 }
 0x178   : > { %18769 = vst [vmem:[#allocation169_spill] sm:$0xff] %v10964_v31  ;;  %v981_v59 = vsel %vm742_vm0, %v726_v0, %v980_v1  ;;  %v10980_v53 = vsel %vm742_vm0, 0.0, %v962_v37  ;;  %v1726_v41 = vmul.f32 %v10571_v27, %v10964_v31  ;;  %v969_v0 = vsel %vm742_vm0, %v702_v19, %v968_v9 }
 0x179   : > { %18772 = vst [vmem:[#allocation172_spill] sm:$0xff] %v10980_v53  ;;  %v989_v24 = vperm.slane %v981_v59, %v10711_v20  ;;  %v1733_v1 = vmul.f32 %v10611_v15, %v10976_v30  ;;  %v1731_v8 = vmul.f32 %v10553_v58, %v10980_v53  ;;  %v958_v2 = vrot.slane %v10964_v31, 4 }
 0x17a   : > { %v977_v27 = vperm.slane %v969_v0, %v10711_v20  ;;  %v1034_v19 = vrot.slane %v10969_v63, 4  ;;  %v11013_v47 = vperm.slane %v993_v40, %v10718_v56 }
 0x17b   : > { %v1002_v59 = vrot.slane %v989_v24, 4 }
 0x17c   : > { %1890 = vrot.lane.b32.xlu1 %v1732_v57, %s10109_s14  ;;  %v10967_v57 = vpop.permute.xlu1 %1626  ;;  %1882 = vrot.lane.b32.xlu0 %v1728_v23, %s10109_s14  ;;  %v960_v23 = vrot.slane %v10944_v52, 4  ;;  %18776 = vst [vmem:[#allocation176_spill] sm:$0xff] %v11013_v47  ;;  %v1035_v0 = vsel %vm742_vm0, %v1034_v19, %v10932_v36  ;;  %v1004_v19 = vrot.slane %v977_v27, 4 }
 0x17d   : > { %18770 = vst [vmem:[#allocation170_spill] sm:$0xff] %v10967_v57 }
 0x17e   : > { %1886 = vrot.lane.b32.xlu2 %v1730_v13, %s10109_s14  ;;  %v990_v13 = vrot.slane %v985_v28, 4  ;;  %v10999_v9 = vsel %vm742_vm0, 0.0, %v960_v23  ;;  %v1003_v23 = vsel %vm742_vm0, %v1002_v59, %v977_v27  ;;  %v1041_v59 = vperm.slane %v1035_v0, %v10711_v20 }
 0x17f   : > { %18773 = vst [vmem:[#allocation173_spill] sm:$0xff] %v10999_v9  ;;  %v1729_v28 = vmul.f32 %v10591_v14, %v10999_v9  ;;  %v11026_v40 = vperm.slane %v1003_v23, %v10718_v56  ;;  %v1016_v14 = vrot.slane %v11013_v47, 4  ;;  %v1005_v27 = vsel %vm742_vm0, %v989_v24, %v1004_v19 }
 0x180   : > { %v991_v37 = vsel %vm742_vm0, %v990_v13, %v973_v51  ;;  %v11007_v13 = vpop.permute.xlu0 %681 }
 0x181   : > { %v11005_v15 = vperm.slane %v991_v37, %v10718_v56  ;;  %18777 = vst [vmem:[#allocation177_spill] sm:$0xff] %v11026_v40  ;;  %v1738_v23 = vmul.f32 %v10636_v33, %v11026_v40 }
 0x183   : > { %18774 = vst [vmem:[#allocation174_spill] sm:$0xff] %v11005_v15  ;;  %v1014_v0 = vrot.slane %v11005_v15, 4 }
 0x184   : > { %1878 = vrot.lane.b32.xlu1 %v1726_v41, %s10109_s14  ;;  %1888 = vrot.lane.b32.xlu0 %v1731_v8, %s10109_s14  ;;  %v11002_v41 = vpop.permute.xlu2 %731  ;;  %v704_v51 = vpop.permute.xlu1 %703 }
 0x185   : > { %v1022_v8 = vrot.slane %v704_v51, 4  ;;  %v11062_v19 = vsel %vm742_vm0, 0.0, %v1014_v0 }
 0x186   : > { %1892 = vrot.lane.b32.xlu2 %v1733_v1, %s10109_s14  ;;  %v11010_v1 = vsel %vm742_vm0, 0.0, %v958_v2  ;;  %v1734_v2 = vmul.f32 %v10565_v49, %v11005_v15  ;;  %v1046_v49 = vrot.slane %v1041_v59, 4  ;;  %v11057_v15 = vperm.slane %v1005_v27, %v10718_v56  ;;  %18781 = vst [vmem:[#allocation181_spill] sm:$0xff] %v11062_v19 }
 0x187   : > { %18775 = vst [vmem:[#allocation175_spill] sm:$0xff] %v11010_v1  ;;  %v1727_v37 = vmul.f32 %v10581_v26, %v11010_v1  ;;  %v11037_v26 = vsel %vm742_vm0, 0.0, %v1016_v14  ;;  %v1736_v14 = vmul.f32 %v10628_v54, %v11013_v47 }
 0x188   : > { %18779 = vst [vmem:[#allocation179_spill] sm:$0xff] %v11037_v26  ;;  %v11042_v30 = vpop.permute.xlu0 %707  ;;  %v1737_v33 = vmul.f32 %v10579_v35, %v11037_v26  ;;  %v1020_v0 = vrot.slane %v11057_v15, 4 }
 0x189   : > { %18780 = vst [vmem:[#allocation180_spill] sm:$0xff] %v11057_v15 }
 0x18c   : > { %1884 = vrot.lane.b32.xlu1 %v1729_v28, %s10109_s14  ;;  %1894 = vrot.lane.b32.xlu0 %v1734_v2, %s10109_s14  ;;  %v1023_v28 = vsel %vm742_vm0, %v1022_v8, %v10616_v55  ;;  %v11034_v58 = vpop.permute.xlu2 %1634  ;;  %v11046_v2 = vpop.permute.xlu1 %729  ;;  %v1036_v8 = vrot.slane %v10932_v36, 4 }
 0x18d   : > { %18778 = vst [vmem:[#allocation178_spill] sm:$0xff] %v11034_v58 }
 0x18e   : > { %1880 = vrot.lane.b32.xlu2 %v1727_v37, %s10109_s14  ;;  %v1029_v37 = vperm.slane %v1023_v28, %v10711_v20  ;;  %v1018_v28 = vrot.slane %v11026_v40, 4  ;;  %v1037_v36 = vsel %vm742_vm0, %v10969_v63, %v1036_v8 }
 0x190   : > { %v1047_v24 = vsel %vm742_vm0, %v1046_v49, %v1029_v37  ;;  %v11069_v54 = vsel %vm742_vm0, 0.0, %v1018_v28  ;;  %v1048_v35 = vrot.slane %v1029_v37, 4  ;;  %v11077_v49 = vpop.permute.xlu0 %1630  ;;  %v1740_v37 = vmul.f32 %v10603_v61, %v11057_v15 }
 0x191   : > { %18783 = vst [vmem:[#allocation183_spill] sm:$0xff] %v11069_v54  ;;  %v11073_v27 = vperm.slane %v1047_v24, %v10718_v56 }
 0x192   : > { %18785 = vst [vmem:[#allocation185_spill] sm:$0xff] %v11077_v49  ;;  %v1049_v8 = vsel %vm742_vm0, %v1041_v59, %v1048_v35 }
 0x193   : > { %18784 = vst [vmem:[#allocation184_spill] sm:$0xff] %v11073_v27  ;;  %v1070_v24 = vrot.slane %v11073_v27, 4  ;;  %v11101_v35 = vperm.slane %v1049_v8, %v10718_v56  ;;  %v1078_v8 = vrot.slane %v10973_v5, 4 }
 0x194   : > { %1902 = vrot.lane.b32.xlu1 %v1738_v23, %s10109_s14  ;;  %1900 = vrot.lane.b32.xlu0 %v1737_v33, %s10109_s14  ;;  %v1735_v33 = vmul.f32 %v10622_v60, %v11062_v19  ;;  %v11088_v28 = vpop.permute.xlu1 %683 }
 0x195   : > { %18788 = vst [vmem:[#allocation188_spill] sm:$0xff] %v11101_v35  ;;  %v11104_v59 = vsel %vm742_vm0, 0.0, %v1070_v24  ;;  %v18793_v24 = vld [vmem:[#allocation109_spill] sm:$0xff] }
 0x196   : > { %1898 = vrot.lane.b32.xlu2 %v1736_v14, %s10109_s14  ;;  %v1024_v14 = vrot.slane %v10616_v55, 4  ;;  %v1739_v55 = vmul.f32 %v10642_v7, %v11069_v54  ;;  %18789 = vst [vmem:[#allocation189_spill] sm:$0xff] %v11104_v59  ;;  %v1743_v54 = vmul.f32 %v18793_v24, %v11104_v59 }
 0x198   : > { %v11064_v23 = vpop.permute.xlu2 %1838  ;;  %v1025_v63 = vsel %vm742_vm0, %v704_v51, %v1024_v14  ;;  %v1090_v51 = vrot.slane %v11046_v2, 4  ;;  %v11096_v14 = vsel %vm742_vm0, 0.0, %v1020_v0  ;;  %v18791_v0 = vld [vmem:[#allocation120_spill] sm:$0xff]  ;;  %v11115_v15 = vpop.permute.xlu0 %1636 }
 0x199   : > { %18782 = vst [vmem:[#allocation182_spill] sm:$0xff] %v11064_v23  ;;  %v1045_v23 = vperm.slane %v1037_v36, %v10711_v20  ;;  %v1033_v36 = vperm.slane %v1025_v63, %v10711_v20 }
 0x19a   : > { %18786 = vst [vmem:[#allocation186_spill] sm:$0xff] %v11096_v14  ;;  %v1091_v60 = vsel %vm742_vm0, %v1090_v51, %v11007_v13  ;;  %v1092_v51 = vrot.slane %v11007_v13, 4 }
 0x19b   : > { %v1060_v63 = vrot.slane %v1033_v36, 4  ;;  %18792 = vst [vmem:[#allocation190_spill] sm:$0xff] %v11115_v15 }
 0x19c   : > { %1896 = vrot.lane.b32.xlu1 %v1735_v33, %s10109_s14  ;;  %1906 = vrot.lane.b32.xlu0 %v1740_v37, %s10109_s14  ;;  %v1058_v33 = vrot.slane %v1045_v23, 4  ;;  %v11121_v40 = vpop.permute.xlu1 %1632  ;;  %v1093_v13 = vsel %vm742_vm0, %v11046_v2, %v1092_v51 }
 0x19d   : > { %18794 = vst [vmem:[#allocation191_spill] sm:$0xff] %v11121_v40  ;;  %v1101_v2 = vperm.slane %v1093_v13, %v10711_v20  ;;  %v18809_v13 = vld [vmem:[#allocation128_spill] sm:$0xff] }
 0x19e   : > { %1904 = vrot.lane.b32.xlu2 %v1739_v55, %s10109_s14  ;;  %v18790_v55 = vld [vmem:[#allocation118_spill] sm:$0xff]  ;;  %v1059_v37 = vsel %vm742_vm0, %v1058_v33, %v1033_v36 }
 0x19f   : > { %v1741_v61 = vmul.f32 %v18790_v55, %v11096_v14  ;;  %v1072_v55 = vrot.slane %v11101_v35, 4  ;;  %v1097_v14 = vperm.slane %v1091_v60, %v10711_v20  ;;  %v11126_v36 = vperm.slane %v1059_v37, %v10718_v56 }
 0x1a0   : > { %v11098_v7 = vpop.permute.xlu2 %1844 }
 0x1a1   : > { %18787 = vst [vmem:[#allocation187_spill] sm:$0xff] %v11098_v7  ;;  %v1742_v7 = vmul.f32 %v18791_v0, %v11073_v27  ;;  %v18797_v0 = vld [vmem:[#allocation113_spill] sm:$0xff]  ;;  %v11135_v60 = vsel %vm742_vm0, 0.0, %v1072_v55  ;;  %v1074_v37 = vrot.slane %v11126_v36, 4 }
 0x1a2   : > { %18795 = vst [vmem:[#allocation192_spill] sm:$0xff] %v11126_v36  ;;  %v1079_v24 = vsel %vm742_vm0, %v1078_v8, %v18797_v0  ;;  %v18801_v8 = vld [vmem:[#allocation123_spill] sm:$0xff] }
 0x1a3   : > { %18798 = vst [vmem:[#allocation113_spill] sm:$0xff] %v11135_v60  ;;  %v1745_v55 = vmul.f32 %v18801_v8, %v11135_v60  ;;  %v11161_v51 = vsel %vm742_vm0, 0.0, %v1074_v37 }
 0x1a4   : > { %1908 = vrot.lane.b32.xlu1 %v1741_v61, %s10109_s14  ;;  %v1061_v61 = vsel %vm742_vm0, %v1045_v23, %v1060_v63  ;;  %1912 = vrot.lane.b32.xlu0 %v1743_v54, %s10109_s14  ;;  %v18800_v23 = vld [vmem:[#allocation122_spill] sm:$0xff]  ;;  %v1085_v54 = vperm.slane %v1079_v24, %v10711_v20  ;;  %18805 = vst [vmem:[#allocation197_spill] sm:$0xff] %v11161_v51 }
 0x1a5   : > { %v11138_v59 = vperm.slane %v1061_v61, %v10718_v56  ;;  %v1744_v63 = vmul.f32 %v18800_v23, %v11101_v35 }
 0x1a6   : > { %1910 = vrot.lane.b32.xlu2 %v1742_v7, %s10109_s14  ;;  %v1102_v7 = vrot.slane %v1097_v14, 4 }
 0x1a7   : > { %18799 = vst [vmem:[#allocation194_spill] sm:$0xff] %v11138_v59  ;;  %v1076_v24 = vrot.slane %v11138_v59, 4 }
 0x1a8   : > { %v11130_v33 = vpop.permute.xlu2 %1832  ;;  %v1103_v26 = vsel %vm742_vm0, %v1102_v7, %v1085_v54 }
 0x1a9   : > { %18796 = vst [vmem:[#allocation193_spill] sm:$0xff] %v11130_v33  ;;  %v18802_v33 = vld [vmem:[#allocation114_spill] sm:$0xff] }
 0x1aa   : > { %v1746_v61 = vmul.f32 %v18802_v33, %v11126_v36  ;;  %v1114_v33 = vrot.slane %v1101_v2, 4  ;;  %v1146_v36 = vrot.slane %v11002_v41, 4 }
 0x1ac   : > { %1914 = vrot.lane.b32.xlu1 %v1744_v63, %s10109_s14  ;;  %1918 = vrot.lane.b32.xlu0 %v1746_v61, %s10109_s14  ;;  %v1080_v63 = vrot.slane %v18797_v0, 4  ;;  %v1747_v61 = vmul.f32 %v18809_v13, %v11161_v51  ;;  %v18810_v0 = vld [vmem:[#allocation129_spill] sm:$0xff] }
 0x1ad   : > { %v11151_v27 = vpop.permute.xlu0 %1834 }
 0x1ae   : > { %18803 = vst [vmem:[#allocation195_spill] sm:$0xff] %v11151_v27  ;;  %1916 = vrot.lane.b32.xlu2 %v1745_v55, %s10109_s14  ;;  %v11155_v23 = vpop.permute.xlu1 %1842  ;;  %v11167_v27 = vperm.slane %v1103_v26, %v10718_v56  ;;  %v1081_v7 = vsel %vm742_vm0, %v10973_v5, %v1080_v63  ;;  %v1104_v55 = vrot.slane %v1085_v54, 4  ;;  %v18811_v5 = vld [vmem:[#allocation119_spill] sm:$0xff] }
 0x1af   : > { %18804 = vst [vmem:[#allocation196_spill] sm:$0xff] %v11155_v23  ;;  %v11172_v23 = vsel %vm742_vm0, 0.0, %v1076_v24  ;;  %v1089_v26 = vperm.slane %v1081_v7, %v10711_v20 }
 0x1b0   : > { %v11164_v8 = vpop.permute.xlu2 %1850  ;;  %18807 = vst [vmem:[#allocation199_spill] sm:$0xff] %v11167_v27  ;;  %v1105_v37 = vsel %vm742_vm0, %v1097_v14, %v1104_v55  ;;  %v1749_v54 = vmul.f32 %v18811_v5, %v11172_v23  ;;  %v1126_v24 = vrot.slane %v11167_v27, 4 }
 0x1b1   : > { %18806 = vst [vmem:[#allocation198_spill] sm:$0xff] %v11164_v8  ;;  %v1748_v8 = vmul.f32 %v18810_v0, %v11138_v59  ;;  %v11189_v14 = vperm.slane %v1105_v37, %v10718_v56  ;;  %v1115_v55 = vsel %vm742_vm0, %v1114_v33, %v1089_v26  ;;  %v1147_v0 = vsel %vm742_vm0, %v1146_v36, %v11088_v28  ;;  %v18819_v36 = vld [vmem:[#allocation132_spill] sm:$0xff]  ;;  %v18821_v59 = vld [vmem:[#allocation117_spill] sm:$0xff] }
 0x1b2   : > { %18808 = vst [vmem:[#allocation200_spill] sm:$0xff] %v11172_v23  ;;  %v11200_v13 = vsel %vm742_vm0, 0.0, %v1126_v24  ;;  %v1134_v37 = vrot.slane %v11042_v30, 4  ;;  %v1116_v5 = vrot.slane %v1089_v26, 4  ;;  %v18820_v24 = vld [vmem:[#allocation124_spill] sm:$0xff] }
 0x1b3   : > { %18813 = vst [vmem:[#allocation202_spill] sm:$0xff] %v11189_v14  ;;  %v1752_v23 = vmul.f32 %v18820_v24, %v11189_v14 }
 0x1b4   : > { %1920 = vrot.lane.b32.xlu1 %v1747_v61, %s10109_s14  ;;  %1924 = vrot.lane.b32.xlu0 %v1749_v54, %s10109_s14  ;;  %18816 = vst [vmem:[#allocation205_spill] sm:$0xff] %v11200_v13  ;;  %v1128_v54 = vrot.slane %v11189_v14, 4  ;;  %v1135_v51 = vsel %vm742_vm0, %v1134_v37, %v18821_v59 }
 0x1b5   : > { %v11193_v61 = vpop.permute.xlu0 %1840 }
 0x1b6   : > { %1922 = vrot.lane.b32.xlu2 %v1748_v8, %s10109_s14  ;;  %v11186_v63 = vpop.permute.xlu1 %1830  ;;  %18814 = vst [vmem:[#allocation203_spill] sm:$0xff] %v11193_v61  ;;  %v11203_v8 = vperm.slane %v1115_v55, %v10718_v56  ;;  %v1153_v61 = vperm.slane %v1147_v0, %v10711_v20  ;;  %v1117_v55 = vsel %vm742_vm0, %v1101_v2, %v1116_v5  ;;  %v1148_v0 = vrot.slane %v11088_v28, 4  ;;  %v18828_v28 = vld [vmem:[#allocation134_spill] sm:$0xff] }
 0x1b7   : > { %18812 = vst [vmem:[#allocation201_spill] sm:$0xff] %v11186_v63  ;;  %v18818_v63 = vld [vmem:[#allocation131_spill] sm:$0xff]  ;;  %v11230_v2 = vperm.slane %v1117_v55, %v10718_v56  ;;  %v1141_v5 = vperm.slane %v1135_v51, %v10711_v20  ;;  %v18830_v51 = vld [vmem:[#allocation130_spill] sm:$0xff] }
 0x1b8   : > { %v11195_v7 = vpop.permute.xlu2 %1856  ;;  %18817 = vst [vmem:[#allocation206_spill] sm:$0xff] %v11203_v8  ;;  %v1750_v33 = vmul.f32 %v18818_v63, %v11167_v27  ;;  %v1130_v26 = vrot.slane %v11203_v8, 4  ;;  %v18829_v55 = vld [vmem:[#allocation135_spill] sm:$0xff] }
 0x1b9   : > { %18815 = vst [vmem:[#allocation204_spill] sm:$0xff] %v11195_v7  ;;  %v1751_v7 = vmul.f32 %v18819_v36, %v11200_v13  ;;  %v1158_v36 = vrot.slane %v1153_v61, 4  ;;  %v1160_v14 = vrot.slane %v1141_v5, 4 }
 0x1ba   : > { %18825 = vst [vmem:[#allocation209_spill] sm:$0xff] %v11230_v2  ;;  %v11236_v37 = vsel %vm742_vm0, 0.0, %v1130_v26  ;;  %v1132_v26 = vrot.slane %v11230_v2, 4 }
 0x1bb   : > { %18827 = vst [vmem:[#allocation211_spill] sm:$0xff] %v11236_v37 }
 0x1bc   : > { %1926 = vrot.lane.b32.xlu1 %v1750_v33, %s10109_s14  ;;  %1930 = vrot.lane.b32.xlu0 %v1752_v23, %s10109_s14  ;;  %v11225_v33 = vsel %vm742_vm0, 0.0, %v1128_v54  ;;  %v1149_v23 = vsel %vm742_vm0, %v11002_v41, %v1148_v0  ;;  %v1159_v54 = vsel %vm742_vm0, %v1158_v36, %v1141_v5  ;;  %v1136_v41 = vrot.slane %v18821_v59, 4 }
 0x1bd   : > { %18823 = vst [vmem:[#allocation207_spill] sm:$0xff] %v11225_v33  ;;  %v1157_v13 = vperm.slane %v1149_v23, %v10711_v20  ;;  %v1161_v36 = vsel %vm742_vm0, %v1153_v61, %v1160_v14  ;;  %v18837_v14 = vld [vmem:[#allocation137_spill] sm:$0xff] }
 0x1be   : > { %1928 = vrot.lane.b32.xlu2 %v1751_v7, %s10109_s14  ;;  %v11219_v63 = vpop.permute.xlu1 %1836  ;;  %v11233_v7 = vpop.permute.xlu0 %1858  ;;  %v1137_v5 = vsel %vm742_vm0, %v11042_v30, %v1136_v41  ;;  %v11269_v23 = vperm.slane %v1161_v36, %v10718_v56  ;;  %v1756_v61 = vmul.f32 %v18837_v14, %v11230_v2  ;;  %v18838_v30 = vld [vmem:[#allocation136_spill] sm:$0xff] }
 0x1bf   : > { %18822 = vst [vmem:[#allocation117_spill] sm:$0xff] %v11219_v63  ;;  %v1753_v63 = vmul.f32 %v18828_v28, %v11225_v33  ;;  %v1170_v59 = vrot.slane %v1157_v13, 4 }
 0x1c0   : > { %v11227_v24 = vpop.permute.xlu2 %1874  ;;  %18826 = vst [vmem:[#allocation210_spill] sm:$0xff] %v11233_v7  ;;  %v1755_v7 = vmul.f32 %v18830_v51, %v11236_v37  ;;  %v1184_v14 = vrot.slane %v11269_v23, 4 }
 0x1c1   : > { %18824 = vst [vmem:[#allocation208_spill] sm:$0xff] %v11227_v24  ;;  %v1754_v24 = vmul.f32 %v18829_v55, %v11203_v8 }
 0x1c2   : > { %18836 = vst [vmem:[#allocation217_spill] sm:$0xff] %v11269_v23 }
 0x1c4   : > { %1932 = vrot.lane.b32.xlu1 %v1753_v63, %s10109_s14  ;;  %v11256_v63 = vperm.slane %v1159_v54, %v10718_v56  ;;  %1936 = vrot.lane.b32.xlu0 %v1755_v7, %s10109_s14  ;;  %v1145_v7 = vperm.slane %v1137_v5, %v10711_v20 }
 0x1c6   : > { %1934 = vrot.lane.b32.xlu2 %v1754_v24, %s10109_s14  ;;  %v11251_v28 = vpop.permute.xlu1 %1854  ;;  %18832 = vst [vmem:[#allocation213_spill] sm:$0xff] %v11256_v63  ;;  %v11263_v55 = vpop.permute.xlu0 %1846  ;;  %v11266_v24 = vsel %vm742_vm0, 0.0, %v1132_v26  ;;  %v1182_v54 = vrot.slane %v11256_v63, 4 }
 0x1c7   : > { %18831 = vst [vmem:[#allocation212_spill] sm:$0xff] %v11251_v28  ;;  %v1757_v41 = vmul.f32 %v18838_v30, %v11266_v24 }
 0x1c8   : > { %v11259_v0 = vpop.permute.xlu2 %1862  ;;  %18834 = vst [vmem:[#allocation215_spill] sm:$0xff] %v11263_v55  ;;  %v18839_v55 = vld [vmem:[#allocation133_spill] sm:$0xff]  ;;  %v11287_v5 = vsel %vm742_vm0, 0.0, %v1182_v54  ;;  %v1760_v54 = vmul.f32 %v10967_v57, %v11269_v23 }
 0x1c9   : > { %18833 = vst [vmem:[#allocation214_spill] sm:$0xff] %v11259_v0  ;;  %v1758_v26 = vmul.f32 %v18839_v55, %v11256_v63  ;;  %v1171_v0 = vsel %vm742_vm0, %v1170_v59, %v1145_v7  ;;  %v1172_v55 = vrot.slane %v1145_v7, 4  ;;  %v11297_v59 = vsel %vm742_vm0, 0.0, %v1184_v14 }
 0x1ca   : > { %18835 = vst [vmem:[#allocation216_spill] sm:$0xff] %v11266_v24  ;;  %v11292_v28 = vperm.slane %v1171_v0, %v10718_v56  ;;  %v1761_v0 = vmul.f32 %v10831_v6, %v11297_v59 }
 0x1cb   : > { %18841 = vst [vmem:[#allocation219_spill] sm:$0xff] %v11287_v5 }
 0x1cc   : > { %1938 = vrot.lane.b32.xlu1 %v1756_v61, %s10109_s14  ;;  %1942 = vrot.lane.b32.xlu0 %v1758_v26, %s10109_s14  ;;  %18843 = vst [vmem:[#allocation221_spill] sm:$0xff] %v11292_v28  ;;  %v1186_v26 = vrot.slane %v11292_v28, 4 }
 0x1cd   : > { %18845 = vst [vmem:[#allocation223_spill] sm:$0xff] %v11297_v59 }
 0x1ce   : > { %1940 = vrot.lane.b32.xlu2 %v1757_v41, %s10109_s14  ;;  %v11282_v36 = vpop.permute.xlu1 %1860  ;;  %v11294_v51 = vpop.permute.xlu0 %1852  ;;  %v1759_v41 = vmul.f32 %v10895_v29, %v11287_v5  ;;  %v1762_v29 = vmul.f32 %v11077_v49, %v11292_v28  ;;  %v517_v49 = vld [vmem:[%s17647_s3] sm:$0xff] }
 0x1cf   : > { %18840 = vst [vmem:[#allocation218_spill] sm:$0xff] %v11282_v36  ;;  %v1173_v36 = vsel %vm742_vm0, %v1157_v13, %v1172_v55  ;;  %v11318_v55 = vsel %vm742_vm0, 0.0, %v1186_v26 }
 0x1d0   : > { %v11289_v61 = vpop.permute.xlu2 %1868  ;;  %18844 = vst [vmem:[#allocation222_spill] sm:$0xff] %v11294_v51  ;;  %v11312_v14 = vperm.slane %v1173_v36, %v10718_v56 }
 0x1d1   : > { %18842 = vst [vmem:[#allocation220_spill] sm:$0xff] %v11289_v61 }
 0x1d2   : > { %18847 = vst [vmem:[#allocation225_spill] sm:$0xff] %v11312_v14  ;;  %v1188_v51 = vrot.slane %v11312_v14, 4  ;;  %v1764_v36 = vmul.f32 %v11034_v58, %v11312_v14 }
 0x1d3   : > { %18849 = vst [vmem:[#allocation227_spill] sm:$0xff] %v11318_v55 }
 0x1d4   : > { %1944 = vrot.lane.b32.xlu1 %v1759_v41, %s10109_s14  ;;  %1948 = vrot.lane.b32.xlu0 %v1761_v0, %s10109_s14  ;;  %v11334_v26 = vsel %vm742_vm0, 0.0, %v1188_v51 }
 0x1d5   : > { %18852 = vst [vmem:[#allocation230_spill] sm:$0xff] %v11334_v26  ;;  %v1765_v58 = vmul.f32 %v11115_v15, %v11334_v26 }
 0x1d6   : > { %1946 = vrot.lane.b32.xlu2 %v1760_v54, %s10109_s14  ;;  %v11309_v7 = vpop.permute.xlu1 %1848  ;;  %v11320_v41 = vpop.permute.xlu0 %1870  ;;  %v1763_v54 = vmul.f32 %v11121_v40, %v11318_v55  ;;  %v533_v40 = vrot.slane %v517_v49, 1 }
 0x1d7   : > { %18846 = vst [vmem:[#allocation224_spill] sm:$0xff] %v11309_v7  ;;  %v536_v7 = vrot.slane %v517_v49, 4 }
 0x1d8   : > { %v11315_v13 = vpop.permute.xlu2 %1886  ;;  %18850 = vst [vmem:[#allocation228_spill] sm:$0xff] %v11320_v41  ;;  %v11349_v51 = vperm.slane %v533_v40, 0 }
 0x1d9   : > { %18848 = vst [vmem:[#allocation226_spill] sm:$0xff] %v11315_v13  ;;  %v11367_v40 = vperm.slane %v536_v7, 0 }
 0x1da   : > { %18856 = vst [vmem:[#allocation234_spill] sm:$0xff] %v11349_v51 }
 0x1db   : > { %18862 = vst [vmem:[#allocation240_spill] sm:$0xff] %v11367_v40 }
 0x1dc   : > { %1950 = vrot.lane.b32.xlu1 %v1762_v29, %s10109_s14  ;;  %1954 = vrot.lane.b32.xlu0 %v1764_v36, %s10109_s14 }
 0x1de   : > { %v11330_v0 = vpop.permute.xlu1 %1866  ;;  %1952 = vrot.lane.b32.xlu2 %v1763_v54, %s10109_s14  ;;  %v11342_v29 = vpop.permute.xlu0 %1876  ;;  %v534_v54 = vrot.slane %v517_v49, 2 }
 0x1df   : > { %18851 = vst [vmem:[#allocation229_spill] sm:$0xff] %v11330_v0  ;;  %v11346_v0 = vperm.slane %v517_v49, 0 }
 0x1e0   : > { %v11340_v13 = vpop.permute.xlu2 %1892  ;;  %18854 = vst [vmem:[#allocation232_spill] sm:$0xff] %v11342_v29  ;;  %v11361_v61 = vperm.slane %v534_v54, 0  ;;  %v539_v54 = vrot.slane %v517_v49, 7 }
 0x1e1   : > { %18853 = vst [vmem:[#allocation231_spill] sm:$0xff] %v11340_v13  ;;  %v535_v13 = vrot.slane %v517_v49, 3 }
 0x1e2   : > { %18855 = vst [vmem:[#allocation233_spill] sm:$0xff] %v11346_v0  ;;  %v11385_v7 = vperm.slane %v539_v54, 0 }
 0x1e3   : > { %18860 = vst [vmem:[#allocation238_spill] sm:$0xff] %v11361_v61 }
 0x1e4   : > { %1956 = vrot.lane.b32.xlu1 %v1765_v58, %s10109_s14  ;;  %2152 = vrot.lane.b32.xlu0 %v11349_v51, %s10103_s6  ;;  %v11363_v58 = vperm.slane %v535_v13, 0  ;;  %18868 = vst [vmem:[#allocation246_spill] sm:$0xff] %v11385_v7 }
 0x1e6   : > { %v11351_v36 = vpop.permute.xlu1 %1872  ;;  %2150 = vrot.lane.b32.xlu2 %v11346_v0, %s10103_s6  ;;  %v11359_v41 = vpop.permute.xlu0 %1864  ;;  %18861 = vst [vmem:[#allocation239_spill] sm:$0xff] %v11363_v58 }
 0x1e7   : > { %18857 = vst [vmem:[#allocation235_spill] sm:$0xff] %v11351_v36  ;;  %v537_v36 = vrot.slane %v517_v49, 5 }
 0x1e8   : > { %v11357_v29 = vpop.permute.xlu2 %1880  ;;  %18859 = vst [vmem:[#allocation237_spill] sm:$0xff] %v11359_v41 }
 0x1e9   : > { %18858 = vst [vmem:[#allocation236_spill] sm:$0xff] %v11357_v29  ;;  %v538_v29 = vrot.slane %v517_v49, 6  ;;  %v11379_v15 = vperm.slane %v537_v36, 0  ;;  %v518_v49 = vld [vmem:[%s17647_s3 + $0x8] sm:$0xff] }
 0x1ea   : > { %v540_v36 = vrot.slane %v518_v49, 1  ;;  %v11400_v54 = vperm.slane %v518_v49, 0 }
 0x1eb   : > { %18866 = vst [vmem:[#allocation244_spill] sm:$0xff] %v11379_v15  ;;  %v11381_v30 = vperm.slane %v538_v29, 0 }
 0x1ec   : > { %2154 = vrot.lane.b32.xlu1 %v11361_v61, %s10103_s6  ;;  %2158 = vrot.lane.b32.xlu0 %v11367_v40, %s10103_s6  ;;  %18872 = vst [vmem:[#allocation250_spill] sm:$0xff] %v11400_v54  ;;  %v11402_v57 = vperm.slane %v540_v36, 0 }
 0x1ed   : > { %18867 = vst [vmem:[#allocation245_spill] sm:$0xff] %v11381_v30 }
 0x1ee   : > { %v11369_v6 = vpop.permute.xlu1 %1890  ;;  %2156 = vrot.lane.b32.xlu2 %v11363_v58, %s10103_s6  ;;  %v11377_v13 = vpop.permute.xlu0 %1882  ;;  %18873 = vst [vmem:[#allocation251_spill] sm:$0xff] %v11402_v57  ;;  %v542_v58 = vrot.slane %v518_v49, 3 }
 0x1ef   : > { %18863 = vst [vmem:[#allocation241_spill] sm:$0xff] %v11369_v6 }
 0x1f0   : > { %v11375_v41 = vpop.permute.xlu2 %1898  ;;  %18865 = vst [vmem:[#allocation243_spill] sm:$0xff] %v11377_v13 }
 0x1f1   : > { %18864 = vst [vmem:[#allocation242_spill] sm:$0xff] %v11375_v41  ;;  %v541_v41 = vrot.slane %v518_v49, 2 }
 0x1f4   : > { %2160 = vrot.lane.b32.xlu1 %v11379_v15, %s10103_s6  ;;  %2164 = vrot.lane.b32.xlu0 %v11385_v7, %s10103_s6  ;;  %v544_v15 = vrot.slane %v518_v49, 5 }
 0x1f6   : > { %v11387_v6 = vpop.permute.xlu1 %1878  ;;  %2162 = vrot.lane.b32.xlu2 %v11381_v30, %s10103_s6  ;;  %v11398_v13 = vpop.permute.xlu0 %1888  ;;  %v11418_v30 = vperm.slane %v542_v58, 0 }
 0x1f7   : > { %18869 = vst [vmem:[#allocation247_spill] sm:$0xff] %v11387_v6  ;;  %v11406_v6 = vperm.slane %v541_v41, 0  ;;  %v11424_v41 = vperm.slane %v544_v15, 0  ;;  %v519_v15 = vld [vmem:[%s17647_s3 + $0x10] sm:$0xff] }
 0x1f8   : > { %v11396_v29 = vpop.permute.xlu2 %1904  ;;  %18871 = vst [vmem:[#allocation249_spill] sm:$0xff] %v11398_v13 }
 0x1f9   : > { %18870 = vst [vmem:[#allocation248_spill] sm:$0xff] %v11396_v29  ;;  %v543_v29 = vrot.slane %v518_v49, 4 }
 0x1fa   : > { %18874 = vst [vmem:[#allocation252_spill] sm:$0xff] %v11406_v6 }
 0x1fb   : > { %18878 = vst [vmem:[#allocation256_spill] sm:$0xff] %v11418_v30 }
 0x1fc   : > { %2166 = vrot.lane.b32.xlu1 %v11400_v54, %s10103_s6  ;;  %2170 = vrot.lane.b32.xlu0 %v11406_v6, %s10103_s6  ;;  %v11420_v54 = vperm.slane %v543_v29, 0  ;;  %18880 = vst [vmem:[#allocation258_spill] sm:$0xff] %v11424_v41  ;;  %v550_v6 = vrot.slane %v519_v15, 4 }
 0x1fe   : > { %v11408_v0 = vpop.permute.xlu1 %1884  ;;  %2168 = vrot.lane.b32.xlu2 %v11402_v57, %s10103_s6  ;;  %v11416_v36 = vpop.permute.xlu0 %1894  ;;  %18879 = vst [vmem:[#allocation257_spill] sm:$0xff] %v11420_v54 }
 0x1ff   : > { %18875 = vst [vmem:[#allocation253_spill] sm:$0xff] %v11408_v0  ;;  %v545_v0 = vrot.slane %v518_v49, 6 }
 0x200   : > { %v11414_v13 = vpop.permute.xlu2 %1910  ;;  %18877 = vst [vmem:[#allocation255_spill] sm:$0xff] %v11416_v36 }
 0x201   : > { %18876 = vst [vmem:[#allocation254_spill] sm:$0xff] %v11414_v13  ;;  %v546_v13 = vrot.slane %v518_v49, 7  ;;  %v11436_v29 = vperm.slane %v545_v0, 0  ;;  %v548_v0 = vrot.slane %v519_v15, 2 }
 0x203   : > { %18884 = vst [vmem:[#allocation262_spill] sm:$0xff] %v11436_v29 }
 0x204   : > { %2172 = vrot.lane.b32.xlu1 %v11418_v30, %s10103_s6  ;;  %2176 = vrot.lane.b32.xlu0 %v11424_v41, %s10103_s6  ;;  %v11441_v30 = vperm.slane %v546_v13, 0 }
 0x206   : > { %v11426_v57 = vpop.permute.xlu1 %1902  ;;  %2174 = vrot.lane.b32.xlu2 %v11420_v54, %s10103_s6  ;;  %v11434_v58 = vpop.permute.xlu0 %1900  ;;  %18885 = vst [vmem:[#allocation263_spill] sm:$0xff] %v11441_v30  ;;  %v547_v54 = vrot.slane %v519_v15, 1 }
 0x207   : > { %18881 = vst [vmem:[#allocation259_spill] sm:$0xff] %v11426_v57  ;;  %v11445_v57 = vperm.slane %v519_v15, 0 }
 0x208   : > { %v11432_v36 = vpop.permute.xlu2 %1916  ;;  %18883 = vst [vmem:[#allocation261_spill] sm:$0xff] %v11434_v58  ;;  %v549_v58 = vrot.slane %v519_v15, 3 }
 0x209   : > { %18882 = vst [vmem:[#allocation260_spill] sm:$0xff] %v11432_v36  ;;  %v11457_v36 = vperm.slane %v547_v54, 0  ;;  %v552_v54 = vrot.slane %v519_v15, 6 }
 0x20a   : > { %18886 = vst [vmem:[#allocation264_spill] sm:$0xff] %v11445_v57 }
 0x20b   : > { %18890 = vst [vmem:[#allocation268_spill] sm:$0xff] %v11457_v36 }
 0x20c   : > { %2178 = vrot.lane.b32.xlu1 %v11436_v29, %s10103_s6  ;;  %2182 = vrot.lane.b32.xlu0 %v11445_v57, %s10103_s6  ;;  %v11459_v29 = vperm.slane %v548_v0, 0  ;;  %v11475_v57 = vperm.slane %v550_v6, 0  ;;  %v520_v6 = vld [vmem:[%s17647_s3 + $0x18] sm:$0xff] }
 0x20e   : > { %v11447_v41 = vpop.permute.xlu1 %1896  ;;  %2180 = vrot.lane.b32.xlu2 %v11441_v30, %s10103_s6  ;;  %v11455_v13 = vpop.permute.xlu0 %1906  ;;  %18891 = vst [vmem:[#allocation269_spill] sm:$0xff] %v11459_v29 }
 0x20f   : > { %18887 = vst [vmem:[#allocation265_spill] sm:$0xff] %v11447_v41  ;;  %v11463_v41 = vperm.slane %v549_v58, 0  ;;  %v11481_v58 = vperm.slane %v552_v54, 0 }
 0x210   : > { %v11453_v49 = vpop.permute.xlu2 %1922  ;;  %18889 = vst [vmem:[#allocation267_spill] sm:$0xff] %v11455_v13 }
 0x211   : > { %18888 = vst [vmem:[#allocation266_spill] sm:$0xff] %v11453_v49  ;;  %v551_v49 = vrot.slane %v519_v15, 5 }
 0x212   : > { %18892 = vst [vmem:[#allocation270_spill] sm:$0xff] %v11463_v41 }
 0x213   : > { %18896 = vst [vmem:[#allocation274_spill] sm:$0xff] %v11475_v57 }
 0x214   : > { %2184 = vrot.lane.b32.xlu1 %v11457_v36, %s10103_s6  ;;  %2188 = vrot.lane.b32.xlu0 %v11463_v41, %s10103_s6  ;;  %v11477_v36 = vperm.slane %v551_v49, 0  ;;  %18898 = vst [vmem:[#allocation276_spill] sm:$0xff] %v11481_v58 }
 0x216   : > { %v11465_v30 = vpop.permute.xlu1 %1908  ;;  %2186 = vrot.lane.b32.xlu2 %v11459_v29, %s10103_s6  ;;  %v11473_v0 = vpop.permute.xlu0 %1912  ;;  %18897 = vst [vmem:[#allocation275_spill] sm:$0xff] %v11477_v36 }
 0x217   : > { %18893 = vst [vmem:[#allocation271_spill] sm:$0xff] %v11465_v30  ;;  %v553_v30 = vrot.slane %v519_v15, 7  ;;  %v11498_v15 = vperm.slane %v520_v6, 0 }
 0x218   : > { %v11471_v13 = vpop.permute.xlu2 %1928  ;;  %18895 = vst [vmem:[#allocation273_spill] sm:$0xff] %v11473_v0 }
 0x219   : > { %18894 = vst [vmem:[#allocation272_spill] sm:$0xff] %v11471_v13  ;;  %v554_v13 = vrot.slane %v520_v6, 1  ;;  %v11496_v54 = vperm.slane %v553_v30, 0  ;;  %v557_v30 = vrot.slane %v520_v6, 4 }
 0x21a   : > { %18903 = vst [vmem:[#allocation281_spill] sm:$0xff] %v11498_v15 }
 0x21b   : > { %18902 = vst [vmem:[#allocation280_spill] sm:$0xff] %v11496_v54 }
 0x21c   : > { %2190 = vrot.lane.b32.xlu1 %v11475_v57, %s10103_s6  ;;  %2194 = vrot.lane.b32.xlu0 %v11481_v58, %s10103_s6 }
 0x21e   : > { %v11483_v29 = vpop.permute.xlu1 %1914  ;;  %2192 = vrot.lane.b32.xlu2 %v11477_v36, %s10103_s6  ;;  %v11494_v0 = vpop.permute.xlu0 %1918  ;;  %v555_v36 = vrot.slane %v520_v6, 2 }
 0x21f   : > { %18899 = vst [vmem:[#allocation277_spill] sm:$0xff] %v11483_v29  ;;  %v11502_v29 = vperm.slane %v554_v13, 0  ;;  %v11520_v13 = vperm.slane %v557_v30, 0 }
 0x220   : > { %v11492_v49 = vpop.permute.xlu2 %1934  ;;  %18901 = vst [vmem:[#allocation279_spill] sm:$0xff] %v11494_v0  ;;  %v11514_v58 = vperm.slane %v555_v36, 0  ;;  %v560_v36 = vrot.slane %v520_v6, 7 }
 0x221   : > { %18900 = vst [vmem:[#allocation278_spill] sm:$0xff] %v11492_v49  ;;  %v556_v49 = vrot.slane %v520_v6, 3 }
 0x222   : > { %18904 = vst [vmem:[#allocation282_spill] sm:$0xff] %v11502_v29  ;;  %v11538_v30 = vperm.slane %v560_v36, 0 }
 0x223   : > { %18908 = vst [vmem:[#allocation286_spill] sm:$0xff] %v11514_v58 }
 0x224   : > { %2196 = vrot.lane.b32.xlu1 %v11496_v54, %s10103_s6  ;;  %2200 = vrot.lane.b32.xlu0 %v11502_v29, %s10103_s6  ;;  %v11516_v54 = vperm.slane %v556_v49, 0  ;;  %18910 = vst [vmem:[#allocation288_spill] sm:$0xff] %v11520_v13 }
 0x225   : > { %18916 = vst [vmem:[#allocation294_spill] sm:$0xff] %v11538_v30 }
 0x226   : > { %v11504_v57 = vpop.permute.xlu1 %1920  ;;  %2198 = vrot.lane.b32.xlu2 %v11498_v15, %s10103_s6  ;;  %v11512_v41 = vpop.permute.xlu0 %1924  ;;  %18909 = vst [vmem:[#allocation287_spill] sm:$0xff] %v11516_v54 }
 0x227   : > { %18905 = vst [vmem:[#allocation283_spill] sm:$0xff] %v11504_v57  ;;  %v558_v57 = vrot.slane %v520_v6, 5 }
 0x228   : > { %v11510_v0 = vpop.permute.xlu2 %1940  ;;  %18907 = vst [vmem:[#allocation285_spill] sm:$0xff] %v11512_v41 }
 0x229   : > { %18906 = vst [vmem:[#allocation284_spill] sm:$0xff] %v11510_v0  ;;  %v559_v0 = vrot.slane %v520_v6, 6  ;;  %v11532_v29 = vperm.slane %v558_v57, 0  ;;  %v521_v6 = vld [vmem:[%s17647_s3 + $0x20] sm:$0xff] }
 0x22a   : > { %v561_v57 = vrot.slane %v521_v6, 1  ;;  %v11553_v36 = vperm.slane %v521_v6, 0 }
 0x22b   : > { %18914 = vst [vmem:[#allocation292_spill] sm:$0xff] %v11532_v29 }
 0x22c   : > { %2202 = vrot.lane.b32.xlu1 %v11514_v58, %s10103_s6  ;;  %2206 = vrot.lane.b32.xlu0 %v11520_v13, %s10103_s6  ;;  %v11534_v58 = vperm.slane %v559_v0, 0  ;;  %18920 = vst [vmem:[#allocation298_spill] sm:$0xff] %v11553_v36 }
 0x22e   : > { %v11522_v15 = vpop.permute.xlu1 %1926  ;;  %2204 = vrot.lane.b32.xlu2 %v11516_v54, %s10103_s6  ;;  %v11530_v49 = vpop.permute.xlu0 %1930  ;;  %18915 = vst [vmem:[#allocation293_spill] sm:$0xff] %v11534_v58  ;;  %v11555_v54 = vperm.slane %v561_v57, 0 }
 0x22f   : > { %18911 = vst [vmem:[#allocation289_spill] sm:$0xff] %v11522_v15 }
 0x230   : > { %v11528_v41 = vpop.permute.xlu2 %1946  ;;  %18913 = vst [vmem:[#allocation291_spill] sm:$0xff] %v11530_v49  ;;  %v562_v49 = vrot.slane %v521_v6, 2 }
 0x231   : > { %18912 = vst [vmem:[#allocation290_spill] sm:$0xff] %v11528_v41 }
 0x232   : > { %18921 = vst [vmem:[#allocation299_spill] sm:$0xff] %v11555_v54 }
 0x234   : > { %2208 = vrot.lane.b32.xlu1 %v11532_v29, %s10103_s6  ;;  %2212 = vrot.lane.b32.xlu0 %v11538_v30, %s10103_s6  ;;  %v563_v29 = vrot.slane %v521_v6, 3  ;;  %v565_v30 = vrot.slane %v521_v6, 5 }
 0x236   : > { %v11540_v15 = vpop.permute.xlu1 %1932  ;;  %2210 = vrot.lane.b32.xlu2 %v11534_v58, %s10103_s6  ;;  %v11551_v41 = vpop.permute.xlu0 %1936  ;;  %v11571_v13 = vperm.slane %v563_v29, 0 }
 0x237   : > { %18917 = vst [vmem:[#allocation295_spill] sm:$0xff] %v11540_v15  ;;  %v11559_v15 = vperm.slane %v562_v49, 0  ;;  %v11577_v49 = vperm.slane %v565_v30, 0  ;;  %v522_v30 = vld [vmem:[%s17647_s3 + $0x28] sm:$0xff] }
 0x238   : > { %v11549_v0 = vpop.permute.xlu2 %1952  ;;  %18919 = vst [vmem:[#allocation297_spill] sm:$0xff] %v11551_v41  ;;  %v571_v51 = vrot.slane %v522_v30, 4 }
 0x239   : > { %18918 = vst [vmem:[#allocation296_spill] sm:$0xff] %v11549_v0  ;;  %v564_v0 = vrot.slane %v521_v6, 4 }
 0x23a   : > { %18922 = vst [vmem:[#allocation300_spill] sm:$0xff] %v11559_v15  ;;  %v11628_v7 = vperm.slane %v571_v51, 0  ;;  %v523_v51 = vld [vmem:[%s17647_s3 + $0x30] sm:$0xff] }
 0x23b   : > { %18926 = vst [vmem:[#allocation304_spill] sm:$0xff] %v11571_v13  ;;  %v577_v56 = vrot.slane %v523_v51, 3  ;;  %v579_v55 = vrot.slane %v523_v51, 5 }
 0x23c   : > { %2214 = vrot.lane.b32.xlu1 %v11553_v36, %s10103_s6  ;;  %2218 = vrot.lane.b32.xlu0 %v11559_v15, %s10103_s6  ;;  %v11573_v36 = vperm.slane %v564_v0, 0  ;;  %18928 = vst [vmem:[#allocation306_spill] sm:$0xff] %v11577_v49  ;;  %v567_v15 = vrot.slane %v521_v6, 7 }
 0x23d   : > { %18944 = vst [vmem:[#allocation322_spill] sm:$0xff] %v11628_v7  ;;  %v11685_v59 = vperm.slane %v579_v55, 0 }
 0x23e   : > { %v11561_v58 = vpop.permute.xlu1 %1938  ;;  %2216 = vrot.lane.b32.xlu2 %v11555_v54, %s10103_s6  ;;  %v11569_v57 = vpop.permute.xlu0 %1942  ;;  %18927 = vst [vmem:[#allocation305_spill] sm:$0xff] %v11573_v36 }
 0x23f   : > { %18923 = vst [vmem:[#allocation301_spill] sm:$0xff] %v11561_v58  ;;  %v566_v58 = vrot.slane %v521_v6, 6 }
 0x240   : > { %v11567_v41 = vpop.permute.xlu2 %2150  ;;  %18925 = vst [vmem:[#allocation303_spill] sm:$0xff] %v11569_v57 }
 0x241   : > { %18924 = vst [vmem:[#allocation302_spill] sm:$0xff] %v11567_v41  ;;  %v11589_v0 = vperm.slane %v566_v58, 0  ;;  %v569_v58 = vrot.slane %v522_v30, 2 }
 0x242   : > { %18962 = vst [vmem:[#allocation340_spill] sm:$0xff] %v11685_v59 }
 0x243   : > { %18932 = vst [vmem:[#allocation310_spill] sm:$0xff] %v11589_v0 }
 0x244   : > { %2220 = vrot.lane.b32.xlu1 %v11571_v13, %s10103_s6  ;;  %2224 = vrot.lane.b32.xlu0 %v11577_v49, %s10103_s6  ;;  %v11594_v13 = vperm.slane %v567_v15, 0 }
 0x246   : > { %v11579_v54 = vpop.permute.xlu1 %1944  ;;  %2222 = vrot.lane.b32.xlu2 %v11573_v36, %s10103_s6  ;;  %v11587_v29 = vpop.permute.xlu0 %1948  ;;  %18933 = vst [vmem:[#allocation311_spill] sm:$0xff] %v11594_v13  ;;  %v568_v36 = vrot.slane %v522_v30, 1 }
 0x247   : > { %18929 = vst [vmem:[#allocation307_spill] sm:$0xff] %v11579_v54  ;;  %v11598_v54 = vperm.slane %v522_v30, 0 }
 0x248   : > { %v11585_v57 = vpop.permute.xlu2 %2156  ;;  %18931 = vst [vmem:[#allocation309_spill] sm:$0xff] %v11587_v29  ;;  %v570_v29 = vrot.slane %v522_v30, 3  ;;  %v11610_v61 = vperm.slane %v568_v36, 0  ;;  %v573_v36 = vrot.slane %v522_v30, 6 }
 0x249   : > { %18930 = vst [vmem:[#allocation308_spill] sm:$0xff] %v11585_v57 }
 0x24a   : > { %18934 = vst [vmem:[#allocation312_spill] sm:$0xff] %v11598_v54 }
 0x24b   : > { %18938 = vst [vmem:[#allocation316_spill] sm:$0xff] %v11610_v61 }
 0x24c   : > { %2226 = vrot.lane.b32.xlu1 %v11589_v0, %s10103_s6  ;;  %2230 = vrot.lane.b32.xlu0 %v11598_v54, %s10103_s6  ;;  %v11612_v0 = vperm.slane %v569_v58, 0  ;;  %v572_v54 = vrot.slane %v522_v30, 5 }
 0x24e   : > { %v11600_v49 = vpop.permute.xlu1 %1950  ;;  %2228 = vrot.lane.b32.xlu2 %v11594_v13, %s10103_s6  ;;  %v11608_v15 = vpop.permute.xlu0 %1954  ;;  %18939 = vst [vmem:[#allocation317_spill] sm:$0xff] %v11612_v0 }
 0x24f   : > { %18935 = vst [vmem:[#allocation313_spill] sm:$0xff] %v11600_v49  ;;  %v11616_v49 = vperm.slane %v570_v29, 0  ;;  %v11634_v29 = vperm.slane %v573_v36, 0 }
 0x250   : > { %v11606_v6 = vpop.permute.xlu2 %2162  ;;  %18937 = vst [vmem:[#allocation315_spill] sm:$0xff] %v11608_v15 }
 0x251   : > { %18936 = vst [vmem:[#allocation314_spill] sm:$0xff] %v11606_v6 }
 0x252   : > { %18940 = vst [vmem:[#allocation318_spill] sm:$0xff] %v11616_v49 }
 0x253   : > { %18946 = vst [vmem:[#allocation324_spill] sm:$0xff] %v11634_v29 }
 0x254   : > { %2232 = vrot.lane.b32.xlu1 %v11610_v61, %s10103_s6  ;;  %2236 = vrot.lane.b32.xlu0 %v11616_v49, %s10103_s6  ;;  %v11630_v61 = vperm.slane %v572_v54, 0  ;;  %v575_v49 = vrot.slane %v523_v51, 1 }
 0x256   : > { %v11618_v13 = vpop.permute.xlu1 %1956  ;;  %2234 = vrot.lane.b32.xlu2 %v11612_v0, %s10103_s6  ;;  %v11626_v58 = vpop.permute.xlu0 %2152  ;;  %18945 = vst [vmem:[#allocation323_spill] sm:$0xff] %v11630_v61 }
 0x257   : > { %18941 = vst [vmem:[#allocation319_spill] sm:$0xff] %v11618_v13  ;;  %v574_v13 = vrot.slane %v522_v30, 7  ;;  %v11651_v30 = vperm.slane %v523_v51, 0 }
 0x258   : > { %v11624_v15 = vpop.permute.xlu2 %2168  ;;  %18943 = vst [vmem:[#allocation321_spill] sm:$0xff] %v11626_v58 }
 0x259   : > { %18942 = vst [vmem:[#allocation320_spill] sm:$0xff] %v11624_v15  ;;  %v11649_v36 = vperm.slane %v574_v13, 0  ;;  %v578_v13 = vrot.slane %v523_v51, 4 }
 0x25a   : > { %18951 = vst [vmem:[#allocation329_spill] sm:$0xff] %v11651_v30 }
 0x25b   : > { %18950 = vst [vmem:[#allocation328_spill] sm:$0xff] %v11649_v36 }
 0x25c   : > { %2238 = vrot.lane.b32.xlu1 %v11628_v7, %s10103_s6  ;;  %2242 = vrot.lane.b32.xlu0 %v11634_v29, %s10103_s6  ;;  %v576_v7 = vrot.slane %v523_v51, 2 }
 0x25e   : > { %v11636_v0 = vpop.permute.xlu1 %2154  ;;  %2240 = vrot.lane.b32.xlu2 %v11630_v61, %s10103_s6  ;;  %v11647_v40 = vpop.permute.xlu0 %2158  ;;  %v11655_v61 = vperm.slane %v575_v49, 0  ;;  %v11667_v14 = vperm.slane %v576_v7, 0  ;;  %v11673_v49 = vperm.slane %v578_v13, 0  ;;  %v581_v7 = vrot.slane %v523_v51, 7 }
 0x25f   : > { %18947 = vst [vmem:[#allocation325_spill] sm:$0xff] %v11636_v0 }
 0x260   : > { %v11645_v54 = vpop.permute.xlu2 %2174  ;;  %18949 = vst [vmem:[#allocation327_spill] sm:$0xff] %v11647_v40  ;;  %v11691_v13 = vperm.slane %v581_v7, 0 }
 0x261   : > { %18948 = vst [vmem:[#allocation326_spill] sm:$0xff] %v11645_v54 }
 0x262   : > { %18952 = vst [vmem:[#allocation330_spill] sm:$0xff] %v11655_v61 }
 0x263   : > { %18956 = vst [vmem:[#allocation334_spill] sm:$0xff] %v11667_v14 }
 0x264   : > { %2244 = vrot.lane.b32.xlu1 %v11649_v36, %s10103_s6  ;;  %2248 = vrot.lane.b32.xlu0 %v11655_v61, %s10103_s6  ;;  %v11669_v36 = vperm.slane %v577_v56, 0  ;;  %18958 = vst [vmem:[#allocation336_spill] sm:$0xff] %v11673_v49  ;;  %v580_v61 = vrot.slane %v523_v51, 6 }
 0x265   : > { %18964 = vst [vmem:[#allocation342_spill] sm:$0xff] %v11691_v13 }
 0x266   : > { %v11657_v29 = vpop.permute.xlu1 %2160  ;;  %2246 = vrot.lane.b32.xlu2 %v11651_v30, %s10103_s6  ;;  %v11665_v26 = vpop.permute.xlu0 %2164  ;;  %18957 = vst [vmem:[#allocation335_spill] sm:$0xff] %v11669_v36 }
 0x267   : > { %18953 = vst [vmem:[#allocation331_spill] sm:$0xff] %v11657_v29 }
 0x268   : > { %v11663_v20 = vpop.permute.xlu2 %2180  ;;  %18955 = vst [vmem:[#allocation333_spill] sm:$0xff] %v11665_v26 }
 0x269   : > { %18954 = vst [vmem:[#allocation332_spill] sm:$0xff] %v11663_v20 }
 0x26c   : > { %2250 = vrot.lane.b32.xlu1 %v11667_v14, %s10103_s6  ;;  %2254 = vrot.lane.b32.xlu0 %v11673_v49, %s10103_s6  ;;  %v11687_v14 = vperm.slane %v580_v61, 0 }
 0x26e   : > { %v11675_v30 = vpop.permute.xlu1 %2166  ;;  %2252 = vrot.lane.b32.xlu2 %v11669_v36, %s10103_s6  ;;  %v11683_v56 = vpop.permute.xlu0 %2170  ;;  %18963 = vst [vmem:[#allocation341_spill] sm:$0xff] %v11687_v14  ;;  %v524_v36 = vld [vmem:[%s17647_s3 + $0x38] sm:$0xff] }
 0x26f   : > { %18959 = vst [vmem:[#allocation337_spill] sm:$0xff] %v11675_v30  ;;  %v582_v55 = vrot.slane %v524_v36, 1  ;;  %v583_v51 = vrot.slane %v524_v36, 2  ;;  %v11706_v7 = vperm.slane %v524_v36, 0  ;;  %v584_v63 = vrot.slane %v524_v36, 3 }
 0x270   : > { %v11681_v28 = vpop.permute.xlu2 %2186  ;;  %18961 = vst [vmem:[#allocation339_spill] sm:$0xff] %v11683_v56  ;;  %v586_v2 = vrot.slane %v524_v36, 5  ;;  %v587_v8 = vrot.slane %v524_v36, 6 }
 0x271   : > { %18960 = vst [vmem:[#allocation338_spill] sm:$0xff] %v11681_v28  ;;  %v11712_v5 = vperm.slane %v583_v51, 0  ;;  %v11724_v37 = vperm.slane %v584_v63, 0 }
 0x272   : > { %18968 = vst [vmem:[#allocation346_spill] sm:$0xff] %v11706_v7  ;;  %v11730_v51 = vperm.slane %v586_v2, 0  ;;  %v2342_v2 = vmul.f32 %v11567_v41, %v10748_v48  ;;  %v2347_v41 = vmul.f32 %v11657_v29, %v10752_v45  ;;  %v2350_v29 = vmul.f32 %v11675_v30, %v10810_v44 }
 0x273   : > { %18970 = vst [vmem:[#allocation348_spill] sm:$0xff] %v11712_v5 }
 0x274   : > { %2256 = vrot.lane.b32.xlu1 %v11685_v59, %s10103_s6  ;;  %2260 = vrot.lane.b32.xlu0 %v11691_v13, %s10103_s6  ;;  %v11708_v59 = vperm.slane %v582_v55, 0  ;;  %v585_v13 = vrot.slane %v524_v36, 4  ;;  %18974 = vst [vmem:[#allocation352_spill] sm:$0xff] %v11724_v37 }
 0x275   : > { %18976 = vst [vmem:[#allocation354_spill] sm:$0xff] %v11730_v51 }
 0x276   : > { %v11696_v49 = vpop.permute.xlu1 %2172  ;;  %2258 = vrot.lane.b32.xlu2 %v11687_v14, %s10103_s6  ;;  %v11704_v23 = vpop.permute.xlu0 %2176  ;;  %18969 = vst [vmem:[#allocation347_spill] sm:$0xff] %v11708_v59 }
 0x277   : > { %18965 = vst [vmem:[#allocation343_spill] sm:$0xff] %v11696_v49  ;;  %v2353_v30 = vmul.f32 %v11696_v49, %v10840_v17 }
 0x278   : > { %v11702_v61 = vpop.permute.xlu2 %2192  ;;  %18967 = vst [vmem:[#allocation345_spill] sm:$0xff] %v11704_v23 }
 0x279   : > { %18966 = vst [vmem:[#allocation344_spill] sm:$0xff] %v11702_v61 }
 0x27c   : > { %2262 = vrot.lane.b32.xlu1 %v11706_v7, %s10103_s6  ;;  %2266 = vrot.lane.b32.xlu0 %v11712_v5, %s10103_s6  ;;  %v11726_v7 = vperm.slane %v585_v13, 0  ;;  %v588_v5 = vrot.slane %v524_v36, 7  ;;  %v11742_v13 = vperm.slane %v587_v8, 0  ;;  %v2343_v8 = vmul.f32 %v11626_v58, %v10786_v32 }
 0x27d   : > { %v2346_v58 = vmul.f32 %v11647_v40, %v10738_v16  ;;  %v2349_v40 = vmul.f32 %v11665_v26, %v10758_v42  ;;  %v2352_v26 = vmul.f32 %v11683_v56, %v10807_v50  ;;  %v2355_v56 = vmul.f32 %v11704_v23, %v10836_v39 }
 0x27e   : > { %v11714_v14 = vpop.permute.xlu1 %2178  ;;  %2264 = vrot.lane.b32.xlu2 %v11708_v59, %s10103_s6  ;;  %v11722_v55 = vpop.permute.xlu0 %2182  ;;  %18975 = vst [vmem:[#allocation353_spill] sm:$0xff] %v11726_v7  ;;  %v11744_v27 = vperm.slane %v588_v5, 0  ;;  %v2344_v5 = vmul.f32 %v11636_v0, %v10726_v21 }
 0x27f   : > { %18971 = vst [vmem:[#allocation349_spill] sm:$0xff] %v11714_v14  ;;  %v2356_v49 = vmul.f32 %v11714_v14, %v10783_v38  ;;  %v2358_v23 = vmul.f32 %v11722_v55, %v10884_v3 }
 0x280   : > { %v11720_v24 = vpop.permute.xlu2 %2198  ;;  %18973 = vst [vmem:[#allocation351_spill] sm:$0xff] %v11722_v55 }
 0x281   : > { %18972 = vst [vmem:[#allocation350_spill] sm:$0xff] %v11720_v24 }
 0x282   : > { %18980 = vst [vmem:[#allocation358_spill] sm:$0xff] %v11742_v13 }
 0x283   : > { %18981 = vst [vmem:[#allocation359_spill] sm:$0xff] %v11744_v27 }
 0x284   : > { %2268 = vrot.lane.b32.xlu1 %v11724_v37, %s10103_s6  ;;  %2272 = vrot.lane.b32.xlu0 %v11730_v51, %s10103_s6 }
 0x286   : > { %v11732_v59 = vpop.permute.xlu1 %2184  ;;  %2270 = vrot.lane.b32.xlu2 %v11726_v7, %s10103_s6  ;;  %v11740_v63 = vpop.permute.xlu0 %2188 }
 0x287   : > { %18977 = vst [vmem:[#allocation355_spill] sm:$0xff] %v11732_v59  ;;  %v2359_v14 = vmul.f32 %v11732_v59, %v10921_v62  ;;  %v2361_v0 = vmul.f32 %v11740_v63, %v10917_v10 }
 0x288   : > { %v11738_v33 = vpop.permute.xlu2 %2204  ;;  %18979 = vst [vmem:[#allocation357_spill] sm:$0xff] %v11740_v63 }
 0x289   : > { %18978 = vst [vmem:[#allocation356_spill] sm:$0xff] %v11738_v33 }
 0x28c   : > { %2274 = vrot.lane.b32.xlu1 %v11742_v13, %s10103_s6  ;;  %2470 = vrot.lane.b32.xlu0 %v2342_v2, %s10109_s14  ;;  %v2345_v13 = vmul.f32 %v11585_v57, %v10779_v34 }
 0x28e   : > { %v11750_v37 = vpop.permute.xlu1 %2190  ;;  %2276 = vrot.lane.b32.xlu2 %v11744_v27, %s10103_s6  ;;  %v11757_v7 = vpop.permute.xlu0 %2194 }
 0x28f   : > { %18982 = vst [vmem:[#allocation360_spill] sm:$0xff] %v11750_v37  ;;  %v2362_v59 = vmul.f32 %v11750_v37, %v10863_v18  ;;  %v2364_v37 = vmul.f32 %v11757_v7, %v10860_v4  ;;  %v9201_v18 = vld [vmem:[#allocation2 + $0x9c] sm:$0xf0] }
 0x290   : > { %v11755_v36 = vpop.permute.xlu2 %2210  ;;  %18984 = vst [vmem:[#allocation362_spill] sm:$0xff] %v11757_v7  ;;  %v9303_v7 = vld [vmem:[#allocation2 + $0x64] sm:$0xf] }
 0x291   : > { %18983 = vst [vmem:[#allocation361_spill] sm:$0xff] %v11755_v36 }
 0x294   : > { %2472 = vrot.lane.b32.xlu1 %v2343_v8, %s10109_s14  ;;  %2476 = vrot.lane.b32.xlu0 %v2345_v13, %s10109_s14  ;;  %v2348_v8 = vmul.f32 %v11606_v6, %v10730_v46 }
 0x296   : > { %v11766_v51 = vpop.permute.xlu1 %2196  ;;  %2474 = vrot.lane.b32.xlu2 %v2344_v5, %s10109_s14  ;;  %v11772_v27 = vpop.permute.xlu0 %2200 }
 0x297   : > { %18985 = vst [vmem:[#allocation363_spill] sm:$0xff] %v11766_v51 }
 0x298   : > { %v11770_v2 = vpop.permute.xlu2 %2216  ;;  %18987 = vst [vmem:[#allocation365_spill] sm:$0xff] %v11772_v27 }
 0x299   : > { %18986 = vst [vmem:[#allocation364_spill] sm:$0xff] %v11770_v2 }
 0x29c   : > { %2478 = vrot.lane.b32.xlu1 %v2346_v58, %s10109_s14  ;;  %2482 = vrot.lane.b32.xlu0 %v2348_v8, %s10109_s14  ;;  %v2351_v58 = vmul.f32 %v11624_v15, %v10857_v22 }
 0x29e   : > { %v11781_v57 = vpop.permute.xlu1 %2202  ;;  %2480 = vrot.lane.b32.xlu2 %v2347_v41, %s10109_s14  ;;  %v11787_v5 = vpop.permute.xlu0 %2206 }
 0x29f   : > { %18988 = vst [vmem:[#allocation366_spill] sm:$0xff] %v11781_v57 }
 0x2a0   : > { %v11785_v13 = vpop.permute.xlu2 %2222  ;;  %18990 = vst [vmem:[#allocation368_spill] sm:$0xff] %v11787_v5 }
 0x2a1   : > { %18989 = vst [vmem:[#allocation367_spill] sm:$0xff] %v11785_v13 }
 0x2a4   : > { %2484 = vrot.lane.b32.xlu1 %v2349_v40, %s10109_s14  ;;  %2488 = vrot.lane.b32.xlu0 %v2351_v58, %s10109_s14  ;;  %v2354_v40 = vmul.f32 %v11645_v54, %v10801_v11 }
 0x2a6   : > { %v11796_v6 = vpop.permute.xlu1 %2208  ;;  %2486 = vrot.lane.b32.xlu2 %v2350_v29, %s10109_s14  ;;  %v11802_v8 = vpop.permute.xlu0 %2212 }
 0x2a7   : > { %18991 = vst [vmem:[#allocation369_spill] sm:$0xff] %v11796_v6 }
 0x2a8   : > { %v11800_v41 = vpop.permute.xlu2 %2228  ;;  %18993 = vst [vmem:[#allocation371_spill] sm:$0xff] %v11802_v8 }
 0x2a9   : > { %18992 = vst [vmem:[#allocation370_spill] sm:$0xff] %v11800_v41 }
 0x2ac   : > { %2490 = vrot.lane.b32.xlu1 %v2352_v26, %s10109_s14  ;;  %2494 = vrot.lane.b32.xlu0 %v2354_v40, %s10109_s14  ;;  %v2357_v26 = vmul.f32 %v11663_v20, %v10829_v25 }
 0x2ae   : > { %v11811_v15 = vpop.permute.xlu1 %2214  ;;  %2492 = vrot.lane.b32.xlu2 %v2353_v30, %s10109_s14  ;;  %v11817_v58 = vpop.permute.xlu0 %2218 }
 0x2af   : > { %18994 = vst [vmem:[#allocation372_spill] sm:$0xff] %v11811_v15 }
 0x2b0   : > { %v11815_v29 = vpop.permute.xlu2 %2234  ;;  %18996 = vst [vmem:[#allocation374_spill] sm:$0xff] %v11817_v58 }
 0x2b1   : > { %18995 = vst [vmem:[#allocation373_spill] sm:$0xff] %v11815_v29 }
 0x2b4   : > { %2496 = vrot.lane.b32.xlu1 %v2355_v56, %s10109_s14  ;;  %2500 = vrot.lane.b32.xlu0 %v2357_v26, %s10109_s14  ;;  %v2360_v56 = vmul.f32 %v11681_v28, %v10879_v43 }
 0x2b6   : > { %v11826_v54 = vpop.permute.xlu1 %2220  ;;  %2498 = vrot.lane.b32.xlu2 %v2356_v49, %s10109_s14  ;;  %v11832_v40 = vpop.permute.xlu0 %2224 }
 0x2b7   : > { %18997 = vst [vmem:[#allocation375_spill] sm:$0xff] %v11826_v54 }
 0x2b8   : > { %v11830_v30 = vpop.permute.xlu2 %2240  ;;  %18999 = vst [vmem:[#allocation377_spill] sm:$0xff] %v11832_v40 }
 0x2b9   : > { %18998 = vst [vmem:[#allocation376_spill] sm:$0xff] %v11830_v30 }
 0x2bc   : > { %2502 = vrot.lane.b32.xlu1 %v2358_v23, %s10109_s14  ;;  %2506 = vrot.lane.b32.xlu0 %v2360_v56, %s10109_s14  ;;  %v2363_v23 = vmul.f32 %v11702_v61, %v10913_v12  ;;  %v9213_v56 = vld [vmem:[#allocation2 + $0xb4] sm:$0xf0]  ;;  %v19006_v12 = vld [vmem:[#allocation161_spill] sm:$0xff] }
 0x2bd   : > { %v2365_v10 = vmul.f32 %v11766_v51, %v19006_v12 }
 0x2be   : > { %v11841_v20 = vpop.permute.xlu1 %2226  ;;  %2504 = vrot.lane.b32.xlu2 %v2359_v14, %s10109_s14  ;;  %v11847_v26 = vpop.permute.xlu0 %2230  ;;  %v9312_v14 = vld [vmem:[#allocation2 + $0xac] sm:$0xf] }
 0x2bf   : > { %19000 = vst [vmem:[#allocation378_spill] sm:$0xff] %v11841_v20  ;;  %v9216_v43 = vor.u32 %v9312_v14, %v9213_v56  ;;  %v9306_v14 = vld [vmem:[#allocation2 + $0x7c] sm:$0xf] }
 0x2c0   : > { %v11845_v49 = vpop.permute.xlu2 %2246  ;;  %19002 = vst [vmem:[#allocation380_spill] sm:$0xff] %v11847_v26 }
 0x2c1   : > { %19001 = vst [vmem:[#allocation379_spill] sm:$0xff] %v11845_v49  ;;  %459 = vmatpush.bf16.msra.mxu1 %v9216_v43  ;;  %v9189_v43 = vld [vmem:[#allocation2 + $0x84] sm:$0xf0] }
 0x2c4   : > { %2508 = vrot.lane.b32.xlu1 %v2361_v0, %s10109_s14  ;;  %2512 = vrot.lane.b32.xlu0 %v2363_v23, %s10109_s14  ;;  %v9309_v0 = vld [vmem:[#allocation2 + $0x94] sm:$0xf] }
 0x2c5   : > { %v9204_v61 = vor.u32 %v9309_v0, %v9201_v18  ;;  %v9192_v18 = vor.u32 %v9306_v14, %v9189_v43  ;;  %v9300_v14 = vld [vmem:[#allocation2 + $0x4c] sm:$0xf]  ;;  %v9165_v43 = vld [vmem:[#allocation2 + $0x54] sm:$0xf0] }
 0x2c6   : > { %v11856_v55 = vpop.permute.xlu1 %2232  ;;  %2510 = vrot.lane.b32.xlu2 %v2362_v59, %s10109_s14  ;;  %v11862_v63 = vpop.permute.xlu0 %2236  ;;  %v2366_v59 = vmul.f32 %v11720_v24, %v10964_v31  ;;  %v9177_v24 = vld [vmem:[#allocation2 + $0x6c] sm:$0xf0] }
 0x2c7   : > { %19003 = vst [vmem:[#allocation381_spill] sm:$0xff] %v11856_v55  ;;  %460 = vmatpush.bf16.msra.mxu1 %v9204_v61  ;;  %v9180_v51 = vor.u32 %v9303_v7, %v9177_v24  ;;  %v2369_v61 = vmul.f32 %v11738_v33, %v10999_v9  ;;  %v9168_v24 = vor.u32 %v9300_v14, %v9165_v43  ;;  %v9153_v33 = vld [vmem:[#allocation2 + $0x3c] sm:$0xf0]  ;;  %v9294_v14 = vld [vmem:[#allocation2 + $0x1c] sm:$0xf] }
 0x2c8   : > { %v11860_v28 = vpop.permute.xlu2 %2252  ;;  %19005 = vst [vmem:[#allocation383_spill] sm:$0xff] %v11862_v63  ;;  %v9141_v43 = vld [vmem:[#allocation2 + $0x24] sm:$0xf0] }
 0x2c9   : > { %19004 = vst [vmem:[#allocation382_spill] sm:$0xff] %v11860_v28 }
 0x2cb   : > { %461 = vmatpush.bf16.msra.mxu1 %v9192_v18 }
 0x2cc   : > { %2514 = vrot.lane.b32.xlu1 %v2364_v37, %s10109_s14  ;;  %2518 = vrot.lane.b32.xlu0 %v2366_v59, %s10109_s14  ;;  %v2367_v37 = vmul.f32 %v11772_v27, %v11010_v1  ;;  %v19013_v27 = vld [vmem:[#allocation167_spill] sm:$0xff] }
 0x2ce   : > { %v11871_v23 = vpop.permute.xlu1 %2238  ;;  %2516 = vrot.lane.b32.xlu2 %v2365_v10, %s10109_s14  ;;  %v11877_v0 = vpop.permute.xlu0 %2242  ;;  %v2368_v10 = vmul.f32 %v11781_v57, %v10944_v52  ;;  %v9297_v57 = vld [vmem:[#allocation2 + $0x34] sm:$0xf] }
 0x2cf   : > { %19007 = vst [vmem:[#allocation384_spill] sm:$0xff] %v11871_v23  ;;  %462 = vmatpush.bf16.msra.mxu1 %v9180_v51  ;;  %v9156_v52 = vor.u32 %v9297_v57, %v9153_v33  ;;  %v19014_v51 = vld [vmem:[#allocation166_spill] sm:$0xff]  ;;  %v9144_v33 = vor.u32 %v9294_v14, %v9141_v43 }
 0x2d0   : > { %v11875_v56 = vpop.permute.xlu2 %2258  ;;  %19009 = vst [vmem:[#allocation386_spill] sm:$0xff] %v11877_v0 }
 0x2d1   : > { %19008 = vst [vmem:[#allocation385_spill] sm:$0xff] %v11875_v56 }
 0x2d3   : > { %463 = vmatpush.bf16.msra.mxu1 %v9168_v24 }
 0x2d4   : > { %2520 = vrot.lane.b32.xlu1 %v2367_v37, %s10109_s14  ;;  %2524 = vrot.lane.b32.xlu0 %v2369_v61, %s10109_s14  ;;  %v2370_v37 = vmul.f32 %v11787_v5, %v19013_v27  ;;  %v2372_v61 = vmul.f32 %v11755_v36, %v19014_v51  ;;  %v19018_v5 = vld [vmem:[#allocation171_spill] sm:$0xff]  ;;  %v9129_v36 = vld [vmem:[#allocation2 + $0xc] sm:$0xf0] }
 0x2d6   : > { %v11886_v59 = vpop.permute.xlu1 %2244  ;;  %2522 = vrot.lane.b32.xlu2 %v2368_v10, %s10109_s14  ;;  %v11892_v7 = vpop.permute.xlu0 %2248  ;;  %v2371_v10 = vmul.f32 %v11796_v6, %v10980_v53  ;;  %v9291_v6 = vld [vmem:[#allocation2 + $0x4] sm:$0xf]  ;;  %v19019_v53 = vld [vmem:[#allocation174_spill] sm:$0xff] }
 0x2d7   : > { %19010 = vst [vmem:[#allocation387_spill] sm:$0xff] %v11886_v59  ;;  %464 = vmatpush.bf16.msra.mxu1 %v9156_v52  ;;  %v9132_v51 = vor.u32 %v9291_v6, %v9129_v36  ;;  %v2375_v52 = vmul.f32 %v11770_v2, %v11062_v19  ;;  %v19023_v6 = vld [vmem:[#allocation23_spill] sm:$0xff]  ;;  %v2376_v36 = vmul.f32 %v11817_v58, %v11013_v47  ;;  %v19029_v58 = vld [vmem:[#allocation180_spill] sm:$0xff] }
 0x2d8   : > { %v11890_v18 = vpop.permute.xlu2 %2264  ;;  %19012 = vst [vmem:[#allocation389_spill] sm:$0xff] %v11892_v7  ;;  %v19028_v2 = vld [vmem:[#allocation183_spill] sm:$0xff] }
 0x2d9   : > { %19011 = vst [vmem:[#allocation388_spill] sm:$0xff] %v11890_v18 }
 0x2db   : > { %465 = vmatpush.bf16.msra.mxu1 %v9144_v33  ;;  %v19024_v33 = vld [vmem:[#allocation179_spill] sm:$0xff] }
 0x2dc   : > { %2526 = vrot.lane.b32.xlu1 %v2370_v37, %s10109_s14  ;;  %2530 = vrot.lane.b32.xlu0 %v2372_v61, %s10109_s14  ;;  %v2373_v37 = vmul.f32 %v11802_v8, %v19018_v5  ;;  %v19025_v8 = vld [vmem:[#allocation177_spill] sm:$0xff] }
 0x2de   : > { %v11901_v9 = vpop.permute.xlu1 %2250  ;;  %2528 = vrot.lane.b32.xlu2 %v2371_v10, %s10109_s14  ;;  %v11907_v57 = vpop.permute.xlu0 %2254  ;;  %v2374_v10 = vmul.f32 %v11811_v15, %v19019_v53  ;;  %v2379_v15 = vmul.f32 %v11832_v40, %v19028_v2  ;;  %v19033_v53 = vld [vmem:[#allocation30_spill] sm:$0xff]  ;;  %v19034_v40 = vld [vmem:[#allocation184_spill] sm:$0xff] }
 0x2df   : > { %19015 = vst [vmem:[#allocation390_spill] sm:$0xff] %v11901_v9  ;;  %466 = vmatpush.bf16.msra.mxu1 %v9132_v51  ;;  %v19061_v2 = vld [vmem:[#allocation14_spill] sm:$0xff] }
 0x2e0   : > { %v11905_v24 = vpop.permute.xlu2 %2270  ;;  %19017 = vst [vmem:[#allocation392_spill] sm:$0xff] %v11907_v57 }
 0x2e1   : > { %19016 = vst [vmem:[#allocation391_spill] sm:$0xff] %v11905_v24 }
 0x2e2   : > { %467 = vmatmul.bf16.vlgmr.msra.gmra.mxu1 %v19023_v6 }
 0x2e4   : > { %2532 = vrot.lane.b32.xlu1 %v2373_v37, %s10109_s14  ;;  %2536 = vrot.lane.b32.xlu0 %v2375_v52, %s10109_s14  ;;  %v2377_v37 = vmul.f32 %v11826_v54, %v19024_v33  ;;  %v2380_v54 = vmul.f32 %v11841_v20, %v19029_v58  ;;  %v2382_v20 = vmul.f32 %v11847_v26, %v19034_v40  ;;  %v19035_v58 = vld [vmem:[#allocation189_spill] sm:$0xff]  ;;  %v19037_v40 = vld [vmem:[#allocation192_spill] sm:$0xff] }
 0x2e5   : > { %v2385_v26 = vmul.f32 %v11862_v63, %v11135_v60  ;;  %v19041_v60 = vld [vmem:[#allocation200_spill] sm:$0xff]  ;;  %v2089_v33 = vmul.f32 %v19061_v2, %v10779_v34 }
 0x2e6   : > { %v11916_v61 = vpop.permute.xlu1 %2256  ;;  %2534 = vrot.lane.b32.xlu2 %v2374_v10, %s10109_s14  ;;  %v11922_v43 = vpop.permute.xlu0 %2260  ;;  %v2378_v10 = vmul.f32 %v11785_v13, %v19025_v8 }
 0x2e7   : > { %19020 = vst [vmem:[#allocation393_spill] sm:$0xff] %v11916_v61 }
 0x2e8   : > { %v11920_v14 = vpop.permute.xlu2 %2276  ;;  %19022 = vst [vmem:[#allocation395_spill] sm:$0xff] %v11922_v43 }
 0x2e9   : > { %19021 = vst [vmem:[#allocation394_spill] sm:$0xff] %v11920_v14 }
 0x2ec   : > { %2538 = vrot.lane.b32.xlu1 %v2376_v36, %s10109_s14  ;;  %2542 = vrot.lane.b32.xlu0 %v2378_v10, %s10109_s14  ;;  %v19030_v36 = vld [vmem:[#allocation186_spill] sm:$0xff] }
 0x2ed   : > { %v2381_v13 = vmul.f32 %v11800_v41, %v19030_v36  ;;  %v2384_v41 = vmul.f32 %v11815_v29, %v11101_v35  ;;  %v19040_v36 = vld [vmem:[#allocation194_spill] sm:$0xff] }
 0x2ee   : > { %v11932_v51 = vpop.permute.xlu1 %2262  ;;  %2540 = vrot.lane.b32.xlu2 %v2377_v37, %s10109_s14  ;;  %v11938_v6 = vpop.permute.xlu0 %2266  ;;  %v2388_v63 = vmul.f32 %v11877_v0, %v19040_v36  ;;  %v19044_v36 = vld [vmem:[#allocation202_spill] sm:$0xff] }
 0x2ef   : > { %19026 = vst [vmem:[#allocation396_spill] sm:$0xff] %v11932_v51 }
 0x2f0   : > { %v11936_v52 = vpop.permute.xlu2 %2474  ;;  %19027 = vst [vmem:[#allocation397_spill] sm:$0xff] %v11938_v6 }
 0x2f2   : > { %472 = vmatmul.bf16.gmra.mxu1 %v19033_v53 }
 0x2f4   : > { %2544 = vrot.lane.b32.xlu1 %v2379_v15, %s10109_s14  ;;  %2548 = vrot.lane.b32.xlu0 %v2381_v13, %s10109_s14  ;;  %v2383_v15 = vmul.f32 %v11856_v55, %v19035_v58  ;;  %v2386_v55 = vmul.f32 %v11871_v23, %v19037_v40  ;;  %v19039_v58 = vld [vmem:[#allocation37_spill] sm:$0xff]  ;;  %v2389_v23 = vmul.f32 %v11886_v59, %v19041_v60  ;;  %v19046_v60 = vld [vmem:[#allocation44_spill] sm:$0xff] }
 0x2f5   : > { %v2392_v59 = vmul.f32 %v11901_v9, %v19044_v36  ;;  %v19048_v9 = vld [vmem:[#allocation211_spill] sm:$0xff] }
 0x2f6   : > { %v11947_v8 = vpop.permute.xlu1 %2268  ;;  %2546 = vrot.lane.b32.xlu2 %v2380_v54, %s10109_s14  ;;  %v11953_v10 = vpop.permute.xlu0 %2272 }
 0x2f7   : > { %19031 = vst [vmem:[#allocation398_spill] sm:$0xff] %v11947_v8 }
 0x2f8   : > { %v11951_v37 = vpop.permute.xlu2 %2480  ;;  %19032 = vst [vmem:[#allocation399_spill] sm:$0xff] %v11953_v10 }
 0x2fc   : > { %2550 = vrot.lane.b32.xlu1 %v2382_v20, %s10109_s14  ;;  %2554 = vrot.lane.b32.xlu0 %v2384_v41, %s10109_s14  ;;  %v19038_v20 = vld [vmem:[#allocation197_spill] sm:$0xff] }
 0x2fd   : > { %v2387_v29 = vmul.f32 %v11830_v30, %v19038_v20 }
 0x2fe   : > { %v11963_v54 = vpop.permute.xlu1 %2274  ;;  %2552 = vrot.lane.b32.xlu2 %v2383_v15, %s10109_s14  ;;  %v11969_v53 = vpop.permute.xlu0 %2470 }
 0x2ff   : > { %19036 = vst [vmem:[#allocation400_spill] sm:$0xff] %v11963_v54 }
 0x300   : > { %v11967_v13 = vpop.permute.xlu2 %2486 }
 0x302   : > { %477 = vmatmul.bf16.gmra.mxu1 %v19039_v58  ;;  %v19043_v58 = vld [vmem:[#allocation205_spill] sm:$0xff] }
 0x303   : > { %v2391_v0 = vmul.f32 %v11892_v7, %v19043_v58  ;;  %v19047_v7 = vld [vmem:[#allocation206_spill] sm:$0xff] }
 0x304   : > { %2556 = vrot.lane.b32.xlu1 %v2385_v26, %s10109_s14  ;;  %2560 = vrot.lane.b32.xlu0 %v2387_v29, %s10109_s14  ;;  %v19042_v26 = vld [vmem:[#allocation199_spill] sm:$0xff]  ;;  %v2394_v58 = vmul.f32 %v11907_v57, %v19047_v7  ;;  %v19051_v7 = vld [vmem:[#allocation213_spill] sm:$0xff] }
 0x305   : > { %v2390_v30 = vmul.f32 %v11845_v49, %v19042_v26 }
 0x306   : > { %v2473_v35 = vpop.permute.xlu1 %2472  ;;  %2558 = vrot.lane.b32.xlu2 %v2386_v55, %s10109_s14  ;;  %v2477_v15 = vpop.permute.xlu0 %2476 }
 0x308   : > { %v11980_v41 = vpop.permute.xlu2 %2492 }
 0x30c   : > { %2562 = vrot.lane.b32.xlu1 %v2388_v63, %s10109_s14  ;;  %2566 = vrot.lane.b32.xlu0 %v2390_v30, %s10109_s14  ;;  %v19045_v63 = vld [vmem:[#allocation207_spill] sm:$0xff] }
 0x30d   : > { %v2393_v49 = vmul.f32 %v11860_v28, %v19045_v63  ;;  %v19049_v28 = vld [vmem:[#allocation209_spill] sm:$0xff] }
 0x30e   : > { %v2479_v20 = vpop.permute.xlu1 %2478  ;;  %2564 = vrot.lane.b32.xlu2 %v2389_v23, %s10109_s14  ;;  %v11994_v29 = vpop.permute.xlu0 %2482  ;;  %v2396_v63 = vmul.f32 %v11875_v56, %v19049_v28 }
 0x310   : > { %v11992_v55 = vpop.permute.xlu2 %2498 }
 0x312   : > { %482 = vmatmul.bf16.gmra.mxu1 %v19046_v60  ;;  %v19050_v60 = vld [vmem:[#allocation216_spill] sm:$0xff] }
 0x313   : > { %v2397_v57 = vmul.f32 %v11922_v43, %v19050_v60  ;;  %v19054_v60 = vld [vmem:[#allocation223_spill] sm:$0xff] }
 0x314   : > { %2568 = vrot.lane.b32.xlu1 %v2391_v0, %s10109_s14  ;;  %2572 = vrot.lane.b32.xlu0 %v2393_v49, %s10109_s14  ;;  %v2395_v0 = vmul.f32 %v11916_v61, %v19048_v9  ;;  %v2398_v61 = vmul.f32 %v11932_v51, %v19051_v7  ;;  %v19053_v9 = vld [vmem:[#allocation217_spill] sm:$0xff]  ;;  %v2401_v51 = vmul.f32 %v11947_v8, %v19054_v60  ;;  %v19056_v7 = vld [vmem:[#allocation227_spill] sm:$0xff] }
 0x315   : > { %v2400_v43 = vmul.f32 %v11938_v6, %v19053_v9  ;;  %v2403_v6 = vmul.f32 %v11953_v10, %v19056_v7  ;;  %v19057_v9 = vld [vmem:[#allocation225_spill] sm:$0xff] }
 0x316   : > { %v2485_v26 = vpop.permute.xlu1 %2484  ;;  %2570 = vrot.lane.b32.xlu2 %v2392_v59, %s10109_s14  ;;  %v12007_v23 = vpop.permute.xlu0 %2488  ;;  %v2404_v8 = vmul.f32 %v11963_v54, %v19057_v9  ;;  %v19062_v54 = vld [vmem:[#allocation16_spill] sm:$0xff] }
 0x317   : > { %v2090_v10 = vmul.f32 %v19062_v54, %v10738_v16 }
 0x318   : > { %v12005_v30 = vpop.permute.xlu2 %2504 }
 0x31c   : > { %2574 = vrot.lane.b32.xlu1 %v2394_v58, %s10109_s14  ;;  %2578 = vrot.lane.b32.xlu0 %v2396_v63, %s10109_s14  ;;  %v19052_v58 = vld [vmem:[#allocation219_spill] sm:$0xff] }
 0x31d   : > { %v2399_v56 = vmul.f32 %v11890_v18, %v19052_v58 }
 0x31e   : > { %v2491_v59 = vpop.permute.xlu1 %2490  ;;  %2576 = vrot.lane.b32.xlu2 %v2395_v0, %s10109_s14  ;;  %v12021_v36 = vpop.permute.xlu0 %2494 }
 0x320   : > { %v12019_v49 = vpop.permute.xlu2 %2510 }
 0x324   : > { %2580 = vrot.lane.b32.xlu1 %v2397_v57, %s10109_s14  ;;  %2584 = vrot.lane.b32.xlu0 %v2399_v56, %s10109_s14  ;;  %v19055_v57 = vld [vmem:[#allocation221_spill] sm:$0xff] }
 0x325   : > { %v2402_v18 = vmul.f32 %v11905_v24, %v19055_v57  ;;  %v19059_v24 = vld [vmem:[#allocation230_spill] sm:$0xff] }
 0x326   : > { %v2497_v28 = vpop.permute.xlu1 %2496  ;;  %2582 = vrot.lane.b32.xlu2 %v2398_v61, %s10109_s14  ;;  %v12034_v0 = vpop.permute.xlu0 %2500 }
 0x328   : > { %v12032_v63 = vpop.permute.xlu2 %2516 }
 0x32c   : > { %2586 = vrot.lane.b32.xlu1 %v2400_v43, %s10109_s14  ;;  %2590 = vrot.lane.b32.xlu0 %v2402_v18, %s10109_s14  ;;  %v19058_v43 = vld [vmem:[#allocation13_spill] sm:$0xff]  ;;  %v19060_v18 = vld [vmem:[#allocation11_spill] sm:$0xff] }
 0x32d   : > { %v2087_v60 = vmul.f32 %v19058_v43, %v10786_v32  ;;  %v2086_v57 = vmul.f32 %v19060_v18, %v10748_v48  ;;  %v2666_v18 = vadd.f32 %v2479_v20, %v2090_v10 }
 0x32e   : > { %v12043_v58 = vpop.permute.xlu1 %2502  ;;  %2588 = vrot.lane.b32.xlu2 %v2401_v51, %s10109_s14  ;;  %v12049_v61 = vpop.permute.xlu0 %2506  ;;  %v2405_v51 = vmul.f32 %v11920_v14, %v19059_v24  ;;  %v2665_v14 = vadd.f32 %v2477_v15, %v2089_v33  ;;  %v19066_v33 = vld [vmem:[#allocation17_spill] sm:$0xff] }
 0x32f   : > { %v2663_v40 = vadd.f32 %v2473_v35, %v2087_v60  ;;  %v2662_v32 = vadd.f32 %v11969_v53, %v2086_v57  ;;  %v19064_v35 = vld [vmem:[#allocation15_spill] sm:$0xff]  ;;  %v2092_v15 = vmul.f32 %v19066_v33, %v10730_v46 }
 0x330   : > { %v12047_v56 = vpop.permute.xlu2 %2522  ;;  %v2091_v60 = vmul.f32 %v19064_v35, %v10752_v45  ;;  %v19067_v35 = vld [vmem:[#allocation20_spill] sm:$0xff] }
 0x331   : > { %v9397_v34 = vpack.i.bf16 %v2663_v40, %v2662_v32  ;;  %v2095_v10 = vmul.f32 %v19067_v35, %v10857_v22  ;;  %v19068_v32 = vld [vmem:[#allocation22_spill] sm:$0xff] }
 0x332   : > { %v2667_v54 = vadd.f32 %v11951_v37, %v2091_v60  ;;  %v2096_v40 = vmul.f32 %v19068_v32, %v10807_v50  ;;  %v19071_v35 = vld [vmem:[#allocation26_spill] sm:$0xff]  ;;  %v19081_v32 = vld [vmem:[#allocation163_spill] sm:$0xff] }
 0x333   : > { %v2671_v37 = vadd.f32 %v12007_v23, %v2095_v10  ;;  %v19072_v23 = vld [vmem:[#allocation24_spill] sm:$0xff]  ;;  %v19203_v50 = vld [vmem:[#allocation55_spill] sm:$0xff] }
 0x334   : > { %2592 = vrot.lane.b32.xlu1 %v2403_v6, %s10109_s14  ;;  %2596 = vrot.lane.b32.xlu0 %v2405_v51, %s10109_s14  ;;  %v19063_v6 = vld [vmem:[#allocation12_spill] sm:$0xff]  ;;  %v19065_v51 = vld [vmem:[#allocation19_spill] sm:$0xff]  ;;  %v9407_v53 = vpack.i.bf16 %v2667_v54, %v2666_v18 }
 0x335   : > { %v2088_v43 = vmul.f32 %v19063_v6, %v10726_v21  ;;  %v2093_v16 = vmul.f32 %v19065_v51, %v10758_v42  ;;  %v19087_v6 = vld [vmem:[#allocation40_spill] sm:$0xff]  ;;  %v19090_v51 = vld [vmem:[#allocation41_spill] sm:$0xff] }
 0x336   : > { %v2509_v19 = vpop.permute.xlu1 %2508  ;;  %2594 = vrot.lane.b32.xlu2 %v2404_v8, %s10109_s14  ;;  %v2513_v2 = vpop.permute.xlu0 %2512 }
 0x337   : > { %v2664_v8 = vadd.f32 %v11936_v52, %v2088_v43  ;;  %v2669_v57 = vadd.f32 %v2485_v26, %v2093_v16  ;;  %v19070_v16 = vld [vmem:[#allocation21_spill] sm:$0xff]  ;;  %v2672_v26 = vadd.f32 %v2491_v59, %v2096_v40  ;;  %v19073_v59 = vld [vmem:[#allocation27_spill] sm:$0xff] }
 0x338   : > { %v12071_v24 = vpop.permute.xlu2 %2528  ;;  %v2097_v54 = vmul.f32 %v19070_v16, %v10840_v17  ;;  %v2101_v40 = vmul.f32 %v19073_v59, %v10829_v25 }
 0x339   : > { %v9402_v48 = vpack.i.bf16 %v2665_v14, %v2664_v8  ;;  %v19069_v14 = vld [vmem:[#allocation18_spill] sm:$0xff] }
 0x33a   : > { %v2094_v52 = vmul.f32 %v19069_v14, %v10810_v44  ;;  %v2673_v8 = vadd.f32 %v11980_v41, %v2097_v54  ;;  %v2099_v14 = vmul.f32 %v19071_v35, %v10836_v39  ;;  %v2677_v54 = vadd.f32 %v12034_v0, %v2101_v40  ;;  %v19078_v35 = vld [vmem:[#allocation33_spill] sm:$0xff]  ;;  %v19079_v0 = vld [vmem:[#allocation159_spill] sm:$0xff] }
 0x33c   : > { %9398 = vrot.lane.b32.xlu1 %v9397_v34, %s10103_s6  ;;  %9408 = vrot.lane.b32.xlu0 %v9407_v53, %s10103_s6  ;;  %v2668_v34 = vadd.f32 %v11994_v29, %v2092_v15  ;;  %v2670_v18 = vadd.f32 %v11967_v13, %v2094_v52  ;;  %v9422_v29 = vpack.i.bf16 %v2673_v8, %v2672_v26  ;;  %v19075_v52 = vld [vmem:[#allocation25_spill] sm:$0xff] }
 0x33d   : > { %v2098_v15 = vmul.f32 %v19072_v23, %v10801_v11  ;;  %v2675_v10 = vadd.f32 %v2497_v28, %v2099_v14  ;;  %v19076_v28 = vld [vmem:[#allocation28_spill] sm:$0xff] }
 0x33e   : > { %v2515_v20 = vpop.permute.xlu1 %2514  ;;  %9403 = vrot.lane.b32.xlu2 %v9402_v48, %s10103_s6  ;;  %v2519_v43 = vpop.permute.xlu0 %2518  ;;  %v9412_v48 = vpack.i.bf16 %v2669_v57, %v2668_v34  ;;  %v9417_v53 = vpack.i.bf16 %v2671_v37, %v2670_v18  ;;  %v19074_v57 = vld [vmem:[#allocation29_spill] sm:$0xff]  ;;  %v2100_v34 = vmul.f32 %v19075_v52, %v10783_v38  ;;  %v2103_v14 = vmul.f32 %v19076_v28, %v10921_v62 }
 0x33f   : > { %v2102_v41 = vmul.f32 %v19074_v57, %v10884_v3  ;;  %v2674_v37 = vadd.f32 %v12021_v36, %v2098_v15  ;;  %v19080_v15 = vld [vmem:[#allocation31_spill] sm:$0xff] }
 0x340   : > { %v12095_v60 = vpop.permute.xlu2 %2534  ;;  %v2104_v40 = vmul.f32 %v19080_v15, %v19079_v0 }
 0x341   : > { %v2678_v26 = vadd.f32 %v12043_v58, %v2102_v41  ;;  %v9427_v8 = vpack.i.bf16 %v2675_v10, %v2674_v37  ;;  %v19082_v58 = vld [vmem:[#allocation34_spill] sm:$0xff] }
 0x342   : > { %v2107_v41 = vmul.f32 %v19082_v58, %v19081_v32  ;;  %v19084_v10 = vld [vmem:[#allocation158_spill] sm:$0xff] }
 0x344   : > { %9413 = vrot.lane.b32.xlu1 %v9412_v48, %s10103_s6  ;;  %9423 = vrot.lane.b32.xlu0 %v9422_v29, %s10103_s6  ;;  %v2676_v48 = vadd.f32 %v11992_v55, %v2100_v34  ;;  %v19077_v29 = vld [vmem:[#allocation164_spill] sm:$0xff] }
 0x345   : > { %v2105_v16 = vmul.f32 %v19078_v35, %v19077_v29  ;;  %v19083_v55 = vld [vmem:[#allocation36_spill] sm:$0xff] }
 0x346   : > { %v2521_v13 = vpop.permute.xlu1 %2520  ;;  %9418 = vrot.lane.b32.xlu2 %v9417_v53, %s10103_s6  ;;  %v2525_v18 = vpop.permute.xlu0 %2524  ;;  %v2679_v53 = vadd.f32 %v12005_v30, %v2103_v14  ;;  %v9432_v23 = vpack.i.bf16 %v2677_v54, %v2676_v48  ;;  %v2108_v30 = vmul.f32 %v19083_v55, %v10860_v4  ;;  %v19085_v34 = vld [vmem:[#allocation32_spill] sm:$0xff]  ;;  %v2680_v54 = vadd.f32 %v12049_v61, %v2104_v40  ;;  %v19088_v61 = vld [vmem:[#allocation38_spill] sm:$0xff] }
 0x347   : > { %v2681_v59 = vadd.f32 %v2509_v19, %v2105_v16  ;;  %v2106_v37 = vmul.f32 %v19085_v34, %v19084_v10  ;;  %v2683_v14 = vadd.f32 %v2513_v2, %v2107_v41  ;;  %v2110_v2 = vmul.f32 %v19088_v61, %v10964_v31  ;;  %v19089_v41 = vld [vmem:[#allocation173_spill] sm:$0xff] }
 0x348   : > { %v2541_v52 = vpop.permute.xlu2 %2540  ;;  %v9437_v36 = vpack.i.bf16 %v2679_v53, %v2678_v26  ;;  %v19086_v26 = vld [vmem:[#allocation35_spill] sm:$0xff]  ;;  %v2684_v16 = vadd.f32 %v2515_v20, %v2108_v30  ;;  %v2113_v20 = vmul.f32 %v19090_v51, %v19089_v41  ;;  %v19140_v41 = vld [vmem:[#allocation206_spill] sm:$0xff] }
 0x349   : > { %v2109_v19 = vmul.f32 %v19086_v26, %v19006_v12  ;;  %v9442_v53 = vpack.i.bf16 %v2681_v59, %v2680_v54  ;;  %v19092_v59 = vld [vmem:[#allocation168_spill] sm:$0xff] }
 0x34c   : > { %9428 = vrot.lane.b32.xlu1 %v9427_v8, %s10103_s6  ;;  %9438 = vrot.lane.b32.xlu0 %v9437_v36, %s10103_s6  ;;  %v2682_v8 = vadd.f32 %v12019_v49, %v2106_v37  ;;  %v2111_v36 = vmul.f32 %v19087_v6, %v11010_v1  ;;  %v19091_v49 = vld [vmem:[#allocation43_spill] sm:$0xff] }
 0x34d   : > { %v19093_v37 = vld [vmem:[#allocation39_spill] sm:$0xff] }
 0x34e   : > { %v2527_v33 = vpop.permute.xlu1 %2526  ;;  %9433 = vrot.lane.b32.xlu2 %v9432_v23, %s10103_s6  ;;  %v2531_v48 = vpop.permute.xlu0 %2530  ;;  %v2685_v23 = vadd.f32 %v12032_v63, %v2109_v19  ;;  %v9447_v28 = vpack.i.bf16 %v2683_v14, %v2682_v8  ;;  %v2687_v40 = vadd.f32 %v2521_v13, %v2111_v36  ;;  %v2114_v63 = vmul.f32 %v19091_v49, %v19013_v27  ;;  %v19095_v8 = vld [vmem:[#allocation42_spill] sm:$0xff]  ;;  %v19096_v49 = vld [vmem:[#allocation47_spill] sm:$0xff] }
 0x34f   : > { %v2112_v54 = vmul.f32 %v19093_v37, %v19092_v59  ;;  %v2686_v14 = vadd.f32 %v2519_v43, %v2110_v2  ;;  %v2689_v19 = vadd.f32 %v2525_v18, %v2113_v20  ;;  %v2117_v51 = vmul.f32 %v19096_v49, %v19018_v5  ;;  %v19097_v43 = vld [vmem:[#allocation50_spill] sm:$0xff]  ;;  %v19099_v20 = vld [vmem:[#allocation45_spill] sm:$0xff]  ;;  %v19101_v37 = vld [vmem:[#allocation48_spill] sm:$0xff] }
 0x350   : > { %v9452_v34 = vpack.i.bf16 %v2685_v23, %v2684_v16  ;;  %v2547_v30 = vpop.permute.xlu2 %2546  ;;  %v19094_v16 = vld [vmem:[#allocation172_spill] sm:$0xff]  ;;  %v2120_v18 = vmul.f32 %v19097_v43, %v11013_v47  ;;  %v19098_v2 = vld [vmem:[#allocation166_spill] sm:$0xff] }
 0x351   : > { %v2115_v13 = vmul.f32 %v19095_v8, %v19094_v16  ;;  %v2688_v36 = vadd.f32 %v12047_v56, %v2112_v54  ;;  %v9457_v6 = vpack.i.bf16 %v2687_v40, %v2686_v14  ;;  %v2116_v58 = vmul.f32 %v19099_v20, %v19098_v2  ;;  %v19103_v54 = vld [vmem:[#allocation49_spill] sm:$0xff]  ;;  %v19107_v20 = vld [vmem:[#allocation52_spill] sm:$0xff]  ;;  %v19151_v47 = vld [vmem:[#allocation102_spill] sm:$0xff] }
 0x352   : > { %v19192_v5 = vld [vmem:[#allocation138_spill] sm:$0xff] }
 0x353   : > { %v9462_v61 = vpack.i.bf16 %v2689_v19, %v2688_v36  ;;  %v19104_v19 = vld [vmem:[#allocation174_spill] sm:$0xff]  ;;  %v2692_v36 = vadd.f32 %v2531_v48, %v2116_v58  ;;  %v19110_v48 = vld [vmem:[#allocation180_spill] sm:$0xff] }
 0x354   : > { %9443 = vrot.lane.b32.xlu1 %v9442_v53, %s10103_s6  ;;  %9453 = vrot.lane.b32.xlu0 %v9452_v34, %s10103_s6  ;;  %v2690_v53 = vadd.f32 %v2527_v33, %v2114_v63  ;;  %v19100_v63 = vld [vmem:[#allocation181_spill] sm:$0xff] }
 0x355   : > { %v2119_v56 = vmul.f32 %v19101_v37, %v19100_v63 }
 0x356   : > { %v2533_v55 = vpop.permute.xlu1 %2532  ;;  %9448 = vrot.lane.b32.xlu2 %v9447_v28, %s10103_s6  ;;  %v2537_v23 = vpop.permute.xlu0 %2536  ;;  %v2691_v28 = vadd.f32 %v12071_v24, %v2115_v13  ;;  %v19102_v24 = vld [vmem:[#allocation179_spill] sm:$0xff]  ;;  %v19105_v13 = vld [vmem:[#allocation46_spill] sm:$0xff] }
 0x357   : > { %v2693_v33 = vadd.f32 %v2533_v55, %v2117_v51  ;;  %v2121_v14 = vmul.f32 %v19103_v54, %v19102_v24 }
 0x358   : > { %v9467_v34 = vpack.i.bf16 %v2691_v28, %v2690_v53  ;;  %v2118_v53 = vmul.f32 %v19105_v13, %v19104_v19  ;;  %v2695_v28 = vadd.f32 %v2537_v23, %v2119_v56  ;;  %v2553_v49 = vpop.permute.xlu2 %2552  ;;  %v19147_v19 = vld [vmem:[#allocation85_spill] sm:$0xff] }
 0x359   : > { %v2697_v26 = vadd.f32 %v2541_v52, %v2121_v14  ;;  %v9472_v15 = vpack.i.bf16 %v2693_v33, %v2692_v36  ;;  %v19113_v33 = vld [vmem:[#allocation56_spill] sm:$0xff] }
 0x35a   : > { %v2694_v55 = vadd.f32 %v12095_v60, %v2118_v53  ;;  %v19111_v60 = vld [vmem:[#allocation53_spill] sm:$0xff] }
 0x35b   : > { %v2124_v23 = vmul.f32 %v19111_v60, %v19110_v48  ;;  %v19126_v48 = vld [vmem:[#allocation200_spill] sm:$0xff] }
 0x35c   : > { %9458 = vrot.lane.b32.xlu1 %v9457_v6, %s10103_s6  ;;  %9468 = vrot.lane.b32.xlu0 %v9467_v34, %s10103_s6  ;;  %v9477_v35 = vpack.i.bf16 %v2695_v28, %v2694_v55  ;;  %v19108_v34 = vld [vmem:[#allocation183_spill] sm:$0xff]  ;;  %v19114_v55 = vld [vmem:[#allocation189_spill] sm:$0xff] }
 0x35e   : > { %v2539_v40 = vpop.permute.xlu1 %2538  ;;  %9463 = vrot.lane.b32.xlu2 %v9462_v61, %s10103_s6  ;;  %v2543_v51 = vpop.permute.xlu0 %2542  ;;  %v19106_v61 = vld [vmem:[#allocation177_spill] sm:$0xff] }
 0x35f   : > { %v2696_v6 = vadd.f32 %v2539_v40, %v2120_v18  ;;  %v2122_v8 = vmul.f32 %v19107_v20, %v19106_v61  ;;  %v19109_v18 = vld [vmem:[#allocation54_spill] sm:$0xff]  ;;  %v19139_v61 = vld [vmem:[#allocation79_spill] sm:$0xff] }
 0x360   : > { %v2123_v40 = vmul.f32 %v19109_v18, %v19108_v34  ;;  %v2559_v53 = vpop.permute.xlu2 %2558 }
 0x361   : > { %v9482_v57 = vpack.i.bf16 %v2697_v26, %v2696_v6  ;;  %v2698_v58 = vadd.f32 %v2543_v51, %v2122_v8  ;;  %v19112_v26 = vld [vmem:[#allocation186_spill] sm:$0xff]  ;;  %v2700_v6 = vadd.f32 %v2547_v30, %v2124_v23  ;;  %v19116_v51 = vld [vmem:[#allocation184_spill] sm:$0xff] }
 0x362   : > { %v2125_v56 = vmul.f32 %v19113_v33, %v19112_v26  ;;  %v19119_v23 = vld [vmem:[#allocation60_spill] sm:$0xff] }
 0x364   : > { %9473 = vrot.lane.b32.xlu1 %v9472_v15, %s10103_s6  ;;  %9483 = vrot.lane.b32.xlu0 %v9482_v57, %s10103_s6  ;;  %v19117_v57 = vld [vmem:[#allocation58_spill] sm:$0xff] }
 0x366   : > { %v2545_v37 = vpop.permute.xlu1 %2544  ;;  %9478 = vrot.lane.b32.xlu2 %v9477_v35, %s10103_s6  ;;  %v2549_v14 = vpop.permute.xlu0 %2548  ;;  %v19115_v35 = vld [vmem:[#allocation57_spill] sm:$0xff] }
 0x367   : > { %v2699_v52 = vadd.f32 %v2545_v37, %v2123_v40  ;;  %v2701_v36 = vadd.f32 %v2549_v14, %v2125_v56  ;;  %v2127_v8 = vmul.f32 %v19115_v35, %v19114_v55  ;;  %v2126_v37 = vmul.f32 %v19117_v57, %v19116_v51  ;;  %v19121_v14 = vld [vmem:[#allocation62_spill] sm:$0xff]  ;;  %v19122_v57 = vld [vmem:[#allocation192_spill] sm:$0xff]  ;;  %v19123_v55 = vld [vmem:[#allocation61_spill] sm:$0xff] }
 0x368   : > { %v2565_v30 = vpop.permute.xlu2 %2564  ;;  %v2130_v63 = vmul.f32 %v19123_v55, %v19122_v57 }
 0x369   : > { %v9487_v15 = vpack.i.bf16 %v2699_v52, %v2698_v58  ;;  %v9492_v28 = vpack.i.bf16 %v2701_v36, %v2700_v6  ;;  %v2703_v20 = vadd.f32 %v2553_v49, %v2127_v8  ;;  %v19118_v52 = vld [vmem:[#allocation188_spill] sm:$0xff]  ;;  %v19125_v49 = vld [vmem:[#allocation66_spill] sm:$0xff] }
 0x36a   : > { %v2128_v56 = vmul.f32 %v19119_v23, %v19118_v52  ;;  %v12196_v52 = vpop.f32.mrf.mxu1 }
 0x36b   : > { %v3609_v25 = vrot.slane %v12196_v52, 4 }
 0x36c   : > { %9488 = vrot.lane.b32.xlu1 %v9487_v15, %s10103_s6  ;;  %v19120_v15 = vld [vmem:[#allocation113_spill] sm:$0xff] }
 0x36d   : > { %v2129_v6 = vmul.f32 %v19121_v14, %v19120_v15  ;;  %v19127_v14 = vld [vmem:[#allocation67_spill] sm:$0xff] }
 0x36e   : > { %v2551_v40 = vpop.permute.xlu1 %2550  ;;  %9493 = vrot.lane.b32.xlu2 %v9492_v28, %s10103_s6  ;;  %v2555_v58 = vpop.permute.xlu0 %2554  ;;  %v19124_v28 = vld [vmem:[#allocation197_spill] sm:$0xff]  ;;  %v2133_v15 = vmul.f32 %v19127_v14, %v19126_v48 }
 0x36f   : > { %v2702_v60 = vadd.f32 %v2551_v40, %v2126_v37  ;;  %v2704_v35 = vadd.f32 %v2555_v58, %v2128_v56  ;;  %v2131_v8 = vmul.f32 %v19125_v49, %v19124_v28  ;;  %v2706_v37 = vadd.f32 %v2559_v53, %v2130_v63  ;;  %v19128_v58 = vld [vmem:[#allocation194_spill] sm:$0xff]  ;;  %v19129_v56 = vld [vmem:[#allocation68_spill] sm:$0xff]  ;;  %v19130_v53 = vld [vmem:[#allocation199_spill] sm:$0xff] }
 0x370   : > { %v2709_v49 = vadd.f32 %v2565_v30, %v2133_v15  ;;  %v19137_v15 = vld [vmem:[#allocation78_spill] sm:$0xff] }
 0x371   : > { %v9497_v18 = vpack.i.bf16 %v2703_v20, %v2702_v60 }
 0x372   : > { %v12208_v48 = vpop.f32.mrf.mxu1 }
 0x373   : > { %9498 = vrot.lane.b32.xlu0 %v9497_v18, %s10103_s6  ;;  %v3665_v42 = vrot.slane %v12208_v48, 4 }
 0x376   : > { %v2557_v36 = vpop.permute.xlu1 %2556  ;;  %v2561_v60 = vpop.permute.xlu0 %2560 }
 0x377   : > { %v2705_v26 = vadd.f32 %v2557_v36, %v2129_v6  ;;  %v2707_v18 = vadd.f32 %v2561_v60, %v2131_v8  ;;  %v2132_v6 = vmul.f32 %v19129_v56, %v19128_v58  ;;  %v2571_v36 = vpop.permute.xlu2 %2570  ;;  %v19131_v8 = vld [vmem:[#allocation72_spill] sm:$0xff]  ;;  %v19132_v60 = vld [vmem:[#allocation205_spill] sm:$0xff]  ;;  %v19134_v58 = vld [vmem:[#allocation202_spill] sm:$0xff] }
 0x379   : > { %v9502_v20 = vpack.i.bf16 %v2705_v26, %v2704_v35  ;;  %v9507_v40 = vpack.i.bf16 %v2707_v18, %v2706_v37  ;;  %v19133_v37 = vld [vmem:[#allocation74_spill] sm:$0xff] }
 0x37a   : > { %v2135_v18 = vmul.f32 %v19133_v37, %v19132_v60  ;;  %v19138_v60 = vld [vmem:[#allocation211_spill] sm:$0xff]  ;;  %v12220_v51 = vpop.f32.mrf.mxu1  ;;  %v19249_v37 = vld [vmem:[#allocation101_spill] sm:$0xff] }
 0x37b   : > { %9503 = vrot.lane.b32.xlu1 %v9502_v20, %s10103_s6  ;;  %9508 = vrot.lane.b32.xlu2 %v9507_v40, %s10103_s6  ;;  %v2134_v20 = vmul.f32 %v19131_v8, %v19130_v53  ;;  %v19135_v40 = vld [vmem:[#allocation73_spill] sm:$0xff]  ;;  %v2139_v24 = vmul.f32 %v19139_v61, %v19138_v60 }
 0x37c   : > { %v2136_v13 = vmul.f32 %v19135_v40, %v19134_v58 }
 0x37e   : > { %v2563_v55 = vpop.permute.xlu1 %2562  ;;  %v2567_v63 = vpop.permute.xlu0 %2566 }
 0x37f   : > { %v2708_v26 = vadd.f32 %v2563_v55, %v2132_v6  ;;  %v2710_v56 = vadd.f32 %v2567_v63, %v2134_v20  ;;  %v2577_v30 = vpop.permute.xlu2 %2576  ;;  %v19136_v55 = vld [vmem:[#allocation207_spill] sm:$0xff]  ;;  %v19141_v63 = vld [vmem:[#allocation80_spill] sm:$0xff] }
 0x381   : > { %v9512_v35 = vpack.i.bf16 %v2709_v49, %v2708_v26  ;;  %v2137_v49 = vmul.f32 %v19137_v15, %v19136_v55 }
 0x383   : > { %9513 = vrot.lane.b32.xlu0 %v9512_v35, %s10103_s6  ;;  %v2712_v35 = vadd.f32 %v2571_v36, %v2136_v13  ;;  %v19142_v36 = vld [vmem:[#allocation209_spill] sm:$0xff] }
 0x386   : > { %v2569_v28 = vpop.permute.xlu1 %2568  ;;  %v2573_v26 = vpop.permute.xlu0 %2572 }
 0x387   : > { %v2711_v57 = vadd.f32 %v2569_v28, %v2135_v18  ;;  %v2713_v54 = vadd.f32 %v2573_v26, %v2137_v49  ;;  %v2138_v28 = vmul.f32 %v19141_v63, %v19140_v41  ;;  %v2715_v18 = vadd.f32 %v2577_v30, %v2139_v24  ;;  %v2583_v13 = vpop.permute.xlu2 %2582  ;;  %v19145_v26 = vld [vmem:[#allocation86_spill] sm:$0xff]  ;;  %v19148_v30 = vld [vmem:[#allocation219_spill] sm:$0xff] }
 0x389   : > { %v9517_v6 = vpack.i.bf16 %v2711_v57, %v2710_v56  ;;  %v9522_v53 = vpack.i.bf16 %v2713_v54, %v2712_v35  ;;  %v19143_v54 = vld [vmem:[#allocation84_spill] sm:$0xff] }
 0x38a   : > { %v2140_v49 = vmul.f32 %v19143_v54, %v19142_v36 }
 0x38b   : > { %9518 = vrot.lane.b32.xlu1 %v9517_v6, %s10103_s6  ;;  %9523 = vrot.lane.b32.xlu2 %v9522_v53, %s10103_s6  ;;  %v19144_v6 = vld [vmem:[#allocation216_spill] sm:$0xff]  ;;  %v19146_v53 = vld [vmem:[#allocation213_spill] sm:$0xff] }
 0x38c   : > { %v2141_v35 = vmul.f32 %v19145_v26, %v19144_v6  ;;  %v2142_v24 = vmul.f32 %v19147_v19, %v19146_v53  ;;  %v19150_v6 = vld [vmem:[#allocation223_spill] sm:$0xff] }
 0x38e   : > { %v2575_v20 = vpop.permute.xlu1 %2574  ;;  %v2579_v56 = vpop.permute.xlu0 %2578  ;;  %v2718_v34 = vadd.f32 %v2583_v13, %v2142_v24 }
 0x38f   : > { %v2714_v58 = vadd.f32 %v2575_v20, %v2138_v28  ;;  %v2716_v60 = vadd.f32 %v2579_v56, %v2140_v49  ;;  %v19149_v28 = vld [vmem:[#allocation103_spill] sm:$0xff]  ;;  %v2589_v36 = vpop.permute.xlu2 %2588  ;;  %v2145_v56 = vmul.f32 %v19151_v47, %v19150_v6  ;;  %v19153_v49 = vld [vmem:[#allocation110_spill] sm:$0xff] }
 0x390   : > { %v2143_v20 = vmul.f32 %v19149_v28, %v19148_v30 }
 0x391   : > { %v9527_v57 = vpack.i.bf16 %v2715_v18, %v2714_v58  ;;  %v2721_v30 = vadd.f32 %v2589_v36, %v2145_v56 }
 0x393   : > { %9528 = vrot.lane.b32.xlu0 %v9527_v57, %s10103_s6  ;;  %v12231_v57 = vpop.f32.mrf.mxu1 }
 0x396   : > { %v2581_v55 = vpop.permute.xlu1 %2580  ;;  %v2585_v18 = vpop.permute.xlu0 %2584 }
 0x397   : > { %v2717_v41 = vadd.f32 %v2581_v55, %v2141_v35  ;;  %v2719_v16 = vadd.f32 %v2585_v18, %v2143_v20  ;;  %v19152_v55 = vld [vmem:[#allocation217_spill] sm:$0xff]  ;;  %v2595_v2 = vpop.permute.xlu2 %2594 }
 0x398   : > { %v2144_v35 = vmul.f32 %v19153_v49, %v19152_v55  ;;  %v19154_v20 = vld [vmem:[#allocation221_spill] sm:$0xff] }
 0x399   : > { %v9532_v58 = vpack.i.bf16 %v2717_v41, %v2716_v60  ;;  %v9537_v31 = vpack.i.bf16 %v2719_v16, %v2718_v34  ;;  %v19156_v34 = vld [vmem:[#allocation125_spill] sm:$0xff] }
 0x39a   : > { %v2147_v18 = vmul.f32 %v19156_v34, %v19056_v7 }
 0x39b   : > { %9533 = vrot.lane.b32.xlu1 %v9532_v58, %s10103_s6  ;;  %9538 = vrot.lane.b32.xlu2 %v9537_v31, %s10103_s6  ;;  %v12240_v24 = vpop.f32.mrf.mxu1  ;;  %v19155_v58 = vld [vmem:[#allocation121_spill] sm:$0xff]  ;;  %v19157_v31 = vld [vmem:[#allocation126_spill] sm:$0xff] }
 0x39c   : > { %v2146_v16 = vmul.f32 %v19155_v58, %v19154_v20  ;;  %v2148_v36 = vmul.f32 %v19157_v31, %v19057_v9 }
 0x39e   : > { %v2587_v53 = vpop.permute.xlu1 %2586  ;;  %v2591_v13 = vpop.permute.xlu0 %2590 }
 0x39f   : > { %v2720_v41 = vadd.f32 %v2587_v53, %v2144_v35  ;;  %v2722_v55 = vadd.f32 %v2591_v13, %v2146_v16  ;;  %v19158_v53 = vld [vmem:[#allocation230_spill] sm:$0xff] }
 0x3a1   : > { %v9542_v60 = vpack.i.bf16 %v2721_v30, %v2720_v41  ;;  %v19159_v30 = vld [vmem:[#allocation127_spill] sm:$0xff] }
 0x3a2   : > { %v2149_v56 = vmul.f32 %v19159_v30, %v19158_v53 }
 0x3a3   : > { %9543 = vrot.lane.b32.xlu0 %v9542_v60, %s10103_s6  ;;  %v2724_v60 = vadd.f32 %v2595_v2, %v2148_v36  ;;  %v12253_v7 = vpop.f32.mrf.mxu1 }
 0x3a6   : > { %v2593_v6 = vpop.permute.xlu1 %2592  ;;  %v2597_v41 = vpop.permute.xlu0 %2596 }
 0x3a7   : > { %v2723_v14 = vadd.f32 %v2593_v6, %v2147_v18  ;;  %v2725_v23 = vadd.f32 %v2597_v41, %v2149_v56 }
 0x3a9   : > { %v9547_v35 = vpack.i.bf16 %v2723_v14, %v2722_v55  ;;  %v9552_v20 = vpack.i.bf16 %v2725_v23, %v2724_v60  ;;  %v12266_v14 = vpop.permute.xlu2 %9403 }
 0x3aa   : > { %19160 = vst [vmem:[#allocation73_spill] sm:$0xff] %v12266_v14 }
 0x3ab   : > { %9548 = vrot.lane.b32.xlu1 %v9547_v35, %s10103_s6  ;;  %3535 = vrot.lane.b32.xlu0 %v12196_v52, %s10106_s13  ;;  %v12262_v2 = vpop.f32.mrf.mxu1 }
 0x3ac   : > { %9553 = vrot.lane.b32.xlu2 %v9552_v20, %s10103_s6 }
 0x3ae   : > { %v12272_v23 = vpop.permute.xlu1 %9398  ;;  %v12290_v20 = vpop.permute.xlu0 %9408 }
 0x3af   : > { %19161 = vst [vmem:[#allocation86_spill] sm:$0xff] %v12272_v23 }
 0x3b0   : > { %19164 = vst [vmem:[#allocation401_spill] sm:$0xff] %v12290_v20 }
 0x3b1   : > { %v12280_v55 = vpop.permute.xlu2 %9418 }
 0x3b2   : > { %19162 = vst [vmem:[#allocation110_spill] sm:$0xff] %v12280_v55 }
 0x3b3   : > { %3537 = vrot.lane.b32.xlu1 %v12208_v48, %s10106_s13  ;;  %3541 = vrot.lane.b32.xlu0 %v12231_v57, %s10106_s13  ;;  %v12274_v6 = vpop.f32.mrf.mxu1 }
 0x3b4   : > { %3539 = vrot.lane.b32.xlu2 %v12220_v51, %s10106_s13 }
 0x3b6   : > { %v12284_v13 = vpop.permute.xlu1 %9413  ;;  %v12304_v36 = vpop.permute.xlu0 %9423 }
 0x3b7   : > { %19163 = vst [vmem:[#allocation127_spill] sm:$0xff] %v12284_v13 }
 0x3b8   : > { %19167 = vst [vmem:[#allocation404_spill] sm:$0xff] %v12304_v36 }
 0x3b9   : > { %v12294_v16 = vpop.permute.xlu2 %9433 }
 0x3ba   : > { %19165 = vst [vmem:[#allocation402_spill] sm:$0xff] %v12294_v16 }
 0x3bb   : > { %3543 = vrot.lane.b32.xlu1 %v12240_v24, %s10106_s13  ;;  %3547 = vrot.lane.b32.xlu0 %v12262_v2, %s10106_s13 }
 0x3bc   : > { %3545 = vrot.lane.b32.xlu2 %v12253_v7, %s10106_s13 }
 0x3be   : > { %v12300_v18 = vpop.permute.xlu1 %9428  ;;  %v12316_v41 = vpop.permute.xlu0 %9438 }
 0x3bf   : > { %19166 = vst [vmem:[#allocation403_spill] sm:$0xff] %v12300_v18 }
 0x3c0   : > { %19170 = vst [vmem:[#allocation407_spill] sm:$0xff] %v12316_v41 }
 0x3c1   : > { %v12306_v56 = vpop.permute.xlu2 %9448 }
 0x3c2   : > { %19168 = vst [vmem:[#allocation405_spill] sm:$0xff] %v12306_v56 }
 0x3c3   : > { %3549 = vrot.lane.b32.xlu1 %v12274_v6, %s10106_s13  ;;  %3561 = vrot.lane.b32.xlu0 %v12208_v48, %s10105_s12 }
 0x3c4   : > { %3559 = vrot.lane.b32.xlu2 %v12196_v52, %s10105_s12 }
 0x3c6   : > { %v12314_v35 = vpop.permute.xlu1 %9443  ;;  %v12328_v56 = vpop.permute.xlu0 %9453 }
 0x3c7   : > { %19169 = vst [vmem:[#allocation406_spill] sm:$0xff] %v12314_v35 }
 0x3c8   : > { %19173 = vst [vmem:[#allocation410_spill] sm:$0xff] %v12328_v56 }
 0x3c9   : > { %v12320_v60 = vpop.permute.xlu2 %9463 }
 0x3ca   : > { %19171 = vst [vmem:[#allocation408_spill] sm:$0xff] %v12320_v60 }
 0x3cb   : > { %3563 = vrot.lane.b32.xlu1 %v12220_v51, %s10105_s12  ;;  %3567 = vrot.lane.b32.xlu0 %v12240_v24, %s10105_s12 }
 0x3cc   : > { %3565 = vrot.lane.b32.xlu2 %v12231_v57, %s10105_s12 }
 0x3ce   : > { %v12326_v18 = vpop.permute.xlu1 %9458  ;;  %v12338_v60 = vpop.permute.xlu0 %9468 }
 0x3cf   : > { %19172 = vst [vmem:[#allocation409_spill] sm:$0xff] %v12326_v18 }
 0x3d0   : > { %19176 = vst [vmem:[#allocation413_spill] sm:$0xff] %v12338_v60 }
 0x3d1   : > { %v12332_v35 = vpop.permute.xlu2 %9478 }
 0x3d2   : > { %19174 = vst [vmem:[#allocation411_spill] sm:$0xff] %v12332_v35 }
 0x3d3   : > { %3569 = vrot.lane.b32.xlu1 %v12253_v7, %s10105_s12  ;;  %3573 = vrot.lane.b32.xlu0 %v12274_v6, %s10105_s12 }
 0x3d4   : > { %3571 = vrot.lane.b32.xlu2 %v12262_v2, %s10105_s12 }
 0x3d6   : > { %v12336_v41 = vpop.permute.xlu1 %9473  ;;  %v12344_v36 = vpop.permute.xlu0 %9483 }
 0x3d7   : > { %19175 = vst [vmem:[#allocation412_spill] sm:$0xff] %v12336_v41 }
 0x3d8   : > { %19179 = vst [vmem:[#allocation416_spill] sm:$0xff] %v12344_v36 }
 0x3d9   : > { %v12340_v20 = vpop.permute.xlu2 %9493 }
 0x3da   : > { %19177 = vst [vmem:[#allocation414_spill] sm:$0xff] %v12340_v20 }
 0x3db   : > { %3583 = vrot.lane.b32.xlu1 %v12196_v52, %s10104_s11  ;;  %3587 = vrot.lane.b32.xlu0 %v12220_v51, %s10104_s11 }
 0x3dc   : > { %3585 = vrot.lane.b32.xlu2 %v12208_v48, %s10104_s11 }
 0x3de   : > { %v12342_v16 = vpop.permute.xlu1 %9488 }
 0x3df   : > { %19178 = vst [vmem:[#allocation415_spill] sm:$0xff] %v12342_v16 }
 0x3e1   : > { %v12346_v18 = vpop.permute.xlu2 %9508 }
 0x3e2   : > { %19180 = vst [vmem:[#allocation417_spill] sm:$0xff] %v12346_v18 }
 0x3e3   : > { %3589 = vrot.lane.b32.xlu1 %v12231_v57, %s10104_s11  ;;  %3593 = vrot.lane.b32.xlu0 %v12253_v7, %s10104_s11 }
 0x3e4   : > { %3591 = vrot.lane.b32.xlu2 %v12240_v24, %s10104_s11 }
 0x3e5   : > { %v12350_v13 = vpop.permute.xlu0 %9498 }
 0x3e6   : > { %19182 = vst [vmem:[#allocation419_spill] sm:$0xff] %v12350_v13 }
 0x3e9   : > { %v12352_v35 = vpop.permute.xlu2 %9523 }
 0x3ea   : > { %19183 = vst [vmem:[#allocation420_spill] sm:$0xff] %v12352_v35 }
 0x3eb   : > { %3595 = vrot.lane.b32.xlu1 %v12262_v2, %s10104_s11 }
 0x3ec   : > { %3597 = vrot.lane.b32.xlu2 %v12274_v6, %s10104_s11 }
 0x3ed   : > { %v12348_v56 = vpop.permute.xlu1 %9503 }
 0x3ee   : > { %19181 = vst [vmem:[#allocation418_spill] sm:$0xff] %v12348_v56 }
 0x3f5   : > { %v12356_v23 = vpop.permute.xlu0 %9513  ;;  %v12358_v41 = vpop.permute.xlu2 %9538 }
 0x3f6   : > { %19185 = vst [vmem:[#allocation422_spill] sm:$0xff] %v12356_v23 }
 0x3f7   : > { %19186 = vst [vmem:[#allocation423_spill] sm:$0xff] %v12358_v41 }
 0x3fd   : > { %v12354_v55 = vpop.permute.xlu1 %9518 }
 0x3fe   : > { %19184 = vst [vmem:[#allocation421_spill] sm:$0xff] %v12354_v55 }
 0x405   : > { %v12362_v20 = vpop.permute.xlu0 %9528 }
 0x406   : > { %19188 = vst [vmem:[#allocation425_spill] sm:$0xff] %v12362_v20  ;;  %v12364_v16 = vpop.permute.xlu2 %9553 }
 0x407   : > { %19189 = vst [vmem:[#allocation426_spill] sm:$0xff] %v12364_v16 }
 0x40d   : > { %v12360_v60 = vpop.permute.xlu1 %9533 }
 0x40e   : > { %19187 = vst [vmem:[#allocation424_spill] sm:$0xff] %v12360_v60  ;;  %v12370_v56 = vpop.permute.xlu2 %3539 }
 0x415   : > { %v12368_v18 = vpop.permute.xlu0 %9543 }
 0x416   : > { %19191 = vst [vmem:[#allocation428_spill] sm:$0xff] %v12368_v18  ;;  %v12374_v55 = vpop.permute.xlu2 %3545 }
 0x41d   : > { %v12366_v36 = vpop.permute.xlu1 %9548  ;;  %v3536_v35 = vpop.permute.xlu0 %3535 }
 0x41e   : > { %19190 = vst [vmem:[#allocation427_spill] sm:$0xff] %v12366_v36  ;;  %v3560_v20 = vpop.permute.xlu2 %3559  ;;  %v3621_v32 = vrot.slane %v3536_v35, 4 }
 0x41f   : > { %v3607_v53 = vrot.slane %v3560_v20, 4 }
 0x421   : > { %v3608_v1 = vsel %vm742_vm0, %v3607_v53, %v12196_v52 }
 0x422   : > { %v3614_v0 = vperm.slane %v3608_v1, %v19192_v5  ;;  %v3610_v1 = vsel %vm742_vm0, %v3560_v20, %v3609_v25  ;;  %v19196_v25 = vld [vmem:[#allocation51_spill] sm:$0xff] }
 0x424   : > { %v3633_v10 = vrot.slane %v3614_v0, 4 }
 0x425   : > { %v12372_v13 = vpop.permute.xlu1 %3537  ;;  %v12378_v41 = vpop.permute.xlu0 %3541 }
 0x426   : > { %v12386_v36 = vpop.permute.xlu2 %3565 }
 0x42d   : > { %v12376_v23 = vpop.permute.xlu1 %3543  ;;  %v12382_v14 = vpop.permute.xlu0 %3547 }
 0x42e   : > { %v12390_v59 = vpop.permute.xlu2 %3571 }
 0x435   : > { %v12380_v60 = vpop.permute.xlu1 %3549  ;;  %v3562_v9 = vpop.permute.xlu0 %3561 }
 0x436   : > { %v3586_v17 = vpop.permute.xlu2 %3585 }
 0x437   : > { %v3675_v4 = vrot.slane %v3586_v17, 4 }
 0x439   : > { %v3676_v52 = vsel %vm742_vm0, %v3675_v4, %v12372_v13 }
 0x43d   : > { %v12384_v16 = vpop.permute.xlu1 %3563  ;;  %v12397_v43 = vpop.permute.xlu0 %3567 }
 0x445   : > { %v12388_v18 = vpop.permute.xlu1 %3569  ;;  %v12412_v44 = vpop.permute.xlu0 %3573 }
 0x44d   : > { %v3584_v62 = vpop.permute.xlu1 %3583 }
 0x44e   : > { %v3619_v12 = vrot.slane %v3584_v62, 4  ;;  %v3622_v27 = vsel %vm742_vm0, %v3584_v62, %v3621_v32  ;;  %v19193_v62 = vld [vmem:[#allocation139_spill] sm:$0xff] }
 0x44f   : > { %v3630_v29 = vperm.slane %v3622_v27, %v19192_v5 }
 0x450   : > { %v3620_v33 = vsel %vm742_vm0, %v3619_v12, %v3536_v35  ;;  %v3618_v12 = vperm.slane %v3610_v1, %v19192_v5  ;;  %v3663_v35 = vrot.slane %v3562_v9, 4 }
 0x451   : > { %v3626_v22 = vperm.slane %v3620_v33, %v19192_v5  ;;  %v3643_v11 = vrot.slane %v3630_v29, 4 }
 0x453   : > { %v3631_v53 = vrot.slane %v3626_v22, 4  ;;  %v3634_v3 = vsel %vm742_vm0, %v3626_v22, %v3633_v10  ;;  %v3644_v27 = vsel %vm742_vm0, %v3643_v11, %v3618_v12  ;;  %v3682_v11 = vperm.slane %v3676_v52, %v19192_v5  ;;  %v19200_v52 = vld [vmem:[#allocation65_spill] sm:$0xff] }
 0x454   : > { %v12405_v32 = vperm.slane %v3634_v3, %v19193_v62  ;;  %v3664_v3 = vsel %vm742_vm0, %v3663_v35, %v12208_v48  ;;  %v12422_v20 = vperm.slane %v3644_v27, %v19193_v62 }
 0x455   : > { %v3632_v33 = vsel %vm742_vm0, %v3631_v53, %v3614_v0  ;;  %v3670_v4 = vperm.slane %v3664_v3, %v19192_v5  ;;  %v19198_v0 = vld [vmem:[#allocation63_spill] sm:$0xff] }
 0x456   : > { %19194 = vst [vmem:[#allocation429_spill] sm:$0xff] %v12405_v32  ;;  %v12415_v22 = vperm.slane %v3632_v33, %v19193_v62  ;;  %v4121_v10 = vmul.f32 %v12405_v32, %v19196_v25  ;;  %v3659_v33 = vrot.slane %v12422_v20, 4  ;;  %v3687_v25 = vrot.slane %v3682_v11, 4 }
 0x457   : > { %19197 = vst [vmem:[#allocation51_spill] sm:$0xff] %v12422_v20  ;;  %v3657_v35 = vrot.slane %v12405_v32, 4  ;;  %v3689_v27 = vrot.slane %v3670_v4, 4 }
 0x458   : > { %19195 = vst [vmem:[#allocation430_spill] sm:$0xff] %v12415_v22  ;;  %4251 = vrot.lane.b32.xlu2 %v4121_v10, %s10109_s14  ;;  %v4119_v53 = vmul.f32 %v12415_v22, %v19198_v0  ;;  %v3655_v1 = vrot.slane %v12415_v22, 4  ;;  %v3645_v10 = vrot.slane %v3618_v12, 4  ;;  %v12439_v39 = vsel %vm742_vm0, 0.0, %v3659_v33 }
 0x459   : > { %19201 = vst [vmem:[#allocation65_spill] sm:$0xff] %v12439_v39  ;;  %v12442_v0 = vsel %vm742_vm0, 0.0, %v3657_v35  ;;  %v4124_v45 = vmul.f32 %v12439_v39, %v19203_v50  ;;  %v3688_v46 = vsel %vm742_vm0, %v3687_v25, %v3670_v4  ;;  %v3690_v12 = vsel %vm742_vm0, %v3682_v11, %v3689_v27  ;;  %v19208_v25 = vld [vmem:[#allocation71_spill] sm:$0xff]  ;;  %v19278_v39 = vld [vmem:[#allocation118_spill] sm:$0xff] }
 0x45a   : > { %4247 = vrot.lane.b32.xlu0 %v4119_v53, %s10109_s14  ;;  %v12434_v38 = vsel %vm742_vm0, 0.0, %v3655_v1  ;;  %19202 = vst [vmem:[#allocation431_spill] sm:$0xff] %v12442_v0  ;;  %v3588_v53 = vpop.permute.xlu0 %3587  ;;  %v3646_v21 = vsel %vm742_vm0, %v3630_v29, %v3645_v10  ;;  %v19204_v1 = vld [vmem:[#allocation69_spill] sm:$0xff]  ;;  %v3677_v35 = vrot.slane %v12372_v13, 4  ;;  %v12456_v50 = vperm.slane %v3688_v46, %v19193_v62  ;;  %v19209_v46 = vld [vmem:[#allocation59_spill] sm:$0xff] }
 0x45b   : > { %19199 = vst [vmem:[#allocation63_spill] sm:$0xff] %v12434_v38  ;;  %v4120_v3 = vmul.f32 %v12434_v38, %v19200_v52  ;;  %v4122_v33 = vmul.f32 %v12442_v0, %v19204_v1  ;;  %v3731_v52 = vrot.slane %v3588_v53, 4  ;;  %v12459_v4 = vperm.slane %v3646_v21, %v19193_v62  ;;  %v19263_v0 = vld [vmem:[#allocation100_spill] sm:$0xff] }
 0x45c   : > { %19205 = vst [vmem:[#allocation55_spill] sm:$0xff] %v12456_v50  ;;  %v12463_v29 = vperm.slane %v3690_v12, %v19193_v62  ;;  %v3678_v11 = vsel %vm742_vm0, %v3586_v17, %v3677_v35  ;;  %v4123_v48 = vmul.f32 %v12422_v20, %v19208_v25  ;;  %v4127_v27 = vmul.f32 %v12456_v50, %v19209_v46 }
 0x45d   : > { %4249 = vrot.lane.b32.xlu1 %v4120_v3, %s10109_s14  ;;  %19206 = vst [vmem:[#allocation69_spill] sm:$0xff] %v12459_v4  ;;  %v3732_v13 = vsel %vm742_vm0, %v3731_v52, %v12370_v56  ;;  %v3661_v21 = vrot.slane %v12459_v4, 4  ;;  %v3686_v3 = vperm.slane %v3678_v11, %v19192_v5  ;;  %v3719_v12 = vrot.slane %v12384_v16, 4 }
 0x45e   : > { %19207 = vst [vmem:[#allocation432_spill] sm:$0xff] %v12463_v29  ;;  %v3738_v17 = vperm.slane %v3732_v13, %v19192_v5 }
 0x45f   : > { %v12486_v52 = vsel %vm742_vm0, 0.0, %v3661_v21  ;;  %v3720_v11 = vsel %vm742_vm0, %v3719_v12, %v12220_v51 }
 0x460   : > { %4257 = vrot.lane.b32.xlu2 %v4124_v45, %s10109_s14  ;;  %v3666_v45 = vsel %vm742_vm0, %v3562_v9, %v3665_v42  ;;  %v3713_v42 = vrot.slane %v12463_v29, 4  ;;  %v19210_v9 = vld [vmem:[#allocation75_spill] sm:$0xff]  ;;  %19211 = vst [vmem:[#allocation71_spill] sm:$0xff] %v12486_v52  ;;  %v3743_v13 = vrot.slane %v3738_v17, 4 }
 0x461   : > { %v3674_v10 = vperm.slane %v3666_v45, %v19192_v5  ;;  %v4125_v1 = vmul.f32 %v12459_v4, %v19210_v9  ;;  %v3699_v45 = vrot.slane %v3686_v3, 4  ;;  %v3726_v9 = vperm.slane %v3720_v11, %v19192_v5  ;;  %v19251_v4 = vld [vmem:[#allocation94_spill] sm:$0xff] }
 0x462   : > { %4253 = vrot.lane.b32.xlu0 %v4122_v33, %s10109_s14  ;;  %v3711_v33 = vrot.slane %v12456_v50, 4  ;;  %v12491_v25 = vsel %vm742_vm0, 0.0, %v3713_v42  ;;  %v19216_v42 = vld [vmem:[#allocation81_spill] sm:$0xff]  ;;  %v3831_v50 = vrot.slane %v12397_v43, 4 }
 0x463   : > { %v3701_v35 = vrot.slane %v3674_v10, 4  ;;  %19212 = vst [vmem:[#allocation59_spill] sm:$0xff] %v12491_v25  ;;  %v3700_v20 = vsel %vm742_vm0, %v3699_v45, %v3674_v10  ;;  %v3744_v12 = vsel %vm742_vm0, %v3743_v13, %v3726_v9  ;;  %v19220_v45 = vld [vmem:[#allocation83_spill] sm:$0xff] }
 0x464   : > { %v12510_v11 = vperm.slane %v3700_v20, %v19193_v62  ;;  %v12517_v10 = vperm.slane %v3744_v12, %v19193_v62  ;;  %v4129_v13 = vmul.f32 %v12463_v29, %v19220_v45  ;;  %v3590_v45 = vpop.permute.xlu1 %3589 }
 0x465   : > { %4255 = vrot.lane.b32.xlu1 %v4123_v48, %s10109_s14  ;;  %v19213_v48 = vld [vmem:[#allocation77_spill] sm:$0xff]  ;;  %v3702_v28 = vsel %vm742_vm0, %v3686_v3, %v3701_v35  ;;  %v3721_v35 = vrot.slane %v12220_v51, 4  ;;  %v19222_v51 = vld [vmem:[#allocation87_spill] sm:$0xff] }
 0x466   : > { %v4126_v46 = vmul.f32 %v12486_v52, %v19213_v48  ;;  %19217 = vst [vmem:[#allocation77_spill] sm:$0xff] %v12510_v11  ;;  %v3715_v20 = vrot.slane %v12510_v11, 4  ;;  %v3767_v12 = vrot.slane %v12517_v10, 4 }
 0x467   : > { %19219 = vst [vmem:[#allocation81_spill] sm:$0xff] %v12517_v10 }
 0x468   : > { %4263 = vrot.lane.b32.xlu2 %v4127_v27, %s10109_s14  ;;  %v12496_v27 = vsel %vm742_vm0, 0.0, %v3711_v33  ;;  %v3733_v33 = vrot.slane %v12370_v56, 4 }
 0x469   : > { %19214 = vst [vmem:[#allocation75_spill] sm:$0xff] %v12496_v27  ;;  %v4128_v48 = vmul.f32 %v12496_v27, %v19216_v42  ;;  %v19227_v27 = vld [vmem:[#allocation76_spill] sm:$0xff] }
 0x46a   : > { %4259 = vrot.lane.b32.xlu0 %v4125_v1, %s10109_s14  ;;  %v19215_v1 = vld [vmem:[#allocation64_spill] sm:$0xff]  ;;  %v3734_v3 = vsel %vm742_vm0, %v3588_v53, %v3733_v33  ;;  %v4131_v53 = vmul.f32 %v12510_v11, %v19222_v51  ;;  %v12538_v33 = vsel %vm742_vm0, 0.0, %v3715_v20  ;;  %v19228_v11 = vld [vmem:[#allocation90_spill] sm:$0xff] }
 0x46b   : > { %v4130_v21 = vmul.f32 %v12491_v25, %v19215_v1  ;;  %v12513_v1 = vperm.slane %v3702_v28, %v19193_v62  ;;  %v3722_v28 = vsel %vm742_vm0, %v12384_v16, %v3721_v35  ;;  %19223 = vst [vmem:[#allocation83_spill] sm:$0xff] %v12538_v33  ;;  %v3745_v35 = vrot.slane %v3726_v9, 4 }
 0x46c   : > { %v3787_v9 = vrot.slane %v3590_v45, 4  ;;  %v3833_v25 = vrot.slane %v12240_v24, 4 }
 0x46d   : > { %4261 = vrot.lane.b32.xlu1 %v4126_v46, %s10109_s14  ;;  %19218 = vst [vmem:[#allocation64_spill] sm:$0xff] %v12513_v1  ;;  %v19221_v46 = vld [vmem:[#allocation70_spill] sm:$0xff]  ;;  %v3717_v42 = vrot.slane %v12513_v1, 4 }
 0x46e   : > { %v4133_v56 = vmul.f32 %v12513_v1, %v19221_v46 }
 0x470   : > { %4269 = vrot.lane.b32.xlu2 %v4130_v21, %s10109_s14  ;;  %v3742_v21 = vperm.slane %v3734_v3, %v19192_v5  ;;  %v12541_v3 = vsel %vm742_vm0, 0.0, %v3767_v12 }
 0x471   : > { %19224 = vst [vmem:[#allocation70_spill] sm:$0xff] %v12541_v3 }
 0x472   : > { %4265 = vrot.lane.b32.xlu0 %v4128_v48, %s10109_s14  ;;  %v3730_v48 = vperm.slane %v3722_v28, %v19192_v5  ;;  %v3755_v16 = vrot.slane %v3742_v21, 4  ;;  %v4136_v28 = vmul.f32 %v12541_v3, %v19227_v27 }
 0x474   : > { %v3757_v51 = vrot.slane %v3730_v48, 4  ;;  %v3756_v20 = vsel %vm742_vm0, %v3755_v16, %v3730_v48  ;;  %v3788_v48 = vsel %vm742_vm0, %v3787_v9, %v12378_v41  ;;  %v19232_v16 = vld [vmem:[#allocation92_spill] sm:$0xff] }
 0x475   : > { %4267 = vrot.lane.b32.xlu1 %v4129_v13, %s10109_s14  ;;  %v19225_v13 = vld [vmem:[#allocation89_spill] sm:$0xff]  ;;  %v12562_v27 = vperm.slane %v3756_v20, %v19193_v62  ;;  %v3794_v20 = vperm.slane %v3788_v48, %v19192_v5 }
 0x476   : > { %v4132_v46 = vmul.f32 %v12538_v33, %v19225_v13  ;;  %v3758_v12 = vsel %vm742_vm0, %v3742_v21, %v3757_v51  ;;  %v19233_v51 = vld [vmem:[#allocation82_spill] sm:$0xff] }
 0x477   : > { %19230 = vst [vmem:[#allocation76_spill] sm:$0xff] %v12562_v27  ;;  %v12567_v21 = vperm.slane %v3758_v12, %v19193_v62 }
 0x478   : > { %4275 = vrot.lane.b32.xlu2 %v4133_v56, %s10109_s14  ;;  %v12546_v56 = vsel %vm742_vm0, 0.0, %v3717_v42  ;;  %v3775_v42 = vrot.slane %v12386_v36, 4 }
 0x479   : > { %19226 = vst [vmem:[#allocation87_spill] sm:$0xff] %v12546_v56  ;;  %v4134_v13 = vmul.f32 %v12546_v56, %v19228_v11  ;;  %v3773_v12 = vrot.slane %v12567_v21, 4 }
 0x47a   : > { %4271 = vrot.lane.b32.xlu0 %v4131_v53, %s10109_s14  ;;  %v3746_v53 = vsel %vm742_vm0, %v3738_v17, %v3745_v35  ;;  %v3789_v17 = vrot.slane %v12378_v41, 4  ;;  %19231 = vst [vmem:[#allocation90_spill] sm:$0xff] %v12567_v21  ;;  %v4135_v35 = vmul.f32 %v12517_v10, %v19232_v16 }
 0x47b   : > { %v12559_v1 = vperm.slane %v3746_v53, %v19193_v62 }
 0x47c   : > { %v3790_v11 = vsel %vm742_vm0, %v3590_v45, %v3789_v17  ;;  %v19234_v45 = vld [vmem:[#allocation93_spill] sm:$0xff]  ;;  %v3771_v17 = vrot.slane %v12562_v27, 4 }
 0x47d   : > { %4273 = vrot.lane.b32.xlu1 %v4132_v46, %s10109_s14  ;;  %19229 = vst [vmem:[#allocation89_spill] sm:$0xff] %v12559_v1  ;;  %v3776_v46 = vsel %vm742_vm0, %v3775_v42, %v12231_v57  ;;  %v3769_v53 = vrot.slane %v12559_v1, 4  ;;  %v3798_v41 = vperm.slane %v3790_v11, %v19192_v5  ;;  %v4137_v9 = vmul.f32 %v12559_v1, %v19234_v45  ;;  %v3592_v45 = vpop.permute.xlu2 %3591 }
 0x47e   : > { %v3782_v42 = vperm.slane %v3776_v46, %v19192_v5  ;;  %v3799_v11 = vrot.slane %v3794_v20, 4  ;;  %v12601_v33 = vsel %vm742_vm0, 0.0, %v3771_v17 }
 0x47f   : > { %v12591_v48 = vsel %vm742_vm0, 0.0, %v3769_v53  ;;  %19238 = vst [vmem:[#allocation93_spill] sm:$0xff] %v12601_v33  ;;  %v19239_v53 = vld [vmem:[#allocation88_spill] sm:$0xff] }
 0x480   : > { %4281 = vrot.lane.b32.xlu2 %v4136_v28, %s10109_s14  ;;  %v4139_v28 = vmul.f32 %v12562_v27, %v19233_v51  ;;  %19235 = vst [vmem:[#allocation92_spill] sm:$0xff] %v12591_v48  ;;  %v3811_v51 = vrot.slane %v3798_v41, 4 }
 0x482   : > { %4277 = vrot.lane.b32.xlu0 %v4134_v13, %s10109_s14  ;;  %v3777_v13 = vrot.slane %v12231_v57, 4  ;;  %v19237_v57 = vld [vmem:[#allocation95_spill] sm:$0xff] }
 0x483   : > { %v4138_v46 = vmul.f32 %v12591_v48, %v19237_v57  ;;  %v19240_v57 = vld [vmem:[#allocation96_spill] sm:$0xff] }
 0x484   : > { %v3778_v16 = vsel %vm742_vm0, %v12386_v36, %v3777_v13  ;;  %v3800_v36 = vsel %vm742_vm0, %v3799_v11, %v3782_v42  ;;  %v4140_v17 = vmul.f32 %v12601_v33, %v19240_v57  ;;  %v19244_v11 = vld [vmem:[#allocation98_spill] sm:$0xff] }
 0x485   : > { %4279 = vrot.lane.b32.xlu1 %v4135_v35, %s10109_s14  ;;  %v12596_v35 = vsel %vm742_vm0, 0.0, %v3773_v12  ;;  %v3843_v12 = vrot.slane %v3592_v45, 4 }
 0x486   : > { %19236 = vst [vmem:[#allocation82_spill] sm:$0xff] %v12596_v35  ;;  %v4142_v58 = vmul.f32 %v12596_v35, %v19239_v53 }
 0x488   : > { %4287 = vrot.lane.b32.xlu2 %v4139_v28, %s10109_s14  ;;  %v3801_v28 = vrot.slane %v3782_v42, 4  ;;  %v3844_v42 = vsel %vm742_vm0, %v3843_v12, %v12376_v23  ;;  %v19246_v12 = vld [vmem:[#allocation99_spill] sm:$0xff] }
 0x48a   : > { %4283 = vrot.lane.b32.xlu0 %v4137_v9, %s10109_s14  ;;  %v3786_v9 = vperm.slane %v3778_v16, %v19192_v5  ;;  %v3802_v13 = vsel %vm742_vm0, %v3794_v20, %v3801_v28  ;;  %v12615_v16 = vperm.slane %v3800_v36, %v19193_v62  ;;  %v19245_v28 = vld [vmem:[#allocation91_spill] sm:$0xff] }
 0x48b   : > { %v12618_v53 = vperm.slane %v3802_v13, %v19193_v62  ;;  %v3850_v13 = vperm.slane %v3844_v42, %v19192_v5 }
 0x48c   : > { %v3812_v38 = vsel %vm742_vm0, %v3811_v51, %v3786_v9  ;;  %19241 = vst [vmem:[#allocation95_spill] sm:$0xff] %v12615_v16  ;;  %v4141_v51 = vmul.f32 %v12567_v21, %v19244_v11  ;;  %v3823_v36 = vrot.slane %v12615_v16, 4  ;;  %v3813_v63 = vrot.slane %v3786_v9, 4  ;;  %v19252_v9 = vld [vmem:[#allocation104_spill] sm:$0xff] }
 0x48d   : > { %4285 = vrot.lane.b32.xlu1 %v4138_v46, %s10109_s14  ;;  %19242 = vst [vmem:[#allocation88_spill] sm:$0xff] %v12618_v53  ;;  %v12622_v20 = vperm.slane %v3812_v38, %v19193_v62  ;;  %v4145_v46 = vmul.f32 %v12618_v53, %v19245_v28  ;;  %v3855_v28 = vrot.slane %v3850_v13, 4 }
 0x48e   : > { %v12643_v11 = vsel %vm742_vm0, 0.0, %v3823_v36  ;;  %v3814_v36 = vsel %vm742_vm0, %v3798_v41, %v3813_v63 }
 0x48f   : > { %19243 = vst [vmem:[#allocation96_spill] sm:$0xff] %v12622_v20  ;;  %v3827_v38 = vrot.slane %v12622_v20, 4 }
 0x490   : > { %4293 = vrot.lane.b32.xlu2 %v4142_v58, %s10109_s14  ;;  %v3832_v58 = vsel %vm742_vm0, %v3831_v50, %v12240_v24  ;;  %v4143_v50 = vmul.f32 %v12615_v16, %v19246_v12  ;;  %19247 = vst [vmem:[#allocation98_spill] sm:$0xff] %v12643_v11  ;;  %v3594_v12 = vpop.permute.xlu0 %3593  ;;  %v19256_v24 = vld [vmem:[#allocation105_spill] sm:$0xff] }
 0x491   : > { %v3838_v57 = vperm.slane %v3832_v58, %v19192_v5  ;;  %v12646_v42 = vsel %vm742_vm0, 0.0, %v3827_v38  ;;  %v4144_v58 = vmul.f32 %v12643_v11, %v19249_v37  ;;  %v3899_v34 = vrot.slane %v3594_v12, 4 }
 0x492   : > { %4289 = vrot.lane.b32.xlu0 %v4140_v17, %s10109_s14  ;;  %v3825_v17 = vrot.slane %v12618_v53, 4  ;;  %19248 = vst [vmem:[#allocation91_spill] sm:$0xff] %v12646_v42  ;;  %v4148_v31 = vmul.f32 %v12646_v42, %v19251_v4 }
 0x495   : > { %4291 = vrot.lane.b32.xlu1 %v4141_v51, %s10109_s14  ;;  %v3857_v51 = vrot.slane %v3838_v57, 4 }
 0x497   : > { %v3858_v38 = vsel %vm742_vm0, %v3850_v13, %v3857_v51  ;;  %v4147_v13 = vmul.f32 %v12622_v20, %v19256_v24 }
 0x498   : > { %4299 = vrot.lane.b32.xlu2 %v4145_v46, %s10109_s14  ;;  %v12651_v46 = vsel %vm742_vm0, 0.0, %v3825_v17  ;;  %v3845_v17 = vrot.slane %v12376_v23, 4  ;;  %v12672_v63 = vperm.slane %v3858_v38, %v19193_v62  ;;  %v3900_v23 = vsel %vm742_vm0, %v3899_v34, %v12374_v55 }
 0x499   : > { %19250 = vst [vmem:[#allocation99_spill] sm:$0xff] %v12651_v46  ;;  %v4146_v37 = vmul.f32 %v12651_v46, %v19252_v9  ;;  %v3887_v38 = vrot.slane %v12388_v18, 4  ;;  %v3906_v34 = vperm.slane %v3900_v23, %v19192_v5 }
 0x49a   : > { %4295 = vrot.lane.b32.xlu0 %v4143_v50, %s10109_s14  ;;  %v3856_v50 = vsel %vm742_vm0, %v3855_v28, %v3838_v57  ;;  %v12668_v57 = vperm.slane %v3814_v36, %v19193_v62  ;;  %19255 = vst [vmem:[#allocation104_spill] sm:$0xff] %v12672_v63  ;;  %v3846_v41 = vsel %vm742_vm0, %v3592_v45, %v3845_v17  ;;  %v19257_v28 = vld [vmem:[#allocation97_spill] sm:$0xff]  ;;  %v19258_v45 = vld [vmem:[#allocation107_spill] sm:$0xff] }
 0x49b   : > { %v12665_v4 = vperm.slane %v3856_v50, %v19193_v62  ;;  %v3854_v36 = vperm.slane %v3846_v41, %v19192_v5  ;;  %v3888_v24 = vsel %vm742_vm0, %v3887_v38, %v12253_v7  ;;  %v3911_v23 = vrot.slane %v3906_v34, 4 }
 0x49c   : > { %19254 = vst [vmem:[#allocation94_spill] sm:$0xff] %v12668_v57  ;;  %v4149_v9 = vmul.f32 %v12668_v57, %v19258_v45 }
 0x49d   : > { %4297 = vrot.lane.b32.xlu1 %v4144_v58, %s10109_s14  ;;  %19253 = vst [vmem:[#allocation101_spill] sm:$0xff] %v12665_v4  ;;  %v4151_v51 = vmul.f32 %v12665_v4, %v19257_v28  ;;  %v3829_v58 = vrot.slane %v12668_v57, 4  ;;  %v3867_v41 = vrot.slane %v3854_v36, 4  ;;  %v19261_v28 = vld [vmem:[#allocation108_spill] sm:$0xff] }
 0x49f   : > { %v12698_v17 = vsel %vm742_vm0, 0.0, %v3829_v58 }
 0x4a0   : > { %4305 = vrot.lane.b32.xlu2 %v4148_v31, %s10109_s14  ;;  %v3834_v31 = vsel %vm742_vm0, %v12397_v43, %v3833_v25  ;;  %v3881_v43 = vrot.slane %v12672_v63, 4  ;;  %v12689_v25 = vpop.permute.xlu2 %3597  ;;  %19259 = vst [vmem:[#allocation105_spill] sm:$0xff] %v12698_v17 }
 0x4a1   : > { %v3842_v50 = vperm.slane %v3834_v31, %v19192_v5 }
 0x4a2   : > { %4301 = vrot.lane.b32.xlu0 %v4146_v37, %s10109_s14  ;;  %v3879_v37 = vrot.slane %v12665_v4, 4 }
 0x4a3   : > { %v3869_v31 = vrot.slane %v3842_v50, 4  ;;  %v3868_v22 = vsel %vm742_vm0, %v3867_v41, %v3842_v50  ;;  %v19269_v41 = vld [vmem:[#allocation112_spill] sm:$0xff] }
 0x4a4   : > { %v12708_v45 = vsel %vm742_vm0, 0.0, %v3879_v37  ;;  %v12724_v47 = vperm.slane %v3868_v22, %v19193_v62 }
 0x4a5   : > { %4303 = vrot.lane.b32.xlu1 %v4147_v13, %s10109_s14  ;;  %v12703_v13 = vsel %vm742_vm0, 0.0, %v3881_v43  ;;  %19262 = vst [vmem:[#allocation107_spill] sm:$0xff] %v12708_v45  ;;  %v3870_v19 = vsel %vm742_vm0, %v3854_v36, %v3869_v31  ;;  %v19264_v43 = vld [vmem:[#allocation111_spill] sm:$0xff]  ;;  %v3889_v31 = vrot.slane %v12253_v7, 4 }
 0x4a6   : > { %19260 = vst [vmem:[#allocation97_spill] sm:$0xff] %v12703_v13  ;;  %v4154_v58 = vmul.f32 %v12703_v13, %v19263_v0  ;;  %v12727_v0 = vperm.slane %v3870_v19, %v19193_v62  ;;  %v3883_v22 = vrot.slane %v12724_v47, 4  ;;  %v19271_v7 = vld [vmem:[#allocation115_spill] sm:$0xff] }
 0x4a7   : > { %19266 = vst [vmem:[#allocation100_spill] sm:$0xff] %v12724_v47  ;;  %v3890_v19 = vsel %vm742_vm0, %v12388_v18, %v3889_v31 }
 0x4a8   : > { %4311 = vrot.lane.b32.xlu2 %v4151_v51, %s10109_s14  ;;  %v4150_v51 = vmul.f32 %v12698_v17, %v19261_v28  ;;  %v4152_v28 = vmul.f32 %v12708_v45, %v19264_v43  ;;  %19267 = vst [vmem:[#allocation111_spill] sm:$0xff] %v12727_v0  ;;  %v3885_v43 = vrot.slane %v12727_v0, 4  ;;  %v12754_v18 = vsel %vm742_vm0, 0.0, %v3883_v22 }
 0x4aa   : > { %4307 = vrot.lane.b32.xlu0 %v4149_v9, %s10109_s14  ;;  %v3894_v9 = vperm.slane %v3888_v24, %v19192_v5  ;;  %v3901_v24 = vrot.slane %v12374_v55, 4 }
 0x4ac   : > { %v3912_v38 = vsel %vm742_vm0, %v3911_v23, %v3894_v9  ;;  %v3902_v36 = vsel %vm742_vm0, %v3594_v12, %v3901_v24  ;;  %v4153_v23 = vmul.f32 %v12672_v63, %v19269_v41  ;;  %v4155_v12 = vmul.f32 %v12724_v47, %v19271_v7 }
 0x4ad   : > { %4309 = vrot.lane.b32.xlu1 %v4150_v51, %s10109_s14  ;;  %v12731_v50 = vperm.slane %v3912_v38, %v19193_v62  ;;  %v19270_v51 = vld [vmem:[#allocation106_spill] sm:$0xff]  ;;  %v3913_v41 = vrot.slane %v3894_v9, 4  ;;  %v12762_v7 = vsel %vm742_vm0, 0.0, %v3885_v43  ;;  %v3943_v43 = vrot.slane %v12390_v59, 4 }
 0x4ae   : > { %v4157_v55 = vmul.f32 %v12727_v0, %v19270_v51  ;;  %19273 = vst [vmem:[#allocation106_spill] sm:$0xff] %v12754_v18  ;;  %v19275_v51 = vld [vmem:[#allocation116_spill] sm:$0xff] }
 0x4af   : > { %19268 = vst [vmem:[#allocation433_spill] sm:$0xff] %v12731_v50  ;;  %v3935_v38 = vrot.slane %v12731_v50, 4 }
 0x4b0   : > { %4317 = vrot.lane.b32.xlu2 %v4154_v58, %s10109_s14  ;;  %v3910_v58 = vperm.slane %v3902_v36, %v19192_v5  ;;  %19276 = vst [vmem:[#allocation116_spill] sm:$0xff] %v12762_v7 }
 0x4b1   : > { %v12757_v31 = vsel %vm742_vm0, 0.0, %v3935_v38 }
 0x4b2   : > { %v12720_v37 = vpop.permute.xlu2 %4251  ;;  %4313 = vrot.lane.b32.xlu0 %v4152_v28, %s10109_s14  ;;  %v3898_v28 = vperm.slane %v3890_v19, %v19192_v5  ;;  %v3923_v36 = vrot.slane %v3910_v58, 4  ;;  %19274 = vst [vmem:[#allocation115_spill] sm:$0xff] %v12757_v31 }
 0x4b3   : > { %19265 = vst [vmem:[#allocation108_spill] sm:$0xff] %v12720_v37  ;;  %v19277_v37 = vld [vmem:[#allocation109_spill] sm:$0xff] }
 0x4b4   : > { %v3925_v19 = vrot.slane %v3898_v28, 4  ;;  %v3924_v22 = vsel %vm742_vm0, %v3923_v36, %v3898_v28 }
 0x4b5   : > { %4315 = vrot.lane.b32.xlu1 %v4153_v23, %s10109_s14  ;;  %v3596_v23 = vpop.permute.xlu1 %3595 }
 0x4b6   : > { %v3926_v38 = vsel %vm742_vm0, %v3910_v58, %v3925_v19  ;;  %v3955_v9 = vrot.slane %v3596_v23, 4  ;;  %v4001_v58 = vrot.slane %v12274_v6, 4  ;;  %v19284_v19 = vld [vmem:[#allocation114_spill] sm:$0xff] }
 0x4b7   : > { %v12785_v28 = vperm.slane %v3926_v38, %v19193_v62  ;;  %v3945_v38 = vrot.slane %v12262_v2, 4 }
 0x4b8   : > { %4323 = vrot.lane.b32.xlu2 %v4157_v55, %s10109_s14  ;;  %v4156_v55 = vmul.f32 %v12754_v18, %v19275_v51  ;;  %v4158_v51 = vmul.f32 %v12762_v7, %v19278_v39  ;;  %v3956_v39 = vsel %vm742_vm0, %v3955_v9, %v12382_v14  ;;  %v4002_v36 = vsel %vm742_vm0, %v12412_v44, %v4001_v58 }
 0x4b9   : > { %19282 = vst [vmem:[#allocation435_spill] sm:$0xff] %v12785_v28  ;;  %v3941_v9 = vrot.slane %v12785_v28, 4  ;;  %v3957_v58 = vrot.slane %v12382_v14, 4 }
 0x4ba   : > { %4319 = vrot.lane.b32.xlu0 %v4155_v12, %s10109_s14  ;;  %v12751_v24 = vpop.permute.xlu2 %4257  ;;  %v4160_v12 = vmul.f32 %v12757_v31, %v19277_v37  ;;  %v12778_v37 = vperm.slane %v3924_v22, %v19193_v62 }
 0x4bb   : > { %19272 = vst [vmem:[#allocation112_spill] sm:$0xff] %v12751_v24  ;;  %v3914_v24 = vsel %vm742_vm0, %v3906_v34, %v3913_v41 }
 0x4bc   : > { %v12775_v29 = vperm.slane %v3914_v24, %v19193_v62  ;;  %19280 = vst [vmem:[#allocation118_spill] sm:$0xff] %v12778_v37  ;;  %v19283_v24 = vld [vmem:[#allocation120_spill] sm:$0xff] }
 0x4bd   : > { %4321 = vrot.lane.b32.xlu1 %v4156_v55, %s10109_s14  ;;  %v4159_v41 = vmul.f32 %v12731_v50, %v19283_v24  ;;  %v3944_v55 = vsel %vm742_vm0, %v3943_v43, %v12262_v2  ;;  %v12804_v24 = vperm.slane %v4002_v36, %v19192_v5  ;;  %v19285_v43 = vld [vmem:[#allocation122_spill] sm:$0xff] }
 0x4be   : > { %19279 = vst [vmem:[#allocation109_spill] sm:$0xff] %v12775_v29  ;;  %v3937_v22 = vrot.slane %v12775_v29, 4  ;;  %v3950_v2 = vperm.slane %v3944_v55, %v19192_v5 }
 0x4c0   : > { %4329 = vrot.lane.b32.xlu2 %v4160_v12, %s10109_s14  ;;  %v4163_v12 = vmul.f32 %v12778_v37, %v19284_v19  ;;  %v4161_v19 = vmul.f32 %v12775_v29, %v19285_v43  ;;  %v12818_v36 = vsel %vm742_vm0, 0.0, %v3937_v22  ;;  %v3958_v43 = vsel %vm742_vm0, %v3596_v23, %v3957_v58 }
 0x4c1   : > { %19287 = vst [vmem:[#allocation114_spill] sm:$0xff] %v12818_v36  ;;  %v3966_v23 = vperm.slane %v3958_v43, %v19192_v5 }
 0x4c2   : > { %4325 = vrot.lane.b32.xlu0 %v4158_v51, %s10109_s14  ;;  %v12781_v34 = vpop.permute.xlu2 %4263  ;;  %v3962_v51 = vperm.slane %v3956_v39, %v19192_v5  ;;  %v4013_v39 = vrot.slane %v12380_v60, 4 }
 0x4c3   : > { %19281 = vst [vmem:[#allocation434_spill] sm:$0xff] %v12781_v34  ;;  %v3946_v34 = vsel %vm742_vm0, %v12390_v59, %v3945_v38  ;;  %v12824_v59 = vsel %vm742_vm0, 0.0, %v3941_v9  ;;  %v4037_v38 = vrot.slane %v12804_v24, 4  ;;  %v19292_v9 = vld [vmem:[#allocation119_spill] sm:$0xff] }
 0x4c4   : > { %v3967_v54 = vrot.slane %v3962_v51, 4  ;;  %19288 = vst [vmem:[#allocation122_spill] sm:$0xff] %v12824_v59  ;;  %v3954_v55 = vperm.slane %v3946_v34, %v19192_v5  ;;  %v4166_v58 = vmul.f32 %v12824_v59, %v19292_v9  ;;  %v3999_v34 = vrot.slane %v12412_v44, 4 }
 0x4c5   : > { %4327 = vrot.lane.b32.xlu1 %v4159_v41, %s10109_s14  ;;  %v3939_v41 = vrot.slane %v12778_v37, 4 }
 0x4c6   : > { %v3968_v15 = vsel %vm742_vm0, %v3967_v54, %v3950_v2 }
 0x4c7   : > { %v12833_v52 = vsel %vm742_vm0, 0.0, %v3939_v41  ;;  %v12853_v9 = vperm.slane %v3968_v15, %v19193_v62  ;;  %v4011_v15 = vrot.slane %v12689_v25, 4 }
 0x4c8   : > { %4335 = vrot.lane.b32.xlu2 %v4163_v12, %s10109_s14  ;;  %v4014_v12 = vsel %vm742_vm0, %v12689_v25, %v4013_v39  ;;  %v19303_v25 = vld [vmem:[#allocation131_spill] sm:$0xff] }
 0x4c9   : > { %v12836_v39 = vperm.slane %v4014_v12, %v19192_v5  ;;  %v19293_v12 = vld [vmem:[#allocation128_spill] sm:$0xff] }
 0x4ca   : > { %4331 = vrot.lane.b32.xlu0 %v4161_v19, %s10109_s14  ;;  %v12815_v14 = vpop.permute.xlu2 %4269  ;;  %v3969_v19 = vrot.slane %v3950_v2, 4  ;;  %v4164_v43 = vmul.f32 %v12833_v52, %v19293_v12  ;;  %19295 = vst [vmem:[#allocation128_spill] sm:$0xff] %v12853_v9  ;;  %v4000_v2 = vsel %vm742_vm0, %v3999_v34, %v12274_v6  ;;  %v3991_v6 = vrot.slane %v12853_v9, 4 }
 0x4cb   : > { %19286 = vst [vmem:[#allocation120_spill] sm:$0xff] %v12815_v14  ;;  %v19290_v14 = vld [vmem:[#allocation123_spill] sm:$0xff]  ;;  %v4038_v41 = vsel %vm742_vm0, %v12836_v39, %v4037_v38  ;;  %v4006_v12 = vperm.slane %v4000_v2, %v19192_v5 }
 0x4cc   : > { %v12828_v61 = vpop.permute.xlu0 %4247  ;;  %v4162_v22 = vmul.f32 %v12818_v36, %v19290_v14  ;;  %19291 = vst [vmem:[#allocation123_spill] sm:$0xff] %v12833_v52  ;;  %v3981_v14 = vrot.slane %v3954_v55, 4  ;;  %v12865_v38 = vperm.slane %v4038_v41, %v19193_v62  ;;  %v4167_v41 = vmul.f32 %v12853_v9, %v19303_v25 }
 0x4cd   : > { %19289 = vst [vmem:[#allocation436_spill] sm:$0xff] %v12828_v61  ;;  %v3970_v61 = vsel %vm742_vm0, %v3962_v51, %v3969_v19  ;;  %v3979_v19 = vrot.slane %v3966_v23, 4 }
 0x4ce   : > { %4333 = vrot.lane.b32.xlu1 %v4162_v22, %s10109_s14  ;;  %v12856_v44 = vperm.slane %v3970_v61, %v19193_v62  ;;  %v3982_v54 = vsel %vm742_vm0, %v3966_v23, %v3981_v14  ;;  %19298 = vst [vmem:[#allocation439_spill] sm:$0xff] %v12865_v38  ;;  %v4053_v23 = vrot.slane %v12865_v38, 4 }
 0x4cf   : > { %v12850_v8 = vpop.permute.xlu1 %4249  ;;  %v12871_v61 = vperm.slane %v3982_v54, %v19193_v62  ;;  %v3980_v34 = vsel %vm742_vm0, %v3979_v19, %v3954_v55  ;;  %v4012_v54 = vsel %vm742_vm0, %v4011_v15, %v12380_v60  ;;  %v19310_v15 = vld [vmem:[#allocation132_spill] sm:$0xff] }
 0x4d0   : > { %4341 = vrot.lane.b32.xlu2 %v4166_v58, %s10109_s14  ;;  %19294 = vst [vmem:[#allocation119_spill] sm:$0xff] %v12850_v8  ;;  %v19301_v58 = vld [vmem:[#allocation129_spill] sm:$0xff]  ;;  %v12897_v55 = vperm.slane %v3980_v34, %v19193_v62  ;;  %v4018_v60 = vperm.slane %v4012_v54, %v19192_v5  ;;  %v19313_v34 = vld [vmem:[#allocation395_spill] sm:$0xff]  ;;  %v4035_v8 = vrot.slane %v12836_v39, 4  ;;  %v3993_v5 = vrot.slane %v12856_v44, 4 }
 0x4d1   : > { %19296 = vst [vmem:[#allocation437_spill] sm:$0xff] %v12856_v44  ;;  %v4165_v14 = vmul.f32 %v12785_v28, %v19301_v58  ;;  %v3997_v58 = vrot.slane %v12871_v61, 4 }
 0x4d2   : > { %4337 = vrot.lane.b32.xlu0 %v4164_v43, %s10109_s14  ;;  %v12860_v51 = vpop.permute.xlu2 %4275  ;;  %19300 = vst [vmem:[#allocation441_spill] sm:$0xff] %v12871_v61  ;;  %v19302_v43 = vld [vmem:[#allocation390_spill] sm:$0xff]  ;;  %v4036_v39 = vsel %vm742_vm0, %v4035_v8, %v12804_v24 }
 0x4d3   : > { %19297 = vst [vmem:[#allocation438_spill] sm:$0xff] %v12860_v51  ;;  %v4617_v51 = vmul.f32 %v12856_v44, %v19302_v43  ;;  %v4025_v43 = vrot.slane %v4006_v12, 4  ;;  %v19329_v24 = vld [vmem:[#allocation398_spill] sm:$0xff] }
 0x4d4   : > { %v12867_v22 = vpop.permute.xlu0 %4253  ;;  %19307 = vst [vmem:[#allocation442_spill] sm:$0xff] %v12897_v55 }
 0x4d5   : > { %19299 = vst [vmem:[#allocation440_spill] sm:$0xff] %v12867_v22  ;;  %v12894_v22 = vsel %vm742_vm0, 0.0, %v3991_v6  ;;  %v19312_v6 = vld [vmem:[#allocation394_spill] sm:$0xff] }
 0x4d6   : > { %4339 = vrot.lane.b32.xlu1 %v4165_v14, %s10109_s14  ;;  %19306 = vst [vmem:[#allocation131_spill] sm:$0xff] %v12894_v22  ;;  %v4168_v25 = vmul.f32 %v12894_v22, %v19310_v15 }
 0x4d7   : > { %v12887_v2 = vpop.permute.xlu1 %4255 }
 0x4d8   : > { %4795 = vrot.lane.b32.xlu2 %v4617_v51, %s10109_s14  ;;  %19304 = vst [vmem:[#allocation129_spill] sm:$0xff] %v12887_v2  ;;  %v12900_v51 = vsel %vm742_vm0, 0.0, %v4053_v23  ;;  %v3995_v23 = vrot.slane %v12897_v55, 4 }
 0x4d9   : > { %19308 = vst [vmem:[#allocation443_spill] sm:$0xff] %v12900_v51  ;;  %v4630_v2 = vmul.f32 %v12900_v51, %v19312_v6  ;;  %v19319_v6 = vld [vmem:[#allocation397_spill] sm:$0xff] }
 0x4da   : > { %4343 = vrot.lane.b32.xlu0 %v4167_v41, %s10109_s14  ;;  %v12891_v14 = vpop.permute.xlu2 %4281  ;;  %v12908_v41 = vsel %vm742_vm0, 0.0, %v3997_v58 }
 0x4db   : > { %19305 = vst [vmem:[#allocation390_spill] sm:$0xff] %v12891_v14  ;;  %v4026_v14 = vsel %vm742_vm0, %v4018_v60, %v4025_v43  ;;  %v4622_v54 = vmul.f32 %v12908_v41, %v19313_v34  ;;  %v12927_v43 = vsel %vm742_vm0, 0.0, %v3995_v23  ;;  %v19320_v34 = vld [vmem:[#allocation393_spill] sm:$0xff]  ;;  %v19321_v23 = vld [vmem:[#allocation379_spill] sm:$0xff] }
 0x4dc   : > { %v12903_v19 = vpop.permute.xlu0 %4259  ;;  %19311 = vst [vmem:[#allocation132_spill] sm:$0xff] %v12908_v41 }
 0x4dd   : > { %19309 = vst [vmem:[#allocation444_spill] sm:$0xff] %v12903_v19  ;;  %v12919_v19 = vperm.slane %v4026_v14, %v19193_v62  ;;  %v4620_v14 = vmul.f32 %v12927_v43, %v19320_v34  ;;  %v12950_v34 = vsel %vm742_vm0, 0.0, %v3993_v5  ;;  %v19330_v5 = vld [vmem:[#allocation385_spill] sm:$0xff] }
 0x4de   : > { %4345 = vrot.lane.b32.xlu1 %v4168_v25, %s10109_s14  ;;  %19317 = vst [vmem:[#allocation446_spill] sm:$0xff] %v12927_v43 }
 0x4df   : > { %19314 = vst [vmem:[#allocation394_spill] sm:$0xff] %v12919_v19  ;;  %v12921_v15 = vpop.permute.xlu1 %4261 }
 0x4e0   : > { %4821 = vrot.lane.b32.xlu2 %v4630_v2, %s10109_s14  ;;  %19315 = vst [vmem:[#allocation395_spill] sm:$0xff] %v12921_v15  ;;  %v4625_v2 = vmul.f32 %v12919_v19, %v19319_v6  ;;  %v4023_v15 = vrot.slane %v4018_v60, 4 }
 0x4e1   : > { %19324 = vst [vmem:[#allocation379_spill] sm:$0xff] %v12950_v34 }
 0x4e2   : > { %4805 = vrot.lane.b32.xlu0 %v4622_v54, %s10109_s14  ;;  %v12924_v58 = vpop.permute.xlu2 %4287  ;;  %v4049_v54 = vrot.slane %v12919_v19, 4  ;;  %v4024_v8 = vsel %vm742_vm0, %v4023_v15, %v4006_v12 }
 0x4e3   : > { %19316 = vst [vmem:[#allocation445_spill] sm:$0xff] %v12924_v58  ;;  %v4615_v58 = vmul.f32 %v12853_v9, %v19321_v23  ;;  %v12958_v23 = vperm.slane %v4036_v39, %v19193_v62 }
 0x4e4   : > { %v12929_v25 = vpop.permute.xlu0 %4265 }
 0x4e5   : > { %19318 = vst [vmem:[#allocation447_spill] sm:$0xff] %v12929_v25 }
 0x4e6   : > { %4811 = vrot.lane.b32.xlu1 %v4625_v2, %s10109_s14  ;;  %v12953_v2 = vsel %vm742_vm0, 0.0, %v4049_v54  ;;  %19327 = vst [vmem:[#allocation450_spill] sm:$0xff] %v12958_v23  ;;  %v4621_v54 = vmul.f32 %v12871_v61, %v19330_v5  ;;  %v19338_v5 = vld [vmem:[#allocation399_spill] sm:$0xff] }
 0x4e7   : > { %v12942_v25 = vpop.permute.xlu1 %4267  ;;  %19325 = vst [vmem:[#allocation448_spill] sm:$0xff] %v12953_v2 }
 0x4e8   : > { %4801 = vrot.lane.b32.xlu2 %v4620_v14, %s10109_s14  ;;  %19322 = vst [vmem:[#allocation397_spill] sm:$0xff] %v12942_v25  ;;  %v19328_v25 = vld [vmem:[#allocation382_spill] sm:$0xff] }
 0x4e9   : > { %v4618_v60 = vmul.f32 %v12950_v34, %v19328_v25  ;;  %v19335_v25 = vld [vmem:[#allocation396_spill] sm:$0xff] }
 0x4ea   : > { %4791 = vrot.lane.b32.xlu0 %v4615_v58, %s10109_s14  ;;  %v12947_v6 = vpop.permute.xlu2 %4293  ;;  %v4626_v58 = vmul.f32 %v12953_v2, %v19329_v24 }
 0x4eb   : > { %19323 = vst [vmem:[#allocation393_spill] sm:$0xff] %v12947_v6  ;;  %v4051_v6 = vrot.slane %v12958_v23, 4 }
 0x4ec   : > { %v12955_v14 = vpop.permute.xlu0 %4271 }
 0x4ed   : > { %19326 = vst [vmem:[#allocation449_spill] sm:$0xff] %v12955_v14  ;;  %v12970_v14 = vperm.slane %v4024_v8, %v19193_v62  ;;  %v12983_v24 = vsel %vm742_vm0, 0.0, %v4051_v6  ;;  %v19342_v6 = vld [vmem:[#allocation400_spill] sm:$0xff]  ;;  %v19343_v62 = vld [vmem:[#allocation391_spill] sm:$0xff] }
 0x4ee   : > { %4797 = vrot.lane.b32.xlu1 %v4618_v60, %s10109_s14  ;;  %19336 = vst [vmem:[#allocation396_spill] sm:$0xff] %v12983_v24 }
 0x4ef   : > { %19331 = vst [vmem:[#allocation382_spill] sm:$0xff] %v12970_v14  ;;  %v12972_v39 = vpop.permute.xlu1 %4273  ;;  %v4623_v60 = vmul.f32 %v12970_v14, %v19335_v25 }
 0x4f0   : > { %4813 = vrot.lane.b32.xlu2 %v4626_v58, %s10109_s14  ;;  %19332 = vst [vmem:[#allocation398_spill] sm:$0xff] %v12972_v39  ;;  %v19337_v58 = vld [vmem:[#allocation389_spill] sm:$0xff] }
 0x4f1   : > { %v4616_v8 = vmul.f32 %v12894_v22, %v19337_v58  ;;  %v4627_v58 = vmul.f32 %v12958_v23, %v19343_v62  ;;  %v19349_v62 = vld [vmem:[#allocation388_spill] sm:$0xff] }
 0x4f2   : > { %4803 = vrot.lane.b32.xlu0 %v4621_v54, %s10109_s14  ;;  %v12976_v12 = vpop.permute.xlu2 %4299  ;;  %v4628_v54 = vmul.f32 %v12983_v24, %v19338_v5 }
 0x4f3   : > { %19333 = vst [vmem:[#allocation385_spill] sm:$0xff] %v12976_v12  ;;  %v4629_v12 = vmul.f32 %v12865_v38, %v19342_v6 }
 0x4f4   : > { %v12978_v15 = vpop.permute.xlu0 %4277 }
 0x4f5   : > { %19334 = vst [vmem:[#allocation451_spill] sm:$0xff] %v12978_v15 }
 0x4f6   : > { %4807 = vrot.lane.b32.xlu1 %v4623_v60, %s10109_s14  ;;  %v4047_v60 = vrot.slane %v12970_v14, 4 }
 0x4f7   : > { %v12991_v39 = vpop.permute.xlu1 %4279 }
 0x4f8   : > { %4793 = vrot.lane.b32.xlu2 %v4616_v8, %s10109_s14  ;;  %19339 = vst [vmem:[#allocation389_spill] sm:$0xff] %v12991_v39  ;;  %v19344_v8 = vld [vmem:[#allocation392_spill] sm:$0xff]  ;;  %v13013_v6 = vsel %vm742_vm0, 0.0, %v4047_v60 }
 0x4f9   : > { %v4619_v5 = vmul.f32 %v12897_v55, %v19344_v8  ;;  %19347 = vst [vmem:[#allocation392_spill] sm:$0xff] %v13013_v6  ;;  %v4624_v39 = vmul.f32 %v13013_v6, %v19349_v62  ;;  %v19351_v8 = vld [vmem:[#allocation374_spill] sm:$0xff]  ;;  %v19356_v6 = vld [vmem:[#allocation375_spill] sm:$0xff] }
 0x4fa   : > { %4817 = vrot.lane.b32.xlu0 %v4628_v54, %s10109_s14  ;;  %v12994_v15 = vpop.permute.xlu2 %4305 }
 0x4fb   : > { %19340 = vst [vmem:[#allocation399_spill] sm:$0xff] %v12994_v15 }
 0x4fc   : > { %v12996_v25 = vpop.permute.xlu0 %4283 }
 0x4fd   : > { %19341 = vst [vmem:[#allocation452_spill] sm:$0xff] %v12996_v25 }
 0x4fe   : > { %4819 = vrot.lane.b32.xlu1 %v4629_v12, %s10109_s14  ;;  %v19350_v12 = vld [vmem:[#allocation373_spill] sm:$0xff] }
 0x4ff   : > { %v13007_v54 = vpop.permute.xlu1 %4285 }
 0x500   : > { %4815 = vrot.lane.b32.xlu2 %v4627_v58, %s10109_s14  ;;  %19345 = vst [vmem:[#allocation400_spill] sm:$0xff] %v13007_v54  ;;  %v4609_v58 = vmul.f32 %v12775_v29, %v19350_v12  ;;  %v4602_v12 = vmul.f32 %v12703_v13, %v19356_v6 }
 0x502   : > { %4799 = vrot.lane.b32.xlu0 %v4619_v5, %s10109_s14  ;;  %v13010_v25 = vpop.permute.xlu2 %4311  ;;  %v4601_v5 = vmul.f32 %v12672_v63, %v19351_v8 }
 0x503   : > { %19346 = vst [vmem:[#allocation391_spill] sm:$0xff] %v13010_v25  ;;  %v19355_v25 = vld [vmem:[#allocation370_spill] sm:$0xff] }
 0x504   : > { %v13015_v15 = vpop.permute.xlu0 %4289  ;;  %v4606_v62 = vmul.f32 %v12762_v7, %v19355_v25 }
 0x505   : > { %19348 = vst [vmem:[#allocation453_spill] sm:$0xff] %v13015_v15 }
 0x506   : > { %4809 = vrot.lane.b32.xlu1 %v4624_v39, %s10109_s14  ;;  %v19357_v39 = vld [vmem:[#allocation387_spill] sm:$0xff] }
 0x507   : > { %v13025_v54 = vpop.permute.xlu1 %4291 }
 0x508   : > { %4779 = vrot.lane.b32.xlu2 %v4609_v58, %s10109_s14  ;;  %19352 = vst [vmem:[#allocation388_spill] sm:$0xff] %v13025_v54  ;;  %v4614_v58 = vmul.f32 %v12824_v59, %v19357_v39  ;;  %v19362_v54 = vld [vmem:[#allocation380_spill] sm:$0xff] }
 0x509   : > { %v4607_v6 = vmul.f32 %v12731_v50, %v19362_v54 }
 0x50a   : > { %4763 = vrot.lane.b32.xlu0 %v4601_v5, %s10109_s14  ;;  %v13028_v60 = vpop.permute.xlu2 %4317 }
 0x50b   : > { %19353 = vst [vmem:[#allocation373_spill] sm:$0xff] %v13028_v60  ;;  %v19361_v60 = vld [vmem:[#allocation372_spill] sm:$0xff] }
 0x50c   : > { %v13030_v15 = vpop.permute.xlu0 %4295  ;;  %v4599_v25 = vmul.f32 %v12665_v4, %v19361_v60 }
 0x50d   : > { %19354 = vst [vmem:[#allocation374_spill] sm:$0xff] %v13030_v15 }
 0x50e   : > { %4773 = vrot.lane.b32.xlu1 %v4606_v62, %s10109_s14  ;;  %v19363_v62 = vld [vmem:[#allocation377_spill] sm:$0xff] }
 0x50f   : > { %v13040_v8 = vpop.permute.xlu1 %4297 }
 0x510   : > { %4765 = vrot.lane.b32.xlu2 %v4602_v12, %s10109_s14  ;;  %19358 = vst [vmem:[#allocation370_spill] sm:$0xff] %v13040_v8  ;;  %v4604_v12 = vmul.f32 %v12754_v18, %v19363_v62  ;;  %v19368_v8 = vld [vmem:[#allocation386_spill] sm:$0xff] }
 0x511   : > { %v4613_v54 = vmul.f32 %v12785_v28, %v19368_v8 }
 0x512   : > { %4789 = vrot.lane.b32.xlu0 %v4614_v58, %s10109_s14  ;;  %v13043_v5 = vpop.permute.xlu2 %4323 }
 0x513   : > { %19359 = vst [vmem:[#allocation375_spill] sm:$0xff] %v13043_v5  ;;  %v19367_v5 = vld [vmem:[#allocation378_spill] sm:$0xff] }
 0x514   : > { %v13045_v15 = vpop.permute.xlu0 %4301  ;;  %v4605_v60 = vmul.f32 %v12727_v0, %v19367_v5 }
 0x515   : > { %19360 = vst [vmem:[#allocation387_spill] sm:$0xff] %v13045_v15 }
 0x516   : > { %4759 = vrot.lane.b32.xlu1 %v4599_v25, %s10109_s14  ;;  %v19369_v25 = vld [vmem:[#allocation383_spill] sm:$0xff] }
 0x517   : > { %v13055_v39 = vpop.permute.xlu1 %4303 }
 0x518   : > { %4775 = vrot.lane.b32.xlu2 %v4607_v6, %s10109_s14  ;;  %19364 = vst [vmem:[#allocation372_spill] sm:$0xff] %v13055_v39  ;;  %v4610_v6 = vmul.f32 %v12818_v36, %v19369_v25  ;;  %v19374_v39 = vld [vmem:[#allocation381_spill] sm:$0xff] }
 0x519   : > { %v4608_v8 = vmul.f32 %v12757_v31, %v19374_v39 }
 0x51a   : > { %4769 = vrot.lane.b32.xlu0 %v4604_v12, %s10109_s14  ;;  %v13058_v58 = vpop.permute.xlu2 %4329 }
 0x51b   : > { %19365 = vst [vmem:[#allocation380_spill] sm:$0xff] %v13058_v58  ;;  %v19373_v58 = vld [vmem:[#allocation376_spill] sm:$0xff] }
 0x51c   : > { %v13060_v15 = vpop.permute.xlu0 %4307  ;;  %v4612_v5 = vmul.f32 %v12833_v52, %v19373_v58 }
 0x51d   : > { %19366 = vst [vmem:[#allocation377_spill] sm:$0xff] %v13060_v15 }
 0x51e   : > { %4771 = vrot.lane.b32.xlu1 %v4605_v60, %s10109_s14  ;;  %v19375_v60 = vld [vmem:[#allocation364_spill] sm:$0xff] }
 0x51f   : > { %v13070_v62 = vpop.permute.xlu1 %4309 }
 0x520   : > { %4787 = vrot.lane.b32.xlu2 %v4613_v54, %s10109_s14  ;;  %19370 = vst [vmem:[#allocation378_spill] sm:$0xff] %v13070_v62  ;;  %v4600_v54 = vmul.f32 %v12708_v45, %v19375_v60  ;;  %v19380_v62 = vld [vmem:[#allocation363_spill] sm:$0xff]  ;;  %v19526_v45 = vld [vmem:[#allocation268_spill] sm:$0xff] }
 0x521   : > { %v4590_v39 = vmul.f32 %v12596_v35, %v19380_v62  ;;  %v19390_v35 = vld [vmem:[#allocation362_spill] sm:$0xff] }
 0x522   : > { %4781 = vrot.lane.b32.xlu0 %v4610_v6, %s10109_s14  ;;  %v13073_v12 = vpop.permute.xlu2 %4335 }
 0x523   : > { %19371 = vst [vmem:[#allocation386_spill] sm:$0xff] %v13073_v12  ;;  %v19379_v12 = vld [vmem:[#allocation367_spill] sm:$0xff] }
 0x524   : > { %v13075_v15 = vpop.permute.xlu0 %4313  ;;  %v4603_v58 = vmul.f32 %v12724_v47, %v19379_v12 }
 0x525   : > { %19372 = vst [vmem:[#allocation383_spill] sm:$0xff] %v13075_v15 }
 0x526   : > { %4785 = vrot.lane.b32.xlu1 %v4612_v5, %s10109_s14  ;;  %v19381_v5 = vld [vmem:[#allocation384_spill] sm:$0xff] }
 0x527   : > { %v13085_v25 = vpop.permute.xlu1 %4315 }
 0x528   : > { %4777 = vrot.lane.b32.xlu2 %v4608_v8, %s10109_s14  ;;  %19376 = vst [vmem:[#allocation376_spill] sm:$0xff] %v13085_v25  ;;  %v4611_v8 = vmul.f32 %v12778_v37, %v19381_v5  ;;  %v19385_v25 = vld [vmem:[#allocation351_spill] sm:$0xff] }
 0x529   : > { %v4583_v62 = vmul.f32 %v12517_v10, %v19385_v25  ;;  %v4589_v25 = vmul.f32 %v12567_v21, %v19390_v35  ;;  %v19400_v21 = vld [vmem:[#allocation360_spill] sm:$0xff] }
 0x52a   : > { %4761 = vrot.lane.b32.xlu0 %v4600_v54, %s10109_s14  ;;  %v13088_v6 = vpop.permute.xlu2 %4341 }
 0x52b   : > { %19377 = vst [vmem:[#allocation381_spill] sm:$0xff] %v13088_v6 }
 0x52c   : > { %v13090_v15 = vpop.permute.xlu0 %4319 }
 0x52d   : > { %19378 = vst [vmem:[#allocation364_spill] sm:$0xff] %v13090_v15  ;;  %v19384_v15 = vld [vmem:[#allocation338_spill] sm:$0xff] }
 0x52e   : > { %4767 = vrot.lane.b32.xlu1 %v4603_v58, %s10109_s14  ;;  %v4585_v12 = vmul.f32 %v12559_v1, %v19384_v15  ;;  %v19386_v58 = vld [vmem:[#allocation366_spill] sm:$0xff] }
 0x52f   : > { %v13100_v60 = vpop.permute.xlu1 %4321 }
 0x530   : > { %4741 = vrot.lane.b32.xlu2 %v4590_v39, %s10109_s14  ;;  %19382 = vst [vmem:[#allocation367_spill] sm:$0xff] %v13100_v60  ;;  %v4593_v39 = vmul.f32 %v12618_v53, %v19386_v58  ;;  %v19395_v53 = vld [vmem:[#allocation369_spill] sm:$0xff] }
 0x531   : > { %v4596_v35 = vmul.f32 %v12646_v42, %v19395_v53  ;;  %v4587_v53 = vmul.f32 %v12562_v27, %v19400_v21  ;;  %v19406_v27 = vld [vmem:[#allocation325_spill] sm:$0xff] }
 0x532   : > { %4783 = vrot.lane.b32.xlu0 %v4611_v8, %s10109_s14  ;;  %v4796_v54 = vpop.permute.xlu2 %4795 }
 0x534   : > { %v13103_v6 = vpop.permute.xlu0 %4325 }
 0x535   : > { %19383 = vst [vmem:[#allocation363_spill] sm:$0xff] %v13103_v6  ;;  %v19389_v6 = vld [vmem:[#allocation371_spill] sm:$0xff] }
 0x536   : > { %4731 = vrot.lane.b32.xlu1 %v4585_v12, %s10109_s14  ;;  %v4598_v15 = vmul.f32 %v12698_v17, %v19389_v6  ;;  %v19391_v12 = vld [vmem:[#allocation357_spill] sm:$0xff] }
 0x537   : > { %v13113_v5 = vpop.permute.xlu1 %4327 }
 0x538   : > { %4727 = vrot.lane.b32.xlu2 %v4583_v62, %s10109_s14  ;;  %19387 = vst [vmem:[#allocation384_spill] sm:$0xff] %v13113_v5  ;;  %v4586_v62 = vmul.f32 %v12591_v48, %v19391_v12  ;;  %v19452_v48 = vld [vmem:[#allocation392_spill] sm:$0xff] }
 0x53a   : > { %4747 = vrot.lane.b32.xlu0 %v4593_v39, %s10109_s14  ;;  %v4822_v8 = vpop.permute.xlu2 %4821 }
 0x53c   : > { %v13116_v60 = vpop.permute.xlu0 %4331 }
 0x53d   : > { %19388 = vst [vmem:[#allocation338_spill] sm:$0xff] %v13116_v60  ;;  %v19394_v60 = vld [vmem:[#allocation344_spill] sm:$0xff] }
 0x53e   : > { %4757 = vrot.lane.b32.xlu1 %v4598_v15, %s10109_s14  ;;  %v4588_v6 = vmul.f32 %v12601_v33, %v19394_v60  ;;  %v19396_v15 = vld [vmem:[#allocation350_spill] sm:$0xff]  ;;  %v19435_v33 = vld [vmem:[#allocation59_spill] sm:$0xff] }
 0x540   : > { %4739 = vrot.lane.b32.xlu2 %v4589_v25, %s10109_s14  ;;  %v13126_v58 = vpop.permute.xlu1 %4333  ;;  %v4591_v25 = vmul.f32 %v12615_v16, %v19396_v15 }
 0x541   : > { %19392 = vst [vmem:[#allocation351_spill] sm:$0xff] %v13126_v58 }
 0x542   : > { %4733 = vrot.lane.b32.xlu0 %v4586_v62, %s10109_s14  ;;  %v4802_v39 = vpop.permute.xlu2 %4801 }
 0x544   : > { %v13129_v5 = vpop.permute.xlu0 %4337 }
 0x545   : > { %19393 = vst [vmem:[#allocation366_spill] sm:$0xff] %v13129_v5  ;;  %v19399_v5 = vld [vmem:[#allocation356_spill] sm:$0xff] }
 0x546   : > { %4737 = vrot.lane.b32.xlu1 %v4588_v6, %s10109_s14  ;;  %v4594_v60 = vmul.f32 %v12651_v46, %v19399_v5  ;;  %v19401_v6 = vld [vmem:[#allocation361_spill] sm:$0xff]  ;;  %v4558_v5 = vmul.f32 %v12908_v41, %v19145_v26  ;;  %v4561_v26 = vmul.f32 %v12919_v19, %v19153_v49 }
 0x548   : > { %4753 = vrot.lane.b32.xlu2 %v4596_v35, %s10109_s14  ;;  %v13139_v12 = vpop.permute.xlu1 %4339  ;;  %v4597_v35 = vmul.f32 %v12668_v57, %v19401_v6  ;;  %v19456_v57 = vld [vmem:[#allocation240_spill] sm:$0xff] }
 0x549   : > { %19397 = vst [vmem:[#allocation371_spill] sm:$0xff] %v13139_v12 }
 0x54a   : > { %4743 = vrot.lane.b32.xlu0 %v4591_v25, %s10109_s14  ;;  %v4814_v62 = vpop.permute.xlu2 %4813 }
 0x54c   : > { %v13142_v58 = vpop.permute.xlu0 %4343 }
 0x54d   : > { %19398 = vst [vmem:[#allocation362_spill] sm:$0xff] %v13142_v58  ;;  %v4553_v58 = vmul.f32 %v12856_v44, %v19135_v40  ;;  %v4566_v40 = vmul.f32 %v12900_v51, %v19159_v30 }
 0x54e   : > { %4749 = vrot.lane.b32.xlu1 %v4594_v60, %s10109_s14 }
 0x54f   : > { %v13161_v12 = vadd.f32 %v4796_v54, %v4553_v58  ;;  %v19407_v54 = vld [vmem:[#allocation365_spill] sm:$0xff] }
 0x550   : > { %4735 = vrot.lane.b32.xlu2 %v4587_v53, %s10109_s14  ;;  %v13152_v15 = vpop.permute.xlu1 %4345  ;;  %v19405_v53 = vld [vmem:[#allocation355_spill] sm:$0xff]  ;;  %v4592_v58 = vmul.f32 %v12643_v11, %v19407_v54 }
 0x551   : > { %19402 = vst [vmem:[#allocation357_spill] sm:$0xff] %v13152_v15  ;;  %v4584_v6 = vmul.f32 %v12541_v3, %v19405_v53  ;;  %v4569_v15 = vmul.f32 %v12405_v32, %v19406_v27 }
 0x552   : > { %4755 = vrot.lane.b32.xlu0 %v4597_v35, %s10109_s14  ;;  %v13155_v25 = vpop.permute.xlu2 %4793  ;;  %19403 = vst [vmem:[#allocation344_spill] sm:$0xff] %v13161_v12  ;;  %v19410_v35 = vld [vmem:[#allocation368_spill] sm:$0xff] }
 0x553   : > { %v4595_v49 = vmul.f32 %v12622_v20, %v19410_v35  ;;  %v19425_v20 = vld [vmem:[#allocation65_spill] sm:$0xff]  ;;  %v19517_v12 = vld [vmem:[#allocation280_spill] sm:$0xff] }
 0x554   : > { %v4806_v21 = vpop.permute.xlu0 %4805 }
 0x555   : > { %v13163_v60 = vadd.f32 %v4806_v21, %v4558_v5  ;;  %v13179_v21 = vadd.f32 %v4822_v8, %v4566_v40  ;;  %v19412_v8 = vld [vmem:[#allocation72_spill] sm:$0xff] }
 0x556   : > { %4729 = vrot.lane.b32.xlu1 %v4584_v6, %s10109_s14  ;;  %v4551_v40 = vmul.f32 %v12853_v9, %v19412_v8  ;;  %v19419_v9 = vld [vmem:[#allocation84_spill] sm:$0xff] }
 0x557   : > { %19404 = vst [vmem:[#allocation369_spill] sm:$0xff] %v13163_v60 }
 0x558   : > { %4699 = vrot.lane.b32.xlu2 %v4569_v15, %s10109_s14  ;;  %v4812_v5 = vpop.permute.xlu1 %4811  ;;  %19408 = vst [vmem:[#allocation350_spill] sm:$0xff] %v13179_v21  ;;  %v19411_v15 = vld [vmem:[#allocation332_spill] sm:$0xff] }
 0x559   : > { %v13181_v27 = vadd.f32 %v4812_v5, %v4561_v26  ;;  %v4582_v3 = vmul.f32 %v12546_v56, %v19411_v15  ;;  %v19413_v26 = vld [vmem:[#allocation78_spill] sm:$0xff]  ;;  %v19415_v5 = vld [vmem:[#allocation71_spill] sm:$0xff] }
 0x55a   : > { %4745 = vrot.lane.b32.xlu0 %v4592_v58, %s10109_s14  ;;  %v13184_v53 = vpop.permute.xlu2 %4815  ;;  %v4554_v54 = vmul.f32 %v12950_v34, %v19413_v26  ;;  %v19414_v58 = vld [vmem:[#allocation333_spill] sm:$0xff]  ;;  %v4557_v26 = vmul.f32 %v12871_v61, %v19419_v9  ;;  %v19426_v9 = vld [vmem:[#allocation102_spill] sm:$0xff] }
 0x55b   : > { %19409 = vst [vmem:[#allocation356_spill] sm:$0xff] %v13181_v27  ;;  %v4574_v30 = vmul.f32 %v19415_v5, %v19414_v58  ;;  %v4562_v5 = vmul.f32 %v12953_v2, %v19426_v9 }
 0x55c   : > { %v4792_v6 = vpop.permute.xlu0 %4791 }
 0x55d   : > { %v13200_v32 = vadd.f32 %v4792_v6, %v4551_v40  ;;  %v19423_v40 = vld [vmem:[#allocation432_spill] sm:$0xff] }
 0x55e   : > { %4751 = vrot.lane.b32.xlu1 %v4595_v49, %s10109_s14  ;;  %v19418_v49 = vld [vmem:[#allocation79_spill] sm:$0xff] }
 0x55f   : > { %19416 = vst [vmem:[#allocation360_spill] sm:$0xff] %v13200_v32  ;;  %v4556_v8 = vmul.f32 %v12927_v43, %v19418_v49  ;;  %v19480_v32 = vld [vmem:[#allocation258_spill] sm:$0xff] }
 0x560   : > { %4725 = vrot.lane.b32.xlu2 %v4582_v3, %s10109_s14  ;;  %v4798_v11 = vpop.permute.xlu1 %4797  ;;  %v19427_v3 = vld [vmem:[#allocation85_spill] sm:$0xff] }
 0x561   : > { %v13202_v35 = vadd.f32 %v4798_v11, %v4554_v54  ;;  %v13213_v58 = vadd.f32 %v4802_v39, %v4556_v8  ;;  %v19422_v11 = vld [vmem:[#allocation339_spill] sm:$0xff]  ;;  %v4559_v39 = vmul.f32 %v12970_v14, %v19427_v3  ;;  %v19429_v8 = vld [vmem:[#allocation430_spill] sm:$0xff] }
 0x562   : > { %4709 = vrot.lane.b32.xlu0 %v4574_v30, %s10109_s14  ;;  %v13205_v15 = vpop.permute.xlu2 %4779  ;;  %v4577_v54 = vmul.f32 %v19423_v40, %v19422_v11  ;;  %v19424_v30 = vld [vmem:[#allocation331_spill] sm:$0xff]  ;;  %v13231_v40 = vadd.f32 %v4814_v62, %v4562_v5  ;;  %v19436_v62 = vld [vmem:[#allocation125_spill] sm:$0xff] }
 0x563   : > { %19417 = vst [vmem:[#allocation361_spill] sm:$0xff] %v13202_v35  ;;  %v4572_v16 = vmul.f32 %v19425_v20, %v19424_v30  ;;  %v19432_v20 = vld [vmem:[#allocation308_spill] sm:$0xff]  ;;  %v19433_v3 = vld [vmem:[#allocation431_spill] sm:$0xff]  ;;  %v4564_v5 = vmul.f32 %v12983_v24, %v19436_v62  ;;  %v19483_v35 = vld [vmem:[#allocation262_spill] sm:$0xff] }
 0x564   : > { %v4804_v56 = vpop.permute.xlu0 %4803  ;;  %19420 = vst [vmem:[#allocation355_spill] sm:$0xff] %v13213_v58  ;;  %v4570_v46 = vmul.f32 %v19433_v3, %v19432_v20  ;;  %v19487_v58 = vld [vmem:[#allocation64_spill] sm:$0xff]  ;;  %v19513_v24 = vld [vmem:[#allocation167_spill] sm:$0xff] }
 0x565   : > { %v13215_v6 = vadd.f32 %v4804_v56, %v4557_v26  ;;  %v19428_v56 = vld [vmem:[#allocation302_spill] sm:$0xff]  ;;  %19430 = vst [vmem:[#allocation365_spill] sm:$0xff] %v13231_v40  ;;  %v19475_v40 = vld [vmem:[#allocation143_spill] sm:$0xff] }
 0x566   : > { %4715 = vrot.lane.b32.xlu1 %v4577_v54, %s10109_s14  ;;  %v4567_v26 = vmul.f32 %v19429_v8, %v19428_v56 }
 0x567   : > { %19421 = vst [vmem:[#allocation325_spill] sm:$0xff] %v13215_v6  ;;  %v19489_v6 = vld [vmem:[#allocation276_spill] sm:$0xff] }
 0x568   : > { %4705 = vrot.lane.b32.xlu2 %v4572_v16, %s10109_s14  ;;  %v4808_v11 = vpop.permute.xlu1 %4807  ;;  %v19434_v16 = vld [vmem:[#allocation343_spill] sm:$0xff] }
 0x569   : > { %v13233_v30 = vadd.f32 %v4808_v11, %v4559_v39  ;;  %v4578_v17 = vmul.f32 %v19435_v33, %v19434_v16  ;;  %v19437_v39 = vld [vmem:[#allocation126_spill] sm:$0xff]  ;;  %v19439_v11 = vld [vmem:[#allocation69_spill] sm:$0xff]  ;;  %v19443_v33 = vld [vmem:[#allocation80_spill] sm:$0xff] }
 0x56a   : > { %4695 = vrot.lane.b32.xlu0 %v4567_v26, %s10109_s14  ;;  %v13236_v49 = vpop.permute.xlu2 %4765  ;;  %v4565_v56 = vmul.f32 %v12865_v38, %v19437_v39  ;;  %v19438_v26 = vld [vmem:[#allocation314_spill] sm:$0xff]  ;;  %v4555_v39 = vmul.f32 %v12897_v55, %v19443_v33  ;;  %v19450_v33 = vld [vmem:[#allocation121_spill] sm:$0xff] }
 0x56b   : > { %19431 = vst [vmem:[#allocation368_spill] sm:$0xff] %v13233_v30  ;;  %v4573_v54 = vmul.f32 %v19439_v11, %v19438_v26  ;;  %v19449_v11 = vld [vmem:[#allocation63_spill] sm:$0xff] }
 0x56c   : > { %v4818_v9 = vpop.permute.xlu0 %4817 }
 0x56d   : > { %v13252_v1 = vadd.f32 %v4818_v9, %v4564_v5  ;;  %v19447_v5 = vld [vmem:[#allocation55_spill] sm:$0xff] }
 0x56e   : > { %4701 = vrot.lane.b32.xlu1 %v4570_v46, %s10109_s14  ;;  %v19442_v46 = vld [vmem:[#allocation74_spill] sm:$0xff] }
 0x56f   : > { %19440 = vst [vmem:[#allocation332_spill] sm:$0xff] %v13252_v1  ;;  %v4552_v62 = vmul.f32 %v12894_v22, %v19442_v46  ;;  %v19451_v22 = vld [vmem:[#allocation103_spill] sm:$0xff]  ;;  %v19459_v46 = vld [vmem:[#allocation246_spill] sm:$0xff]  ;;  %v19467_v1 = vld [vmem:[#allocation140_spill] sm:$0xff] }
 0x570   : > { %4717 = vrot.lane.b32.xlu2 %v4578_v17, %s10109_s14  ;;  %v4820_v8 = vpop.permute.xlu1 %4819  ;;  %v4563_v17 = vmul.f32 %v12958_v23, %v19450_v33  ;;  %v19485_v23 = vld [vmem:[#allocation250_spill] sm:$0xff] }
 0x571   : > { %v13254_v20 = vadd.f32 %v4820_v8, %v4565_v56  ;;  %v13266_v26 = vadd.f32 %v13155_v25, %v4552_v62  ;;  %v19446_v8 = vld [vmem:[#allocation337_spill] sm:$0xff]  ;;  %v4560_v25 = vmul.f32 %v19452_v48, %v19451_v22  ;;  %v19454_v62 = vld [vmem:[#allocation83_spill] sm:$0xff]  ;;  %v19464_v22 = vld [vmem:[#allocation148_spill] sm:$0xff] }
 0x572   : > { %4707 = vrot.lane.b32.xlu0 %v4573_v54, %s10109_s14  ;;  %v13257_v16 = vpop.permute.xlu2 %4775  ;;  %v4575_v54 = vmul.f32 %v19447_v5, %v19446_v8  ;;  %v19448_v56 = vld [vmem:[#allocation321_spill] sm:$0xff]  ;;  %v19455_v5 = vld [vmem:[#allocation142_spill] sm:$0xff] }
 0x573   : > { %19441 = vst [vmem:[#allocation72_spill] sm:$0xff] %v13254_v20  ;;  %v4568_v10 = vmul.f32 %v19449_v11, %v19448_v56  ;;  %v13286_v56 = vmul.f32 %v19456_v57, %v19455_v5  ;;  %v19458_v11 = vld [vmem:[#allocation145_spill] sm:$0xff]  ;;  %v19468_v5 = vld [vmem:[#allocation238_spill] sm:$0xff] }
 0x574   : > { %v4800_v3 = vpop.permute.xlu0 %4799  ;;  %19444 = vst [vmem:[#allocation78_spill] sm:$0xff] %v13266_v26  ;;  %v13290_v42 = vmul.f32 %v19459_v46, %v19458_v11  ;;  %v13306_v57 = vmul.f32 %v19468_v5, %v19467_v1  ;;  %v19469_v20 = vld [vmem:[#allocation141_spill] sm:$0xff]  ;;  %v19479_v5 = vld [vmem:[#allocation154_spill] sm:$0xff] }
 0x575   : > { %v13268_v9 = vadd.f32 %v4800_v3, %v4555_v39  ;;  %v19453_v3 = vld [vmem:[#allocation345_spill] sm:$0xff]  ;;  %19457 = vst [vmem:[#allocation79_spill] sm:$0xff] %v13286_v56  ;;  %v19592_v56 = vld [vmem:[#allocation316_spill] sm:$0xff] }
 0x576   : > { %4711 = vrot.lane.b32.xlu1 %v4575_v54, %s10109_s14  ;;  %v4580_v39 = vmul.f32 %v19454_v62, %v19453_v3  ;;  %19460 = vst [vmem:[#allocation84_spill] sm:$0xff] %v13290_v42  ;;  %v13293_v54 = vadd.f32 %v13184_v53, %v4563_v17  ;;  %v19465_v3 = vld [vmem:[#allocation234_spill] sm:$0xff]  ;;  %v19470_v11 = vld [vmem:[#allocation245_spill] sm:$0xff]  ;;  %v19471_v53 = vld [vmem:[#allocation144_spill] sm:$0xff] }
 0x577   : > { %19445 = vst [vmem:[#allocation333_spill] sm:$0xff] %v13268_v9  ;;  %v13302_v62 = vmul.f32 %v19465_v3, %v19464_v22  ;;  %v13310_v46 = vmul.f32 %v19470_v11, %v19469_v20  ;;  %v19472_v17 = vld [vmem:[#allocation244_spill] sm:$0xff]  ;;  %v19476_v26 = vld [vmem:[#allocation233_spill] sm:$0xff]  ;;  %v19477_v3 = vld [vmem:[#allocation146_spill] sm:$0xff] }
 0x578   : > { %4697 = vrot.lane.b32.xlu2 %v4568_v10, %s10109_s14  ;;  %v4810_v8 = vpop.permute.xlu1 %4809  ;;  %19461 = vst [vmem:[#allocation339_spill] sm:$0xff] %v13293_v54  ;;  %v13322_v22 = vmul.f32 %v19476_v26, %v19475_v40  ;;  %v19478_v9 = vld [vmem:[#allocation239_spill] sm:$0xff]  ;;  %v19486_v26 = vld [vmem:[#allocation349_spill] sm:$0xff]  ;;  %v19620_v42 = vld [vmem:[#allocation342_spill] sm:$0xff] }
 0x579   : > { %v13295_v33 = vadd.f32 %v4810_v8, %v4560_v25  ;;  %19466 = vst [vmem:[#allocation85_spill] sm:$0xff] %v13302_v62  ;;  %v13314_v25 = vmul.f32 %v19472_v17, %v19471_v53  ;;  %v19473_v8 = vld [vmem:[#allocation150_spill] sm:$0xff]  ;;  %v13326_v1 = vmul.f32 %v19478_v9, %v19477_v3  ;;  %v13332_v53 = vmul.f32 %v19480_v32, %v19479_v5  ;;  %v19482_v17 = vld [vmem:[#allocation147_spill] sm:$0xff]  ;;  %v19488_v9 = vld [vmem:[#allocation157_spill] sm:$0xff] }
 0x57a   : > { %4721 = vrot.lane.b32.xlu0 %v4580_v39, %s10109_s14  ;;  %v13298_v10 = vpop.permute.xlu2 %4787  ;;  %v19474_v39 = vld [vmem:[#allocation252_spill] sm:$0xff]  ;;  %v4581_v3 = vmul.f32 %v19487_v58, %v19486_v26  ;;  %v13346_v55 = vmul.f32 %v19489_v6, %v19488_v9  ;;  %v19491_v20 = vld [vmem:[#allocation149_spill] sm:$0xff]  ;;  %v19501_v58 = vld [vmem:[#allocation263_spill] sm:$0xff] }
 0x57b   : > { %19462 = vst [vmem:[#allocation331_spill] sm:$0xff] %v13295_v33  ;;  %v13318_v30 = vmul.f32 %v19474_v39, %v19473_v8  ;;  %v13336_v8 = vmul.f32 %v19483_v35, %v19482_v17  ;;  %v19484_v39 = vld [vmem:[#allocation151_spill] sm:$0xff]  ;;  %v19492_v33 = vld [vmem:[#allocation257_spill] sm:$0xff]  ;;  %v19493_v5 = vld [vmem:[#allocation160_spill] sm:$0xff] }
 0x57c   : > { %19463 = vst [vmem:[#allocation102_spill] sm:$0xff] %v13298_v10  ;;  %v4764_v11 = vpop.permute.xlu0 %4763  ;;  %v13340_v40 = vmul.f32 %v19485_v23, %v19484_v39  ;;  %v13350_v54 = vmul.f32 %v19492_v33, %v19491_v20  ;;  %v19494_v32 = vld [vmem:[#allocation264_spill] sm:$0xff]  ;;  %v19496_v17 = vld [vmem:[#allocation326_spill] sm:$0xff]  ;;  %v19497_v35 = vld [vmem:[#allocation77_spill] sm:$0xff] }
 0x57d   : > { %19481 = vst [vmem:[#allocation302_spill] sm:$0xff] %v13332_v53  ;;  %v13354_v27 = vmul.f32 %v19494_v32, %v19493_v5  ;;  %v4579_v21 = vmul.f32 %v19497_v35, %v19496_v17  ;;  %v19498_v39 = vld [vmem:[#allocation155_spill] sm:$0xff]  ;;  %v19499_v23 = vld [vmem:[#allocation256_spill] sm:$0xff]  ;;  %v19503_v6 = vld [vmem:[#allocation270_spill] sm:$0xff] }
 0x57e   : > { %19490 = vst [vmem:[#allocation308_spill] sm:$0xff] %v13346_v55  ;;  %v13360_v48 = vmul.f32 %v19499_v23, %v19498_v39  ;;  %v19500_v26 = vld [vmem:[#allocation152_spill] sm:$0xff]  ;;  %v19505_v20 = vld [vmem:[#allocation158_spill] sm:$0xff]  ;;  %4723 = vrot.lane.b32.xlu1 %v4581_v3, %s10109_s14  ;;  %v19508_v17 = vld [vmem:[#allocation251_spill] sm:$0xff] }
 0x57f   : > { %19495 = vst [vmem:[#allocation343_spill] sm:$0xff] %v13354_v27  ;;  %v13364_v38 = vmul.f32 %v19501_v58, %v19500_v26  ;;  %v19502_v9 = vld [vmem:[#allocation164_spill] sm:$0xff]  ;;  %v19506_v33 = vld [vmem:[#allocation274_spill] sm:$0xff]  ;;  %v19516_v3 = vld [vmem:[#allocation161_spill] sm:$0xff] }
 0x580   : > { %v13368_v37 = vmul.f32 %v19503_v6, %v19502_v9  ;;  %v13372_v31 = vmul.f32 %v19506_v33, %v19505_v20  ;;  %v19507_v5 = vld [vmem:[#allocation156_spill] sm:$0xff]  ;;  %v19509_v39 = vld [vmem:[#allocation50_spill] sm:$0xff]  ;;  %4719 = vrot.lane.b32.xlu2 %v4579_v21, %s10109_s14  ;;  %v19511_v9 = vld [vmem:[#allocation327_spill] sm:$0xff]  ;;  %v13392_v60 = vmul.f32 %v19517_v12, %v19516_v3  ;;  %v4774_v21 = vpop.permute.xlu1 %4773 }
 0x581   : > { %v13377_v32 = vmul.f32 %v19508_v17, %v19507_v5  ;;  %v4537_v23 = vmul.f32 %v12672_v63, %v19509_v39  ;;  %v19510_v35 = vld [vmem:[#allocation56_spill] sm:$0xff]  ;;  %v19512_v6 = vld [vmem:[#allocation51_spill] sm:$0xff]  ;;  %v19520_v17 = vld [vmem:[#allocation269_spill] sm:$0xff] }
 0x582   : > { %19504 = vst [vmem:[#allocation125_spill] sm:$0xff] %v13368_v37  ;;  %v4542_v26 = vmul.f32 %v12762_v7, %v19510_v35  ;;  %v4571_v58 = vmul.f32 %v19512_v6, %v19511_v9  ;;  %v19514_v20 = vld [vmem:[#allocation288_spill] sm:$0xff]  ;;  %v19519_v5 = vld [vmem:[#allocation159_spill] sm:$0xff]  ;;  %v19523_v63 = vld [vmem:[#allocation294_spill] sm:$0xff] }
 0x583   : > { %v13388_v33 = vmul.f32 %v19514_v20, %v19513_v24  ;;  %19518 = vst [vmem:[#allocation314_spill] sm:$0xff] %v13392_v60  ;;  %v13396_v47 = vmul.f32 %v19520_v17, %v19519_v5  ;;  %v19522_v39 = vld [vmem:[#allocation171_spill] sm:$0xff]  ;;  %v19525_v7 = vld [vmem:[#allocation165_spill] sm:$0xff]  ;;  %v13410_v14 = vadd.f32 %v4764_v11, %v4537_v23  ;;  %v13415_v5 = vpop.permute.xlu2 %4777  ;;  %v19537_v12 = vld [vmem:[#allocation168_spill] sm:$0xff] }
 0x584   : > { %v13400_v35 = vmul.f32 %v19523_v63, %v19522_v39  ;;  %v13404_v9 = vmul.f32 %v19526_v45, %v19525_v7  ;;  %v19528_v6 = vld [vmem:[#allocation163_spill] sm:$0xff]  ;;  %v13412_v3 = vadd.f32 %v4774_v21, %v4542_v26  ;;  %4703 = vrot.lane.b32.xlu0 %v4571_v58, %s10109_s14  ;;  %19533 = vst [vmem:[#allocation345_spill] sm:$0xff] %v13415_v5  ;;  %v19535_v39 = vld [vmem:[#allocation282_spill] sm:$0xff]  ;;  %v19540_v45 = vld [vmem:[#allocation60_spill] sm:$0xff] }
 0x585   : > { %19515 = vst [vmem:[#allocation126_spill] sm:$0xff] %v13388_v33  ;;  %v19529_v24 = vld [vmem:[#allocation275_spill] sm:$0xff]  ;;  %v19538_v10 = vld [vmem:[#allocation286_spill] sm:$0xff]  ;;  %v19543_v26 = vld [vmem:[#allocation293_spill] sm:$0xff] }
 0x586   : > { %19521 = vst [vmem:[#allocation74_spill] sm:$0xff] %v13396_v47  ;;  %v13408_v20 = vmul.f32 %v19529_v24, %v19528_v6  ;;  %v19534_v17 = vld [vmem:[#allocation175_spill] sm:$0xff]  ;;  %v13423_v7 = vmul.f32 %v19538_v10, %v19537_v12  ;;  %v4545_v6 = vmul.f32 %v12775_v29, %v19540_v45  ;;  %v19542_v11 = vld [vmem:[#allocation166_spill] sm:$0xff]  ;;  %v19545_v58 = vld [vmem:[#allocation176_spill] sm:$0xff]  ;;  %v4790_v10 = vpop.permute.xlu0 %4789 }
 0x587   : > { %19524 = vst [vmem:[#allocation80_spill] sm:$0xff] %v13400_v35  ;;  %v13419_v63 = vmul.f32 %v19535_v39, %v19534_v17  ;;  %v19541_v24 = vld [vmem:[#allocation67_spill] sm:$0xff]  ;;  %v13431_v21 = vmul.f32 %v19543_v26, %v19542_v11  ;;  %v19546_v5 = vld [vmem:[#allocation300_spill] sm:$0xff]  ;;  %v19548_v17 = vld [vmem:[#allocation169_spill] sm:$0xff] }
 0x588   : > { %19527 = vst [vmem:[#allocation337_spill] sm:$0xff] %v13404_v9  ;;  %v4550_v23 = vmul.f32 %v12824_v59, %v19541_v24  ;;  %v19549_v39 = vld [vmem:[#allocation281_spill] sm:$0xff]  ;;  %v19551_v45 = vld [vmem:[#allocation172_spill] sm:$0xff]  ;;  %v13448_v24 = vadd.f32 %v13205_v15, %v4545_v6  ;;  %v19568_v6 = vld [vmem:[#allocation287_spill] sm:$0xff] }
 0x589   : > { %19530 = vst [vmem:[#allocation321_spill] sm:$0xff] %v13408_v20  ;;  %v13435_v20 = vmul.f32 %v19546_v5, %v19545_v58  ;;  %v19552_v29 = vld [vmem:[#allocation292_spill] sm:$0xff]  ;;  %v19557_v58 = vld [vmem:[#allocation75_spill] sm:$0xff]  ;;  %v19729_v47 = vld [vmem:[#allocation265_spill] sm:$0xff] }
 0x58a   : > { %19531 = vst [vmem:[#allocation121_spill] sm:$0xff] %v13410_v14  ;;  %v13450_v11 = vadd.f32 %v4790_v10, %v4550_v23  ;;  %v19556_v59 = vld [vmem:[#allocation320_spill] sm:$0xff]  ;;  %v19558_v5 = vld [vmem:[#allocation183_spill] sm:$0xff]  ;;  %v19567_v10 = vld [vmem:[#allocation173_spill] sm:$0xff] }
 0x58b   : > { %19532 = vst [vmem:[#allocation103_spill] sm:$0xff] %v13412_v3  ;;  %v4576_v26 = vmul.f32 %v19557_v58, %v19556_v59  ;;  %v19563_v14 = vld [vmem:[#allocation184_spill] sm:$0xff]  ;;  %v13470_v23 = vmul.f32 %v19568_v6, %v19567_v10  ;;  %v19569_v59 = vld [vmem:[#allocation179_spill] sm:$0xff]  ;;  %v19766_v37 = vld [vmem:[#allocation345_spill] sm:$0xff] }
 0x58c   : > { %19536 = vst [vmem:[#allocation142_spill] sm:$0xff] %v13419_v63  ;;  %v13439_v63 = vmul.f32 %v19549_v39, %v19548_v17  ;;  %v19561_v39 = vld [vmem:[#allocation174_spill] sm:$0xff]  ;;  %v19564_v3 = vld [vmem:[#allocation312_spill] sm:$0xff] }
 0x58d   : > { %19539 = vst [vmem:[#allocation145_spill] sm:$0xff] %v13423_v7  ;;  %v13445_v7 = vmul.f32 %v19552_v29, %v19551_v45  ;;  %v13464_v45 = vmul.f32 %v19564_v3, %v19563_v14  ;;  %v19566_v29 = vld [vmem:[#allocation170_spill] sm:$0xff]  ;;  %v19570_v58 = vld [vmem:[#allocation304_spill] sm:$0xff]  ;;  %4713 = vrot.lane.b32.xlu1 %v4576_v26, %s10109_s14 }
 0x58e   : > { %19544 = vst [vmem:[#allocation148_spill] sm:$0xff] %v13431_v21  ;;  %v4177_v15 = vmul.f32 %v12919_v19, %v19566_v29  ;;  %v19576_v19 = vld [vmem:[#allocation49_spill] sm:$0xff]  ;;  %v19577_v3 = vld [vmem:[#allocation46_spill] sm:$0xff]  ;;  %v19740_v60 = vld [vmem:[#allocation344_spill] sm:$0xff] }
 0x58f   : > { %19547 = vst [vmem:[#allocation140_spill] sm:$0xff] %v13435_v20  ;;  %v19559_v20 = vld [vmem:[#allocation306_spill] sm:$0xff]  ;;  %v4538_v10 = vmul.f32 %v12703_v13, %v19576_v19  ;;  %v4535_v6 = vmul.f32 %v12665_v4, %v19577_v3  ;;  %v19585_v29 = vld [vmem:[#allocation181_spill] sm:$0xff]  ;;  %v19589_v13 = vld [vmem:[#allocation324_spill] sm:$0xff] }
 0x590   : > { %19550 = vst [vmem:[#allocation141_spill] sm:$0xff] %v13439_v63  ;;  %v13456_v17 = vmul.f32 %v19559_v20, %v19558_v5  ;;  %v19562_v63 = vld [vmem:[#allocation298_spill] sm:$0xff]  ;;  %v19572_v5 = vld [vmem:[#allocation177_spill] sm:$0xff]  ;;  %4363 = vrot.lane.b32.xlu2 %v4177_v15, %s10109_s14  ;;  %v4760_v15 = vpop.permute.xlu1 %4759 }
 0x591   : > { %19553 = vst [vmem:[#allocation144_spill] sm:$0xff] %v13445_v7  ;;  %v13460_v12 = vmul.f32 %v19562_v63, %v19561_v39  ;;  %v13474_v7 = vmul.f32 %v19570_v58, %v19569_v59  ;;  %v19573_v20 = vld [vmem:[#allocation305_spill] sm:$0xff]  ;;  %v19578_v59 = vld [vmem:[#allocation124_spill] sm:$0xff]  ;;  %v19583_v26 = vld [vmem:[#allocation310_spill] sm:$0xff] }
 0x592   : > { %19554 = vst [vmem:[#allocation150_spill] sm:$0xff] %v13448_v24  ;;  %v19579_v58 = vld [vmem:[#allocation113_spill] sm:$0xff]  ;;  %v19582_v39 = vld [vmem:[#allocation180_spill] sm:$0xff]  ;;  %v19588_v19 = vld [vmem:[#allocation194_spill] sm:$0xff] }
 0x593   : > { %19555 = vst [vmem:[#allocation143_spill] sm:$0xff] %v13450_v11  ;;  %v13498_v24 = vmul.f32 %v19583_v26, %v19582_v39  ;;  %v19586_v11 = vld [vmem:[#allocation299_spill] sm:$0xff]  ;;  %v13506_v3 = vmul.f32 %v19589_v13, %v19588_v19  ;;  %v19591_v4 = vld [vmem:[#allocation189_spill] sm:$0xff]  ;;  %v13517_v39 = vadd.f32 %v13236_v49, %v4538_v10  ;;  %v13519_v26 = vadd.f32 %v4760_v15, %v4535_v6  ;;  %v19610_v6 = vld [vmem:[#allocation206_spill] sm:$0xff] }
 0x594   : > { %19560 = vst [vmem:[#allocation146_spill] sm:$0xff] %v13456_v17  ;;  %v13478_v17 = vmul.f32 %v19573_v20, %v19572_v5  ;;  %v4169_v5 = vmul.f32 %v12856_v44, %v19578_v59  ;;  %v19580_v20 = vld [vmem:[#allocation318_spill] sm:$0xff]  ;;  %v13502_v14 = vmul.f32 %v19586_v11, %v19585_v29  ;;  %v13510_v59 = vmul.f32 %v19592_v56, %v19591_v4  ;;  %v13522_v29 = vpop.permute.xlu2 %4741  ;;  %v19601_v11 = vld [vmem:[#allocation205_spill] sm:$0xff]  ;;  %v19604_v56 = vld [vmem:[#allocation192_spill] sm:$0xff] }
 0x595   : > { %19565 = vst [vmem:[#allocation154_spill] sm:$0xff] %v13464_v45  ;;  %v13494_v63 = vmul.f32 %v19580_v20, %v19579_v58  ;;  %v19594_v44 = vld [vmem:[#allocation186_spill] sm:$0xff]  ;;  %v19595_v58 = vld [vmem:[#allocation311_spill] sm:$0xff]  ;;  %v19608_v49 = vld [vmem:[#allocation317_spill] sm:$0xff] }
 0x596   : > { %19571 = vst [vmem:[#allocation147_spill] sm:$0xff] %v13474_v7  ;;  %v13514_v20 = vmul.f32 %v19595_v58, %v19594_v44  ;;  %4347 = vrot.lane.b32.xlu0 %v4169_v5, %s10109_s14  ;;  %v19607_v58 = vld [vmem:[#allocation188_spill] sm:$0xff]  ;;  %v19616_v13 = vld [vmem:[#allocation197_spill] sm:$0xff]  ;;  %v19617_v19 = vld [vmem:[#allocation323_spill] sm:$0xff] }
 0x597   : > { %19574 = vst [vmem:[#allocation151_spill] sm:$0xff] %v13478_v17  ;;  %v13536_v10 = vmul.f32 %v19608_v49, %v19607_v58  ;;  %v19611_v15 = vld [vmem:[#allocation336_spill] sm:$0xff]  ;;  %v19622_v49 = vld [vmem:[#allocation202_spill] sm:$0xff]  ;;  %v19706_v33 = vld [vmem:[#allocation321_spill] sm:$0xff] }
 0x598   : > { %19581 = vst [vmem:[#allocation349_spill] sm:$0xff] %v13494_v63  ;;  %v13540_v5 = vmul.f32 %v19611_v15, %v19610_v6  ;;  %v19625_v15 = vld [vmem:[#allocation199_spill] sm:$0xff]  ;;  %v19722_v21 = vld [vmem:[#allocation382_spill] sm:$0xff]  ;;  %v19735_v45 = vld [vmem:[#allocation48_spill] sm:$0xff] }
 0x599   : > { %19584 = vst [vmem:[#allocation157_spill] sm:$0xff] %v13498_v24  ;;  %v19738_v63 = vld [vmem:[#allocation100_spill] sm:$0xff]  ;;  %v19739_v17 = vld [vmem:[#allocation369_spill] sm:$0xff]  ;;  %v19773_v27 = vld [vmem:[#allocation162_spill] sm:$0xff] }
 0x59a   : > { %19587 = vst [vmem:[#allocation149_spill] sm:$0xff] %v13502_v14  ;;  %v19743_v24 = vld [vmem:[#allocation396_spill] sm:$0xff] }
 0x59b   : > { %19590 = vst [vmem:[#allocation160_spill] sm:$0xff] %v13506_v3  ;;  %v19602_v3 = vld [vmem:[#allocation330_spill] sm:$0xff] }
 0x59c   : > { %19593 = vst [vmem:[#allocation326_spill] sm:$0xff] %v13510_v59  ;;  %v13528_v4 = vmul.f32 %v19602_v3, %v19601_v11  ;;  %v19605_v59 = vld [vmem:[#allocation322_spill] sm:$0xff]  ;;  %v13548_v11 = vmul.f32 %v19617_v19, %v19616_v13  ;;  %v4770_v3 = vpop.permute.xlu0 %4769  ;;  %v19629_v19 = vld [vmem:[#allocation217_spill] sm:$0xff] }
 0x59d   : > { %19596 = vst [vmem:[#allocation155_spill] sm:$0xff] %v13514_v20  ;;  %v13532_v44 = vmul.f32 %v19605_v59, %v19604_v56  ;;  %v19614_v20 = vld [vmem:[#allocation328_spill] sm:$0xff]  ;;  %v19632_v56 = vld [vmem:[#allocation211_spill] sm:$0xff] }
 0x59e   : > { %19597 = vst [vmem:[#allocation152_spill] sm:$0xff] %v13517_v39  ;;  %v19619_v59 = vld [vmem:[#allocation216_spill] sm:$0xff] }
 0x59f   : > { %19598 = vst [vmem:[#allocation164_spill] sm:$0xff] %v13519_v26  ;;  %v13554_v58 = vmul.f32 %v19620_v42, %v19619_v59  ;;  %v19633_v26 = vld [vmem:[#allocation340_spill] sm:$0xff]  ;;  %v19635_v59 = vld [vmem:[#allocation213_spill] sm:$0xff]  ;;  %v19636_v42 = vld [vmem:[#allocation346_spill] sm:$0xff] }
 0x5a0   : > { %19599 = vst [vmem:[#allocation158_spill] sm:$0xff] %v13522_v29  ;;  %v19613_v29 = vld [vmem:[#allocation200_spill] sm:$0xff]  ;;  %v13572_v39 = vmul.f32 %v19633_v26, %v19632_v56  ;;  %v19646_v56 = vld [vmem:[#allocation209_spill] sm:$0xff] }
 0x5a1   : > { %19603 = vst [vmem:[#allocation156_spill] sm:$0xff] %v13528_v4  ;;  %v13544_v14 = vmul.f32 %v19614_v20, %v19613_v29  ;;  %v19628_v20 = vld [vmem:[#allocation136_spill] sm:$0xff]  ;;  %v19647_v26 = vld [vmem:[#allocation341_spill] sm:$0xff]  ;;  %v19760_v4 = vld [vmem:[#allocation118_spill] sm:$0xff] }
 0x5a2   : > { %19606 = vst [vmem:[#allocation50_spill] sm:$0xff] %v13532_v44  ;;  %v19623_v44 = vld [vmem:[#allocation334_spill] sm:$0xff]  ;;  %v4174_v13 = vmul.f32 %v12908_v41, %v19628_v20  ;;  %v19641_v20 = vld [vmem:[#allocation335_spill] sm:$0xff] }
 0x5a3   : > { %19609 = vst [vmem:[#allocation56_spill] sm:$0xff] %v13536_v10  ;;  %v13558_v6 = vmul.f32 %v19623_v44, %v19622_v49  ;;  %v19638_v49 = vld [vmem:[#allocation130_spill] sm:$0xff] }
 0x5a4   : > { %19612 = vst [vmem:[#allocation327_spill] sm:$0xff] %v13540_v5  ;;  %v19626_v5 = vld [vmem:[#allocation329_spill] sm:$0xff]  ;;  %v4172_v44 = vmul.f32 %v12927_v43, %v19638_v49  ;;  %4357 = vrot.lane.b32.xlu1 %v4174_v13, %s10109_s14  ;;  %v19652_v43 = vld [vmem:[#allocation54_spill] sm:$0xff]  ;;  %v19657_v13 = vld [vmem:[#allocation347_spill] sm:$0xff] }
 0x5a5   : > { %19615 = vst [vmem:[#allocation167_spill] sm:$0xff] %v13544_v14  ;;  %v13562_v29 = vmul.f32 %v19626_v5, %v19625_v15  ;;  %v19630_v14 = vld [vmem:[#allocation348_spill] sm:$0xff]  ;;  %v4540_v5 = vmul.f32 %v12754_v18, %v19652_v43  ;;  %v19653_v15 = vld [vmem:[#allocation53_spill] sm:$0xff] }
 0x5a6   : > { %19618 = vst [vmem:[#allocation161_spill] sm:$0xff] %v13548_v11  ;;  %v13568_v11 = vmul.f32 %v19630_v14, %v19629_v19  ;;  %v19643_v19 = vld [vmem:[#allocation227_spill] sm:$0xff]  ;;  %v19644_v14 = vld [vmem:[#allocation354_spill] sm:$0xff]  ;;  %4353 = vrot.lane.b32.xlu2 %v4172_v44, %s10109_s14  ;;  %v19662_v43 = vld [vmem:[#allocation221_spill] sm:$0xff] }
 0x5a7   : > { %19621 = vst [vmem:[#allocation159_spill] sm:$0xff] %v13554_v58  ;;  %v13576_v58 = vmul.f32 %v19636_v42, %v19635_v59  ;;  %v19649_v59 = vld [vmem:[#allocation223_spill] sm:$0xff]  ;;  %v19650_v42 = vld [vmem:[#allocation352_spill] sm:$0xff]  ;;  %v19663_v18 = vld [vmem:[#allocation353_spill] sm:$0xff] }
 0x5a8   : > { %19624 = vst [vmem:[#allocation171_spill] sm:$0xff] %v13558_v6  ;;  %v19640_v6 = vld [vmem:[#allocation207_spill] sm:$0xff]  ;;  %v13597_v49 = vmul.f32 %v19650_v42, %v19649_v59  ;;  %v19659_v59 = vld [vmem:[#allocation225_spill] sm:$0xff]  ;;  %v19660_v42 = vld [vmem:[#allocation358_spill] sm:$0xff] }
 0x5a9   : > { %19627 = vst [vmem:[#allocation165_spill] sm:$0xff] %v13562_v29  ;;  %v13584_v41 = vmul.f32 %v19641_v20, %v19640_v6  ;;  %v4541_v6 = vmul.f32 %v12727_v0, %v19653_v15  ;;  %v4772_v15 = vpop.permute.xlu1 %4771  ;;  %v19675_v44 = vld [vmem:[#allocation62_spill] sm:$0xff] }
 0x5aa   : > { %19631 = vst [vmem:[#allocation163_spill] sm:$0xff] %v13568_v11  ;;  %v13588_v11 = vmul.f32 %v19644_v14, %v19643_v19  ;;  %v19654_v19 = vld [vmem:[#allocation190_spill] sm:$0xff]  ;;  %v19655_v14 = vld [vmem:[#allocation195_spill] sm:$0xff] }
 0x5ab   : > { %19634 = vst [vmem:[#allocation175_spill] sm:$0xff] %v13572_v39  ;;  %v13592_v39 = vmul.f32 %v19647_v26, %v19646_v56  ;;  %v4182_v20 = vmul.f32 %v12900_v51, %v19654_v19  ;;  %v19656_v26 = vld [vmem:[#allocation219_spill] sm:$0xff]  ;;  %v19666_v19 = vld [vmem:[#allocation230_spill] sm:$0xff]  ;;  %v13626_v56 = vadd.f32 %v4770_v3, %v4540_v5  ;;  %v19676_v3 = vld [vmem:[#allocation201_spill] sm:$0xff]  ;;  %v19772_v7 = vsub.f32 %v13306_v57, %v19655_v14 }
 0x5ac   : > { %19637 = vst [vmem:[#allocation168_spill] sm:$0xff] %v13576_v58  ;;  %v13610_v62 = vmul.f32 %v19657_v13, %v19656_v26  ;;  %v19667_v51 = vld [vmem:[#allocation359_spill] sm:$0xff]  ;;  %v13628_v26 = vadd.f32 %v4772_v15, %v4541_v6  ;;  %v19678_v15 = vld [vmem:[#allocation117_spill] sm:$0xff]  ;;  %v19684_v6 = vld [vmem:[#allocation212_spill] sm:$0xff] }
 0x5ad   : > { %19642 = vst [vmem:[#allocation60_spill] sm:$0xff] %v13584_v41  ;;  %v13624_v58 = vmul.f32 %v19667_v51, %v19666_v19  ;;  %4373 = vrot.lane.b32.xlu0 %v4182_v20, %s10109_s14  ;;  %v4546_v19 = vmul.f32 %v12818_v36, %v19675_v44  ;;  %v19682_v36 = vld [vmem:[#allocation134_spill] sm:$0xff]  ;;  %v19695_v20 = vld [vmem:[#allocation224_spill] sm:$0xff]  ;;  %v19786_v35 = vsub.f32 %v13326_v1, %v19678_v15  ;;  %v19805_v41 = vld [vmem:[#allocation135_spill] sm:$0xff] }
 0x5ae   : > { %19645 = vst [vmem:[#allocation67_spill] sm:$0xff] %v13588_v11  ;;  %v4170_v5 = vmul.f32 %v12950_v34, %v19682_v36  ;;  %v19690_v51 = vld [vmem:[#allocation222_spill] sm:$0xff]  ;;  %v19691_v34 = vld [vmem:[#allocation68_spill] sm:$0xff]  ;;  %v19807_v29 = vsub.f32 %v13377_v32, %v19695_v20 }
 0x5af   : > { %19648 = vst [vmem:[#allocation166_spill] sm:$0xff] %v13592_v39  ;;  %v13618_v39 = vmul.f32 %v19663_v18, %v19662_v43  ;;  %v19694_v36 = vld [vmem:[#allocation228_spill] sm:$0xff] }
 0x5b0   : > { %19651 = vst [vmem:[#allocation176_spill] sm:$0xff] %v13597_v49  ;;  %v13614_v49 = vmul.f32 %v19660_v42, %v19659_v59  ;;  %v13631_v59 = vpop.permute.xlu2 %4727  ;;  %v19672_v42 = vld [vmem:[#allocation198_spill] sm:$0xff]  ;;  %4349 = vrot.lane.b32.xlu1 %v4170_v5, %s10109_s14  ;;  %v19790_v57 = vld [vmem:[#allocation404_spill] sm:$0xff] }
 0x5b1   : > { %19658 = vst [vmem:[#allocation169_spill] sm:$0xff] %v13610_v62  ;;  %v9426_v1 = vunpack.i.h.bf16 %v19790_v57  ;;  %v19792_v15 = vld [vmem:[#allocation356_spill] sm:$0xff] }
 0x5b2   : > { %19661 = vst [vmem:[#allocation172_spill] sm:$0xff] %v13614_v49 }
 0x5b3   : > { %19664 = vst [vmem:[#allocation320_spill] sm:$0xff] %v13618_v39  ;;  %v19674_v39 = vld [vmem:[#allocation58_spill] sm:$0xff] }
 0x5b4   : > { %19668 = vst [vmem:[#allocation183_spill] sm:$0xff] %v13624_v58  ;;  %v4543_v0 = vmul.f32 %v12731_v50, %v19674_v39  ;;  %v19683_v50 = vld [vmem:[#allocation210_spill] sm:$0xff]  ;;  %v19906_v58 = vld [vmem:[#allocation413_spill] sm:$0xff] }
 0x5b5   : > { %19669 = vst [vmem:[#allocation174_spill] sm:$0xff] %v13626_v56  ;;  %v19686_v56 = vld [vmem:[#allocation153_spill] sm:$0xff] }
 0x5b6   : > { %19670 = vst [vmem:[#allocation184_spill] sm:$0xff] %v13628_v26  ;;  %v13652_v39 = vadd.f32 %v13257_v16, %v4543_v0  ;;  %v4178_v18 = vmul.f32 %v12953_v2, %v19686_v56  ;;  %v19687_v26 = vld [vmem:[#allocation215_spill] sm:$0xff]  ;;  %v19688_v16 = vld [vmem:[#allocation218_spill] sm:$0xff]  ;;  %v4549_v56 = vmul.f32 %v12785_v28, %v19691_v34  ;;  %v4786_v28 = vpop.permute.xlu1 %4785 }
 0x5b7   : > { %19671 = vst [vmem:[#allocation170_spill] sm:$0xff] %v13631_v59  ;;  %v4782_v59 = vpop.permute.xlu0 %4781  ;;  %v19692_v2 = vld [vmem:[#allocation66_spill] sm:$0xff]  ;;  %v19705_v34 = vld [vmem:[#allocation235_spill] sm:$0xff]  ;;  %v19814_v32 = vsub.f32 %v13340_v40, %v19687_v26  ;;  %v19815_v20 = vsub.f32 %v13364_v38, %v19688_v16  ;;  %v19819_v38 = vld [vmem:[#allocation325_spill] sm:$0xff] }
 0x5b8   : > { %19680 = vst [vmem:[#allocation173_spill] sm:$0xff] %v13652_v39  ;;  %v13654_v44 = vadd.f32 %v4782_v59, %v4546_v19  ;;  %v4548_v0 = vmul.f32 %v12833_v52, %v19692_v2  ;;  %4365 = vrot.lane.b32.xlu2 %v4178_v18, %s10109_s14  ;;  %v19693_v59 = vld [vmem:[#allocation137_spill] sm:$0xff]  ;;  %v13702_v5 = vpop.permute.xlu2 %4739  ;;  %v19736_v39 = vld [vmem:[#allocation107_spill] sm:$0xff]  ;;  %v19741_v19 = vpack.i.bf16 %v19739_v17, %v19740_v60 }
 0x5b9   : > { %v4173_v13 = vmul.f32 %v12871_v61, %v19693_v59  ;;  %v19700_v59 = vld [vmem:[#allocation102_spill] sm:$0xff]  ;;  %19703 = vst [vmem:[#allocation46_spill] sm:$0xff] %v13702_v5  ;;  %v19720_v52 = vld [vmem:[#allocation253_spill] sm:$0xff]  ;;  %v4536_v43 = vmul.f32 %v19736_v39, %v19735_v45  ;;  %v19820_v16 = vld [vmem:[#allocation355_spill] sm:$0xff] }
 0x5ba   : > { %19681 = vst [vmem:[#allocation179_spill] sm:$0xff] %v13654_v44  ;;  %v13697_v61 = vadd.f32 %v19700_v59, %v4549_v56  ;;  %v13699_v55 = vadd.f32 %v4786_v28, %v4548_v0  ;;  %v19710_v56 = vld [vmem:[#allocation243_spill] sm:$0xff]  ;;  %v19711_v59 = vld [vmem:[#allocation145_spill] sm:$0xff]  ;;  %v19765_v45 = vld [vmem:[#allocation86_spill] sm:$0xff] }
 0x5bb   : > { %4355 = vrot.lane.b32.xlu0 %v4173_v13, %s10109_s14  ;;  %v19721_v28 = vld [vmem:[#allocation133_spill] sm:$0xff]  ;;  %v9400_v18 = vunpack.i.l.bf16 %v19765_v45 }
 0x5bc   : > { %19701 = vst [vmem:[#allocation177_spill] sm:$0xff] %v13697_v61  ;;  %v4175_v9 = vmul.f32 %v19722_v21, %v19721_v28  ;;  %v19730_v28 = vld [vmem:[#allocation149_spill] sm:$0xff]  ;;  %v19737_v61 = vld [vmem:[#allocation52_spill] sm:$0xff]  ;;  %v19742_v21 = vld [vmem:[#allocation191_spill] sm:$0xff] }
 0x5bd   : > { %19702 = vst [vmem:[#allocation49_spill] sm:$0xff] %v13699_v55  ;;  %v4539_v2 = vmul.f32 %v19738_v63, %v19737_v61  ;;  %v4180_v44 = vmul.f32 %v19743_v24, %v19742_v21  ;;  %v19752_v17 = vld [vmem:[#allocation73_spill] sm:$0xff]  ;;  %v19758_v61 = vld [vmem:[#allocation115_spill] sm:$0xff] }
 0x5be   : > { %4359 = vrot.lane.b32.xlu1 %v4175_v9, %s10109_s14  ;;  %v4768_v63 = vpop.permute.xlu1 %4767  ;;  %v19756_v24 = vld [vmem:[#allocation161_spill] sm:$0xff] }
 0x5bf   : > { %v4762_v53 = vpop.permute.xlu0 %4761  ;;  %v13770_v21 = vadd.f32 %v4768_v63, %v4539_v2  ;;  %v19757_v0 = vld [vmem:[#allocation57_spill] sm:$0xff] }
 0x5c0   : > { %9558 = vrot.lane.b32.xlu2 %v19741_v19, %s10103_s6  ;;  %v9405_v19 = vunpack.i.l.bf16 %v19752_v17  ;;  %v13768_v13 = vadd.f32 %v4762_v53, %v4536_v43  ;;  %v13773_v9 = vpop.permute.xlu2 %4753  ;;  %v4544_v39 = vmul.f32 %v19758_v61, %v19757_v0  ;;  %v19759_v5 = vld [vmem:[#allocation61_spill] sm:$0xff]  ;;  %v19768_v61 = vld [vmem:[#allocation439_spill] sm:$0xff]  ;;  %v19808_v53 = vld [vmem:[#allocation84_spill] sm:$0xff] }
 0x5c1   : > { %19754 = vst [vmem:[#allocation113_spill] sm:$0xff] %v13770_v21  ;;  %v4547_v60 = vmul.f32 %v19760_v4, %v19759_v5  ;;  %v19767_v5 = vld [vmem:[#allocation178_spill] sm:$0xff] }
 0x5c2   : > { %19753 = vst [vmem:[#allocation124_spill] sm:$0xff] %v13768_v13  ;;  %v13790_v55 = vadd.f32 %v19766_v37, %v4544_v39  ;;  %v4181_v4 = vmul.f32 %v19768_v61, %v19767_v5  ;;  %v2985_v63 = vsel %vm2982_vm1, %v19772_v7, %v9405_v19  ;;  %v19774_v13 = vld [vmem:[#allocation392_spill] sm:$0xff]  ;;  %v19775_v39 = vld [vmem:[#allocation291_spill] sm:$0xff]  ;;  %v9401_v61 = vunpack.i.h.bf16 %v19765_v45 }
 0x5c3   : > { %4369 = vrot.lane.b32.xlu0 %v4180_v44, %s10109_s14  ;;  %v9406_v44 = vunpack.i.h.bf16 %v19752_v17  ;;  %v4176_v37 = vmul.f32 %v19774_v13, %v19773_v27  ;;  %v19787_v7 = vsub.f32 %v13322_v22, %v19676_v3  ;;  %v19789_v5 = vld [vmem:[#allocation127_spill] sm:$0xff]  ;;  %v9425_v19 = vunpack.i.l.bf16 %v19790_v57  ;;  %v19802_v22 = vld [vmem:[#allocation85_spill] sm:$0xff] }
 0x5c4   : > { %v9416_v13 = vunpack.i.h.bf16 %v19789_v5  ;;  %v19803_v3 = vld [vmem:[#allocation193_spill] sm:$0xff] }
 0x5c5   : > { %v2986_v17 = vsel %vm2982_vm1, %v19786_v35, %v9406_v44  ;;  %v2983_v27 = vsel %vm2982_vm1, %v19787_v7, %v9400_v18  ;;  %v19791_v35 = vld [vmem:[#allocation350_spill] sm:$0xff] }
 0x5c6   : > { %4371 = vrot.lane.b32.xlu1 %v4181_v4, %s10109_s14  ;;  %v3047_v4 = vrot.slane %v2985_v63, 4  ;;  %v13833_v11 = vpop.permute.xlu1 %4731  ;;  %v19793_v63 = vpack.i.bf16 %v19791_v35, %v19792_v15  ;;  %v19797_v7 = vld [vmem:[#allocation402_spill] sm:$0xff]  ;;  %v3053_v18 = vrot.slane %v2986_v17, 4 }
 0x5c7   : > { %v4784_v10 = vpop.permute.xlu0 %4783  ;;  %v9436_v14 = vunpack.i.h.bf16 %v19797_v7 }
 0x5c8   : > { %v13792_v0 = vadd.f32 %v4784_v10, %v4547_v60  ;;  %v19776_v10 = vld [vmem:[#allocation171_spill] sm:$0xff]  ;;  %4361 = vrot.lane.b32.xlu2 %v4176_v37, %s10109_s14  ;;  %v19788_v60 = vld [vmem:[#allocation110_spill] sm:$0xff]  ;;  %v9415_v37 = vunpack.i.l.bf16 %v19789_v5  ;;  %v13843_v45 = vpop.permute.xlu2 %4735  ;;  %v3048_v15 = vsel %vm742_vm0, %v3047_v4, %v2983_v27 }
 0x5c9   : > { %v9421_v43 = vunpack.i.h.bf16 %v19788_v60  ;;  %19794 = vst [vmem:[#allocation180_spill] sm:$0xff] %v13843_v45  ;;  %v9420_v44 = vunpack.i.l.bf16 %v19788_v60  ;;  %v9435_v60 = vunpack.i.l.bf16 %v19797_v7  ;;  %v19804_v45 = vsub.f32 %v19802_v22, %v19803_v3  ;;  %v19806_v5 = vld [vmem:[#allocation442_spill] sm:$0xff]  ;;  %v19809_v27 = vld [vmem:[#allocation187_spill] sm:$0xff]  ;;  %v19811_v7 = vld [vmem:[#allocation196_spill] sm:$0xff] }
 0x5ca   : > { %v4171_v2 = vmul.f32 %v19806_v5, %v19805_v41  ;;  %v19810_v4 = vsub.f32 %v19808_v53, %v19809_v27  ;;  %v19812_v62 = vsub.f32 %v13310_v46, %v19811_v7  ;;  %v19816_v53 = vld [vmem:[#allocation138_spill] sm:$0xff]  ;;  %v19817_v46 = vsub.f32 %v13318_v30, %v19672_v42 }
 0x5cb   : > { %9563 = vrot.lane.b32.xlu0 %v19793_v63, %s10103_s6  ;;  %v2984_v57 = vsel %vm2982_vm1, %v19804_v45, %v9401_v61  ;;  %v2992_v35 = vsel %vm2982_vm1, %v19807_v29, %v9421_v43  ;;  %v19813_v61 = vsub.f32 %v13360_v48, %v19690_v51  ;;  %v2991_v29 = vsel %vm2982_vm1, %v19814_v32, %v9420_v44  ;;  %v19825_v44 = vld [vmem:[#allocation405_spill] sm:$0xff]  ;;  %v19828_v32 = vld [vmem:[#allocation203_spill] sm:$0xff] }
 0x5cc   : > { %v2990_v17 = vsel %vm2982_vm1, %v19810_v4, %v9416_v13  ;;  %v2989_v22 = vsel %vm2982_vm1, %v19812_v62, %v9415_v37  ;;  %v2998_v13 = vsel %vm2982_vm1, %v19815_v20, %v9436_v14  ;;  %v13891_v43 = vperm.slane %v3048_v15, %v19816_v53  ;;  %v19818_v62 = vld [vmem:[#allocation401_spill] sm:$0xff]  ;;  %v19826_v4 = vld [vmem:[#allocation408_spill] sm:$0xff] }
 0x5cd   : > { %v2994_v41 = vsel %vm2982_vm1, %v19813_v61, %v9426_v1  ;;  %v2993_v48 = vsel %vm2982_vm1, %v19817_v46, %v9425_v19  ;;  %v3054_v51 = vsel %vm742_vm0, %v3053_v18, %v2984_v57  ;;  %v9411_v40 = vunpack.i.h.bf16 %v19818_v62  ;;  %v19822_v37 = vld [vmem:[#allocation185_spill] sm:$0xff]  ;;  %v19823_v1 = vld [vmem:[#allocation450_spill] sm:$0xff] }
 0x5ce   : > { %4351 = vrot.lane.b32.xlu1 %v4171_v2, %s10109_s14  ;;  %v9410_v26 = vunpack.i.l.bf16 %v19818_v62  ;;  %v19821_v14 = vpack.i.bf16 %v19819_v38, %v19820_v16  ;;  %v4179_v45 = vmul.f32 %v19823_v1, %v19822_v37  ;;  %v19824_v42 = vsub.f32 %v13336_v8, %v19683_v50  ;;  %v13911_v18 = vpop.permute.xlu1 %4757  ;;  %v19831_v62 = vld [vmem:[#allocation182_spill] sm:$0xff] }
 0x5cf   : > { %v13857_v63 = vpop.permute.xlu0 %4747  ;;  %v3065_v2 = vrot.slane %v2990_v17, 4  ;;  %v3059_v19 = vrot.slane %v2989_v22, 4  ;;  %v3109_v3 = vrot.slane %v2994_v41, 4  ;;  %v9451_v15 = vunpack.i.h.bf16 %v19825_v44 }
 0x5d0   : > { %9573 = vrot.lane.b32.xlu2 %v19821_v14, %s10103_s6  ;;  %v2997_v30 = vsel %vm2982_vm1, %v19824_v42, %v9435_v60  ;;  %v9450_v57 = vunpack.i.l.bf16 %v19825_v44  ;;  %v3103_v27 = vrot.slane %v2993_v48, 4  ;;  %v9466_v7 = vunpack.i.h.bf16 %v19826_v4  ;;  %v13917_v61 = vpop.permute.xlu2 %4699  ;;  %v19827_v60 = vld [vmem:[#allocation403_spill] sm:$0xff] }
 0x5d1   : > { %v13920_v50 = vperm.slane %v3054_v51, %v19816_v53  ;;  %v3073_v8 = vrot.slane %v13891_v43, 4  ;;  %v9431_v17 = vunpack.i.h.bf16 %v19827_v60  ;;  %v9430_v22 = vunpack.i.l.bf16 %v19827_v60  ;;  %v19830_v48 = vld [vmem:[#allocation79_spill] sm:$0xff]  ;;  %v19847_v60 = vld [vmem:[#allocation78_spill] sm:$0xff] }
 0x5d2   : > { %v3121_v41 = vrot.slane %v2998_v13, 4  ;;  %v19829_v20 = vsub.f32 %v13314_v25, %v19828_v32  ;;  %v19832_v38 = vsub.f32 %v19830_v48, %v19831_v62  ;;  %v9465_v51 = vunpack.i.l.bf16 %v19826_v4  ;;  %v19894_v32 = vld [vmem:[#allocation231_spill] sm:$0xff] }
 0x5d3   : > { %4367 = vrot.lane.b32.xlu0 %v4179_v45, %s10109_s14  ;;  %v3115_v37 = vrot.slane %v2997_v30, 4  ;;  %v3110_v13 = vsel %vm742_vm0, %v3109_v3, %v2992_v35  ;;  %v19833_v25 = vsub.f32 %v19706_v33, %v19705_v34  ;;  %v3104_v30 = vsel %vm742_vm0, %v3103_v27, %v2991_v29  ;;  %v19837_v34 = vld [vmem:[#allocation302_spill] sm:$0xff]  ;;  %v19838_v3 = vld [vmem:[#allocation204_spill] sm:$0xff] }
 0x5d4   : > { %v2988_v46 = vsel %vm2982_vm1, %v19829_v20, %v9411_v40  ;;  %v2987_v16 = vsel %vm2982_vm1, %v19832_v38, %v9410_v26  ;;  %v19834_v26 = vsub.f32 %v13372_v31, %v19694_v36  ;;  %v13961_v33 = vsel %vm742_vm0, %v13920_v50, %v3073_v8  ;;  %v19849_v20 = vld [vmem:[#allocation411_spill] sm:$0xff] }
 0x5d5   : > { %v3060_v45 = vsel %vm742_vm0, %v3059_v19, %v2987_v16  ;;  %v3066_v42 = vsel %vm742_vm0, %v3065_v2, %v2988_v46  ;;  %v13943_v40 = vsel %vm2982_vm1, %v19833_v25, %v9451_v15  ;;  %v19835_v19 = vsub.f32 %v13470_v23, %v19720_v52  ;;  %19836 = vst [vmem:[#allocation181_spill] sm:$0xff] %v13961_v33  ;;  %v19841_v52 = vld [vmem:[#allocation361_spill] sm:$0xff]  ;;  %v19842_v23 = vld [vmem:[#allocation360_spill] sm:$0xff]  ;;  %v19850_v38 = vld [vmem:[#allocation407_spill] sm:$0xff] }
 0x5d6   : > { %v13949_v44 = vsel %vm2982_vm1, %v19834_v26, %v9450_v57  ;;  %v19839_v31 = vsub.f32 %v19837_v34, %v19838_v3  ;;  %v19840_v29 = vsub.f32 %v13350_v54, %v19684_v6  ;;  %v19843_v57 = vpack.i.bf16 %v19841_v52, %v19842_v23  ;;  %v19846_v6 = vld [vmem:[#allocation333_spill] sm:$0xff]  ;;  %v14000_v62 = vpop.permute.xlu1 %4737  ;;  %v19877_v52 = vld [vmem:[#allocation332_spill] sm:$0xff] }
 0x5d7   : > { %v13934_v14 = vpop.permute.xlu0 %4733  ;;  %v13956_v2 = vsel %vm2982_vm1, %v19835_v19, %v9466_v7  ;;  %v13976_v27 = vperm.slane %v3060_v45, %v19816_v53  ;;  %v13979_v4 = vperm.slane %v3066_v42, %v19816_v53  ;;  %v13982_v7 = vperm.slane %v3110_v13, %v19816_v53  ;;  %v19851_v45 = vld [vmem:[#allocation365_spill] sm:$0xff]  ;;  %v19852_v42 = vld [vmem:[#allocation368_spill] sm:$0xff] }
 0x5d8   : > { %v2996_v36 = vsel %vm2982_vm1, %v19839_v31, %v9431_v17  ;;  %v2995_v15 = vsel %vm2982_vm1, %v19840_v29, %v9430_v22  ;;  %9568 = vrot.lane.b32.xlu1 %v19843_v57, %s10103_s6  ;;  %v19845_v8 = vsub.f32 %v19711_v59, %v19710_v56  ;;  %v19848_v17 = vpack.i.bf16 %v19846_v6, %v19847_v60  ;;  %v14010_v25 = vpop.permute.xlu2 %4725  ;;  %v19857_v6 = vld [vmem:[#allocation337_spill] sm:$0xff]  ;;  %v19901_v33 = vld [vmem:[#allocation236_spill] sm:$0xff] }
 0x5d9   : > { %19844 = vst [vmem:[#allocation194_spill] sm:$0xff] %v13982_v7  ;;  %v13995_v22 = vperm.slane %v3104_v30, %v19816_v53  ;;  %v9481_v46 = vunpack.i.h.bf16 %v19849_v20  ;;  %v9480_v48 = vunpack.i.l.bf16 %v19849_v20  ;;  %v3116_v56 = vsel %vm742_vm0, %v3115_v37, %v2995_v15  ;;  %v19854_v30 = vld [vmem:[#allocation406_spill] sm:$0xff]  ;;  %v19858_v60 = vld [vmem:[#allocation237_spill] sm:$0xff]  ;;  %v19910_v7 = vld [vmem:[#allocation147_spill] sm:$0xff] }
 0x5da   : > { %v13988_v54 = vsel %vm2982_vm1, %v19845_v8, %v9465_v51  ;;  %9588 = vrot.lane.b32.xlu2 %v19848_v17, %s10103_s6  ;;  %v3122_v59 = vsel %vm742_vm0, %v3121_v41, %v2996_v36  ;;  %v9441_v16 = vunpack.i.h.bf16 %v19850_v38  ;;  %v9440_v51 = vunpack.i.l.bf16 %v19850_v38  ;;  %v19855_v37 = vld [vmem:[#allocation410_spill] sm:$0xff]  ;;  %v19860_v38 = vld [vmem:[#allocation343_spill] sm:$0xff] }
 0x5db   : > { %v19853_v13 = vpack.i.bf16 %v19851_v45, %v19852_v42  ;;  %v3215_v26 = vrot.slane %v13988_v54, 4  ;;  %v9446_v19 = vunpack.i.h.bf16 %v19854_v30  ;;  %v9445_v34 = vunpack.i.l.bf16 %v19854_v30  ;;  %v19861_v45 = vld [vmem:[#allocation214_spill] sm:$0xff]  ;;  %v19887_v36 = vld [vmem:[#allocation155_spill] sm:$0xff] }
 0x5dc   : > { %v9456_v3 = vunpack.i.h.bf16 %v19855_v37  ;;  %v9455_v29 = vunpack.i.l.bf16 %v19855_v37  ;;  %v14024_v23 = vperm.slane %v3116_v56, %v19816_v53  ;;  %v14027_v57 = vperm.slane %v3122_v59, %v19816_v53  ;;  %v19867_v37 = vld [vmem:[#allocation220_spill] sm:$0xff] }
 0x5dd   : > { %9578 = vrot.lane.b32.xlu0 %v19853_v13, %s10103_s6  ;;  %v19856_v8 = vsub.f32 %v19730_v28, %v19729_v47  ;;  %v19859_v17 = vsub.f32 %v19857_v6, %v19858_v60  ;;  %v19862_v42 = vsub.f32 %v19860_v38, %v19861_v45  ;;  %v19863_v13 = vld [vmem:[#allocation255_spill] sm:$0xff]  ;;  %v19865_v47 = vld [vmem:[#allocation414_spill] sm:$0xff] }
 0x5de   : > { %v19864_v59 = vsub.f32 %v13460_v12, %v19863_v13  ;;  %v9496_v28 = vunpack.i.h.bf16 %v19865_v47  ;;  %v19869_v60 = vld [vmem:[#allocation74_spill] sm:$0xff]  ;;  %v19875_v13 = vld [vmem:[#allocation412_spill] sm:$0xff] }
 0x5df   : > { %v14020_v15 = vpop.permute.xlu0 %4743  ;;  %v14033_v54 = vsel %vm2982_vm1, %v19856_v8, %v9481_v46  ;;  %v3000_v20 = vsel %vm2982_vm1, %v19859_v17, %v9441_v16  ;;  %v2999_v56 = vsel %vm2982_vm1, %v19862_v42, %v9440_v51  ;;  %v19866_v46 = vld [vmem:[#allocation125_spill] sm:$0xff]  ;;  %v19872_v45 = vld [vmem:[#allocation314_spill] sm:$0xff]  ;;  %v19873_v51 = vld [vmem:[#allocation232_spill] sm:$0xff] }
 0x5e0   : > { %v14047_v30 = vsel %vm2982_vm1, %v19864_v59, %v9480_v48  ;;  %v19868_v8 = vsub.f32 %v19866_v46, %v19867_v37  ;;  %v19870_v16 = vld [vmem:[#allocation229_spill] sm:$0xff]  ;;  %v19874_v42 = vsub.f32 %v19872_v45, %v19873_v51  ;;  %v9476_v48 = vunpack.i.h.bf16 %v19875_v13  ;;  %v19876_v59 = vld [vmem:[#allocation72_spill] sm:$0xff]  ;;  %v19884_v45 = vld [vmem:[#allocation150_spill] sm:$0xff] }
 0x5e1   : > { %v19871_v17 = vsub.f32 %v19869_v60, %v19870_v16  ;;  %v19878_v31 = vpack.i.bf16 %v19876_v59, %v19877_v52  ;;  %v19879_v46 = vld [vmem:[#allocation308_spill] sm:$0xff]  ;;  %v19882_v60 = vld [vmem:[#allocation409_spill] sm:$0xff]  ;;  %v9495_v52 = vunpack.i.l.bf16 %v19865_v47 }
 0x5e2   : > { %v3002_v6 = vsel %vm2982_vm1, %v19868_v8, %v9446_v19  ;;  %v3006_v12 = vsel %vm2982_vm1, %v19874_v42, %v9456_v3  ;;  %v19880_v37 = vld [vmem:[#allocation208_spill] sm:$0xff]  ;;  %v9461_v16 = vunpack.i.h.bf16 %v19882_v60  ;;  %v19883_v3 = vld [vmem:[#allocation143_spill] sm:$0xff] }
 0x5e3   : > { %v3001_v38 = vsel %vm2982_vm1, %v19871_v17, %v9445_v34  ;;  %9583 = vrot.lane.b32.xlu1 %v19878_v31, %s10103_s6  ;;  %v19881_v19 = vsub.f32 %v19879_v46, %v19880_v37  ;;  %v9460_v34 = vunpack.i.l.bf16 %v19882_v60  ;;  %v9475_v17 = vunpack.i.l.bf16 %v19875_v13  ;;  %v19886_v59 = vld [vmem:[#allocation416_spill] sm:$0xff]  ;;  %v19888_v13 = vld [vmem:[#allocation271_spill] sm:$0xff]  ;;  %v14094_v31 = vpop.permute.xlu2 %4705 }
 0x5e4   : > { %v19885_v51 = vpack.i.bf16 %v19883_v3, %v19884_v45  ;;  %v9486_v46 = vunpack.i.h.bf16 %v19886_v59  ;;  %v3165_v37 = vrot.slane %v3002_v6, 4  ;;  %v3177_v60 = vrot.slane %v3006_v12, 4  ;;  %v19890_v3 = vld [vmem:[#allocation339_spill] sm:$0xff]  ;;  %v19893_v42 = vld [vmem:[#allocation80_spill] sm:$0xff] }
 0x5e5   : > { %v3005_v8 = vsel %vm2982_vm1, %v19881_v19, %v9455_v29  ;;  %v14082_v29 = vpop.permute.xlu1 %4749  ;;  %v3159_v19 = vrot.slane %v3001_v38, 4  ;;  %v19889_v35 = vsub.f32 %v19887_v36, %v19888_v13  ;;  %v19891_v45 = vld [vmem:[#allocation331_spill] sm:$0xff]  ;;  %v19895_v5 = vsub.f32 %v19893_v42, %v19894_v32  ;;  %v19896_v38 = vld [vmem:[#allocation42_spill] sm:$0xff]  ;;  %v19898_v36 = vld [vmem:[#allocation45_spill] sm:$0xff] }
 0x5e6   : > { %9603 = vrot.lane.b32.xlu2 %v19885_v51, %s10103_s6  ;;  %v19892_v51 = vpack.i.bf16 %v19890_v3, %v19891_v45  ;;  %v3171_v47 = vrot.slane %v3005_v8, 4  ;;  %v19897_v12 = vld [vmem:[#allocation91_spill] sm:$0xff]  ;;  %v19899_v13 = vld [vmem:[#allocation94_spill] sm:$0xff]  ;;  %v19903_v45 = vld [vmem:[#allocation141_spill] sm:$0xff]  ;;  %v9471_v32 = vunpack.i.h.bf16 %v19906_v58 }
 0x5e7   : > { %v14088_v41 = vsel %vm2982_vm1, %v19889_v35, %v9496_v28  ;;  %v3014_v6 = vsel %vm2982_vm1, %v19895_v5, %v9476_v48  ;;  %v4532_v1 = vmul.f32 %v19897_v12, %v19896_v38  ;;  %v4533_v35 = vmul.f32 %v19899_v13, %v19898_v36  ;;  %v19900_v28 = vld [vmem:[#allocation142_spill] sm:$0xff]  ;;  %v19907_v42 = vld [vmem:[#allocation148_spill] sm:$0xff]  ;;  %v19908_v5 = vld [vmem:[#allocation241_spill] sm:$0xff]  ;;  %v4756_v12 = vpop.permute.xlu0 %4755 }
 0x5e8   : > { %9593 = vrot.lane.b32.xlu0 %v19892_v51, %s10103_s6  ;;  %v19902_v49 = vsub.f32 %v19900_v28, %v19901_v33  ;;  %v19904_v51 = vld [vmem:[#allocation247_spill] sm:$0xff]  ;;  %v19909_v48 = vsub.f32 %v19907_v42, %v19908_v5  ;;  %v19911_v36 = vld [vmem:[#allocation261_spill] sm:$0xff] }
 0x5e9   : > { %v19905_v21 = vsub.f32 %v19903_v45, %v19904_v51  ;;  %v19912_v13 = vsub.f32 %v19910_v7, %v19911_v36  ;;  %v14125_v28 = vadd.f32 %v4756_v12, %v4533_v35  ;;  %v19913_v45 = vld [vmem:[#allocation157_spill] sm:$0xff]  ;;  %v19914_v51 = vld [vmem:[#allocation267_spill] sm:$0xff]  ;;  %v3233_v7 = vrot.slane %v3014_v6, 4  ;;  %v19925_v35 = vld [vmem:[#allocation144_spill] sm:$0xff] }
 0x5ea   : > { %v3008_v3 = vsel %vm2982_vm1, %v19902_v49, %v9461_v16  ;;  %v3013_v38 = vsel %vm2982_vm1, %v19909_v48, %v9475_v17  ;;  %v9485_v49 = vunpack.i.l.bf16 %v19886_v59  ;;  %v14123_v16 = vadd.f32 %v13773_v9, %v4532_v1  ;;  %v19917_v59 = vld [vmem:[#allocation121_spill] sm:$0xff] }
 0x5eb   : > { %v3007_v8 = vsel %vm2982_vm1, %v19905_v21, %v9460_v34  ;;  %v3018_v33 = vsel %vm2982_vm1, %v19912_v13, %v9486_v46  ;;  %v3160_v21 = vsel %vm742_vm0, %v3159_v19, %v2999_v56  ;;  %v3166_v34 = vsel %vm742_vm0, %v3165_v37, %v3000_v20  ;;  %v19916_v20 = vld [vmem:[#allocation103_spill] sm:$0xff]  ;;  %v19926_v5 = vld [vmem:[#allocation249_spill] sm:$0xff]  ;;  %v19977_v56 = vld [vmem:[#allocation82_spill] sm:$0xff] }
 0x5ec   : > { %v19915_v17 = vsub.f32 %v19913_v45, %v19914_v51  ;;  %v3172_v46 = vsel %vm742_vm0, %v3171_v47, %v13949_v44  ;;  %v3178_v9 = vsel %vm742_vm0, %v3177_v60, %v13943_v40  ;;  %v9470_v1 = vunpack.i.l.bf16 %v19906_v58  ;;  %v19920_v40 = vld [vmem:[#allocation179_spill] sm:$0xff]  ;;  %v19921_v60 = vld [vmem:[#allocation173_spill] sm:$0xff]  ;;  %v19933_v51 = vld [vmem:[#allocation152_spill] sm:$0xff] }
 0x5ed   : > { %v19918_v37 = vpack.i.bf16 %v19916_v20, %v19917_v59  ;;  %v19919_v19 = vrot.slane %v13956_v2, 4  ;;  %v3227_v44 = vrot.slane %v3013_v38, 4  ;;  %v3277_v47 = vrot.slane %v3018_v33, 4  ;;  %v14168_v36 = vpop.permute.xlu1 %4729  ;;  %v14182_v20 = vpop.permute.xlu2 %4717 }
 0x5ee   : > { %v14133_v42 = vsel %vm2982_vm1, %v19915_v17, %v9495_v52  ;;  %v3216_v52 = vsel %vm742_vm0, %v3215_v26, %v3007_v8  ;;  %v19922_v58 = vpack.i.bf16 %v19920_v40, %v19921_v60  ;;  %v14155_v12 = vperm.slane %v3160_v21, %v19816_v53  ;;  %v19928_v8 = vld [vmem:[#allocation140_spill] sm:$0xff] }
 0x5ef   : > { %9598 = vrot.lane.b32.xlu1 %v19918_v37, %s10103_s6  ;;  %v3222_v6 = vsel %vm742_vm0, %v19919_v19, %v3008_v3  ;;  %v14158_v13 = vperm.slane %v3166_v34, %v19816_v53  ;;  %v19927_v26 = vsub.f32 %v19925_v35, %v19926_v5  ;;  %v19929_v3 = vld [vmem:[#allocation242_spill] sm:$0xff]  ;;  %v14171_v33 = vperm.slane %v3172_v46, %v19816_v53  ;;  %v19941_v19 = vld [vmem:[#allocation417_spill] sm:$0xff] }
 0x5f0   : > { %9618 = vrot.lane.b32.xlu2 %v19922_v58, %s10103_s6  ;;  %19923 = vst [vmem:[#allocation189_spill] sm:$0xff] %v14155_v12  ;;  %v19930_v48 = vsub.f32 %v19928_v8, %v19929_v3  ;;  %v14174_v21 = vperm.slane %v3178_v9, %v19816_v53  ;;  %v3289_v34 = vrot.slane %v14088_v41, 4  ;;  %v14186_v59 = vperm.slane %v3216_v52, %v19816_v53  ;;  %v19938_v9 = vld [vmem:[#allocation126_spill] sm:$0xff] }
 0x5f1   : > { %19924 = vst [vmem:[#allocation186_spill] sm:$0xff] %v14158_v13  ;;  %v3012_v2 = vsel %vm2982_vm1, %v19927_v26, %v9471_v32  ;;  %v19934_v32 = vld [vmem:[#allocation164_spill] sm:$0xff]  ;;  %v14189_v46 = vperm.slane %v3222_v6, %v19816_v53  ;;  %v19939_v37 = vld [vmem:[#allocation226_spill] sm:$0xff]  ;;  %v9511_v40 = vunpack.i.h.bf16 %v19941_v19  ;;  %v3278_v35 = vsel %vm742_vm0, %v3277_v47, %v14033_v54  ;;  %v19943_v26 = vld [vmem:[#allocation415_spill] sm:$0xff] }
 0x5f2   : > { %v3017_v38 = vsel %vm2982_vm1, %v19930_v48, %v9485_v49  ;;  %19931 = vst [vmem:[#allocation205_spill] sm:$0xff] %v14171_v33  ;;  %v3234_v45 = vsel %vm742_vm0, %v3233_v7, %v3012_v2  ;;  %v19935_v17 = vpack.i.bf16 %v19933_v51, %v19934_v32  ;;  %v3283_v49 = vrot.slane %v14133_v42, 4  ;;  %v14199_v42 = vpop.permute.xlu0 %4745  ;;  %v19947_v51 = vld [vmem:[#allocation184_spill] sm:$0xff]  ;;  %v19948_v32 = vld [vmem:[#allocation174_spill] sm:$0xff]  ;;  %v19961_v54 = vld [vmem:[#allocation151_spill] sm:$0xff] }
 0x5f3   : > { %19932 = vst [vmem:[#allocation192_spill] sm:$0xff] %v14174_v21  ;;  %v19940_v41 = vsub.f32 %v19938_v9, %v19939_v37  ;;  %v3271_v58 = vrot.slane %v3017_v38, 4  ;;  %v9510_v6 = vunpack.i.l.bf16 %v19941_v19  ;;  %v14204_v5 = vperm.slane %v3234_v45, %v19816_v53  ;;  %v19946_v38 = vld [vmem:[#allocation418_spill] sm:$0xff]  ;;  %v19950_v37 = vld [vmem:[#allocation283_spill] sm:$0xff]  ;;  %v19984_v33 = vld [vmem:[#allocation420_spill] sm:$0xff] }
 0x5f4   : > { %9608 = vrot.lane.b32.xlu0 %v19935_v17, %s10103_s6  ;;  %19936 = vst [vmem:[#allocation188_spill] sm:$0xff] %v14186_v59  ;;  %v9491_v2 = vunpack.i.h.bf16 %v19943_v26  ;;  %v9490_v3 = vunpack.i.l.bf16 %v19943_v26  ;;  %v14216_v48 = vperm.slane %v3278_v35, %v19816_v53  ;;  %v9505_v45 = vunpack.i.l.bf16 %v19946_v38  ;;  %v19953_v35 = vld [vmem:[#allocation92_spill] sm:$0xff] }
 0x5f5   : > { %19937 = vst [vmem:[#allocation206_spill] sm:$0xff] %v14189_v46  ;;  %v3011_v7 = vsel %vm2982_vm1, %v19940_v41, %v9470_v1  ;;  %v19949_v17 = vpack.i.bf16 %v19947_v51, %v19948_v32  ;;  %v19951_v41 = vsub.f32 %v19756_v24, %v19950_v37  ;;  %v3272_v19 = vsel %vm742_vm0, %v3271_v58, %v14047_v30  ;;  %v19955_v51 = vld [vmem:[#allocation50_spill] sm:$0xff]  ;;  %v19956_v32 = vld [vmem:[#allocation279_spill] sm:$0xff]  ;;  %v19959_v37 = vld [vmem:[#allocation248_spill] sm:$0xff] }
 0x5f6   : > { %v3228_v60 = vsel %vm742_vm0, %v3227_v44, %v3011_v7  ;;  %19942 = vst [vmem:[#allocation200_spill] sm:$0xff] %v14204_v5  ;;  %v19954_v44 = vpack.i.bf16 %v13792_v0, %v13790_v55  ;;  %v9506_v58 = vunpack.i.h.bf16 %v19946_v38  ;;  %v19962_v55 = vld [vmem:[#allocation259_spill] sm:$0xff]  ;;  %v19967_v1 = vld [vmem:[#allocation89_spill] sm:$0xff]  ;;  %v14265_v38 = vpop.permute.xlu2 %4697  ;;  %v19980_v59 = vld [vmem:[#allocation260_spill] sm:$0xff] }
 0x5f7   : > { %v14213_v47 = vperm.slane %v3228_v60, %v19816_v53  ;;  %19945 = vst [vmem:[#allocation216_spill] sm:$0xff] %v14216_v48  ;;  %9613 = vrot.lane.b32.xlu1 %v19949_v17, %s10103_s6  ;;  %v14228_v7 = vsel %vm2982_vm1, %v19951_v41, %v9511_v40  ;;  %v19952_v60 = vld [vmem:[#allocation33_spill] sm:$0xff]  ;;  %v19957_v17 = vsub.f32 %v19955_v51, %v19956_v32  ;;  %v19958_v40 = vld [vmem:[#allocation146_spill] sm:$0xff]  ;;  %v19976_v24 = vld [vmem:[#allocation35_spill] sm:$0xff] }
 0x5f8   : > { %v4522_v26 = vmul.f32 %v19953_v35, %v19952_v60  ;;  %9633 = vrot.lane.b32.xlu2 %v19954_v44, %s10103_s6  ;;  %v19960_v41 = vsub.f32 %v19958_v40, %v19959_v37  ;;  %v14250_v60 = vpop.permute.xlu1 %4751  ;;  %v19963_v0 = vsub.f32 %v19961_v54, %v19962_v55  ;;  %v19964_v51 = vld [vmem:[#allocation29_spill] sm:$0xff]  ;;  %v14269_v54 = vperm.slane %v3272_v19, %v19816_v53  ;;  %v19972_v55 = vld [vmem:[#allocation56_spill] sm:$0xff] }
 0x5f9   : > { %19944 = vst [vmem:[#allocation197_spill] sm:$0xff] %v14213_v47  ;;  %v14242_v9 = vsel %vm2982_vm1, %v19957_v17, %v9510_v6  ;;  %v19965_v32 = vld [vmem:[#allocation81_spill] sm:$0xff]  ;;  %v19966_v17 = vld [vmem:[#allocation31_spill] sm:$0xff]  ;;  %v20040_v5 = vld [vmem:[#allocation76_spill] sm:$0xff] }
 0x5fa   : > { %v3020_v30 = vsel %vm2982_vm1, %v19960_v41, %v9491_v2  ;;  %v3019_v44 = vsel %vm2982_vm1, %v19963_v0, %v9490_v3  ;;  %v4519_v6 = vmul.f32 %v19965_v32, %v19964_v51  ;;  %v4521_v8 = vmul.f32 %v19967_v1, %v19966_v17  ;;  %v19968_v40 = vld [vmem:[#allocation177_spill] sm:$0xff]  ;;  %19971 = vst [vmem:[#allocation202_spill] sm:$0xff] %v14269_v54  ;;  %v14281_v41 = vpop.permute.xlu0 %4709 }
 0x5fb   : > { %v4906_v52 = vadd.f32 %v13934_v14, %v4522_v26  ;;  %v19969_v2 = vld [vmem:[#allocation49_spill] sm:$0xff]  ;;  %v19975_v14 = vld [vmem:[#allocation422_spill] sm:$0xff]  ;;  %v3284_v19 = vsel %vm742_vm0, %v3283_v49, %v3019_v44  ;;  %v3290_v3 = vsel %vm742_vm0, %v3289_v34, %v3020_v30  ;;  %v9525_v49 = vunpack.i.l.bf16 %v19984_v33  ;;  %v19985_v34 = vld [vmem:[#allocation47_spill] sm:$0xff] }
 0x5fc   : > { %v19970_v37 = vpack.i.bf16 %v19968_v40, %v19969_v2  ;;  %v19973_v0 = vld [vmem:[#allocation277_spill] sm:$0xff]  ;;  %v9516_v26 = vunpack.i.h.bf16 %v19975_v14  ;;  %v4526_v40 = vmul.f32 %v19977_v56, %v19976_v24  ;;  %v19978_v2 = vld [vmem:[#allocation170_spill] sm:$0xff]  ;;  %v4905_v46 = vadd.f32 %v13833_v11, %v4521_v8 }
 0x5fd   : > { %v19974_v51 = vsub.f32 %v19972_v55, %v19973_v0  ;;  %v19979_v48 = vld [vmem:[#allocation349_spill] sm:$0xff]  ;;  %v9515_v0 = vunpack.i.l.bf16 %v19975_v14  ;;  %v14302_v14 = vperm.slane %v3284_v19, %v19816_v53  ;;  %v19996_v8 = vld [vmem:[#allocation266_spill] sm:$0xff]  ;;  %v19999_v19 = vld [vmem:[#allocation88_spill] sm:$0xff] }
 0x5fe   : > { %9623 = vrot.lane.b32.xlu0 %v19970_v37, %s10103_s6  ;;  %v4903_v37 = vadd.f32 %v19978_v2, %v4519_v6  ;;  %v19981_v55 = vsub.f32 %v19979_v48, %v19980_v59  ;;  %v19983_v6 = vld [vmem:[#allocation158_spill] sm:$0xff]  ;;  %v19986_v30 = vld [vmem:[#allocation105_spill] sm:$0xff]  ;;  %v19988_v48 = vld [vmem:[#allocation124_spill] sm:$0xff] }
 0x5ff   : > { %v3025_v17 = vsel %vm2982_vm1, %v19974_v51, %v9505_v45  ;;  %v19982_v51 = vld [vmem:[#allocation419_spill] sm:$0xff]  ;;  %v4910_v2 = vadd.f32 %v19983_v6, %v4526_v40  ;;  %v4534_v13 = vmul.f32 %v19986_v30, %v19985_v34  ;;  %v19987_v59 = vld [vmem:[#allocation113_spill] sm:$0xff]  ;;  %19990 = vst [vmem:[#allocation199_spill] sm:$0xff] %v14302_v14  ;;  %v19995_v34 = vld [vmem:[#allocation160_spill] sm:$0xff] }
 0x600   : > { %v3026_v45 = vsel %vm2982_vm1, %v19981_v55, %v9506_v58  ;;  %v9501_v21 = vunpack.i.h.bf16 %v19982_v51  ;;  %v9500_v24 = vunpack.i.l.bf16 %v19982_v51  ;;  %v9647_v11 = vpack.i.bf16 %v4906_v52, %v4903_v37  ;;  %v19991_v51 = vld [vmem:[#allocation167_spill] sm:$0xff]  ;;  %v19992_v40 = vld [vmem:[#allocation285_spill] sm:$0xff]  ;;  %v14319_v12 = vpop.permute.xlu1 %4715 }
 0x601   : > { %v3327_v44 = vrot.slane %v3025_v17, 4  ;;  %v19989_v58 = vpack.i.bf16 %v19987_v59, %v19988_v48  ;;  %v3333_v55 = vrot.slane %v3026_v45, 4  ;;  %v19993_v52 = vsub.f32 %v19991_v51, %v19992_v40  ;;  %v19998_v48 = vld [vmem:[#allocation39_spill] sm:$0xff]  ;;  %v20000_v51 = vld [vmem:[#allocation326_spill] sm:$0xff] }
 0x602   : > { %v9637_v6 = vpack.i.bf16 %v4910_v2, %v4905_v46  ;;  %9648 = vrot.lane.b32.xlu2 %v9647_v11, %s10103_s6  ;;  %v14310_v17 = vperm.slane %v3290_v3, %v19816_v53  ;;  %v19997_v54 = vsub.f32 %v19995_v34, %v19996_v8  ;;  %v4918_v45 = vadd.f32 %v13911_v18, %v4534_v13  ;;  %v20003_v11 = vld [vmem:[#allocation154_spill] sm:$0xff]  ;;  %v14333_v18 = vpop.permute.xlu2 %4719 }
 0x603   : > { %9628 = vrot.lane.b32.xlu1 %v19989_v58, %s10103_s6  ;;  %v3030_v37 = vsel %vm2982_vm1, %v19993_v52, %v9516_v26  ;;  %v4529_v58 = vmul.f32 %v19999_v19, %v19998_v48  ;;  %v20001_v26 = vld [vmem:[#allocation273_spill] sm:$0xff]  ;;  %v20004_v3 = vld [vmem:[#allocation254_spill] sm:$0xff]  ;;  %v9526_v8 = vunpack.i.h.bf16 %v19984_v33  ;;  %v20008_v13 = vsub.f32 %v19776_v10, %v19775_v39 }
 0x604   : > { %19994 = vst [vmem:[#allocation136_spill] sm:$0xff] %v14310_v17  ;;  %v3029_v59 = vsel %vm2982_vm1, %v19997_v54, %v9515_v0  ;;  %v20002_v46 = vsub.f32 %v20000_v51, %v20001_v26  ;;  %v20005_v40 = vsub.f32 %v20003_v11, %v20004_v3  ;;  %v20006_v54 = vld [vmem:[#allocation34_spill] sm:$0xff]  ;;  %v20007_v0 = vld [vmem:[#allocation93_spill] sm:$0xff]  ;;  %v3345_v51 = vrot.slane %v3030_v37, 4  ;;  %v20012_v37 = vld [vmem:[#allocation60_spill] sm:$0xff] }
 0x605   : > { %v4524_v34 = vmul.f32 %v20007_v0, %v20006_v54  ;;  %v3033_v48 = vsel %vm2982_vm1, %v20008_v13, %v9525_v49  ;;  %v4913_v26 = vadd.f32 %v13857_v63, %v4529_v58  ;;  %v3339_v33 = vrot.slane %v3029_v59, 4  ;;  %v20010_v11 = vld [vmem:[#allocation90_spill] sm:$0xff]  ;;  %v20011_v10 = vld [vmem:[#allocation421_spill] sm:$0xff]  ;;  %v20030_v54 = vld [vmem:[#allocation12_spill] sm:$0xff] }
 0x606   : > { %v3024_v2 = vsel %vm2982_vm1, %v20002_v46, %v9501_v21  ;;  %v3023_v52 = vsel %vm2982_vm1, %v20005_v40, %v9500_v24  ;;  %9638 = vrot.lane.b32.xlu0 %v9637_v6, %s10103_s6  ;;  %v20009_v46 = vld [vmem:[#allocation36_spill] sm:$0xff]  ;;  %v14345_v40 = vpop.permute.xlu0 %4695  ;;  %v9520_v49 = vunpack.i.l.bf16 %v20011_v10  ;;  %v3383_v59 = vrot.slane %v3033_v48, 4  ;;  %v20020_v48 = vld [vmem:[#allocation423_spill] sm:$0xff] }
 0x607   : > { %v3328_v21 = vsel %vm742_vm0, %v3327_v44, %v3023_v52  ;;  %v3334_v24 = vsel %vm742_vm0, %v3333_v55, %v3024_v2  ;;  %v4525_v3 = vmul.f32 %v20010_v11, %v20009_v46  ;;  %v4908_v6 = vadd.f32 %v14000_v62, %v4524_v34  ;;  %v20013_v52 = vld [vmem:[#allocation295_spill] sm:$0xff]  ;;  %v20016_v2 = vld [vmem:[#allocation46_spill] sm:$0xff] }
 0x608   : > { %v9642_v44 = vpack.i.bf16 %v4918_v45, %v4913_v26  ;;  %v20014_v63 = vsub.f32 %v20012_v37, %v20013_v52  ;;  %v14355_v58 = vperm.slane %v3328_v21, %v19816_v53  ;;  %v14359_v34 = vperm.slane %v3334_v24, %v19816_v53  ;;  %v20018_v45 = vld [vmem:[#allocation41_spill] sm:$0xff]  ;;  %v20019_v26 = vld [vmem:[#allocation99_spill] sm:$0xff] }
 0x609   : > { %v4909_v62 = vadd.f32 %v20016_v2, %v4525_v3  ;;  %v3346_v13 = vsel %vm742_vm0, %v3345_v51, %v14228_v7  ;;  %v9521_v46 = vunpack.i.h.bf16 %v20011_v10  ;;  %v4530_v39 = vmul.f32 %v20019_v26, %v20018_v45  ;;  %v20021_v3 = vld [vmem:[#allocation19_spill] sm:$0xff]  ;;  %v20024_v10 = vld [vmem:[#allocation165_spill] sm:$0xff]  ;;  %v20027_v45 = vld [vmem:[#allocation38_spill] sm:$0xff] }
 0x60a   : > { %v3034_v55 = vsel %vm2982_vm1, %v20014_v63, %v9526_v8  ;;  %20015 = vst [vmem:[#allocation217_spill] sm:$0xff] %v14355_v58  ;;  %v3340_v8 = vsel %vm742_vm0, %v3339_v33, %v14242_v9  ;;  %v9541_v21 = vunpack.i.h.bf16 %v20020_v48  ;;  %v20022_v52 = vld [vmem:[#allocation71_spill] sm:$0xff]  ;;  %v20023_v7 = vpack.i.bf16 %v14125_v28, %v14123_v16  ;;  %v20025_v63 = vld [vmem:[#allocation289_spill] sm:$0xff] }
 0x60b   : > { %20017 = vst [vmem:[#allocation211_spill] sm:$0xff] %v14359_v34  ;;  %9643 = vrot.lane.b32.xlu1 %v9642_v44, %s10103_s6  ;;  %v9652_v37 = vpack.i.bf16 %v4909_v62, %v4908_v6  ;;  %v4510_v24 = vmul.f32 %v20022_v52, %v20021_v3  ;;  %v9540_v51 = vunpack.i.l.bf16 %v20020_v48  ;;  %v20026_v2 = vsub.f32 %v20024_v10, %v20025_v63  ;;  %v20028_v9 = vld [vmem:[#allocation95_spill] sm:$0xff]  ;;  %v14384_v62 = vpop.permute.xlu1 %4701  ;;  %v20031_v16 = vld [vmem:[#allocation429_spill] sm:$0xff]  ;;  %v20033_v48 = vld [vmem:[#allocation70_spill] sm:$0xff] }
 0x60c   : > { %9663 = vrot.lane.b32.xlu2 %v20023_v7, %s10103_s6  ;;  %v4527_v33 = vmul.f32 %v20028_v9, %v20027_v45  ;;  %v4914_v6 = vadd.f32 %v14082_v29, %v4530_v39  ;;  %v14387_v3 = vperm.slane %v3346_v13, %v19816_v53  ;;  %v4505_v28 = vmul.f32 %v20031_v16, %v20030_v54  ;;  %v20032_v7 = vld [vmem:[#allocation28_spill] sm:$0xff] }
 0x60d   : > { %v3031_v44 = vsel %vm2982_vm1, %v20026_v2, %v9520_v49  ;;  %v4520_v17 = vmul.f32 %v20033_v48, %v20032_v7  ;;  %v4894_v10 = vadd.f32 %v14281_v41, %v4510_v24  ;;  %v14395_v49 = vpop.permute.xlu2 %4363  ;;  %v3389_v63 = vrot.slane %v3034_v55, 4  ;;  %v20036_v39 = vld [vmem:[#allocation156_spill] sm:$0xff] }
 0x60e   : > { %20029 = vst [vmem:[#allocation213_spill] sm:$0xff] %v14387_v3  ;;  %9653 = vrot.lane.b32.xlu0 %v9652_v37, %s10103_s6  ;;  %v14398_v29 = vperm.slane %v3340_v8, %v19816_v53  ;;  %v20037_v2 = vld [vmem:[#allocation272_spill] sm:$0xff]  ;;  %v4911_v54 = vadd.f32 %v14020_v15, %v4527_v33  ;;  %v3384_v14 = vsel %vm742_vm0, %v3383_v59, %v3031_v44  ;;  %v4708_v55 = vpop.permute.xlu0 %4707  ;;  %v20046_v33 = vld [vmem:[#allocation303_spill] sm:$0xff]  ;;  %v20063_v59 = vld [vmem:[#allocation22_spill] sm:$0xff] }
 0x60f   : > { %20034 = vst [vmem:[#allocation130_spill] sm:$0xff] %v14395_v49  ;;  %v20038_v13 = vsub.f32 %v20036_v39, %v20037_v2  ;;  %v20039_v7 = vld [vmem:[#allocation32_spill] sm:$0xff]  ;;  %v4889_v37 = vadd.f32 %v13917_v61, %v4505_v28  ;;  %v4904_v24 = vadd.f32 %v14168_v36, %v4520_v17  ;;  %v20041_v49 = vld [vmem:[#allocation169_spill] sm:$0xff]  ;;  %v20042_v39 = vld [vmem:[#allocation307_spill] sm:$0xff]  ;;  %v14428_v47 = vperm.slane %v3384_v14, %v19816_v53 }
 0x610   : > { %20035 = vst [vmem:[#allocation207_spill] sm:$0xff] %v14398_v29  ;;  %v4523_v41 = vmul.f32 %v20040_v5, %v20039_v7  ;;  %v20043_v2 = vsub.f32 %v20041_v49, %v20042_v39  ;;  %v9657_v15 = vpack.i.bf16 %v4914_v6, %v4911_v54  ;;  %v20045_v44 = vld [vmem:[#allocation168_spill] sm:$0xff]  ;;  %v20051_v49 = vld [vmem:[#allocation43_spill] sm:$0xff]  ;;  %v20053_v39 = vld [vmem:[#allocation425_spill] sm:$0xff] }
 0x611   : > { %v3032_v45 = vsel %vm2982_vm1, %v20038_v13, %v9521_v46  ;;  %v20047_v13 = vsub.f32 %v20045_v44, %v20046_v33  ;;  %v20049_v36 = vld [vmem:[#allocation180_spill] sm:$0xff]  ;;  %v9677_v28 = vpack.i.bf16 %v4894_v10, %v4889_v37  ;;  %20050 = vst [vmem:[#allocation223_spill] sm:$0xff] %v14428_v47  ;;  %v20055_v33 = vld [vmem:[#allocation69_spill] sm:$0xff]  ;;  %v20056_v10 = vrot.slane %v14027_v57, 4  ;;  %v20068_v3 = vld [vmem:[#allocation27_spill] sm:$0xff] }
 0x612   : > { %v14416_v46 = vsel %vm2982_vm1, %v20043_v2, %v9541_v21  ;;  %v4907_v17 = vadd.f32 %v20049_v36, %v4523_v41  ;;  %v3390_v21 = vsel %vm742_vm0, %v3389_v63, %v3032_v45  ;;  %v20052_v6 = vld [vmem:[#allocation96_spill] sm:$0xff]  ;;  %v9531_v2 = vunpack.i.h.bf16 %v20053_v39  ;;  %v20058_v41 = vld [vmem:[#allocation98_spill] sm:$0xff]  ;;  %v20062_v7 = vld [vmem:[#allocation65_spill] sm:$0xff] }
 0x613   : > { %20044 = vst [vmem:[#allocation227_spill] sm:$0xff] %v14416_v46  ;;  %v14423_v61 = vsel %vm2982_vm1, %v20047_v13, %v9540_v51  ;;  %v4531_v54 = vmul.f32 %v20052_v6, %v20051_v49  ;;  %9658 = vrot.lane.b32.xlu1 %v9657_v15, %s10103_s6  ;;  %v20054_v51 = vld [vmem:[#allocation17_spill] sm:$0xff]  ;;  %v3140_v14 = vsel %vm742_vm0, %v20056_v10, %v14024_v23  ;;  %v9530_v63 = vunpack.i.l.bf16 %v20053_v39  ;;  %v20057_v45 = vld [vmem:[#allocation40_spill] sm:$0xff]  ;;  %v4712_v36 = vpop.permute.xlu1 %4711  ;;  %v20060_v49 = vld [vmem:[#allocation426_spill] sm:$0xff] }
 0x614   : > { %20048 = vst [vmem:[#allocation209_spill] sm:$0xff] %v14423_v61  ;;  %v9667_v44 = vpack.i.bf16 %v4907_v17, %v4904_v24  ;;  %v4509_v13 = vmul.f32 %v20055_v33, %v20054_v51  ;;  %9678 = vrot.lane.b32.xlu2 %v9677_v28, %s10103_s6  ;;  %v4528_v37 = vmul.f32 %v20058_v41, %v20057_v45  ;;  %v20059_v24 = vrot.slane %v13979_v4, 4  ;;  %v20061_v51 = vld [vmem:[#allocation15_spill] sm:$0xff]  ;;  %v20064_v10 = vld [vmem:[#allocation432_spill] sm:$0xff] }
 0x615   : > { %v4915_v15 = vadd.f32 %v14250_v60, %v4531_v54  ;;  %v9556_v28 = vunpack.i.h.bf16 %v20060_v49  ;;  %v4508_v8 = vmul.f32 %v20062_v7, %v20061_v51  ;;  %v4513_v47 = vmul.f32 %v20064_v10, %v20063_v59  ;;  %v14456_v45 = vpop.permute.xlu2 %4353  ;;  %v20066_v54 = vld [vmem:[#allocation424_spill] sm:$0xff]  ;;  %v20069_v29 = vld [vmem:[#allocation87_spill] sm:$0xff] }
 0x616   : > { %v3084_v17 = vsel %vm742_vm0, %v20059_v24, %v13976_v27  ;;  %v4893_v39 = vadd.f32 %v4708_v55, %v4509_v13  ;;  %9668 = vrot.lane.b32.xlu0 %v9667_v44, %s10103_s6  ;;  %20065 = vst [vmem:[#allocation54_spill] sm:$0xff] %v14456_v45  ;;  %v9555_v60 = vunpack.i.l.bf16 %v20060_v49  ;;  %v9535_v34 = vunpack.i.l.bf16 %v20066_v54  ;;  %v20067_v24 = vld [vmem:[#allocation139_spill] sm:$0xff]  ;;  %v14468_v59 = vpop.permute.xlu0 %4721 }
 0x617   : > { %v4912_v58 = vadd.f32 %v14199_v42, %v4528_v37  ;;  %v14462_v46 = vperm.slane %v3140_v14, %v20067_v24  ;;  %v4518_v51 = vmul.f32 %v20069_v29, %v20068_v3  ;;  %v4892_v61 = vadd.f32 %v14094_v31, %v4508_v8  ;;  %v20071_v49 = vld [vmem:[#allocation175_spill] sm:$0xff]  ;;  %v20072_v42 = vld [vmem:[#allocation297_spill] sm:$0xff]  ;;  %v20076_v3 = vld [vmem:[#allocation278_spill] sm:$0xff] }
 0x618   : > { %v4897_v55 = vadd.f32 %v14319_v12, %v4513_v47  ;;  %v14471_v44 = vperm.slane %v3084_v17, %v20067_v24  ;;  %v14474_v13 = vperm.slane %v3390_v21, %v19816_v53  ;;  %v20073_v37 = vsub.f32 %v20071_v49, %v20072_v42  ;;  %v20075_v41 = vld [vmem:[#allocation327_spill] sm:$0xff]  ;;  %v20079_v49 = vld [vmem:[#allocation194_spill] sm:$0xff] }
 0x619   : > { %v20077_v45 = vsub.f32 %v20075_v41, %v20076_v3  ;;  %v9672_v12 = vpack.i.bf16 %v4915_v15, %v4912_v58  ;;  %v4902_v47 = vadd.f32 %v14010_v25, %v4518_v51  ;;  %v9692_v8 = vpack.i.bf16 %v4893_v39, %v4892_v61  ;;  %v20085_v58 = vld [vmem:[#allocation172_spill] sm:$0xff]  ;;  %v20086_v15 = vld [vmem:[#allocation315_spill] sm:$0xff]  ;;  %v20091_v3 = vld [vmem:[#allocation166_spill] sm:$0xff] }
 0x61a   : > { %20070 = vst [vmem:[#allocation53_spill] sm:$0xff] %v14474_v13  ;;  %v14480_v14 = vsel %vm2982_vm1, %v20073_v37, %v9531_v2  ;;  %v20078_v21 = vrot.slane %v13920_v50, 4  ;;  %v20080_v42 = vrot.slane %v20079_v49, 4  ;;  %v20081_v37 = vld [vmem:[#allocation183_spill] sm:$0xff]  ;;  %v20087_v25 = vsub.f32 %v20085_v58, %v20086_v15  ;;  %v20089_v50 = vld [vmem:[#allocation14_spill] sm:$0xff] }
 0x61b   : > { %20074 = vst [vmem:[#allocation190_spill] sm:$0xff] %v14480_v14  ;;  %v14486_v31 = vsel %vm2982_vm1, %v20077_v45, %v9530_v63  ;;  %v20082_v13 = vld [vmem:[#allocation319_spill] sm:$0xff]  ;;  %9673 = vrot.lane.b32.xlu1 %v9672_v12, %s10103_s6  ;;  %v3151_v45 = vrot.slane %v14462_v46, 4  ;;  %v9536_v51 = vunpack.i.h.bf16 %v20066_v54  ;;  %v4724_v15 = vpop.permute.xlu1 %4723 }
 0x61c   : > { %v3072_v17 = vsel %vm742_vm0, %v20078_v21, %v13891_v43  ;;  %v3128_v2 = vsel %vm742_vm0, %v20080_v42, %v13995_v22  ;;  %v20083_v41 = vsub.f32 %v20081_v37, %v20082_v13  ;;  %v14507_v61 = vsel %vm2982_vm1, %v20087_v25, %v9555_v60  ;;  %v20090_v39 = vld [vmem:[#allocation431_spill] sm:$0xff]  ;;  %v20092_v13 = vld [vmem:[#allocation301_spill] sm:$0xff]  ;;  %9693 = vrot.lane.b32.xlu2 %v9692_v8, %s10103_s6 }
 0x61d   : > { %20088 = vst [vmem:[#allocation219_spill] sm:$0xff] %v14507_v61  ;;  %v4506_v43 = vmul.f32 %v20090_v39, %v20089_v50  ;;  %v20093_v21 = vsub.f32 %v20091_v3, %v20092_v13  ;;  %v9682_v42 = vpack.i.bf16 %v4902_v47, %v4897_v55  ;;  %v3095_v60 = vrot.slane %v14471_v44, 4  ;;  %v20094_v37 = vld [vmem:[#allocation11_spill] sm:$0xff]  ;;  %v20096_v50 = vld [vmem:[#allocation18_spill] sm:$0xff]  ;;  %v20099_v55 = vld [vmem:[#allocation181_spill] sm:$0xff] }
 0x61e   : > { %v14501_v63 = vsel %vm2982_vm1, %v20083_v41, %v9556_v28  ;;  %v20095_v41 = vld [vmem:[#allocation430_spill] sm:$0xff]  ;;  %v3078_v25 = vperm.slane %v3072_v17, %v20067_v24  ;;  %v3134_v54 = vperm.slane %v3128_v2, %v20067_v24  ;;  %v20097_v3 = vld [vmem:[#allocation55_spill] sm:$0xff]  ;;  %v14534_v47 = vperm.slane %v20099_v55, %v20067_v24 }
 0x61f   : > { %20084 = vst [vmem:[#allocation195_spill] sm:$0xff] %v14501_v63  ;;  %v14518_v28 = vsel %vm2982_vm1, %v20093_v21, %v9535_v34  ;;  %v4503_v58 = vmul.f32 %v20095_v41, %v20094_v37  ;;  %v4890_v12 = vadd.f32 %v14384_v62, %v4506_v43  ;;  %v4511_v13 = vmul.f32 %v20097_v3, %v20096_v50  ;;  %v14530_v34 = vpop.permute.xlu2 %4365  ;;  %v20103_v43 = vld [vmem:[#allocation13_spill] sm:$0xff]  ;;  %v20104_v21 = vld [vmem:[#allocation63_spill] sm:$0xff]  ;;  %v20105_v50 = vld [vmem:[#allocation16_spill] sm:$0xff] }
 0x620   : > { %9683 = vrot.lane.b32.xlu0 %v9682_v42, %s10103_s6  ;;  %20098 = vst [vmem:[#allocation225_spill] sm:$0xff] %v14530_v34  ;;  %v20101_v8 = vrot.slane %v13976_v27, 4  ;;  %v20102_v17 = vrot.slane %v13995_v22, 4  ;;  %v4504_v37 = vmul.f32 %v20104_v21, %v20103_v43  ;;  %v20106_v14 = vld [vmem:[#allocation51_spill] sm:$0xff]  ;;  %v3152_v55 = vsel %vm742_vm0, %v3151_v45, %v3134_v54  ;;  %v20107_v34 = vld [vmem:[#allocation21_spill] sm:$0xff] }
 0x621   : > { %20100 = vst [vmem:[#allocation221_spill] sm:$0xff] %v14534_v47  ;;  %v4887_v42 = vadd.f32 %v14345_v40, %v4503_v58  ;;  %v4507_v53 = vmul.f32 %v20106_v14, %v20105_v50  ;;  %v20108_v27 = vld [vmem:[#allocation59_spill] sm:$0xff]  ;;  %v4895_v6 = vadd.f32 %v4712_v36, %v4511_v13  ;;  %v3096_v22 = vsel %vm742_vm0, %v3095_v60, %v3078_v25  ;;  %v20112_v60 = vld [vmem:[#allocation25_spill] sm:$0xff] }
 0x622   : > { %v3086_v62 = vsel %vm742_vm0, %v13979_v4, %v20101_v8  ;;  %v3130_v2 = vsel %vm742_vm0, %v20079_v49, %v20102_v17  ;;  %v4514_v30 = vmul.f32 %v20108_v27, %v20107_v34  ;;  %v4704_v4 = vpop.permute.xlu0 %4703  ;;  %v20109_v8 = vrot.slane %v14024_v23, 4  ;;  %v20113_v23 = vld [vmem:[#allocation64_spill] sm:$0xff]  ;;  %v20144_v45 = vld [vmem:[#allocation251_spill] sm:$0xff] }
 0x623   : > { %v4888_v17 = vadd.f32 %v14265_v38, %v4504_v37  ;;  %v9687_v40 = vpack.i.bf16 %v4890_v12, %v4887_v42  ;;  %v4891_v58 = vadd.f32 %v4704_v4, %v4507_v53  ;;  %v14559_v43 = vperm.slane %v3130_v2, %v20067_v24  ;;  %v20115_v12 = vld [vmem:[#allocation159_spill] sm:$0xff]  ;;  %v20116_v2 = vld [vmem:[#allocation284_spill] sm:$0xff]  ;;  %v20119_v42 = vld [vmem:[#allocation26_spill] sm:$0xff] }
 0x624   : > { %v3142_v49 = vsel %vm742_vm0, %v14027_v57, %v20109_v8  ;;  %v4898_v34 = vadd.f32 %v14182_v20, %v4514_v30  ;;  %v3496_v36 = vpack.c.bf16 %v3152_v55, %v3152_v55  ;;  %v14564_v13 = vperm.slane %v3086_v62, %v20067_v24  ;;  %v20120_v55 = vld [vmem:[#allocation83_spill] sm:$0xff] }
 0x625   : > { %20110 = vst [vmem:[#allocation230_spill] sm:$0xff] %v14559_v43  ;;  %v4517_v50 = vmul.f32 %v20113_v23, %v20112_v60  ;;  %v9707_v26 = vpack.i.bf16 %v4891_v58, %v4888_v17  ;;  %9688 = vrot.lane.b32.xlu1 %v9687_v40, %s10103_s6  ;;  %v3495_v57 = vpack.c.bf16 %v3096_v22, %v3096_v22  ;;  %v3395_v30 = vrot.slane %v14518_v28, 4  ;;  %v4714_v17 = vpop.permute.xlu1 %4713  ;;  %v20121_v40 = vld [vmem:[#allocation20_spill] sm:$0xff]  ;;  %v20122_v58 = vld [vmem:[#allocation75_spill] sm:$0xff] }
 0x626   : > { %20111 = vst [vmem:[#allocation198_spill] sm:$0xff] %v14564_v13  ;;  %v14570_v53 = vperm.slane %v3142_v49, %v20067_v24  ;;  %v20117_v37 = vsub.f32 %v20115_v12, %v20116_v2  ;;  %v9697_v62 = vpack.i.bf16 %v4898_v34, %v4895_v6  ;;  %v4516_v4 = vmul.f32 %v20120_v55, %v20119_v42  ;;  %v20128_v2 = vld [vmem:[#allocation24_spill] sm:$0xff] }
 0x627   : > { %v4901_v8 = vadd.f32 %v4724_v15, %v4517_v50  ;;  %9708 = vrot.lane.b32.xlu2 %v9707_v26, %s10103_s6  ;;  %v3101_v22 = vrot.slane %v14534_v47, 4  ;;  %v3157_v49 = vrot.slane %v14559_v43, 4  ;;  %v4512_v60 = vmul.f32 %v20122_v58, %v20121_v40  ;;  %v20230_v43 = vld [vmem:[#allocation282_spill] sm:$0xff] }
 0x628   : > { %20114 = vst [vmem:[#allocation58_spill] sm:$0xff] %v14570_v53  ;;  %v14577_v20 = vsel %vm2982_vm1, %v20117_v37, %v9536_v51  ;;  %9698 = vrot.lane.b32.xlu0 %v9697_v62, %s10103_s6  ;;  %v14588_v51 = vpop.permute.xlu2 %9558  ;;  %v3097_v28 = vrot.slane %v3078_v25, 4  ;;  %v3153_v6 = vrot.slane %v3134_v54, 4  ;;  %v14590_v34 = vunpack.c.l.b16 %v3496_v36  ;;  %v20129_v37 = vld [vmem:[#allocation77_spill] sm:$0xff]  ;;  %v20146_v36 = vld [vmem:[#allocation258_spill] sm:$0xff] }
 0x629   : > { %20118 = vst [vmem:[#allocation62_spill] sm:$0xff] %v14577_v20  ;;  %v4900_v15 = vadd.f32 %v14468_v59, %v4516_v4  ;;  %v14593_v50 = vunpack.c.l.b16 %v3495_v57  ;;  %v14597_v26 = vsel %vm742_vm0, %v14564_v13, %v3101_v22  ;;  %v14601_v12 = vsel %vm742_vm0, %v14570_v53, %v3157_v49  ;;  %v20189_v20 = vld [vmem:[#allocation280_spill] sm:$0xff]  ;;  %v20208_v4 = vld [vmem:[#allocation435_spill] sm:$0xff] }
 0x62a   : > { %20123 = vst [vmem:[#allocation201_spill] sm:$0xff] %v14588_v51  ;;  %v4515_v62 = vmul.f32 %v20129_v37, %v20128_v2  ;;  %v4896_v42 = vadd.f32 %v4714_v17, %v4512_v60  ;;  %v14605_v25 = vpop.permute.xlu0 %4347  ;;  %v14609_v54 = vsel %vm742_vm0, %v14471_v44, %v3097_v28  ;;  %v14613_v59 = vsel %vm742_vm0, %v14462_v46, %v3153_v6  ;;  %v20134_v60 = vld [vmem:[#allocation262_spill] sm:$0xff]  ;;  %v20157_v17 = vld [vmem:[#allocation305_spill] sm:$0xff]  ;;  %v20162_v44 = vld [vmem:[#allocation104_spill] sm:$0xff] }
 0x62b   : > { %20124 = vst [vmem:[#allocation117_spill] sm:$0xff] %v14590_v34  ;;  %v14618_v57 = vsel %vm742_vm0, %v3395_v30, %v14486_v31  ;;  %v9702_v49 = vpack.i.bf16 %v4901_v8, %v4900_v15  ;;  %v14629_v28 = vmul.f32 %v20113_v23, %v20134_v60  ;;  %v20136_v8 = vld [vmem:[#allocation250_spill] sm:$0xff]  ;;  %v20138_v15 = vld [vmem:[#allocation252_spill] sm:$0xff]  ;;  %v20140_v23 = vld [vmem:[#allocation257_spill] sm:$0xff]  ;;  %v14656_v22 = vmul.f32 %v20122_v58, %v20144_v45 }
 0x62c   : > { %20125 = vst [vmem:[#allocation134_spill] sm:$0xff] %v14593_v50  ;;  %v4899_v40 = vadd.f32 %v14333_v18, %v4515_v62  ;;  %v14640_v6 = vmul.f32 %v20097_v3, %v20136_v8  ;;  %v14644_v2 = vmul.f32 %v20064_v10, %v20138_v15  ;;  %v14648_v62 = vmul.f32 %v20129_v37, %v20140_v23  ;;  %v20142_v60 = vld [vmem:[#allocation256_spill] sm:$0xff]  ;;  %v20148_v8 = vld [vmem:[#allocation263_spill] sm:$0xff]  ;;  %v20150_v37 = vld [vmem:[#allocation238_spill] sm:$0xff] }
 0x62d   : > { %20126 = vst [vmem:[#allocation210_spill] sm:$0xff] %v14597_v26  ;;  %9703 = vrot.lane.b32.xlu1 %v9702_v49, %s10103_s6  ;;  %v14652_v38 = vmul.f32 %v20108_v27, %v20142_v60  ;;  %v14660_v3 = vmul.f32 %v20120_v55, %v20146_v36  ;;  %v14664_v10 = vmul.f32 %v20069_v29, %v20148_v8  ;;  %v4358_v15 = vpop.permute.xlu1 %4357  ;;  %v20153_v27 = vld [vmem:[#allocation101_spill] sm:$0xff]  ;;  %v20154_v60 = vld [vmem:[#allocation310_spill] sm:$0xff]  ;;  %v20155_v45 = vld [vmem:[#allocation111_spill] sm:$0xff] }
 0x62e   : > { %20127 = vst [vmem:[#allocation212_spill] sm:$0xff] %v14601_v12  ;;  %v9712_v49 = vpack.i.bf16 %v4899_v40, %v4896_v42  ;;  %v14668_v42 = vmul.f32 %v20031_v16, %v20150_v37  ;;  %v20152_v40 = vld [vmem:[#allocation298_spill] sm:$0xff]  ;;  %v14676_v58 = vmul.f32 %v20155_v45, %v20154_v60  ;;  %v20158_v55 = vld [vmem:[#allocation100_spill] sm:$0xff]  ;;  %v20171_v18 = vld [vmem:[#allocation245_spill] sm:$0xff] }
 0x62f   : > { %20130 = vst [vmem:[#allocation153_spill] sm:$0xff] %v14609_v54  ;;  %v14672_v23 = vmul.f32 %v20153_v27, %v20152_v40  ;;  %v14680_v36 = vmul.f32 %v20158_v55, %v20157_v17  ;;  %v20161_v8 = vld [vmem:[#allocation300_spill] sm:$0xff]  ;;  %v20163_v37 = vld [vmem:[#allocation306_spill] sm:$0xff]  ;;  %v20165_v27 = vld [vmem:[#allocation311_spill] sm:$0xff] }
 0x630   : > { %20131 = vst [vmem:[#allocation215_spill] sm:$0xff] %v14613_v59  ;;  %9713 = vrot.lane.b32.xlu0 %v9712_v49, %s10103_s6  ;;  %v14683_v29 = vpop.permute.xlu2 %4361  ;;  %v14687_v16 = vmul.f32 %v20162_v44, %v20161_v8  ;;  %v20164_v30 = vld [vmem:[#allocation106_spill] sm:$0xff]  ;;  %v20166_v31 = vld [vmem:[#allocation116_spill] sm:$0xff]  ;;  %v20174_v8 = vld [vmem:[#allocation97_spill] sm:$0xff]  ;;  %s249_s6 = sand.u32 1, %s10087_s19  }
 0x631   : > { %20132 = vst [vmem:[#allocation218_spill] sm:$0xff] %v14618_v57  ;;  %v14691_v40 = vmul.f32 %v20164_v30, %v20163_v37  ;;  %v14695_v60 = vmul.f32 %v20166_v31, %v20165_v27  ;;  %v20167_v45 = vld [vmem:[#allocation342_spill] sm:$0xff]  ;;  %v20168_v46 = vld [vmem:[#allocation132_spill] sm:$0xff]  ;;  %v14705_v57 = vmul.f32 %v20055_v33, %v20171_v18  ;;  %v20175_v30 = vld [vmem:[#allocation299_spill] sm:$0xff]  ;;  %s9015_s9 = scalar_lea.sflag [#allocation4], %s249_s6 }
 0x632   : > { %20135 = vst [vmem:[#allocation222_spill] sm:$0xff] %v14629_v28  ;;  %v4110_v17 = vmul.f32 %v20168_v46, %v20167_v45  ;;  %v20169_v55 = vld [vmem:[#allocation244_spill] sm:$0xff]  ;;  %v20176_v37 = vld [vmem:[#allocation107_spill] sm:$0xff]  ;;  %v14715_v31 = vpop.permute.xlu0 %4373  ;;  %v20211_v50 = vld [vmem:[#allocation446_spill] sm:$0xff] }
 0x633   : > { %20137 = vst [vmem:[#allocation68_spill] sm:$0xff] %v14640_v6  ;;  %v14701_v49 = vmul.f32 %v20062_v7, %v20169_v55  ;;  %v20173_v44 = vld [vmem:[#allocation304_spill] sm:$0xff]  ;;  %v14713_v63 = vmul.f32 %v20176_v37, %v20175_v30  ;;  %v20181_v7 = vld [vmem:[#allocation274_spill] sm:$0xff]  ;;  %v20234_v53 = vld [vmem:[#allocation115_spill] sm:$0xff] }
 0x634   : > { %20139 = vst [vmem:[#allocation66_spill] sm:$0xff] %v14644_v2  ;;  %v14709_v61 = vmul.f32 %v20174_v8, %v20173_v44  ;;  %v20179_v27 = vld [vmem:[#allocation240_spill] sm:$0xff]  ;;  %v14723_v45 = vmul.f32 %v20040_v5, %v20181_v7  ;;  %v4494_v55 = vsub.f32 %v4110_v17, %v4358_v15  ;;  %v20185_v44 = vld [vmem:[#allocation233_spill] sm:$0xff]  ;;  %v20187_v30 = vld [vmem:[#allocation246_spill] sm:$0xff] }
 0x635   : > { %20141 = vst [vmem:[#allocation137_spill] sm:$0xff] %v14648_v62  ;;  %v14719_v46 = vmul.f32 %v20106_v14, %v20179_v27  ;;  %v20183_v33 = vld [vmem:[#allocation276_spill] sm:$0xff]  ;;  %v14731_v8 = vmul.f32 %v20095_v41, %v20185_v44  ;;  %v14735_v37 = vmul.f32 %v20022_v52, %v20187_v30  ;;  %v14739_v14 = vmul.f32 %v19977_v56, %v20189_v20  ;;  %v20191_v27 = vld [vmem:[#allocation269_spill] sm:$0xff]  ;;  %v20193_v7 = vld [vmem:[#allocation239_spill] sm:$0xff]  ;;  %v14785_v34 = vpop.permute.xlu1 %4349 }
 0x636   : > { %20143 = vst [vmem:[#allocation228_spill] sm:$0xff] %v14652_v38  ;;  %v14727_v18 = vmul.f32 %v20010_v11, %v20183_v33  ;;  %v14743_v5 = vmul.f32 %v19967_v1, %v20191_v27  ;;  %v14747_v11 = vmul.f32 %v20090_v39, %v20193_v7  ;;  %v20195_v15 = vld [vmem:[#allocation264_spill] sm:$0xff]  ;;  %v20196_v17 = vld [vmem:[#allocation270_spill] sm:$0xff]  ;;  %v9561_v33 = vunpack.i.h.bf16 %v14588_v51  ;;  %v20201_v39 = vld [vmem:[#allocation275_spill] sm:$0xff] }
 0x637   : > { %20145 = vst [vmem:[#allocation224_spill] sm:$0xff] %v14656_v22  ;;  %v14751_v41 = vmul.f32 %v19965_v32, %v20195_v15  ;;  %v14755_v52 = vmul.f32 %v19953_v35, %v20196_v17  ;;  %v20197_v56 = vld [vmem:[#allocation234_spill] sm:$0xff]  ;;  %v20199_v1 = vld [vmem:[#allocation268_spill] sm:$0xff]  ;;  %v14768_v30 = vmul.f32 %v20007_v0, %v20201_v39  ;;  %v20203_v32 = vld [vmem:[#allocation293_spill] sm:$0xff] }
 0x638   : > { %20147 = vst [vmem:[#allocation102_spill] sm:$0xff] %v14660_v3  ;;  %v14760_v20 = vmul.f32 %v20104_v21, %v20197_v56  ;;  %v14764_v44 = vmul.f32 %v20033_v48, %v20199_v1  ;;  %v20204_v27 = vld [vmem:[#allocation94_spill] sm:$0xff]  ;;  %v20207_v17 = vld [vmem:[#allocation324_spill] sm:$0xff]  ;;  %v5262_v1 = vsel %vm2982_vm1, %v4494_v55, %v9561_v33  ;;  %v20214_v39 = vld [vmem:[#allocation91_spill] sm:$0xff] }
 0x639   : > { %20149 = vst [vmem:[#allocation235_spill] sm:$0xff] %v14664_v10  ;;  %v14772_v7 = vmul.f32 %v20204_v27, %v20203_v32  ;;  %v20205_v35 = vld [vmem:[#allocation286_spill] sm:$0xff]  ;;  %v14780_v21 = vmul.f32 %v20208_v4, %v20207_v17  ;;  %v20210_v56 = vld [vmem:[#allocation340_spill] sm:$0xff]  ;;  %v20215_v32 = vld [vmem:[#allocation281_spill] sm:$0xff] }
 0x63a   : > { %20151 = vst [vmem:[#allocation321_spill] sm:$0xff] %v14668_v42  ;;  %v14776_v15 = vmul.f32 %v19999_v19, %v20205_v35  ;;  %v4108_v48 = vmul.f32 %v20211_v50, %v20210_v56  ;;  %v20213_v0 = vld [vmem:[#allocation292_spill] sm:$0xff]  ;;  %v14793_v27 = vmul.f32 %v20028_v9, %v20215_v32  ;;  %v20217_v19 = vld [vmem:[#allocation287_spill] sm:$0xff]  ;;  %v14803_v50 = vpop.permute.xlu2 %9573  ;;  %v20223_v55 = vld [vmem:[#allocation294_spill] sm:$0xff] }
 0x63b   : > { %20156 = vst [vmem:[#allocation243_spill] sm:$0xff] %v14676_v58  ;;  %v14789_v54 = vmul.f32 %v20214_v39, %v20213_v0  ;;  %v20218_v35 = vld [vmem:[#allocation99_spill] sm:$0xff]  ;;  %v20220_v4 = vld [vmem:[#allocation288_spill] sm:$0xff]  ;;  %v20224_v33 = vld [vmem:[#allocation105_spill] sm:$0xff]  ;;  %v9575_v59 = vunpack.i.l.bf16 %v14803_v50 }
 0x63c   : > { %20159 = vst [vmem:[#allocation145_spill] sm:$0xff] %v14680_v36  ;;  %v14797_v12 = vmul.f32 %v20218_v35, %v20217_v19  ;;  %v20221_v17 = vld [vmem:[#allocation96_spill] sm:$0xff]  ;;  %v14807_v56 = vmul.f32 %v20224_v33, %v20223_v55  ;;  %v20226_v0 = vld [vmem:[#allocation322_spill] sm:$0xff]  ;;  %v5625_v55 = vrot.slane %v5262_v1, 4  ;;  %v14825_v33 = vpop.permute.xlu0 %4355  ;;  %v20239_v35 = vld [vmem:[#allocation317_spill] sm:$0xff] }
 0x63d   : > { %20160 = vst [vmem:[#allocation253_spill] sm:$0xff] %v14683_v29  ;;  %v14801_v26 = vmul.f32 %v20221_v17, %v20220_v4  ;;  %v20227_v39 = vld [vmem:[#allocation118_spill] sm:$0xff]  ;;  %v20233_v13 = vld [vmem:[#allocation316_spill] sm:$0xff]  ;;  %v20240_v19 = vld [vmem:[#allocation109_spill] sm:$0xff] }
 0x63e   : > { %20170 = vst [vmem:[#allocation133_spill] sm:$0xff] %v14701_v49  ;;  %v14811_v47 = vmul.f32 %v20227_v39, %v20226_v0  ;;  %v20228_v9 = vld [vmem:[#allocation54_spill] sm:$0xff]  ;;  %v14823_v24 = vmul.f32 %v20234_v53, %v20233_v13  ;;  %v20235_v0 = vld [vmem:[#allocation328_spill] sm:$0xff]  ;;  %v14837_v42 = vmul.f32 %v20240_v19, %v20239_v35  ;;  %v20244_v1 = vld [vmem:[#allocation323_spill] sm:$0xff] }
 0x63f   : > { %20172 = vst [vmem:[#allocation265_spill] sm:$0xff] %v14705_v57  ;;  %v4492_v32 = vsub.f32 %v4108_v48, %v20228_v9  ;;  %v20231_v4 = vld [vmem:[#allocation98_spill] sm:$0xff]  ;;  %v20237_v48 = vld [vmem:[#allocation312_spill] sm:$0xff]  ;;  %v20238_v9 = vld [vmem:[#allocation433_spill] sm:$0xff] }
 0x640   : > { %20177 = vst [vmem:[#allocation149_spill] sm:$0xff] %v14713_v63  ;;  %v14819_v17 = vmul.f32 %v20231_v4, %v20230_v43  ;;  %v20236_v39 = vld [vmem:[#allocation122_spill] sm:$0xff]  ;;  %v14833_v29 = vmul.f32 %v20238_v9, %v20237_v48  ;;  %v20262_v19 = vld [vmem:[#allocation392_spill] sm:$0xff]  ;;  %v20265_v35 = vld [vmem:[#allocation443_spill] sm:$0xff] }
 0x641   : > { %20178 = vst [vmem:[#allocation48_spill] sm:$0xff] %v14715_v31  ;;  %v5260_v43 = vsel %vm2982_vm1, %v4492_v32, %v9575_v59  ;;  %v20241_v4 = vld [vmem:[#allocation318_spill] sm:$0xff]  ;;  %v20245_v31 = vld [vmem:[#allocation123_spill] sm:$0xff]  ;;  %v20308_v22 = vld [vmem:[#allocation400_spill] sm:$0xff] }
 0x642   : > { %20180 = vst [vmem:[#allocation52_spill] sm:$0xff] %v14719_v46  ;;  %v20242_v13 = vld [vmem:[#allocation114_spill] sm:$0xff]  ;;  %v14846_v51 = vmul.f32 %v20245_v31, %v20244_v1  ;;  %v14853_v48 = vsel %vm742_vm0, %v5625_v55, %v5260_v43  ;;  %v20259_v55 = vld [vmem:[#allocation448_spill] sm:$0xff]  ;;  %v20264_v59 = vld [vmem:[#allocation359_spill] sm:$0xff] }
 0x643   : > { %20182 = vst [vmem:[#allocation369_spill] sm:$0xff] %v14723_v45  ;;  %v14842_v53 = vmul.f32 %v20242_v13, %v20241_v4  ;;  %v20252_v32 = vld [vmem:[#allocation330_spill] sm:$0xff]  ;;  %v20253_v4 = vld [vmem:[#allocation131_spill] sm:$0xff]  ;;  %v14879_v6 = vmul.f32 %v20265_v35, %v20264_v59  ;;  %v20319_v2 = vld [vmem:[#allocation377_spill] sm:$0xff] }
 0x644   : > { %20184 = vst [vmem:[#allocation344_spill] sm:$0xff] %v14727_v18  ;;  %v14861_v13 = vmul.f32 %v20253_v4, %v20252_v32  ;;  %v20255_v31 = vld [vmem:[#allocation394_spill] sm:$0xff]  ;;  %v20281_v32 = vld [vmem:[#allocation341_spill] sm:$0xff]  ;;  %v9311_v28 = vld [vmem:[#allocation2 + $0xa0] sm:$0xf0] }
 0x645   : > { %20186 = vst [vmem:[#allocation191_spill] sm:$0xff] %v14731_v8  ;;  %v20275_v38 = vld [vmem:[#allocation358_spill] sm:$0xff]  ;;  %v14907_v8 = vpop.permute.xlu2 %9588  ;;  %v20318_v18 = vld [vmem:[#allocation380_spill] sm:$0xff]  ;;  %v9305_v62 = vld [vmem:[#allocation2 + $0x70] sm:$0xf0] }
 0x646   : > { %20188 = vst [vmem:[#allocation73_spill] sm:$0xff] %v14735_v37  ;;  %v20279_v59 = vld [vmem:[#allocation334_spill] sm:$0xff]  ;;  %v20348_v45 = vld [vmem:[#allocation253_spill] sm:$0xff] }
 0x647   : > { %20190 = vst [vmem:[#allocation161_spill] sm:$0xff] %v14739_v14 }
 0x648   : > { %20192 = vst [vmem:[#allocation57_spill] sm:$0xff] %v14743_v5  ;;  %v20330_v5 = vld [vmem:[#allocation351_spill] sm:$0xff] }
 0x649   : > { %20194 = vst [vmem:[#allocation61_spill] sm:$0xff] %v14747_v11 }
 0x64a   : > { %20198 = vst [vmem:[#allocation86_spill] sm:$0xff] %v14760_v20 }
 0x64b   : > { %20200 = vst [vmem:[#allocation345_spill] sm:$0xff] %v14764_v44 }
 0x64c   : > { %20202 = vst [vmem:[#allocation178_spill] sm:$0xff] %v14768_v30 }
 0x64d   : > { %20206 = vst [vmem:[#allocation162_spill] sm:$0xff] %v14776_v15  ;;  %v14979_v11 = vpop.permute.xlu2 %9603  ;;  %v20327_v15 = vld [vmem:[#allocation363_spill] sm:$0xff] }
 0x64e   : > { %20209 = vst [vmem:[#allocation291_spill] sm:$0xff] %v14780_v21  ;;  %v9605_v3 = vunpack.i.l.bf16 %v14979_v11 }
 0x64f   : > { %20212 = vst [vmem:[#allocation171_spill] sm:$0xff] %v14785_v34  ;;  %v14829_v34 = vmul.f32 %v20236_v39, %v20235_v0  ;;  %v20247_v0 = vld [vmem:[#allocation329_spill] sm:$0xff]  ;;  %v20248_v39 = vld [vmem:[#allocation128_spill] sm:$0xff] }
 0x650   : > { %20216 = vst [vmem:[#allocation110_spill] sm:$0xff] %v14793_v27  ;;  %v14850_v21 = vmul.f32 %v20248_v39, %v20247_v0  ;;  %v20258_v39 = vld [vmem:[#allocation352_spill] sm:$0xff]  ;;  %v14887_v0 = vpop.permute.xlu1 %4359 }
 0x651   : > { %20219 = vst [vmem:[#allocation127_spill] sm:$0xff] %v14797_v12  ;;  %v14871_v43 = vmul.f32 %v20259_v55, %v20258_v39  ;;  %v20273_v39 = vld [vmem:[#allocation396_spill] sm:$0xff] }
 0x652   : > { %20222 = vst [vmem:[#allocation404_spill] sm:$0xff] %v14801_v26 }
 0x653   : > { %20225 = vst [vmem:[#allocation350_spill] sm:$0xff] %v14807_v56  ;;  %v9171_v56 = vld [vmem:[#allocation2 + $0x50] sm:$0xf] }
 0x654   : > { %20232 = vst [vmem:[#allocation356_spill] sm:$0xff] %v14819_v17  ;;  %v20323_v17 = vld [vmem:[#allocation376_spill] sm:$0xff] }
 0x655   : > { %20243 = vst [vmem:[#allocation402_spill] sm:$0xff] %v14842_v53  ;;  %v20254_v53 = vld [vmem:[#allocation348_spill] sm:$0xff] }
 0x656   : > { %20246 = vst [vmem:[#allocation85_spill] sm:$0xff] %v14846_v51  ;;  %v14865_v1 = vmul.f32 %v20255_v31, %v20254_v53  ;;  %v20268_v53 = vld [vmem:[#allocation346_spill] sm:$0xff] }
 0x657   : > { %20249 = vst [vmem:[#allocation193_spill] sm:$0xff] %v14853_v48  ;;  %v20261_v48 = vld [vmem:[#allocation347_spill] sm:$0xff]  ;;  %v20269_v31 = vld [vmem:[#allocation382_spill] sm:$0xff] }
 0x658   : > { %20256 = vst [vmem:[#allocation135_spill] sm:$0xff] %v14865_v1  ;;  %v14875_v9 = vmul.f32 %v20262_v19, %v20261_v48  ;;  %v14885_v49 = vmul.f32 %v20269_v31, %v20268_v53  ;;  %v20272_v51 = vld [vmem:[#allocation354_spill] sm:$0xff]  ;;  %v20276_v48 = vld [vmem:[#allocation439_spill] sm:$0xff]  ;;  %v20282_v53 = vld [vmem:[#allocation441_spill] sm:$0xff] }
 0x659   : > { %20260 = vst [vmem:[#allocation84_spill] sm:$0xff] %v14871_v43  ;;  %v14891_v55 = vmul.f32 %v20273_v39, %v20272_v51  ;;  %v14895_v19 = vmul.f32 %v20276_v48, %v20275_v38  ;;  %v14905_v31 = vmul.f32 %v20282_v53, %v20281_v32  ;;  %v20285_v51 = vld [vmem:[#allocation450_spill] sm:$0xff]  ;;  %v20294_v43 = vld [vmem:[#allocation335_spill] sm:$0xff]  ;;  %v14931_v48 = vpop.permute.xlu0 %4369 }
 0x65a   : > { %20263 = vst [vmem:[#allocation187_spill] sm:$0xff] %v14875_v9  ;;  %v9314_v38 = vld [vmem:[#allocation2 + $0xb8] sm:$0xf0]  ;;  %v20295_v1 = vld [vmem:[#allocation379_spill] sm:$0xff]  ;;  %v9207_v9 = vld [vmem:[#allocation2 + $0x98] sm:$0xf] }
 0x65b   : > { %20266 = vst [vmem:[#allocation196_spill] sm:$0xff] %v14879_v6  ;;  %v20280_v6 = vld [vmem:[#allocation437_spill] sm:$0xff]  ;;  %v9208_v35 = vor.u32 %v9311_v28, %v9207_v9  ;;  %v20306_v9 = vld [vmem:[#allocation399_spill] sm:$0xff] }
 0x65c   : > { %20270 = vst [vmem:[#allocation401_spill] sm:$0xff] %v14885_v49  ;;  %v14901_v4 = vmul.f32 %v20280_v6, %v20279_v59  ;;  %v20284_v49 = vld [vmem:[#allocation353_spill] sm:$0xff]  ;;  %v20289_v6 = vld [vmem:[#allocation336_spill] sm:$0xff]  ;;  %v20290_v59 = vld [vmem:[#allocation442_spill] sm:$0xff] }
 0x65d   : > { %20271 = vst [vmem:[#allocation325_spill] sm:$0xff] %v14887_v0  ;;  %v14911_v39 = vmul.f32 %v20285_v51, %v20284_v49  ;;  %v14919_v20 = vmul.f32 %v20290_v59, %v20289_v6  ;;  %v9195_v53 = vld [vmem:[#allocation2 + $0x80] sm:$0xf]  ;;  %v9308_v49 = vld [vmem:[#allocation2 + $0x88] sm:$0xf0]  ;;  %v20324_v28 = vld [vmem:[#allocation381_spill] sm:$0xff] }
 0x65e   : > { %20274 = vst [vmem:[#allocation355_spill] sm:$0xff] %v14891_v55  ;;  %v9219_v55 = vld [vmem:[#allocation2 + $0xb0] sm:$0xf]  ;;  %v9196_v44 = vor.u32 %v9308_v49, %v9195_v53  ;;  %v4486_v26 = vsub.f32 %v14829_v34, %v20324_v28  ;;  %v20328_v53 = vld [vmem:[#allocation384_spill] sm:$0xff]  ;;  %v9302_v49 = vld [vmem:[#allocation2 + $0x58] sm:$0xf0] }
 0x65f   : > { %20277 = vst [vmem:[#allocation185_spill] sm:$0xff] %v14895_v19  ;;  %v9220_v32 = vor.u32 %v9314_v38, %v9219_v55  ;;  %v14929_v19 = vmul.f32 %v20295_v1, %v20294_v43  ;;  %v14969_v38 = vpop.permute.xlu1 %4371  ;;  %v20321_v55 = vld [vmem:[#allocation386_spill] sm:$0xff]  ;;  %v4493_v43 = vsub.f32 %v14905_v31, %v14825_v33  ;;  %v4479_v34 = vsub.f32 %v14833_v29, %v20328_v53  ;;  %v20344_v57 = vld [vmem:[#allocation193_spill] sm:$0xff] }
 0x660   : > { %20283 = vst [vmem:[#allocation405_spill] sm:$0xff] %v14907_v8  ;;  %v20309_v8 = vld [vmem:[#allocation391_spill] sm:$0xff]  ;;  %v4489_v33 = vsub.f32 %v14901_v4, %v14605_v25  ;;  %v9576_v31 = vunpack.i.h.bf16 %v14803_v50  ;;  %v20329_v0 = vld [vmem:[#allocation338_spill] sm:$0xff]  ;;  %v20337_v4 = vld [vmem:[#allocation357_spill] sm:$0xff]  ;;  %v9172_v29 = vor.u32 %v9302_v49, %v9171_v56 }
 0x661   : > { %20286 = vst [vmem:[#allocation408_spill] sm:$0xff] %v14911_v39  ;;  %488 = vmatpush.bf16.msra.mxu2 %v9220_v32  ;;  %v20305_v32 = vld [vmem:[#allocation389_spill] sm:$0xff]  ;;  %v9564_v27 = vpop.permute.xlu0 %9563  ;;  %v4481_v59 = vsub.f32 %v14837_v42, %v20329_v0  ;;  %v20331_v1 = vld [vmem:[#allocation402_spill] sm:$0xff]  ;;  %v20340_v0 = vld [vmem:[#allocation135_spill] sm:$0xff] }
 0x662   : > { %v20312_v39 = vld [vmem:[#allocation373_spill] sm:$0xff]  ;;  %v4482_v30 = vsub.f32 %v20331_v1, %v20330_v5  ;;  %v20336_v53 = vld [vmem:[#allocation362_spill] sm:$0xff]  ;;  %v5261_v63 = vsel %vm2982_vm1, %v4493_v43, %v9576_v31  ;;  %v20342_v1 = vld [vmem:[#allocation84_spill] sm:$0xff]  ;;  %v9619_v31 = vpop.permute.xlu2 %9618  ;;  %v9566_v36 = vunpack.i.h.bf16 %v9564_v27  ;;  %v9565_v56 = vunpack.i.l.bf16 %v9564_v27 }
 0x663   : > { %v20338_v50 = vld [vmem:[#allocation201_spill] sm:$0xff]  ;;  %v20339_v42 = vld [vmem:[#allocation130_spill] sm:$0xff]  ;;  %v9620_v10 = vunpack.i.l.bf16 %v9619_v31  ;;  %v20347_v6 = vld [vmem:[#allocation196_spill] sm:$0xff] }
 0x664   : > { %v4497_v12 = vsub.f32 %v20340_v0, %v20339_v42  ;;  %v20341_v5 = vld [vmem:[#allocation225_spill] sm:$0xff]  ;;  %v20343_v51 = vld [vmem:[#allocation138_spill] sm:$0xff]  ;;  %v5619_v42 = vrot.slane %v5261_v63, 4  ;;  %v9606_v0 = vunpack.i.h.bf16 %v14979_v11  ;;  %v9621_v63 = vunpack.i.h.bf16 %v9619_v31 }
 0x665   : > { %489 = vmatpush.bf16.msra.mxu2 %v9208_v35  ;;  %v9183_v35 = vld [vmem:[#allocation2 + $0x68] sm:$0xf]  ;;  %v5247_v11 = vsel %vm2982_vm1, %v4479_v34, %v9620_v10  ;;  %v20351_v10 = vld [vmem:[#allocation325_spill] sm:$0xff] }
 0x666   : > { %v9184_v28 = vor.u32 %v9305_v62, %v9183_v35  ;;  %v4488_v62 = vsub.f32 %v14861_v13, %v20337_v4  ;;  %v9560_v35 = vunpack.i.l.bf16 %v20338_v50  ;;  %v15031_v13 = vperm.slane %v20344_v57, %v20343_v51  ;;  %v9159_v57 = vld [vmem:[#allocation2 + $0x38] sm:$0xf]  ;;  %v20352_v34 = vld [vmem:[#allocation401_spill] sm:$0xff] }
 0x667   : > { %v4352_v14 = vpop.permute.xlu1 %4351  ;;  %v20345_v4 = vld [vmem:[#allocation405_spill] sm:$0xff] }
 0x668   : > { %v5257_v25 = vsel %vm2982_vm1, %v4489_v33, %v9560_v35  ;;  %v9591_v50 = vunpack.i.h.bf16 %v20345_v4  ;;  %v4491_v43 = vsub.f32 %v14919_v20, %v4352_v14  ;;  %v20346_v35 = vld [vmem:[#allocation48_spill] sm:$0xff]  ;;  %v5643_v46 = vrot.slane %v15031_v13, 4 }
 0x669   : > { %490 = vmatpush.bf16.msra.mxu2 %v9196_v44  ;;  %v5249_v44 = vsel %vm2982_vm1, %v4481_v59, %v9605_v3  ;;  %v9590_v3 = vunpack.i.l.bf16 %v20345_v4  ;;  %v15038_v33 = vpop.permute.xlu0 %4367  ;;  %v4502_v37 = vsub.f32 %v20347_v6, %v20346_v35  ;;  %v5607_v20 = vrot.slane %v5257_v25, 4  ;;  %v20349_v4 = vld [vmem:[#allocation187_spill] sm:$0xff] }
 0x66a   : > { %v5551_v59 = vrot.slane %v5249_v44, 4  ;;  %v5259_v49 = vsel %vm2982_vm1, %v4491_v43, %v9591_v50  ;;  %v4496_v44 = vsub.f32 %v20349_v4, %v20348_v45  ;;  %v20350_v43 = vld [vmem:[#allocation171_spill] sm:$0xff]  ;;  %v15051_v6 = vsel %vm2982_vm1, %v4486_v26, %v9606_v0 }
 0x66b   : > { %v5620_v14 = vsel %vm742_vm0, %v5619_v42, %v5259_v49  ;;  %v4490_v58 = vsub.f32 %v14929_v19, %v20350_v43  ;;  %v15054_v31 = vsel %vm2982_vm1, %v4502_v37, %v9566_v36  ;;  %v5256_v25 = vsel %vm2982_vm1, %v4488_v62, %v9590_v3  ;;  %v20353_v42 = vld [vmem:[#allocation355_spill] sm:$0xff]  ;;  %v9296_v19 = vld [vmem:[#allocation2 + $0x28] sm:$0xf0] }
 0x66c   : > { %v5552_v27 = vsel %vm742_vm0, %v5551_v59, %v5247_v11  ;;  %v4500_v59 = vsub.f32 %v20353_v42, %v14931_v48  ;;  %v5265_v49 = vsel %vm2982_vm1, %v4497_v12, %v9565_v56  ;;  %v15065_v26 = vperm.slane %v5620_v14, %v20343_v51  ;;  %v9634_v12 = vpop.permute.xlu2 %9633 }
 0x66d   : > { %491 = vmatpush.bf16.msra.mxu2 %v9184_v28  ;;  %v9299_v28 = vld [vmem:[#allocation2 + $0x40] sm:$0xf0]  ;;  %v5250_v36 = vsel %vm2982_vm1, %v4482_v30, %v9621_v63  ;;  %v5569_v62 = vrot.slane %v15051_v6, 4  ;;  %v5681_v3 = vrot.slane %v15054_v31, 4  ;;  %v5663_v56 = vrot.slane %v5265_v49, 4  ;;  %v20389_v6 = vld [vmem:[#allocation364_spill] sm:$0xff] }
 0x66e   : > { %v9160_v50 = vor.u32 %v9299_v28, %v9159_v57  ;;  %v9147_v57 = vld [vmem:[#allocation2 + $0x20] sm:$0xf]  ;;  %v20354_v28 = vld [vmem:[#allocation185_spill] sm:$0xff]  ;;  %v15071_v43 = vperm.slane %v5552_v27, %v20343_v51  ;;  %v20356_v63 = vsub.f32 %v14850_v21, %v20336_v53  ;;  %v9636_v31 = vunpack.i.h.bf16 %v9634_v12 }
 0x66f   : > { %v4501_v35 = vsub.f32 %v20354_v28, %v14969_v38  ;;  %v9569_v37 = vpop.permute.xlu1 %9568  ;;  %v9148_v0 = vor.u32 %v9296_v19, %v9147_v57  ;;  %v20355_v38 = vld [vmem:[#allocation408_spill] sm:$0xff]  ;;  %v5645_v57 = vrot.slane %v15065_v26, 4  ;;  %v20357_v19 = vsub.f32 %v14823_v24, %v20318_v18 }
 0x670   : > { %v9571_v48 = vunpack.i.h.bf16 %v9569_v37  ;;  %v9570_v11 = vunpack.i.l.bf16 %v9569_v37  ;;  %v4499_v14 = vsub.f32 %v20355_v38, %v15038_v33  ;;  %v9293_v37 = vld [vmem:[#allocation2 + $0x10] sm:$0xf0]  ;;  %v20358_v18 = vsub.f32 %v14811_v47, %v20321_v55 }
 0x671   : > { %492 = vmatpush.bf16.msra.mxu2 %v9172_v29  ;;  %v4495_v29 = vsub.f32 %v20352_v34, %v20351_v10  ;;  %v9635_v10 = vunpack.i.l.bf16 %v9634_v12  ;;  %v5557_v34 = vrot.slane %v5250_v36, 4  ;;  %v9579_v42 = vpop.permute.xlu0 %9578  ;;  %v9135_v36 = vld [vmem:[#allocation2 + $0x8] sm:$0xf]  ;;  %v5644_v47 = vsel %vm742_vm0, %v5643_v46, %v15065_v26 }
 0x672   : > { %v5258_v30 = vsel %vm2982_vm1, %v4490_v58, %v9571_v48  ;;  %v9581_v21 = vunpack.i.h.bf16 %v9579_v42  ;;  %v9580_v53 = vunpack.i.l.bf16 %v9579_v42  ;;  %v5577_v48 = vrot.slane %v15071_v43, 4 }
 0x673   : > { %v5613_v49 = vrot.slane %v5258_v30, 4  ;;  %v5248_v33 = vsel %vm2982_vm1, %v20357_v19, %v9635_v10  ;;  %v9136_v12 = vor.u32 %v9293_v37, %v9135_v36  ;;  %v20359_v10 = vsub.f32 %v20342_v1, %v20341_v5  ;;  %v20360_v19 = vld [vmem:[#allocation139_spill] sm:$0xff] }
 0x674   : > { %v5558_v28 = vsel %vm742_vm0, %v5557_v34, %v5248_v33  ;;  %v5263_v38 = vsel %vm2982_vm1, %v4495_v29, %v9580_v53  ;;  %v15113_v33 = vperm.slane %v5644_v47, %v20360_v19  ;;  %v20361_v53 = vld [vmem:[#allocation23_spill] sm:$0xff] }
 0x675   : > { %493 = vmatpush.bf16.msra.mxu2 %v9160_v50  ;;  %v5255_v50 = vsel %vm2982_vm1, %v20356_v63, %v9570_v11  ;;  %v5614_v11 = vsel %vm742_vm0, %v5613_v49, %v5256_v25  ;;  %v5266_v34 = vsel %vm2982_vm1, %v20359_v10, %v9581_v21  ;;  %v5664_v63 = vsel %vm742_vm0, %v5663_v56, %v5263_v38  ;;  %v9649_v49 = vpop.permute.xlu2 %9648 }
 0x676   : > { %v5608_v27 = vsel %vm742_vm0, %v5607_v20, %v5255_v50  ;;  %v15091_v20 = vperm.slane %v5558_v28, %v20343_v51  ;;  %v5618_v24 = vperm.slane %v5614_v11, %v20343_v51  ;;  %v5669_v5 = vrot.slane %v5266_v34, 4 }
 0x677   : > { %v5612_v58 = vperm.slane %v5608_v27, %v20343_v51  ;;  %v9584_v50 = vpop.permute.xlu1 %9583  ;;  %v9651_v1 = vunpack.i.h.bf16 %v9649_v49  ;;  %v9650_v27 = vunpack.i.l.bf16 %v9649_v49  ;;  %v20362_v11 = vsub.f32 %v14755_v52, %v20308_v22 }
 0x678   : > { %v5575_v30 = vrot.slane %v15091_v20, 4  ;;  %v5631_v55 = vrot.slane %v5618_v24, 4  ;;  %v9586_v29 = vunpack.i.h.bf16 %v9584_v50  ;;  %v9585_v42 = vunpack.i.l.bf16 %v9584_v50 }
 0x679   : > { %494 = vmatpush.bf16.msra.mxu2 %v9148_v0  ;;  %v15098_v0 = vsel %vm2982_vm1, %v20358_v18, %v9636_v31  ;;  %v5633_v25 = vrot.slane %v5612_v58, 4  ;;  %v15110_v31 = vperm.slane %v5664_v63, %v20343_v51  ;;  %v9594_v46 = vpop.permute.xlu0 %9593  ;;  %v20363_v18 = vsub.f32 %v14751_v41, %v20305_v32 }
 0x67a   : > { %v5269_v28 = vsel %vm2982_vm1, %v4501_v35, %v9586_v29  ;;  %v5268_v21 = vsel %vm2982_vm1, %v4500_v59, %v9585_v42  ;;  %v5632_v26 = vsel %vm742_vm0, %v5631_v55, %v5612_v58  ;;  %v9596_v38 = vunpack.i.h.bf16 %v9594_v46 }
 0x67b   : > { %v5689_v56 = vrot.slane %v15110_v31, 4  ;;  %v5675_v36 = vrot.slane %v5269_v28, 4  ;;  %v5682_v37 = vsel %vm742_vm0, %v5681_v3, %v5268_v21  ;;  %v15131_v35 = vsel %vm2982_vm1, %v20363_v18, %v9650_v27 }
 0x67c   : > { %v5686_v59 = vperm.slane %v5682_v37, %v20343_v51  ;;  %v9595_v10 = vunpack.i.l.bf16 %v9594_v46  ;;  %v15136_v3 = vperm.slane %v5632_v26, %v20360_v19  ;;  %v5655_v22 = vrot.slane %v15113_v33, 4 }
 0x67d   : > { %495 = vmatpush.bf16.msra.mxu2 %v9136_v12  ;;  %v15125_v12 = vsel %vm2982_vm1, %v20362_v11, %v9651_v1  ;;  %v5634_v52 = vsel %vm742_vm0, %v5618_v24, %v5633_v25  ;;  %v5646_v34 = vsel %vm742_vm0, %v15031_v13, %v5645_v57  ;;  %v5267_v32 = vsel %vm2982_vm1, %v4499_v14, %v9596_v38  ;;  %v9664_v57 = vpop.permute.xlu2 %9663 }
 0x67e   : > { %v5389_v58 = vrot.slane %v15125_v12, 4  ;;  %v5699_v41 = vrot.slane %v5686_v59, 4  ;;  %v5264_v63 = vsel %vm2982_vm1, %v4496_v44, %v9595_v10  ;;  %v15148_v50 = vperm.slane %v5634_v52, %v20360_v19 }
 0x67f   : > { %v5676_v47 = vsel %vm742_vm0, %v5675_v36, %v5267_v32  ;;  %v5670_v55 = vsel %vm742_vm0, %v5669_v5, %v5264_v63  ;;  %v9599_v29 = vpop.permute.xlu1 %9598  ;;  %v5656_v24 = vsel %vm742_vm0, %v5655_v22, %v15136_v3  ;;  %v15155_v13 = vperm.slane %v5646_v34, %v20360_v19 }
 0x680   : > { %496 = vmatmul.bf16.vlgmr.msra.gmra.mxu2 %v20361_v53  ;;  %v5680_v14 = vperm.slane %v5676_v47, %v20343_v51  ;;  %v5674_v45 = vperm.slane %v5670_v55, %v20343_v51  ;;  %v9601_v4 = vunpack.i.h.bf16 %v9599_v29  ;;  %v9600_v44 = vunpack.i.l.bf16 %v9599_v29 }
 0x681   : > { %v9666_v25 = vunpack.i.h.bf16 %v9664_v57  ;;  %v9665_v42 = vunpack.i.l.bf16 %v9664_v57  ;;  %v5725_v49 = vpack.c.bf16 %v5656_v24, %v5656_v24  ;;  %v5661_v1 = vrot.slane %v15148_v50, 4  ;;  %v9609_v53 = vpop.permute.xlu0 %9608 }
 0x682   : > { %v5701_v5 = vrot.slane %v5680_v14, 4  ;;  %v5687_v27 = vrot.slane %v5674_v45, 4  ;;  %v20364_v28 = vsub.f32 %v14695_v60, %v20327_v15  ;;  %v20365_v46 = vsub.f32 %v14687_v16, %v20323_v17 }
 0x683   : > { %v20366_v11 = vsub.f32 %v14772_v7, %v20319_v2  ;;  %v20367_v38 = vsub.f32 %v14789_v54, %v20306_v9  ;;  %v9611_v16 = vunpack.i.h.bf16 %v9609_v53  ;;  %v9610_v17 = vunpack.i.l.bf16 %v9609_v53 }
 0x684   : > { %v5246_v21 = vsel %vm2982_vm1, %v20364_v28, %v9601_v4  ;;  %v5241_v26 = vsel %vm2982_vm1, %v20365_v46, %v9600_v44  ;;  %v5688_v10 = vsel %vm742_vm0, %v5687_v27, %v15110_v31  ;;  %v5700_v2 = vsel %vm742_vm0, %v5699_v41, %v5680_v14  ;;  %v20375_v46 = vld [vmem:[#allocation30_spill] sm:$0xff] }
 0x685   : > { %v5513_v36 = vrot.slane %v5246_v21, 4  ;;  %v5495_v37 = vrot.slane %v5241_v26, 4  ;;  %v15172_v18 = vsel %vm2982_vm1, %v20366_v11, %v9666_v25  ;;  %v15178_v60 = vsel %vm2982_vm1, %v20367_v38, %v9665_v42  ;;  %v9679_v24 = vpop.permute.xlu2 %9678  ;;  %v20377_v11 = vld [vmem:[#allocation395_spill] sm:$0xff] }
 0x686   : > { %v5451_v15 = vrot.slane %v15172_v18, 4  ;;  %v15184_v22 = vperm.slane %v5688_v10, %v20360_v19  ;;  %v15187_v7 = vunpack.c.l.b16 %v5725_v49  ;;  %v5662_v54 = vsel %vm742_vm0, %v15155_v13, %v5661_v1  ;;  %v20372_v49 = vld [vmem:[#allocation243_spill] sm:$0xff] }
 0x687   : > { %v20368_v9 = vsub.f32 %v14709_v61, %v20312_v39  ;;  %v20369_v34 = vsub.f32 %v14672_v23, %v20309_v8  ;;  %v15202_v32 = vperm.slane %v5700_v2, %v20360_v19  ;;  %v5690_v41 = vsel %vm742_vm0, %v5674_v45, %v5689_v56  ;;  %v9614_v55 = vpop.permute.xlu1 %9613  ;;  %v20373_v1 = vld [vmem:[#allocation375_spill] sm:$0xff] }
 0x688   : > { %v15208_v61 = vperm.slane %v5690_v41, %v20360_v19  ;;  %v5702_v39 = vsel %vm742_vm0, %v5686_v59, %v5701_v5  ;;  %v9616_v23 = vunpack.i.h.bf16 %v9614_v55  ;;  %v9615_v8 = vunpack.i.l.bf16 %v9614_v55  ;;  %v20370_v59 = vld [vmem:[#allocation367_spill] sm:$0xff] }
 0x689   : > { %v15195_v52 = vsel %vm2982_vm1, %v20368_v9, %v9611_v16  ;;  %v5239_v31 = vsel %vm2982_vm1, %v20369_v34, %v9610_v17  ;;  %v5711_v14 = vrot.slane %v15202_v32, 4  ;;  %v9681_v56 = vunpack.i.h.bf16 %v9679_v24  ;;  %v9624_v28 = vpop.permute.xlu0 %9623  ;;  %v20379_v16 = vld [vmem:[#allocation321_spill] sm:$0xff]  ;;  %v20380_v17 = vld [vmem:[#allocation108_spill] sm:$0xff] }
 0x68a   : > { %v5501_v63 = vrot.slane %v15195_v52, 4  ;;  %v5496_v47 = vsel %vm742_vm0, %v5495_v37, %v5239_v31  ;;  %v9680_v45 = vunpack.i.l.bf16 %v9679_v24  ;;  %v15216_v4 = vperm.slane %v5702_v39, %v20360_v19  ;;  %v20376_v37 = vld [vmem:[#allocation73_spill] sm:$0xff] }
 0x68b   : > { %v15212_v29 = vperm.slane %v5496_v47, %v20343_v51  ;;  %v5717_v44 = vrot.slane %v15208_v61, 4  ;;  %v20371_v25 = vsub.f32 %v14691_v40, %v20370_v59  ;;  %v20374_v5 = vsub.f32 %v20372_v49, %v20373_v1 }
 0x68c   : > { %v5712_v21 = vsel %vm742_vm0, %v5711_v14, %v15184_v22  ;;  %v20378_v38 = vsub.f32 %v20376_v37, %v20377_v11  ;;  %v20381_v10 = vsub.f32 %v20379_v16, %v20380_v17  ;;  %v9626_v31 = vunpack.i.h.bf16 %v9624_v28  ;;  %v20388_v16 = vld [vmem:[#allocation145_spill] sm:$0xff] }
 0x68d   : > { %v5521_v57 = vrot.slane %v15212_v29, 4  ;;  %v5244_v42 = vsel %vm2982_vm1, %v20371_v25, %v9615_v8  ;;  %v5245_v27 = vsel %vm2982_vm1, %v20374_v5, %v9616_v23  ;;  %v9625_v41 = vunpack.i.l.bf16 %v9624_v28  ;;  %v20382_v23 = vld [vmem:[#allocation291_spill] sm:$0xff]  ;;  %v20385_v25 = vld [vmem:[#allocation85_spill] sm:$0xff] }
 0x68e   : > { %v5507_v26 = vrot.slane %v5245_v27, 4  ;;  %v5514_v53 = vsel %vm742_vm0, %v5513_v36, %v5244_v42  ;;  %v5214_v40 = vsel %vm2982_vm1, %v20378_v38, %v9681_v56  ;;  %v15240_v2 = vsel %vm2982_vm1, %v20381_v10, %v9680_v45  ;;  %v20383_v8 = vld [vmem:[#allocation371_spill] sm:$0xff]  ;;  %v20386_v42 = vld [vmem:[#allocation366_spill] sm:$0xff]  ;;  %v20391_v10 = vld [vmem:[#allocation149_spill] sm:$0xff] }
 0x68f   : > { %v15243_v9 = vperm.slane %v5514_v53, %v20343_v51  ;;  %v5289_v52 = vrot.slane %v5214_v40, 4  ;;  %v5271_v34 = vrot.slane %v15240_v2, 4  ;;  %v5726_v36 = vpack.c.bf16 %v5712_v21, %v5712_v21  ;;  %v9629_v5 = vpop.permute.xlu1 %9628  ;;  %v9694_v53 = vpop.permute.xlu2 %9693 }
 0x690   : > { %501 = vmatmul.bf16.gmra.mxu2 %v20375_v46  ;;  %v5718_v47 = vsel %vm742_vm0, %v15216_v4, %v5717_v44  ;;  %v5749_v55 = vpack.c.bf16 %v5662_v54, %v5662_v54  ;;  %v20384_v24 = vsub.f32 %v20382_v23, %v20383_v8  ;;  %v5657_v45 = vrot.slane %v15136_v3, 4 }
 0x691   : > { %v5531_v39 = vrot.slane %v15243_v9, 4  ;;  %v5750_v56 = vpack.c.bf16 %v5718_v47, %v5718_v47  ;;  %v20387_v49 = vsub.f32 %v20385_v25, %v20386_v42  ;;  %v6778_v27 = vunpack.c.l.b16 %v5726_v36  ;;  %v9639_v47 = vpop.permute.xlu0 %9638  ;;  %v20394_v25 = vld [vmem:[#allocation265_spill] sm:$0xff]  ;;  %v20395_v42 = vld [vmem:[#allocation444_spill] sm:$0xff] }
 0x692   : > { %v5253_v14 = vsel %vm2982_vm1, %v20384_v24, %v9626_v31  ;;  %v7057_v44 = vunpack.c.l.b16 %v5749_v55  ;;  %v9631_v28 = vunpack.i.h.bf16 %v9629_v5  ;;  %v9630_v21 = vunpack.i.l.bf16 %v9629_v5  ;;  %v20392_v31 = vld [vmem:[#allocation383_spill] sm:$0xff] }
 0x693   : > { %v5563_v59 = vrot.slane %v5253_v14, 4  ;;  %v5252_v1 = vsel %vm2982_vm1, %v20387_v49, %v9625_v41  ;;  %v7058_v46 = vunpack.c.l.b16 %v5750_v56  ;;  %v6782_v11 = vpack.c.b16 %v6778_v27, %v15187_v7 }
 0x694   : > { %v5570_v54 = vsel %vm742_vm0, %v5569_v62, %v5252_v1  ;;  %v9696_v38 = vunpack.i.h.bf16 %v9694_v53  ;;  %v20390_v17 = vsub.f32 %v20388_v16, %v20389_v6  ;;  %v20393_v41 = vsub.f32 %v20391_v10, %v20392_v31 }
 0x695   : > { %v5564_v3 = vsel %vm742_vm0, %v5563_v59, %v15098_v0  ;;  %v15264_v37 = vperm.slane %v5570_v54, %v20343_v51  ;;  %v7062_v0 = vpack.c.b16 %v7058_v46, %v7057_v44  ;;  %v6806_v8 = vsel %vm6783_vm2, %v6782_v11, 0  ;;  %v20398_v46 = vld [vmem:[#allocation112_spill] sm:$0xff] }
 0x696   : > { %v15268_v40 = vperm.slane %v5564_v3, %v20343_v51  ;;  %v5243_v62 = vsel %vm2982_vm1, %v20390_v17, %v9631_v28  ;;  %v5240_v36 = vsel %vm2982_vm1, %v20393_v41, %v9630_v21  ;;  %6812 = vmatpush.bf16.xpose.msra.mxu3 %v6806_v8  ;;  %v20396_v49 = vsub.f32 %v20394_v25, %v20395_v42  ;;  %v20397_v21 = vld [vmem:[#allocation133_spill] sm:$0xff] }
 0x697   : > { %v5587_v55 = vrot.slane %v15264_v37, 4  ;;  %v5502_v7 = vsel %vm742_vm0, %v5501_v63, %v5240_v36  ;;  %v5508_v23 = vsel %vm742_vm0, %v5507_v26, %v5243_v62  ;;  %v7085_v59 = vsel %vm6783_vm2, %v7062_v0, 0  ;;  %v20401_v0 = vld [vmem:[#allocation393_spill] sm:$0xff] }
 0x698   : > { %v5589_v24 = vrot.slane %v15268_v40, 4  ;;  %v15284_v14 = vperm.slane %v5502_v7, %v20343_v51  ;;  %v15287_v56 = vperm.slane %v5508_v23, %v20343_v51  ;;  %7091 = vmatpush.bf16.xpose.msrb.mxu2 %v7085_v59  ;;  %v5213_v63 = vsel %vm2982_vm1, %v20396_v49, %v9696_v38  ;;  %v9709_v23 = vpop.permute.xlu2 %9708  ;;  %v20403_v59 = vld [vmem:[#allocation37_spill] sm:$0xff]  ;;  %v20405_v49 = vld [vmem:[#allocation452_spill] sm:$0xff] }
 0x699   : > { %v9695_v26 = vunpack.i.l.bf16 %v9694_v53  ;;  %v5658_v1 = vsel %vm742_vm0, %v15113_v33, %v5657_v45  ;;  %v5713_v5 = vrot.slane %v15184_v22, 4  ;;  %v5283_v54 = vrot.slane %v5213_v63, 4  ;;  %v9644_v45 = vpop.permute.xlu1 %9643  ;;  %v9654_v8 = vpop.permute.xlu0 %9653 }
 0x69a   : > { %v5519_v27 = vrot.slane %v15284_v14, 4  ;;  %v5533_v44 = vrot.slane %v15287_v56, 4  ;;  %v5733_v28 = vpack.c.bf16 %v5658_v1, %v5658_v1  ;;  %v20399_v3 = vsub.f32 %v20397_v21, %v20398_v46  ;;  %v20407_v21 = vld [vmem:[#allocation350_spill] sm:$0xff] }
 0x69b   : > { %v5714_v38 = vsel %vm742_vm0, %v15202_v32, %v5713_v5  ;;  %v5659_v53 = vrot.slane %v15155_v13, 4  ;;  %v5715_v33 = vrot.slane %v15216_v4, 4  ;;  %v9641_v17 = vunpack.i.h.bf16 %v9639_v47  ;;  %v20400_v4 = vld [vmem:[#allocation161_spill] sm:$0xff]  ;;  %v20408_v46 = vld [vmem:[#allocation378_spill] sm:$0xff] }
 0x69c   : > { %v5212_v11 = vsel %vm2982_vm1, %v20399_v3, %v9695_v26  ;;  %v5734_v16 = vpack.c.bf16 %v5714_v38, %v5714_v38  ;;  %v6871_v6 = vunpack.c.l.b16 %v5733_v28  ;;  %v9640_v32 = vunpack.i.l.bf16 %v9639_v47 }
 0x69d   : > { %v5290_v22 = vsel %vm742_vm0, %v5289_v52, %v5212_v11  ;;  %v5660_v10 = vsel %vm742_vm0, %v5659_v53, %v15148_v50  ;;  %v5716_v31 = vsel %vm742_vm0, %v5715_v33, %v15208_v61  ;;  %v20402_v7 = vsub.f32 %v20400_v4, %v20401_v0  ;;  %v20404_v50 = vld [vmem:[#allocation57_spill] sm:$0xff] }
 0x69e   : > { %v15309_v62 = vperm.slane %v5290_v22, %v20343_v51  ;;  %v6872_v41 = vunpack.c.l.b16 %v5734_v16  ;;  %v5741_v13 = vpack.c.bf16 %v5660_v10, %v5660_v10  ;;  %v5742_v36 = vpack.c.bf16 %v5716_v31, %v5716_v31  ;;  %v20410_v31 = vld [vmem:[#allocation162_spill] sm:$0xff] }
 0x69f   : > { %v5230_v52 = vsel %vm2982_vm1, %v20402_v7, %v9641_v17  ;;  %v20406_v63 = vsub.f32 %v20404_v50, %v20405_v49  ;;  %v9646_v47 = vunpack.i.h.bf16 %v9644_v45  ;;  %v20409_v3 = vsub.f32 %v20407_v21, %v20408_v46  ;;  %v20416_v7 = vld [vmem:[#allocation86_spill] sm:$0xff] }
 0x6a0   : > { %506 = vmatmul.bf16.gmra.mxu2 %v20403_v59  ;;  %v5307_v25 = vrot.slane %v15309_v62, 4  ;;  %v5401_v42 = vrot.slane %v5230_v52, 4  ;;  %v6876_v26 = vpack.c.b16 %v6872_v41, %v6871_v6  ;;  %v6964_v1 = vunpack.c.l.b16 %v5741_v13  ;;  %v20417_v52 = vld [vmem:[#allocation119_spill] sm:$0xff] }
 0x6a1   : > { %v5225_v61 = vsel %vm2982_vm1, %v20406_v63, %v9640_v32  ;;  %v6965_v5 = vunpack.c.l.b16 %v5742_v36  ;;  %v5238_v11 = vsel %vm2982_vm1, %v20409_v3, %v9646_v47  ;;  %v9645_v38 = vunpack.i.l.bf16 %v9644_v45  ;;  %v20411_v32 = vld [vmem:[#allocation385_spill] sm:$0xff]  ;;  %v20413_v36 = vld [vmem:[#allocation52_spill] sm:$0xff]  ;;  %v9659_v59 = vpop.permute.xlu1 %9658 }
 0x6a2   : > { %v5383_v28 = vrot.slane %v5225_v61, 4  ;;  %v9711_v53 = vunpack.i.h.bf16 %v9709_v23  ;;  %v9710_v33 = vunpack.i.l.bf16 %v9709_v23  ;;  %v6899_v22 = vsel %vm6783_vm2, %v6876_v26, 0  ;;  %v20414_v45 = vld [vmem:[#allocation129_spill] sm:$0xff] }
 0x6a3   : > { %v6969_v16 = vpack.c.b16 %v6965_v5, %v6964_v1  ;;  %v5457_v10 = vrot.slane %v5238_v11, 4  ;;  %6905 = vmatpush.bf16.xpose.msrb.mxu0 %v6899_v22  ;;  %v20412_v41 = vsub.f32 %v20410_v31, %v20411_v32  ;;  %v20415_v4 = vsub.f32 %v20413_v36, %v20414_v45  ;;  %v20419_v11 = vld [vmem:[#allocation344_spill] sm:$0xff]  ;;  %v20428_v45 = vld [vmem:[#allocation110_spill] sm:$0xff] }
 0x6a4   : > { %v5384_v17 = vsel %vm742_vm0, %v5383_v28, %v15131_v35  ;;  %v20418_v23 = vsub.f32 %v20416_v7, %v20417_v52  ;;  %v9656_v5 = vunpack.i.h.bf16 %v9654_v8  ;;  %v9655_v28 = vunpack.i.l.bf16 %v9654_v8  ;;  %v20423_v8 = vld [vmem:[#allocation453_spill] sm:$0xff] }
 0x6a5   : > { %v15333_v6 = vperm.slane %v5384_v17, %v20343_v51  ;;  %v5233_v13 = vsel %vm2982_vm1, %v20412_v41, %v9645_v38  ;;  %v5211_v0 = vsel %vm2982_vm1, %v20415_v4, %v9711_v53  ;;  %v6992_v50 = vsel %vm6783_vm2, %v6969_v16, 0  ;;  %v20420_v38 = vld [vmem:[#allocation388_spill] sm:$0xff]  ;;  %v9669_v16 = vpop.permute.xlu0 %9668  ;;  %v20425_v41 = vld [vmem:[#allocation127_spill] sm:$0xff]  ;;  %v20429_v4 = vld [vmem:[#allocation374_spill] sm:$0xff] }
 0x6a6   : > { %v15347_v35 = vsel %vm2982_vm1, %v20418_v23, %v9710_v33  ;;  %v5439_v49 = vrot.slane %v5233_v13, 4  ;;  %v5458_v63 = vsel %vm742_vm0, %v5457_v10, %v15178_v60  ;;  %v5284_v61 = vsel %vm742_vm0, %v5283_v54, %v5211_v0  ;;  %6998 = vmatpush.bf16.xpose.msrb.mxu1 %v6992_v50  ;;  %v20422_v10 = vld [vmem:[#allocation178_spill] sm:$0xff] }
 0x6a7   : > { %v5409_v47 = vrot.slane %v15333_v6, 4  ;;  %v15355_v26 = vperm.slane %v5458_v63, %v20343_v51  ;;  %v15358_v1 = vperm.slane %v5284_v61, %v20343_v51  ;;  %v9661_v21 = vunpack.i.h.bf16 %v9659_v59 }
 0x6a8   : > { %v9660_v46 = vunpack.i.l.bf16 %v9659_v59  ;;  %v5520_v3 = vsel %vm742_vm0, %v5519_v27, %v15212_v29  ;;  %v20421_v53 = vsub.f32 %v20419_v11, %v20420_v38  ;;  %v20424_v31 = vsub.f32 %v20422_v10, %v20423_v8  ;;  %v20426_v27 = vld [vmem:[#allocation387_spill] sm:$0xff] }
 0x6a9   : > { %v5475_v60 = vrot.slane %v15355_v26, 4  ;;  %v5309_v54 = vrot.slane %v15358_v1, 4  ;;  %v5526_v22 = vperm.slane %v5520_v3, %v20360_v19  ;;  %v20427_v13 = vsub.f32 %v20425_v41, %v20426_v27  ;;  %v20432_v27 = vld [vmem:[#allocation369_spill] sm:$0xff] }
 0x6aa   : > { %v5229_v33 = vsel %vm2982_vm1, %v20421_v53, %v9656_v5  ;;  %v5228_v32 = vsel %vm2982_vm1, %v20424_v31, %v9655_v28  ;;  %v20430_v0 = vsub.f32 %v20428_v45, %v20429_v4  ;;  %v5532_v50 = vsel %vm742_vm0, %v5531_v39, %v15287_v56 }
 0x6ab   : > { %v5395_v17 = vrot.slane %v5229_v33, 4  ;;  %v15377_v36 = vsel %vm2982_vm1, %v20427_v13, %v9661_v21  ;;  %v5402_v52 = vsel %vm742_vm0, %v5401_v42, %v5228_v32  ;;  %v5538_v5 = vperm.slane %v5532_v50, %v20360_v19  ;;  %v20431_v33 = vld [vmem:[#allocation44_spill] sm:$0xff]  ;;  %v20433_v13 = vld [vmem:[#allocation445_spill] sm:$0xff]  ;;  %v20436_v50 = vld [vmem:[#allocation390_spill] sm:$0xff] }
 0x6ac   : > { %v5231_v7 = vsel %vm2982_vm1, %v20430_v0, %v9660_v46  ;;  %v5445_v23 = vrot.slane %v15377_v36, 4  ;;  %v15391_v63 = vperm.slane %v5402_v52, %v20343_v51  ;;  %v5576_v42 = vsel %vm742_vm0, %v5575_v30, %v15071_v43  ;;  %v15414_v46 = vpop.permute.xlu1 %9673 }
 0x6ad   : > { %v5440_v59 = vsel %vm742_vm0, %v5439_v49, %v5231_v7  ;;  %v5582_v49 = vperm.slane %v5576_v42, %v20360_v19  ;;  %v5588_v39 = vsel %vm742_vm0, %v5587_v55, %v15268_v40  ;;  %v5522_v28 = vsel %vm742_vm0, %v15284_v14, %v5521_v57  ;;  %v9684_v0 = vpop.permute.xlu0 %9683 }
 0x6ae   : > { %v15394_v61 = vperm.slane %v5440_v59, %v20343_v51  ;;  %v5534_v21 = vsel %vm742_vm0, %v15243_v9, %v5533_v44  ;;  %v5419_v30 = vrot.slane %v15391_v63, 4  ;;  %v5543_v11 = vrot.slane %v5538_v5, 4  ;;  %v20435_v59 = vld [vmem:[#allocation345_spill] sm:$0xff] }
 0x6af   : > { %v5594_v38 = vperm.slane %v5588_v39, %v20360_v19  ;;  %v5530_v55 = vperm.slane %v5522_v28, %v20360_v19  ;;  %v5542_v29 = vperm.slane %v5534_v21, %v20360_v19  ;;  %v5578_v57 = vsel %vm742_vm0, %v15091_v20, %v5577_v48 }
 0x6b0   : > { %v5465_v3 = vrot.slane %v15394_v61, 4  ;;  %v5590_v9 = vsel %vm742_vm0, %v15264_v37, %v5589_v24  ;;  %v5544_v14 = vsel %vm742_vm0, %v5543_v11, %v5526_v22  ;;  %v5586_v44 = vperm.slane %v5578_v57, %v20360_v19  ;;  %511 = vmatmul.bf16.gmra.mxu2 %v20431_v33 }
 0x6b1   : > { %v5599_v56 = vrot.slane %v5594_v38, 4  ;;  %v5598_v53 = vperm.slane %v5590_v9, %v20360_v19  ;;  %v5723_v10 = vpack.c.bf16 %v5544_v14, %v5544_v14  ;;  %v5549_v8 = vrot.slane %v5530_v55, 4 }
 0x6b2   : > { %v9671_v43 = vunpack.i.h.bf16 %v9669_v16  ;;  %v9670_v31 = vunpack.i.l.bf16 %v9669_v16  ;;  %v5605_v20 = vrot.slane %v5586_v44, 4  ;;  %v5545_v40 = vrot.slane %v5526_v22, 4 }
 0x6b3   : > { %v5600_v48 = vsel %vm742_vm0, %v5599_v56, %v5582_v49  ;;  %v5601_v32 = vrot.slane %v5582_v49, 4  ;;  %v6775_v37 = vunpack.c.l.b16 %v5723_v10  ;;  %v5550_v24 = vsel %vm742_vm0, %v5542_v29, %v5549_v8 }
 0x6b4   : > { %v5724_v41 = vpack.c.bf16 %v5600_v48, %v5600_v48  ;;  %v20434_v45 = vsub.f32 %v20432_v27, %v20433_v13  ;;  %v5606_v7 = vsel %vm742_vm0, %v5598_v53, %v5605_v20  ;;  %v5747_v52 = vpack.c.bf16 %v5550_v24, %v5550_v24  ;;  %v9689_v11 = vpop.permute.xlu1 %9688 }
 0x6b5   : > { %v20437_v42 = vsub.f32 %v20435_v59, %v20436_v50  ;;  %v5748_v39 = vpack.c.bf16 %v5606_v7, %v5606_v7  ;;  %v5602_v14 = vsel %vm742_vm0, %v5594_v38, %v5601_v32  ;;  %v5547_v12 = vrot.slane %v5542_v29, 4  ;;  %v20438_v29 = vld [vmem:[#allocation404_spill] sm:$0xff] }
 0x6b6   : > { %v5227_v4 = vsel %vm2982_vm1, %v20434_v45, %v9671_v43  ;;  %v6776_v49 = vunpack.c.l.b16 %v5724_v41  ;;  %v7055_v57 = vunpack.c.l.b16 %v5747_v52  ;;  %v5603_v48 = vrot.slane %v5598_v53, 4  ;;  %v20439_v53 = vld [vmem:[#allocation372_spill] sm:$0xff] }
 0x6b7   : > { %v5396_v16 = vsel %vm742_vm0, %v5395_v17, %v5227_v4  ;;  %v5224_v22 = vsel %vm2982_vm1, %v20437_v42, %v9670_v31  ;;  %v5546_v17 = vsel %vm742_vm0, %v5538_v5, %v5545_v40  ;;  %v7056_v33 = vunpack.c.l.b16 %v5748_v39  ;;  %v20441_v52 = vld [vmem:[#allocation356_spill] sm:$0xff]  ;;  %v9699_v39 = vpop.permute.xlu0 %9698 }
 0x6b8   : > { %v15446_v28 = vperm.slane %v5396_v16, %v20343_v51  ;;  %v5390_v21 = vsel %vm742_vm0, %v5389_v58, %v5224_v22  ;;  %v6781_v56 = vpack.c.b16 %v6776_v49, %v6775_v37  ;;  %v5731_v8 = vpack.c.bf16 %v5546_v17, %v5546_v17  ;;  %v20442_v16 = vld [vmem:[#allocation370_spill] sm:$0xff]  ;;  %v20444_v17 = vld [vmem:[#allocation235_spill] sm:$0xff] }
 0x6b9   : > { %v15452_v9 = vperm.slane %v5390_v21, %v20343_v51  ;;  %v5732_v31 = vpack.c.bf16 %v5602_v14, %v5602_v14  ;;  %v7061_v20 = vpack.c.b16 %v7056_v33, %v7055_v57  ;;  %v9676_v24 = vunpack.i.h.bf16 %v15414_v46  ;;  %v20445_v14 = vld [vmem:[#allocation451_spill] sm:$0xff] }
 0x6ba   : > { %v5421_v10 = vrot.slane %v15446_v28, 4  ;;  %v6803_v58 = vsel %vm6783_vm2, %v6781_v56, 0  ;;  %v6869_v41 = vunpack.c.l.b16 %v5731_v8  ;;  %v5548_v38 = vsel %vm742_vm0, %v5547_v12, %v5530_v55 }
 0x6bb   : > { %v5407_v43 = vrot.slane %v15452_v9, 4  ;;  %6813 = vmatpush.bf16.xpose.msra.mxu3 %v6803_v58  ;;  %v6870_v5 = vunpack.c.l.b16 %v5732_v31  ;;  %v5604_v40 = vsel %vm742_vm0, %v5603_v48, %v5586_v44  ;;  %v9675_v32 = vunpack.i.l.bf16 %v15414_v46  ;;  %v20447_v48 = vld [vmem:[#allocation66_spill] sm:$0xff]  ;;  %v20448_v58 = vld [vmem:[#allocation397_spill] sm:$0xff] }
 0x6bc   : > { %v7082_v37 = vsel %vm6783_vm2, %v7061_v20, 0  ;;  %v5739_v27 = vpack.c.bf16 %v5548_v38, %v5548_v38  ;;  %v5740_v13 = vpack.c.bf16 %v5604_v40, %v5604_v40  ;;  %v20440_v45 = vsub.f32 %v20438_v29, %v20439_v53  ;;  %v9704_v12 = vpop.permute.xlu1 %9703  ;;  %v20453_v53 = vld [vmem:[#allocation191_spill] sm:$0xff] }
 0x6bd   : > { %7092 = vmatpush.bf16.xpose.msrb.mxu2 %v7082_v37  ;;  %v6875_v7 = vpack.c.b16 %v6870_v5, %v6869_v41  ;;  %v20443_v59 = vsub.f32 %v20441_v52, %v20442_v16  ;;  %v9686_v44 = vunpack.i.h.bf16 %v9684_v0  ;;  %v20446_v56 = vsub.f32 %v20444_v17, %v20445_v14  ;;  %v20451_v37 = vld [vmem:[#allocation440_spill] sm:$0xff] }
 0x6be   : > { %v5235_v4 = vsel %vm2982_vm1, %v20440_v45, %v9676_v24  ;;  %v6962_v50 = vunpack.c.l.b16 %v5739_v27  ;;  %v6963_v42 = vunpack.c.l.b16 %v5740_v13  ;;  %v9691_v36 = vunpack.i.h.bf16 %v9689_v11  ;;  %v20454_v45 = vld [vmem:[#allocation436_spill] sm:$0xff] }
 0x6bf   : > { %v5232_v55 = vsel %vm2982_vm1, %v20443_v59, %v9675_v32  ;;  %v5452_v46 = vsel %vm742_vm0, %v5451_v15, %v5235_v4  ;;  %v6896_v21 = vsel %vm6783_vm2, %v6875_v7, 0  ;;  %v5222_v18 = vsel %vm2982_vm1, %v20446_v56, %v9686_v44  ;;  %v20450_v32 = vld [vmem:[#allocation61_spill] sm:$0xff]  ;;  %v20456_v52 = vld [vmem:[#allocation228_spill] sm:$0xff] }
 0x6c0   : > { %v5446_v22 = vsel %vm742_vm0, %v5445_v23, %v5232_v55  ;;  %v5456_v49 = vperm.slane %v5452_v46, %v20343_v51  ;;  %v9685_v15 = vunpack.i.l.bf16 %v9684_v0  ;;  %6906 = vmatpush.bf16.xpose.msrb.mxu0 %v6896_v21  ;;  %v6968_v33 = vpack.c.b16 %v6963_v42, %v6962_v50  ;;  %v20457_v16 = vld [vmem:[#allocation120_spill] sm:$0xff]  ;;  %v20460_v42 = vld [vmem:[#allocation434_spill] sm:$0xff] }
 0x6c1   : > { %v5450_v57 = vperm.slane %v5446_v22, %v20343_v51  ;;  %v5345_v31 = vrot.slane %v5222_v18, 4  ;;  %v20449_v20 = vsub.f32 %v20447_v48, %v20448_v58  ;;  %v9690_v24 = vunpack.i.l.bf16 %v9689_v11  ;;  %v20459_v50 = vld [vmem:[#allocation68_spill] sm:$0xff]  ;;  %v20462_v18 = vld [vmem:[#allocation222_spill] sm:$0xff] }
 0x6c2   : > { %v5477_v8 = vrot.slane %v5456_v49, 4  ;;  %v9701_v5 = vunpack.i.h.bf16 %v9699_v39  ;;  %v6989_v38 = vsel %vm6783_vm2, %v6968_v33, 0  ;;  %v20452_v0 = vsub.f32 %v20450_v32, %v20451_v37  ;;  %v20466_v48 = vld [vmem:[#allocation398_spill] sm:$0xff] }
 0x6c3   : > { %v5463_v23 = vrot.slane %v5450_v57, 4  ;;  %v5217_v41 = vsel %vm2982_vm1, %v20449_v20, %v9685_v15  ;;  %v9700_v13 = vunpack.i.l.bf16 %v9699_v39  ;;  %6999 = vmatpush.bf16.xpose.msrb.mxu1 %v6989_v38  ;;  %v20455_v4 = vsub.f32 %v20453_v53, %v20454_v45  ;;  %v20463_v15 = vld [vmem:[#allocation438_spill] sm:$0xff] }
 0x6c4   : > { %v5327_v40 = vrot.slane %v5217_v41, 4  ;;  %v5210_v27 = vsel %vm2982_vm1, %v20452_v0, %v9691_v36  ;;  %v20458_v11 = vsub.f32 %v20456_v52, %v20457_v16  ;;  %v9706_v55 = vunpack.i.h.bf16 %v9704_v12 }
 0x6c5   : > { %v5277_v29 = vrot.slane %v5210_v27, 4  ;;  %v5207_v7 = vsel %vm2982_vm1, %v20455_v4, %v9690_v24  ;;  %v20461_v22 = vsub.f32 %v20459_v50, %v20460_v42  ;;  %v9705_v21 = vunpack.i.l.bf16 %v9704_v12  ;;  %v20465_v12 = vld [vmem:[#allocation102_spill] sm:$0xff]  ;;  %v9714_v4 = vpop.permute.xlu0 %9713  ;;  %v20471_v42 = vld [vmem:[#allocation224_spill] sm:$0xff] }
 0x6c6   : > { %v5218_v59 = vsel %vm2982_vm1, %v20458_v11, %v9701_v5  ;;  %v5272_v46 = vsel %vm742_vm0, %v5271_v34, %v5207_v7  ;;  %v20464_v2 = vsub.f32 %v20462_v18, %v20463_v15  ;;  %v20467_v58 = vsub.f32 %v20465_v12, %v20466_v48 }
 0x6c7   : > { %v5333_v44 = vrot.slane %v5218_v59, 4  ;;  %v5215_v39 = vsel %vm2982_vm1, %v20461_v22, %v9700_v13  ;;  %v15510_v17 = vperm.slane %v5272_v46, %v20343_v51  ;;  %v5278_v14 = vsel %vm742_vm0, %v5277_v29, %v15347_v35  ;;  %v20472_v22 = vld [vmem:[#allocation447_spill] sm:$0xff] }
 0x6c8   : > { %v5328_v56 = vsel %vm742_vm0, %v5327_v40, %v5215_v39  ;;  %v5221_v34 = vsel %vm2982_vm1, %v20464_v2, %v9706_v55  ;;  %v15520_v33 = vperm.slane %v5278_v14, %v20343_v51  ;;  %v5220_v20 = vsel %vm2982_vm1, %v20467_v58, %v9705_v21  ;;  %v20469_v55 = vld [vmem:[#allocation449_spill] sm:$0xff] }
 0x6c9   : > { %v15523_v36 = vperm.slane %v5328_v56, %v20343_v51  ;;  %v5339_v41 = vrot.slane %v5221_v34, 4  ;;  %v5297_v35 = vrot.slane %v15510_v17, 4  ;;  %v5346_v24 = vsel %vm742_vm0, %v5345_v31, %v5220_v20 }
 0x6ca   : > { %v5408_v5 = vsel %vm742_vm0, %v5407_v43, %v15333_v6  ;;  %v5420_v38 = vsel %vm742_vm0, %v5419_v30, %v15446_v28  ;;  %v5295_v40 = vrot.slane %v15520_v33, 4  ;;  %v15542_v37 = vperm.slane %v5346_v24, %v20343_v51 }
 0x6cb   : > { %v5353_v32 = vrot.slane %v15523_v36, 4  ;;  %v5414_v0 = vperm.slane %v5408_v5, %v20360_v19  ;;  %v5426_v31 = vperm.slane %v5420_v38, %v20360_v19  ;;  %v5464_v27 = vsel %vm742_vm0, %v5463_v23, %v15394_v61 }
 0x6cc   : > { %v5476_v43 = vsel %vm742_vm0, %v5475_v60, %v5456_v49  ;;  %v5410_v30 = vsel %vm742_vm0, %v15452_v9, %v5409_v47  ;;  %v5363_v13 = vrot.slane %v15542_v37, 4  ;;  %v5470_v29 = vperm.slane %v5464_v27, %v20360_v19 }
 0x6cd   : > { %v5482_v53 = vperm.slane %v5476_v43, %v20360_v19  ;;  %v5418_v45 = vperm.slane %v5410_v30, %v20360_v19  ;;  %v5431_v7 = vrot.slane %v5426_v31, 4  ;;  %v5422_v60 = vsel %vm742_vm0, %v15391_v63, %v5421_v10 }
 0x6ce   : > { %v5466_v6 = vsel %vm742_vm0, %v5450_v57, %v5465_v3  ;;  %v5478_v47 = vsel %vm742_vm0, %v15355_v26, %v5477_v8  ;;  %v5430_v49 = vperm.slane %v5422_v60, %v20360_v19  ;;  %v9716_v11 = vunpack.i.h.bf16 %v9714_v4  ;;  %v20468_v8 = vld [vmem:[#allocation137_spill] sm:$0xff] }
 0x6cf   : > { %v5487_v9 = vrot.slane %v5482_v53, 4  ;;  %v5437_v23 = vrot.slane %v5418_v45, 4  ;;  %v5474_v52 = vperm.slane %v5466_v6, %v20360_v19  ;;  %v5432_v16 = vsel %vm742_vm0, %v5431_v7, %v5414_v0 }
 0x6d0   : > { %v5486_v28 = vperm.slane %v5478_v47, %v20360_v19  ;;  %v9715_v59 = vunpack.i.l.bf16 %v9714_v4  ;;  %v5721_v61 = vpack.c.bf16 %v5432_v16, %v5432_v16  ;;  %v20470_v46 = vsub.f32 %v20468_v8, %v20469_v55 }
 0x6d1   : > { %v5488_v63 = vsel %vm742_vm0, %v5487_v9, %v5470_v29  ;;  %v5438_v3 = vsel %vm742_vm0, %v5430_v49, %v5437_v23  ;;  %v5493_v10 = vrot.slane %v5474_v52, 4  ;;  %v20473_v39 = vsub.f32 %v20471_v42, %v20472_v22 }
 0x6d2   : > { %v5722_v57 = vpack.c.bf16 %v5488_v63, %v5488_v63  ;;  %v5745_v26 = vpack.c.bf16 %v5438_v3, %v5438_v3  ;;  %v5219_v50 = vsel %vm2982_vm1, %v20470_v46, %v9716_v11  ;;  %v6773_v14 = vunpack.c.l.b16 %v5721_v61 }
 0x6d3   : > { %v5216_v21 = vsel %vm2982_vm1, %v20473_v39, %v9715_v59  ;;  %v5494_v56 = vsel %vm742_vm0, %v5486_v28, %v5493_v10  ;;  %v5340_v18 = vsel %vm742_vm0, %v5339_v41, %v5219_v50  ;;  %v5433_v20 = vrot.slane %v5414_v0, 4 }
 0x6d4   : > { %v5334_v15 = vsel %vm742_vm0, %v5333_v44, %v5216_v21  ;;  %v6774_v2 = vunpack.c.l.b16 %v5722_v57  ;;  %v5746_v34 = vpack.c.bf16 %v5494_v56, %v5494_v56  ;;  %v7053_v12 = vunpack.c.l.b16 %v5745_v26 }
 0x6d5   : > { %v5344_v48 = vperm.slane %v5340_v18, %v20343_v51  ;;  %v5338_v58 = vperm.slane %v5334_v15, %v20343_v51  ;;  %v5489_v24 = vrot.slane %v5470_v29, 4  ;;  %v5435_v5 = vrot.slane %v5430_v49, 4 }
 0x6d6   : > { %v6780_v38 = vpack.c.b16 %v6774_v2, %v6773_v14  ;;  %v7054_v27 = vunpack.c.l.b16 %v5746_v34  ;;  %v5491_v30 = vrot.slane %v5486_v28, 4  ;;  %v5434_v7 = vsel %vm742_vm0, %v5426_v31, %v5433_v20 }
 0x6d7   : > { %v5365_v43 = vrot.slane %v5344_v48, 4  ;;  %v5351_v4 = vrot.slane %v5338_v58, 4  ;;  %v5490_v41 = vsel %vm742_vm0, %v5482_v53, %v5489_v24  ;;  %v5436_v44 = vsel %vm742_vm0, %v5435_v5, %v5418_v45 }
 0x6d8   : > { %v6800_v60 = vsel %vm6783_vm2, %v6780_v38, 0  ;;  %v7060_v6 = vpack.c.b16 %v7054_v27, %v7053_v12  ;;  %v5729_v47 = vpack.c.bf16 %v5434_v7, %v5434_v7  ;;  %v5730_v9 = vpack.c.bf16 %v5490_v41, %v5490_v41  ;;  %v20474_v27 = vld [vmem:[#allocation58_spill] sm:$0xff] }
 0x6d9   : > { %6814 = vmatpush.bf16.xpose.msra.mxu3 %v6800_v60  ;;  %v5492_v0 = vsel %vm742_vm0, %v5491_v30, %v5474_v52  ;;  %v5737_v29 = vpack.c.bf16 %v5436_v44, %v5436_v44  ;;  %v5296_v49 = vsel %vm742_vm0, %v5295_v40, %v15510_v17  ;;  %v5308_v31 = vsel %vm742_vm0, %v5307_v25, %v15358_v1 }
 0x6da   : > { %v7079_v53 = vsel %vm6783_vm2, %v7060_v6, 0  ;;  %v6867_v45 = vunpack.c.l.b16 %v5729_v47  ;;  %v6868_v23 = vunpack.c.l.b16 %v5730_v9  ;;  %v5738_v16 = vpack.c.bf16 %v5492_v0, %v5492_v0  ;;  %v20475_v47 = vld [vmem:[#allocation198_spill] sm:$0xff] }
 0x6db   : > { %7093 = vmatpush.bf16.xpose.msrb.mxu2 %v7079_v53  ;;  %v6960_v28 = vunpack.c.l.b16 %v5737_v29  ;;  %v5302_v11 = vperm.slane %v5296_v49, %v20360_v19  ;;  %v5314_v52 = vperm.slane %v5308_v31, %v20360_v19  ;;  %v5352_v59 = vsel %vm742_vm0, %v5351_v4, %v15523_v36  ;;  %v20476_v31 = vld [vmem:[#allocation197_spill] sm:$0xff]  ;;  %v20477_v53 = vld [vmem:[#allocation200_spill] sm:$0xff] }
 0x6dc   : > { %v6874_v40 = vpack.c.b16 %v6868_v23, %v6867_v45  ;;  %v6961_v63 = vunpack.c.l.b16 %v5738_v16  ;;  %v5358_v61 = vperm.slane %v5352_v59, %v20360_v19  ;;  %v5364_v25 = vsel %vm742_vm0, %v5363_v13, %v5344_v48  ;;  %v20481_v59 = vld [vmem:[#allocation186_spill] sm:$0xff] }
 0x6dd   : > { %v5319_v3 = vrot.slane %v5314_v52, 4  ;;  %v5370_v10 = vperm.slane %v5364_v25, %v20360_v19  ;;  %v5298_v57 = vsel %vm742_vm0, %v15520_v33, %v5297_v35  ;;  %v5310_v26 = vsel %vm742_vm0, %v15309_v62, %v5309_v54  ;;  %v20484_v25 = vld [vmem:[#allocation192_spill] sm:$0xff] }
 0x6de   : > { %v6893_v8 = vsel %vm6783_vm2, %v6874_v40, 0  ;;  %v6967_v55 = vpack.c.b16 %v6961_v63, %v6960_v28  ;;  %v5306_v46 = vperm.slane %v5298_v57, %v20360_v19  ;;  %v5318_v13 = vperm.slane %v5310_v26, %v20360_v19  ;;  %v20479_v28 = vld [vmem:[#allocation230_spill] sm:$0xff] }
 0x6df   : > { %6907 = vmatpush.bf16.xpose.msrb.mxu0 %v6893_v8  ;;  %v5320_v50 = vsel %vm742_vm0, %v5319_v3, %v5302_v11  ;;  %v5375_v42 = vrot.slane %v5370_v10, 4  ;;  %v5354_v17 = vsel %vm742_vm0, %v5338_v58, %v5353_v32  ;;  %v5366_v1 = vsel %vm742_vm0, %v15542_v37, %v5365_v43 }
 0x6e0   : > { %v6986_v62 = vsel %vm6783_vm2, %v6967_v55, 0  ;;  %v5719_v54 = vpack.c.bf16 %v5320_v50, %v5320_v50  ;;  %v5325_v33 = vrot.slane %v5306_v46, 4  ;;  %v5362_v35 = vperm.slane %v5354_v17, %v20360_v19  ;;  %v20486_v55 = vld [vmem:[#allocation215_spill] sm:$0xff] }
 0x6e1   : > { %7000 = vmatpush.bf16.xpose.msrb.mxu1 %v6986_v62  ;;  %v5376_v22 = vsel %vm742_vm0, %v5375_v42, %v5358_v61  ;;  %v5374_v39 = vperm.slane %v5366_v1, %v20360_v19  ;;  %v5321_v21 = vrot.slane %v5302_v11, 4  ;;  %v5377_v14 = vrot.slane %v5358_v61, 4  ;;  %v20483_v61 = vld [vmem:[#allocation205_spill] sm:$0xff] }
 0x6e2   : > { %v5720_v56 = vpack.c.bf16 %v5376_v22, %v5376_v22  ;;  %v6771_v36 = vunpack.c.l.b16 %v5719_v54  ;;  %v5326_v32 = vsel %vm742_vm0, %v5318_v13, %v5325_v33  ;;  %v5381_v18 = vrot.slane %v5362_v35, 4  ;;  %v20488_v42 = vld [vmem:[#allocation221_spill] sm:$0xff] }
 0x6e3   : > { %v5743_v15 = vpack.c.bf16 %v5326_v32, %v5326_v32  ;;  %v5322_v37 = vsel %vm742_vm0, %v5314_v52, %v5321_v21  ;;  %v5378_v2 = vsel %vm742_vm0, %v5370_v10, %v5377_v14  ;;  %v5323_v34 = vrot.slane %v5318_v13, 4  ;;  %v20480_v52 = vld [vmem:[#allocation189_spill] sm:$0xff]  ;;  %v20491_v21 = vld [vmem:[#allocation206_spill] sm:$0xff] }
 0x6e4   : > { %v6772_v12 = vunpack.c.l.b16 %v5720_v56  ;;  %v5382_v48 = vsel %vm742_vm0, %v5374_v39, %v5381_v18  ;;  %v5727_v58 = vpack.c.bf16 %v5322_v37, %v5322_v37  ;;  %v5728_v20 = vpack.c.bf16 %v5378_v2, %v5378_v2 }
 0x6e5   : > { %v5744_v24 = vpack.c.bf16 %v5382_v48, %v5382_v48  ;;  %v5324_v5 = vsel %vm742_vm0, %v5323_v34, %v5306_v46  ;;  %v5379_v38 = vrot.slane %v5374_v39, 4  ;;  %v3155_v43 = vrot.slane %v20474_v27, 4  ;;  %v20490_v39 = vld [vmem:[#allocation188_spill] sm:$0xff]  ;;  %v20497_v34 = vld [vmem:[#allocation153_spill] sm:$0xff] }
 0x6e6   : > { %v6779_v30 = vpack.c.b16 %v6772_v12, %v6771_v36  ;;  %v6865_v4 = vunpack.c.l.b16 %v5727_v58  ;;  %v6866_v7 = vunpack.c.l.b16 %v5728_v20  ;;  %v5735_v41 = vpack.c.bf16 %v5324_v5, %v5324_v5  ;;  %v20493_v36 = vld [vmem:[#allocation210_spill] sm:$0xff] }
 0x6e7   : > { %v7051_v44 = vunpack.c.l.b16 %v5743_v15  ;;  %v7052_v60 = vunpack.c.l.b16 %v5744_v24  ;;  %v5380_v6 = vsel %vm742_vm0, %v5379_v38, %v5362_v35  ;;  %v3099_v9 = vrot.slane %v20475_v47, 4  ;;  %v20495_v15 = vld [vmem:[#allocation212_spill] sm:$0xff] }
 0x6e8   : > { %v6797_v0 = vsel %vm6783_vm2, %v6779_v30, 0  ;;  %v6873_v29 = vpack.c.b16 %v6866_v7, %v6865_v4  ;;  %v5736_v49 = vpack.c.bf16 %v5380_v6, %v5380_v6  ;;  %v20478_v45 = vrot.slane %v20477_v53, 4 }
 0x6e9   : > { %6815 = vmatpush.bf16.xpose.msra.mxu3 %v6797_v0  ;;  %v7059_v16 = vpack.c.b16 %v7052_v60, %v7051_v44  ;;  %v3156_v11 = vsel %vm742_vm0, %v3155_v43, %v20479_v28  ;;  %v20482_v40 = vrot.slane %v20481_v59, 4  ;;  %v20485_v3 = vrot.slane %v20484_v25, 4  ;;  %v20501_v44 = vld [vmem:[#allocation117_spill] sm:$0xff]  ;;  %v20502_v60 = vld [vmem:[#allocation134_spill] sm:$0xff] }
 0x6ea   : > { %v3252_v23 = vsel %vm742_vm0, %v20478_v45, %v20476_v31  ;;  %v6890_v57 = vsel %vm6783_vm2, %v6873_v29, 0  ;;  %v6958_v26 = vunpack.c.l.b16 %v5735_v41  ;;  %v6959_v8 = vunpack.c.l.b16 %v5736_v49  ;;  %v20507_v45 = vld [vmem:[#allocation163_spill] sm:$0xff] }
 0x6eb   : > { %v3184_v63 = vsel %vm742_vm0, %v20482_v40, %v20480_v52  ;;  %v3196_v10 = vsel %vm742_vm0, %v20485_v3, %v20483_v61  ;;  %v20487_v46 = vpack.c.bf16 %v20486_v55, %v20486_v55  ;;  %v7076_v50 = vsel %vm6783_vm2, %v7059_v16, 0  ;;  %6908 = vmatpush.bf16.xpose.msrb.mxu0 %v6890_v57  ;;  %v20512_v3 = vld [vmem:[#allocation62_spill] sm:$0xff]  ;;  %v20515_v57 = vld [vmem:[#allocation176_spill] sm:$0xff] }
 0x6ec   : > { %v3100_v17 = vsel %vm742_vm0, %v3099_v9, %v20488_v42  ;;  %v3258_v1 = vperm.slane %v3252_v23, %v20360_v19  ;;  %v20489_v62 = vrot.slane %v20480_v52, 4  ;;  %7094 = vmatpush.bf16.xpose.msrb.mxu2 %v7076_v50  ;;  %v6966_v33 = vpack.c.b16 %v6959_v8, %v6958_v26  ;;  %v20508_v23 = vld [vmem:[#allocation290_spill] sm:$0xff]  ;;  %v20516_v26 = vld [vmem:[#allocation309_spill] sm:$0xff] }
 0x6ed   : > { %v6846_v13 = vunpack.c.l.b16 %v20487_v46  ;;  %v3512_v35 = vpack.c.bf16 %v3156_v11, %v3156_v11  ;;  %v3202_v22 = vperm.slane %v3196_v10, %v20360_v19  ;;  %v20492_v14 = vrot.slane %v20491_v21, 4  ;;  %v20510_v11 = vld [vmem:[#allocation427_spill] sm:$0xff] }
 0x6ee   : > { %v3186_v54 = vsel %vm742_vm0, %v20481_v59, %v20489_v62  ;;  %v20494_v32 = vpack.c.bf16 %v20493_v36, %v20493_v36  ;;  %v20496_v37 = vpack.c.bf16 %v20495_v15, %v20495_v15  ;;  %v20498_v12 = vpack.c.bf16 %v20497_v34, %v20497_v34 }
 0x6ef   : > { %v3240_v56 = vsel %vm742_vm0, %v20492_v14, %v20490_v39  ;;  %v20499_v58 = vrot.slane %v20490_v39, 4  ;;  %v6983_v24 = vsel %vm6783_vm2, %v6966_v33, 0  ;;  %v3511_v5 = vpack.c.bf16 %v3100_v17, %v3100_v17  ;;  %v20518_v14 = vld [vmem:[#allocation67_spill] sm:$0xff] }
 0x6f0   : > { %v7031_v18 = vunpack.c.l.b16 %v20494_v32  ;;  %v7032_v2 = vunpack.c.l.b16 %v20496_v37  ;;  %v6845_v48 = vunpack.c.l.b16 %v20498_v12  ;;  %v3194_v38 = vperm.slane %v3186_v54, %v20360_v19  ;;  %7001 = vmatpush.bf16.xpose.msrb.mxu1 %v6983_v24 }
 0x6f1   : > { %v3242_v20 = vsel %vm742_vm0, %v20491_v21, %v20499_v58  ;;  %v20500_v27 = vrot.slane %v20476_v31, 4  ;;  %v3190_v4 = vperm.slane %v3184_v63, %v20360_v19  ;;  %v3246_v7 = vperm.slane %v3240_v56, %v20360_v19  ;;  %v20505_v31 = vld [vmem:[#allocation428_spill] sm:$0xff]  ;;  %v20511_v63 = vld [vmem:[#allocation190_spill] sm:$0xff] }
 0x6f2   : > { %v6853_v30 = vpack.c.b16 %v6846_v13, %v6845_v48  ;;  %v3263_v41 = vrot.slane %v3258_v1, 4  ;;  %v20503_v6 = vpack.c.b16 %v20501_v44, %v20502_v60  ;;  %v6939_v47 = vunpack.c.l.b16 %v3512_v35  ;;  %v20519_v56 = vld [vmem:[#allocation296_spill] sm:$0xff] }
 0x6f3   : > { %v3254_v43 = vsel %vm742_vm0, %v20477_v53, %v20500_v27  ;;  %v3207_v9 = vrot.slane %v3202_v22, 4  ;;  %v20504_v0 = vrot.slane %v20483_v61, 4  ;;  %v3250_v49 = vperm.slane %v3242_v20, %v20360_v19  ;;  %v20522_v27 = vld [vmem:[#allocation195_spill] sm:$0xff] }
 0x6f4   : > { %9221 = vmatmul.msk.bf16.vlgmr.msra.gmra.mxu3 %vm6783_vm2, %v20503_v6  ;;  %v20506_v53 = vunpack.i.l.bf16 %v20505_v31  ;;  %v20509_v16 = vsub.f32 %v20507_v45, %v20508_v23  ;;  %v9551_v52 = vunpack.i.h.bf16 %v20510_v11  ;;  %v7039_v59 = vpack.c.b16 %v7032_v2, %v7031_v18  ;;  %9225 = vmatmul.msk.bf16.vlgmr.msrb.gmra.mxu0 %vm6783_vm2, %v6853_v30  ;;  %v20527_v6 = vld [vmem:[#allocation227_spill] sm:$0xff] }
 0x6f5   : > { %v3198_v29 = vsel %vm742_vm0, %v20484_v25, %v20504_v0  ;;  %v3262_v40 = vperm.slane %v3254_v43, %v20360_v19  ;;  %v20513_v61 = vrot.slane %v20512_v3, 4  ;;  %v20514_v25 = vunpack.i.h.bf16 %v20505_v31  ;;  %v20529_v31 = vld [vmem:[#allocation313_spill] sm:$0xff] }
 0x6f6   : > { %v3041_v28 = vsel %vm2982_vm1, %v20509_v16, %v20506_v53  ;;  %v20517_v8 = vsub.f32 %v20515_v57, %v20516_v26  ;;  %v6938_v46 = vunpack.c.l.b16 %v3511_v5  ;;  %v3213_v13 = vrot.slane %v3194_v38, 4  ;;  %9233 = vmatmul.msk.bf16.vlgmr.msrb.gmra.mxu2 %vm6783_vm2, %v7039_v59  ;;  %v20521_v5 = vld [vmem:[#allocation209_spill] sm:$0xff]  ;;  %v20535_v57 = vld [vmem:[#allocation216_spill] sm:$0xff] }
 0x6f7   : > { %v3402_v10 = vsel %vm742_vm0, %v20513_v61, %v20511_v63  ;;  %v3264_v50 = vsel %vm742_vm0, %v3263_v41, %v3246_v7  ;;  %v3206_v42 = vperm.slane %v3198_v29, %v20360_v19  ;;  %v3209_v17 = vrot.slane %v3190_v4, 4  ;;  %v20525_v41 = vld [vmem:[#allocation213_spill] sm:$0xff]  ;;  %v20528_v29 = vld [vmem:[#allocation320_spill] sm:$0xff] }
 0x6f8   : > { %v3042_v55 = vsel %vm2982_vm1, %v20517_v8, %v20514_v25  ;;  %v3265_v62 = vrot.slane %v3246_v7, 4  ;;  %v3439_v54 = vrot.slane %v3041_v28, 4  ;;  %v6946_v33 = vpack.c.b16 %v6939_v47, %v6938_v46  ;;  %v20524_v7 = vld [vmem:[#allocation207_spill] sm:$0xff]  ;;  %v20534_v25 = vld [vmem:[#allocation202_spill] sm:$0xff] }
 0x6f9   : > { %v3208_v35 = vsel %vm742_vm0, %v3207_v9, %v3190_v4  ;;  %v3269_v39 = vrot.slane %v3250_v49, 4  ;;  %v3445_v21 = vrot.slane %v3042_v55, 4  ;;  %v20520_v36 = vsub.f32 %v20518_v14, %v20519_v56  ;;  %v20531_v28 = vld [vmem:[#allocation199_spill] sm:$0xff]  ;;  %v20537_v55 = vld [vmem:[#allocation217_spill] sm:$0xff] }
 0x6fa   : > { %v3266_v18 = vsel %vm742_vm0, %v3258_v1, %v3265_v62  ;;  %v3267_v15 = vrot.slane %v3262_v40, 4  ;;  %v9550_v37 = vunpack.i.l.bf16 %v20510_v11  ;;  %9229 = vmatmul.msk.bf16.vlgmr.msrb.gmra.mxu1 %vm6783_vm2, %v6946_v33  ;;  %v3498_v2 = vpack.c.bf16 %v3264_v50, %v3264_v50  ;;  %v20532_v11 = vld [vmem:[#allocation136_spill] sm:$0xff]  ;;  %v20538_v46 = vld [vmem:[#allocation211_spill] sm:$0xff] }
 0x6fb   : > { %v3044_v32 = vsel %vm2982_vm1, %v20520_v36, %v9551_v52  ;;  %v3214_v34 = vsel %vm742_vm0, %v3206_v42, %v3213_v13  ;;  %v3270_v12 = vsel %vm742_vm0, %v3262_v40, %v3269_v39  ;;  %v15732_v48 = vperm.slane %v3402_v10, %v20343_v51 }
 0x6fc   : > { %v3497_v58 = vpack.c.bf16 %v3208_v35, %v3208_v35  ;;  %v3210_v20 = vsel %vm742_vm0, %v3202_v22, %v3209_v17  ;;  %v3211_v24 = vrot.slane %v3206_v42, 4  ;;  %v3440_v1 = vsel %vm742_vm0, %v3439_v54, %v20521_v5 }
 0x6fd   : > { %v20523_v43 = vrot.slane %v20522_v27, 4  ;;  %v3506_v4 = vpack.c.bf16 %v3266_v18, %v3266_v18  ;;  %v20526_v44 = vrot.slane %v20525_v41, 4  ;;  %v3446_v47 = vsel %vm742_vm0, %v3445_v21, %v20527_v6 }
 0x6fe   : > { %v3521_v9 = vpack.c.bf16 %v3214_v34, %v3214_v34  ;;  %v3522_v0 = vpack.c.bf16 %v3270_v12, %v3270_v12  ;;  %v3268_v22 = vsel %vm742_vm0, %v3267_v15, %v3250_v49  ;;  %v20530_v53 = vsub.f32 %v20528_v29, %v20529_v31 }
 0x6ff   : > { %v3458_v30 = vsel %vm742_vm0, %v20523_v43, %v3044_v32  ;;  %v3364_v60 = vsel %vm742_vm0, %v20526_v44, %v20524_v7  ;;  %v6754_v23 = vunpack.c.l.b16 %v3498_v2  ;;  %v3505_v16 = vpack.c.bf16 %v3210_v20, %v3210_v20 }
 0x700   : > { %v3043_v45 = vsel %vm2982_vm1, %v20530_v53, %v9550_v37  ;;  %v20533_v52 = vrot.slane %v20532_v11, 4  ;;  %v15756_v40 = vperm.slane %v3458_v30, %v20343_v51  ;;  %v6753_v63 = vunpack.c.l.b16 %v3497_v58  ;;  %v20544_v30 = vld [vmem:[#allocation219_spill] sm:$0xff] }
 0x701   : > { %v3212_v3 = vsel %vm742_vm0, %v3211_v24, %v3194_v38  ;;  %v3370_v49 = vperm.slane %v3364_v60, %v20360_v19  ;;  %v6848_v61 = vunpack.c.l.b16 %v3506_v4  ;;  %v3514_v10 = vpack.c.bf16 %v3268_v22, %v3268_v22 }
 0x702   : > { %v3308_v59 = vsel %vm742_vm0, %v20533_v52, %v20531_v28  ;;  %v20536_v26 = vrot.slane %v20535_v57, 4  ;;  %v20539_v13 = vrot.slane %v20538_v46, 4  ;;  %v7033_v42 = vunpack.c.l.b16 %v3521_v9 }
 0x703   : > { %v7034_v17 = vunpack.c.l.b16 %v3522_v0  ;;  %v3314_v62 = vperm.slane %v3308_v59, %v20360_v19  ;;  %v20540_v38 = vrot.slane %v20537_v55, 4  ;;  %v6760_v33 = vpack.c.b16 %v6754_v23, %v6753_v63  ;;  %v20546_v59 = vld [vmem:[#allocation53_spill] sm:$0xff] }
 0x704   : > { %v3296_v8 = vsel %vm742_vm0, %v20536_v26, %v20534_v25  ;;  %v3352_v50 = vsel %vm742_vm0, %v20539_v13, %v20537_v55  ;;  %v6847_v35 = vunpack.c.l.b16 %v3505_v16  ;;  %v3513_v39 = vpack.c.bf16 %v3212_v3, %v3212_v3  ;;  %v20547_v3 = vld [vmem:[#allocation218_spill] sm:$0xff] }
 0x705   : > { %v3354_v54 = vsel %vm742_vm0, %v20538_v46, %v20540_v38  ;;  %v20541_v21 = vrot.slane %v20524_v7, 4  ;;  %v3302_v56 = vperm.slane %v3296_v8, %v20360_v19  ;;  %v3358_v36 = vperm.slane %v3352_v50, %v20360_v19  ;;  %9222 = vmatmul.msk.bf16.gmra.mxu3 %vm6783_vm2, %v6760_v33 }
 0x706   : > { %v3375_v32 = vrot.slane %v3370_v49, 4  ;;  %v20542_v18 = vrot.slane %v20534_v25, 4  ;;  %v6854_v37 = vpack.c.b16 %v6848_v61, %v6847_v35  ;;  %v6941_v2 = vunpack.c.l.b16 %v3514_v10 }
 0x707   : > { %v3366_v14 = vsel %vm742_vm0, %v20525_v41, %v20541_v21  ;;  %v20543_v34 = vrot.slane %v20531_v28, 4  ;;  %v3362_v58 = vperm.slane %v3354_v54, %v20360_v19  ;;  %v3419_v20 = vrot.slane %v15732_v48, 4 }
 0x708   : > { %v3298_v15 = vsel %vm742_vm0, %v20535_v57, %v20542_v18  ;;  %v7040_v24 = vpack.c.b16 %v7034_v17, %v7033_v42  ;;  %v3319_v5 = vrot.slane %v3314_v62, 4  ;;  %v3374_v27 = vperm.slane %v3366_v14, %v20360_v19  ;;  %9226 = vmatmul.msk.bf16.gmra.mxu0 %vm6783_vm2, %v6854_v37  ;;  %v20548_v42 = vld [vmem:[#allocation223_spill] sm:$0xff] }
 0x709   : > { %v3310_v12 = vsel %vm742_vm0, %v20532_v11, %v20543_v34  ;;  %v3444_v43 = vperm.slane %v3440_v1, %v20343_v51  ;;  %v20545_v4 = vrot.slane %v20544_v30, 4  ;;  %v6940_v41 = vunpack.c.l.b16 %v3513_v39 }
 0x70a   : > { %v3306_v44 = vperm.slane %v3298_v15, %v20360_v19  ;;  %v3450_v60 = vperm.slane %v3446_v47, %v20343_v51  ;;  %9234 = vmatmul.msk.bf16.gmra.mxu2 %vm6783_vm2, %v7040_v24  ;;  %v3376_v6 = vsel %vm742_vm0, %v3375_v32, %v3358_v36  ;;  %v3318_v9 = vperm.slane %v3310_v12, %v20360_v19 }
 0x70b   : > { %v3452_v7 = vsel %vm742_vm0, %v20545_v4, %v3043_v45  ;;  %v3377_v0 = vrot.slane %v3358_v36, 4  ;;  %v3475_v1 = vrot.slane %v15756_v40, 4  ;;  %v6947_v22 = vpack.c.b16 %v6941_v2, %v6940_v41 }
 0x70c   : > { %v3381_v29 = vrot.slane %v3362_v58, 4  ;;  %v3321_v31 = vrot.slane %v3302_v56, 4  ;;  %v3456_v53 = vperm.slane %v3452_v7, %v20343_v51  ;;  %v3320_v45 = vsel %vm742_vm0, %v3319_v5, %v3302_v56 }
 0x70d   : > { %v3378_v23 = vsel %vm742_vm0, %v3370_v49, %v3377_v0  ;;  %v3379_v16 = vrot.slane %v3374_v27, 4  ;;  %9230 = vmatmul.msk.bf16.gmra.mxu1 %vm6783_vm2, %v6947_v22  ;;  %v3500_v47 = vpack.c.bf16 %v3376_v6, %v3376_v6  ;;  %v3325_v28 = vrot.slane %v3306_v44, 4 }
 0x70e   : > { %v3382_v11 = vsel %vm742_vm0, %v3374_v27, %v3381_v29  ;;  %v3322_v52 = vsel %vm742_vm0, %v3314_v62, %v3321_v31  ;;  %v3407_v63 = vrot.slane %v20546_v59, 4  ;;  %v3400_v61 = vperm.slane %v20547_v3, %v20343_v51 }
 0x70f   : > { %v3463_v10 = vrot.slane %v3450_v60, 4  ;;  %v3323_v25 = vrot.slane %v3318_v9, 4  ;;  %v3499_v57 = vpack.c.bf16 %v3320_v45, %v3320_v45  ;;  %v3326_v26 = vsel %vm742_vm0, %v3318_v9, %v3325_v28 }
 0x710   : > { %v3508_v49 = vpack.c.bf16 %v3378_v23, %v3378_v23  ;;  %v3476_v8 = vsel %vm742_vm0, %v3475_v1, %v3456_v53  ;;  %v3465_v55 = vrot.slane %v3444_v43, 4  ;;  %v3524_v46 = vpack.c.bf16 %v3382_v11, %v3382_v11 }
 0x711   : > { %v3507_v13 = vpack.c.bf16 %v3322_v52, %v3322_v52  ;;  %v3380_v50 = vsel %vm742_vm0, %v3379_v16, %v3362_v58  ;;  %v3409_v17 = vrot.slane %v20548_v42, 4  ;;  %v3477_v62 = vrot.slane %v3456_v53, 4 }
 0x712   : > { %v6756_v38 = vunpack.c.l.b16 %v3500_v47  ;;  %v3420_v54 = vsel %vm742_vm0, %v3419_v20, %v3400_v61  ;;  %v3421_v33 = vrot.slane %v3400_v61, 4  ;;  %v3523_v35 = vpack.c.bf16 %v3326_v26, %v3326_v26 }
 0x713   : > { %v3324_v39 = vsel %vm742_vm0, %v3323_v25, %v3306_v44  ;;  %v3482_v21 = vperm.slane %v3476_v8, %v20360_v19  ;;  %v6755_v14 = vunpack.c.l.b16 %v3499_v57  ;;  %v6850_v56 = vunpack.c.l.b16 %v3508_v49 }
 0x714   : > { %v3516_v36 = vpack.c.bf16 %v3380_v50, %v3380_v50  ;;  %v3464_v32 = vsel %vm742_vm0, %v3463_v10, %v3444_v43  ;;  %v7036_v18 = vunpack.c.l.b16 %v3524_v46  ;;  %v6849_v15 = vunpack.c.l.b16 %v3507_v13 }
 0x715   : > { %v3426_v37 = vperm.slane %v3420_v54, %v20360_v19  ;;  %v3466_v2 = vsel %vm742_vm0, %v3450_v60, %v3465_v55  ;;  %v6761_v34 = vpack.c.b16 %v6756_v38, %v6755_v14  ;;  %v3515_v12 = vpack.c.bf16 %v3324_v39, %v3324_v39  ;;  %v15851_v14 = vpop.f32.mrf.mxu2 }
 0x716   : > { %v3408_v58 = vsel %vm742_vm0, %v3407_v63, %v20548_v42  ;;  %v3478_v20 = vsel %vm742_vm0, %v15756_v40, %v3477_v62  ;;  %v7035_v24 = vunpack.c.l.b16 %v3523_v35  ;;  %v3470_v5 = vperm.slane %v3464_v32, %v20360_v19  ;;  %20549 = vst [vmem:[#allocation403_spill] sm:$0xff] %v15851_v14 }
 0x717   : > { %v3487_v27 = vrot.slane %v3482_v21, 4  ;;  %v3410_v43 = vsel %vm742_vm0, %v20546_v59, %v3409_v17  ;;  %9223 = vmatmul.msk.bf16.gmra.mxu3 %vm6783_vm2, %v6761_v34  ;;  %v6855_v30 = vpack.c.b16 %v6850_v56, %v6849_v15  ;;  %v6943_v4 = vunpack.c.l.b16 %v3516_v36 }
 0x718   : > { %v3422_v7 = vsel %vm742_vm0, %v15732_v48, %v3421_v33  ;;  %v3474_v41 = vperm.slane %v3466_v2, %v20360_v19  ;;  %v7041_v44 = vpack.c.b16 %v7036_v18, %v7035_v24  ;;  %v3414_v60 = vperm.slane %v3408_v58, %v20360_v19 }
 0x719   : > { %v3431_v40 = vrot.slane %v3426_v37, 4  ;;  %v3486_v6 = vperm.slane %v3478_v20, %v20360_v19  ;;  %9227 = vmatmul.msk.bf16.gmra.mxu0 %vm6783_vm2, %v6855_v30  ;;  %v6942_v9 = vunpack.c.l.b16 %v3515_v12  ;;  %v3418_v0 = vperm.slane %v3410_v43, %v20360_v19 }
 0x71a   : > { %9235 = vmatmul.msk.bf16.gmra.mxu2 %vm6783_vm2, %v7041_v44  ;;  %v3488_v1 = vsel %vm742_vm0, %v3487_v27, %v3470_v5  ;;  %v3430_v22 = vperm.slane %v3422_v7, %v20360_v19  ;;  %v3489_v48 = vrot.slane %v3470_v5, 4  ;;  %v3493_v31 = vrot.slane %v3474_v41, 4 }
 0x71b   : > { %v6948_v29 = vpack.c.b16 %v6943_v4, %v6942_v9  ;;  %v3432_v53 = vsel %vm742_vm0, %v3431_v40, %v3414_v60  ;;  %v3433_v45 = vrot.slane %v3414_v60, 4  ;;  %v3491_v16 = vrot.slane %v3486_v6, 4 }
 0x71c   : > { %v3490_v23 = vsel %vm742_vm0, %v3482_v21, %v3489_v48  ;;  %v3502_v47 = vpack.c.bf16 %v3488_v1, %v3488_v1  ;;  %v3437_v28 = vrot.slane %v3418_v0, 4  ;;  %v3494_v11 = vsel %vm742_vm0, %v3486_v6, %v3493_v31 }
 0x71d   : > { %9231 = vmatmul.msk.bf16.gmra.mxu1 %vm6783_vm2, %v6948_v29  ;;  %v3434_v52 = vsel %vm742_vm0, %v3426_v37, %v3433_v45  ;;  %v3435_v59 = vrot.slane %v3430_v22, 4  ;;  %v3501_v63 = vpack.c.bf16 %v3432_v53, %v3432_v53  ;;  %v3510_v61 = vpack.c.bf16 %v3490_v23, %v3490_v23  ;;  %v15853_v56 = vpop.f32.mrf.mxu2 }
 0x71e   : > { %v3438_v3 = vsel %vm742_vm0, %v3430_v22, %v3437_v28  ;;  %v3526_v10 = vpack.c.bf16 %v3494_v11, %v3494_v11  ;;  %v3492_v25 = vsel %vm742_vm0, %v3491_v16, %v3474_v41  ;;  %v6758_v57 = vunpack.c.l.b16 %v3502_v47  ;;  %20550 = vst [vmem:[#allocation203_spill] sm:$0xff] %v15853_v56 }
 0x71f   : > { %v3509_v26 = vpack.c.bf16 %v3434_v52, %v3434_v52  ;;  %v3525_v49 = vpack.c.bf16 %v3438_v3, %v3438_v3  ;;  %v3436_v8 = vsel %vm742_vm0, %v3435_v59, %v3418_v0  ;;  %v6757_v55 = vunpack.c.l.b16 %v3501_v63 }
 0x720   : > { %v6852_v46 = vunpack.c.l.b16 %v3510_v61  ;;  %v3518_v13 = vpack.c.bf16 %v3492_v25, %v3492_v25  ;;  %v7038_v50 = vunpack.c.l.b16 %v3526_v10  ;;  %v3517_v62 = vpack.c.bf16 %v3436_v8, %v3436_v8 }
 0x721   : > { %v6762_v42 = vpack.c.b16 %v6758_v57, %v6757_v55  ;;  %v6851_v17 = vunpack.c.l.b16 %v3509_v26  ;;  %v7037_v38 = vunpack.c.l.b16 %v3525_v49  ;;  %v7116_v2 = vlaneseq }
 0x722   : > { %v6945_v33 = vunpack.c.l.b16 %v3518_v13  ;;  %v6944_v39 = vunpack.c.l.b16 %v3517_v62 }
 0x723   : > { %v6856_v54 = vpack.c.b16 %v6852_v46, %v6851_v17  ;;  %v7042_v35 = vpack.c.b16 %v7038_v50, %v7037_v38  ;;  %v7117_v12 = vshrl.u32 %v7116_v2, 7  ;;  %v15867_v58 = vand.u32 127, %v7116_v2 }
 0x724   : > { %v6949_v21 = vpack.c.b16 %v6945_v33, %v6944_v39 }
 0x725   : > { %v15855_v36 = vpop.f32.mrf.mxu2  ;;  %v15869_v20 = vadd.s32 32, %v7117_v12  ;;  %vm7127_vm4 = vcmp.le.s32.totalorder %v15867_v58, %v7117_v12  ;;  %v7118_v41 = vadd.s32 8, %v7117_v12  ;;  %v15886_v60 = vadd.s32 40, %v7117_v12 }
 0x726   : > { %v15909_v45 = vadd.s32 48, %v7117_v12  ;;  %v7119_v52 = vadd.s32 16, %v7117_v12  ;;  %v7120_v3 = vadd.s32 24, %v7117_v12  ;;  %v15925_v61 = vadd.s32 56, %v7117_v12 }
 0x727   : > { %9224 = vmatmul.msk.bf16.gmra.mxu3 %vm6783_vm2, %v6762_v42  ;;  %vm7131_vm3 = vcmp.le.s32.totalorder %v15867_v58, %v15869_v20  ;;  %vm7132_vm6 = vcmp.le.s32.totalorder %v15867_v58, %v15886_v60  ;;  %vm7128_vm7 = vcmp.le.s32.totalorder %v15867_v58, %v7118_v41 }
 0x728   : > { %vm7133_vm8 = vcmp.le.s32.totalorder %v15867_v58, %v15909_v45  ;;  %vm7129_vm9 = vcmp.le.s32.totalorder %v15867_v58, %v7119_v52  ;;  %vm7134_vm10 = vcmp.le.s32.totalorder %v15867_v58, %v15925_v61  ;;  %vm7130_vm11 = vcmp.le.s32.totalorder %v15867_v58, %v7120_v3 }
 0x729   : > { %9228 = vmatmul.msk.bf16.gmra.mxu0 %vm6783_vm2, %v6856_v54 }
 0x72a   : > { %9236 = vmatmul.msk.bf16.gmra.mxu2 %vm6783_vm2, %v7042_v35 }
 0x72d   : > { %9232 = vmatmul.msk.bf16.gmra.mxu1 %vm6783_vm2, %v6949_v21  ;;  %v15857_v32 = vpop.f32.mrf.mxu2 }
 0x735   : > { %v15859_v18 = vpop.f32.mrf.mxu2 }
 0x73d   : > { %v15861_v15 = vpop.f32.mrf.mxu2 }
 0x745   : > { %v15863_v37 = vpop.f32.mrf.mxu2 }
 0x74d   : > { %v15865_v34 = vpop.f32.mrf.mxu2 }
 0x771   : > { %v6910_v43 = vpop.f32.mrf.mxu0 }
 0x772   : > { %v15901_v1 = vsel %vm7127_vm4, %v6910_v43, -inf  ;;  %v9722_v43 = vpack.i.bf16 %v15865_v34, %v15863_v37 }
 0x773   : > { %v7208_v53 = vsel %vm7183_vm5, %v15901_v1, -inf }
 0x777   : > { %v7003_v24 = vpop.f32.mrf.mxu1  ;;  %v6817_v5 = vpop.f32.mrf.mxu3 }
 0x778   : > { %v15876_v27 = vsel %vm7127_vm4, %v6817_v5, -inf  ;;  %v15890_v40 = vsel %vm7127_vm4, %v7003_v24, -inf }
 0x779   : > { %v7184_v30 = vsel %vm7183_vm5, %v15876_v27, -inf  ;;  %v7096_v4 = vpop.f32.mrf.mxu2  ;;  %v7232_v22 = vsel %vm7183_vm5, %v15890_v40, -inf  ;;  %v6912_v31 = vpop.f32.mrf.mxu0 }
 0x77a   : > { %7185 = vmax.xlane.f32.xlu1 %v7184_v30  ;;  %v15882_v7 = vsel %vm7127_vm4, %v7096_v4, -inf  ;;  %v15913_v23 = vsel %vm7128_vm7, %v6912_v31, -inf  ;;  %v9732_v30 = vpack.i.bf16 %v15861_v15, %v15859_v18  ;;  %v9752_v4 = vpack.i.bf16 %v15857_v32, %v15855_v36 }
 0x77b   : > { %v7256_v44 = vsel %vm7183_vm5, %v15882_v7, -inf  ;;  %v7211_v28 = vsel %vm7183_vm5, %v15913_v23, -inf }
 0x77c   : > { %7257 = vmax.xlane.f32.xlu0 %v7256_v44 }
 0x77f   : > { %v7005_v6 = vpop.f32.mrf.mxu1  ;;  %v6819_v9 = vpop.f32.mrf.mxu3 }
 0x780   : > { %v15897_v0 = vsel %vm7128_vm7, %v6819_v9, -inf  ;;  %v15930_v10 = vsel %vm7128_vm7, %v7005_v6, -inf }
 0x781   : > { %v7187_v48 = vsel %vm7183_vm5, %v15897_v0, -inf  ;;  %v7098_v29 = vpop.f32.mrf.mxu2  ;;  %v7235_v49 = vsel %vm7183_vm5, %v15930_v10, -inf }
 0x782   : > { %7233 = vmax.xlane.f32.xlu1 %v7232_v22  ;;  %7188 = vmax.xlane.f32.xlu2 %v7187_v48  ;;  %v15917_v16 = vsel %vm7128_vm7, %v7098_v29, -inf }
 0x783   : > { %v7259_v11 = vsel %vm7183_vm5, %v15917_v16, -inf }
 0x784   : > { %7209 = vmax.xlane.f32.xlu0 %v7208_v53 }
 0x785   : > { %v6915_v17 = vpop.f32.mrf.mxu0 }
 0x786   : > { %v15969_v35 = vsel %vm7129_vm9, %v6915_v17, -inf }
 0x787   : > { %v7214_v21 = vsel %vm7183_vm5, %v15969_v35, -inf }
 0x788   : > { %v6822_v47 = vpop.f32.mrf.mxu3 }
 0x789   : > { %v15951_v13 = vsel %vm7129_vm9, %v6822_v47, -inf }
 0x78a   : > { %v7008_v59 = vpop.f32.mrf.mxu1  ;;  %7212 = vmax.xlane.f32.xlu1 %v7211_v28  ;;  %7260 = vmax.xlane.f32.xlu2 %v7259_v11  ;;  %v7190_v62 = vsel %vm7183_vm5, %v15951_v13, -inf }
 0x78b   : > { %v15959_v42 = vsel %vm7129_vm9, %v7008_v59, -inf }
 0x78c   : > { %v7238_v54 = vsel %vm7183_vm5, %v15959_v42, -inf }
 0x78d   : > { %v7101_v63 = vpop.f32.mrf.mxu2  ;;  %v6917_v12 = vpop.f32.mrf.mxu0 }
 0x78e   : > { %v15934_v25 = vsel %vm7129_vm9, %v7101_v63, -inf  ;;  %v15981_v24 = vsel %vm7130_vm11, %v6917_v12, -inf }
 0x78f   : > { %v7262_v8 = vsel %vm7183_vm5, %v15934_v25, -inf  ;;  %v7217_v5 = vsel %vm7183_vm5, %v15981_v24, -inf }
 0x790   : > { %v6824_v57 = vpop.f32.mrf.mxu3 }
 0x791   : > { %v15941_v26 = vsel %vm7130_vm11, %v6824_v57, -inf }
 0x792   : > { %v7193_v55 = vsel %vm7183_vm5, %v15941_v26, -inf  ;;  %7263 = vmax.xlane.f32.xlu1 %v7262_v8  ;;  %7236 = vmax.xlane.f32.xlu2 %v7235_v49  ;;  %v7010_v46 = vpop.f32.mrf.mxu1 }
 0x793   : > { %7194 = vmax.xlane.f32.xlu0 %v7193_v55  ;;  %v15955_v50 = vsel %vm7130_vm11, %v7010_v46, -inf  ;;  %v9762_v46 = vpack.i.bf16 %v15853_v56, %v15851_v14 }
 0x794   : > { %v7241_v38 = vsel %vm7183_vm5, %v15955_v50, -inf }
 0x795   : > { %v7103_v33 = vpop.f32.mrf.mxu2 }
 0x796   : > { %v15973_v39 = vsel %vm7130_vm11, %v7103_v33, -inf  ;;  %v6920_v8 = vpop.f32.mrf.mxu0 }
 0x797   : > { %v7265_v2 = vsel %vm7183_vm5, %v15973_v39, -inf }
 0x79a   : > { %7242 = vmax.xlane.f32.xlu1 %v7241_v38  ;;  %7191 = vmax.xlane.f32.xlu2 %v7190_v62  ;;  %v6827_v41 = vpop.f32.mrf.mxu3  ;;  %v7013_v55 = vpop.f32.mrf.mxu1 }
 0x79b   : > { %7239 = vmax.xlane.f32.xlu0 %v7238_v54  ;;  %v16014_v31 = vsel %vm7131_vm3, %v6827_v41, -inf }
 0x79c   : > { %v7196_v47 = vsel %vm7183_vm5, %v16014_v31, -inf }
 0x79d   : > { %v7106_v9 = vpop.f32.mrf.mxu2 }
 0x79e   : > { %v16009_v48 = vsel %vm7131_vm3, %v7106_v9, -inf  ;;  %v6922_v54 = vpop.f32.mrf.mxu0 }
 0x79f   : > { %v7268_v53 = vsel %vm7183_vm5, %v16009_v48, -inf }
 0x7a2   : > { %7215 = vmax.xlane.f32.xlu1 %v7214_v21  ;;  %7266 = vmax.xlane.f32.xlu2 %v7265_v2  ;;  %v6829_v44 = vpop.f32.mrf.mxu3  ;;  %v7015_v33 = vpop.f32.mrf.mxu1 }
 0x7a3   : > { %v16002_v6 = vsel %vm7132_vm6, %v6829_v44, -inf  ;;  %v16078_v20 = vsel %vm7132_vm6, %v7015_v33, -inf }
 0x7a4   : > { %v7199_v22 = vsel %vm7183_vm5, %v16002_v6, -inf  ;;  %20554 = vst [vmem:[#allocation204_spill] sm:$0xff] %v16078_v20 }
 0x7a5   : > { %v7108_v28 = vpop.f32.mrf.mxu2 }
 0x7a6   : > { %v16023_v59 = vsel %vm7132_vm6, %v7108_v28, -inf  ;;  %v16051_v28 = vsel %vm7131_vm3, %v6920_v8, -inf }
 0x7a7   : > { %v7271_v63 = vsel %vm7183_vm5, %v16023_v59, -inf  ;;  %20551 = vst [vmem:[#allocation79_spill] sm:$0xff] %v16051_v28 }
 0x7aa   : > { %7218 = vmax.xlane.f32.xlu1 %v7217_v5 }
 0x7af   : > { %9723 = vrot.lane.b32.xlu0 %v9722_v43, %s10105_s12 }
 0x7b7   : > { %9733 = vrot.lane.b32.xlu0 %v9732_v30, %s10106_s13 }
 0x7ba   : > { %9718 = vrot.lane.b32.xlu2 %v9722_v43, %s10106_s13 }
 0x7bf   : > { %9743 = vrot.lane.b32.xlu0 %v9732_v30, %s10104_s11 }
 0x7c2   : > { %9738 = vrot.lane.b32.xlu2 %v9732_v30, %s10105_s12  ;;  %v6225_v30 = vrot.slane %v15865_v34, 4 }
 0x7c3   : > { %9728 = vrot.lane.b32.xlu1 %v9722_v43, %s10104_s11 }
 0x7c7   : > { %9753 = vrot.lane.b32.xlu0 %v9752_v4, %s10105_s12 }
 0x7ca   : > { %9748 = vrot.lane.b32.xlu2 %v9752_v4, %s10106_s13 }
 0x7ed   : > { %v7186_v29 = vpop.xlane.xlu1 %7185  ;;  %7200 = vmax.xlane.f32.xlu1 %v7199_v22 }
 0x7ee   : > { %v7280_v5 = vsub.f32 %v15876_v27, %v7186_v29  ;;  %v7018_v27 = vpop.f32.mrf.mxu1 }
 0x7ef   : > { %v7258_v3 = vpop.xlane.xlu0 %7257 }
 0x7f0   : > { %v7304_v43 = vsub.f32 %v15882_v7, %v7258_v3 }
 0x7f1   : > { %7269 = vmax.xlane.f32.xlu0 %v7268_v53 }
 0x7f2   : > { %v7360_v41 = vmul.f32 1.442695, %v7304_v43 }
 0x7f3   : > { %7197 = vmax.xlane.f32.xlu2 %v7196_v47  ;;  %v6925_v47 = vpop.f32.mrf.mxu0 }
 0x7f4   : > { %v16102_v43 = vsel %vm7133_vm8, %v6925_v47, -inf }
 0x7f5   : > { %v7234_v11 = vpop.xlane.xlu1 %7233  ;;  %v7189_v52 = vpop.xlane.xlu2 %7188  ;;  %20555 = vst [vmem:[#allocation361_spill] sm:$0xff] %v16102_v43 }
 0x7f6   : > { %v7281_v29 = vsub.f32 %v15897_v0, %v7189_v52  ;;  %v16060_v0 = vsel %vm7131_vm3, %v7013_v55, -inf  ;;  %v7020_v47 = vpop.f32.mrf.mxu1 }
 0x7f7   : > { %v7210_v38 = vpop.xlane.xlu0 %7209  ;;  %20552 = vst [vmem:[#allocation182_spill] sm:$0xff] %v16060_v0  ;;  %v16084_v55 = vsel %vm7183_vm5, %v16060_v0, -inf }
 0x7fb   : > { %7272 = vmax.xlane.f32.xlu2 %v7271_v63  ;;  %v7288_v63 = vsub.f32 %v15901_v1, %v7210_v38  ;;  %v16070_v1 = vsel %vm7132_vm6, %v6922_v54, -inf  ;;  %v7314_v38 = vmul.f32 1.442695, %v7281_v29  ;;  %v7111_v54 = vpop.f32.mrf.mxu2 }
 0x7fc   : > { %20553 = vst [vmem:[#allocation302_spill] sm:$0xff] %v16070_v1  ;;  %v16089_v60 = vsel %vm7183_vm5, %v16070_v1, -inf }
 0x7fd   : > { %v7213_v57 = vpop.xlane.xlu1 %7212  ;;  %v7261_v49 = vpop.xlane.xlu2 %7260 }
 0x7fe   : > { %v7289_v9 = vsub.f32 %v15913_v23, %v7213_v57  ;;  %v7305_v8 = vsub.f32 %v15917_v16, %v7261_v49  ;;  %v7328_v16 = vmul.f32 1.442695, %v7288_v63 }
 0x800   : > { %v7362_v33 = vmul.f32 1.442695, %v7305_v8 }
 0x805   : > { %9763 = vrot.lane.b32.xlu0 %v9762_v46, %s10106_s13  ;;  %v7237_v17 = vpop.xlane.xlu2 %7236  ;;  %v7264_v62 = vpop.xlane.xlu1 %7263 }
 0x806   : > { %9758 = vrot.lane.b32.xlu1 %v9752_v4, %s10104_s11  ;;  %v7195_v2 = vpop.xlane.xlu0 %7194  ;;  %v7296_v4 = vsub.f32 %v15890_v40, %v7234_v11  ;;  %v6832_v40 = vpop.f32.mrf.mxu3  ;;  %v7312_v11 = vmul.f32 1.442695, %v7280_v5  ;;  %v16065_v5 = vsel %vm7183_vm5, %v16051_v28, -inf  ;;  %v7306_v23 = vsub.f32 %v15934_v25, %v7264_v62 }
 0x807   : > { %v7297_v49 = vsub.f32 %v15930_v10, %v7237_v17  ;;  %v7330_v25 = vmul.f32 1.442695, %v7289_v9  ;;  %v7283_v62 = vsub.f32 %v15941_v26, %v7195_v2  ;;  %v16107_v2 = vsel %vm7133_vm8, %v7018_v27, -inf  ;;  %v6927_v9 = vpop.f32.mrf.mxu0 }
 0x808   : > { %v7344_v52 = vmul.f32 1.442695, %v7296_v4  ;;  %9837 = vpow2.f32 %v7312_v11  ;;  %v7364_v26 = vmul.f32 1.442695, %v7306_v23  ;;  %20556 = vst [vmem:[#allocation360_spill] sm:$0xff] %v16107_v2  ;;  %v16119_v4 = vsel %vm7133_vm8, %v7111_v54, -inf }
 0x809   : > { %9839 = vpow2.f32 %v7360_v41  ;;  %v16114_v41 = vsel %vm7133_vm8, %v6832_v40, -inf  ;;  %20558 = vst [vmem:[#allocation78_spill] sm:$0xff] %v16119_v4  ;;  %v7318_v27 = vmul.f32 1.442695, %v7283_v62  ;;  %v16125_v11 = vsel %vm7183_vm5, %v16102_v43, -inf }
 0x80a   : > { %9841 = vpow2.f32 %v7344_v52  ;;  %20557 = vst [vmem:[#allocation333_spill] sm:$0xff] %v16114_v41  ;;  %v16132_v45 = vsel %vm7183_vm5, %v16107_v2, -inf  ;;  %v16149_v54 = vsel %vm7134_vm10, %v6927_v9, -inf }
 0x80b   : > { %9843 = vpow2.f32 %v7314_v38  ;;  %20559 = vst [vmem:[#allocation411_spill] sm:$0xff] %v16149_v54 }
 0x80c   : > { %9845 = vpow2.f32 %v7328_v16  ;;  %v16138_v16 = vsel %vm7183_vm5, %v16114_v41, -inf }
 0x80d   : > { %v16031_v21 = vpop.xlane.xlu2 %7191  ;;  %v16033_v12 = vpop.xlane.xlu1 %7242  ;;  %9847 = vpow2.f32 %v7330_v25  ;;  %v16154_v25 = vsel %vm7134_vm10, %v7020_v47, -inf }
 0x80e   : > { %v7240_v22 = vpop.xlane.xlu0 %7239  ;;  %v7299_v10 = vsub.f32 %v15955_v50, %v16033_v12  ;;  %v7346_v50 = vmul.f32 1.442695, %v7297_v49  ;;  %v7282_v12 = vsub.f32 %v15951_v13, %v16031_v21  ;;  %v16121_v29 = vpop.eup %9837  ;;  %9849 = vpow2.f32 %v7362_v33  ;;  %20560 = vst [vmem:[#allocation407_spill] sm:$0xff] %v16154_v25 }
 0x80f   : > { %v6834_v13 = vpop.f32.mrf.mxu3  ;;  %v7298_v40 = vsub.f32 %v15959_v42, %v7240_v22  ;;  %v16128_v52 = vpop.eup %9839  ;;  %9851 = vpow2.f32 %v7364_v26  ;;  %v16142_v49 = vsel %vm7183_vm5, %v16119_v4, -inf }
 0x810   : > { %v7350_v21 = vmul.f32 1.442695, %v7299_v10  ;;  %v16134_v23 = vpop.eup %9841  ;;  %9853 = vpow2.f32 %v7346_v50  ;;  %v7316_v42 = vmul.f32 1.442695, %v7282_v12  ;;  %v16159_v62 = vsel %vm7134_vm10, %v6834_v13, -inf }
 0x811   : > { %v16144_v22 = vpop.eup %9843  ;;  %20561 = vst [vmem:[#allocation365_spill] sm:$0xff] %v16159_v62  ;;  %9855 = vpow2.f32 %v7318_v27  ;;  %v7348_v26 = vmul.f32 1.442695, %v7298_v40  ;;  %v20563_v40 = vrot.slane %v15863_v37, 4 }
 0x812   : > { %v16161_v10 = vpop.eup %9845  ;;  %9857 = vpow2.f32 %v7350_v21  ;;  %v16173_v21 = vsel %vm7183_vm5, %v16149_v54, -inf }
 0x813   : > { %9768 = vrot.lane.b32.xlu2 %v9762_v46, %s10105_s12  ;;  %v16167_v47 = vpop.eup %9847  ;;  %9859 = vpow2.f32 %v7316_v42 }
 0x814   : > { %v16169_v27 = vpop.eup %9849  ;;  %9861 = vpow2.f32 %v7348_v26 }
 0x815   : > { %v16041_v44 = vpop.xlane.xlu2 %7266  ;;  %v16073_v57 = vpop.xlane.xlu1 %7215 }
 0x816   : > { %v7290_v50 = vsub.f32 %v15969_v35, %v16073_v57  ;;  %v7307_v12 = vsub.f32 %v15973_v39, %v16041_v44  ;;  %v16177_v35 = vsel %vm7183_vm5, %v16154_v25, -inf  ;;  %v16180_v44 = vpop.eup %9851  ;;  %v16192_v25 = vsel %vm7183_vm5, %v16159_v62, -inf }
 0x817   : > { %20562 = vst [vmem:[#allocation368_spill] sm:$0xff] %v16180_v44  ;;  %v16188_v2 = vpop.eup %9853 }
 0x818   : > { %v7332_v42 = vmul.f32 1.442695, %v7290_v50 }
 0x81a   : > { %9863 = vpow2.f32 %v7332_v42 }
 0x81b   : > { %9773 = vrot.lane.b32.xlu2 %v9762_v46, %s10104_s11  ;;  %v16097_v46 = vsel %vm7183_vm5, %v16078_v20, -inf }
 0x81d   : > { %v16093_v17 = vpop.permute.xlu2 %9718  ;;  %v7219_v33 = vpop.xlane.xlu1 %7218 }
 0x81e   : > { %v7291_v39 = vsub.f32 %v15981_v24, %v7219_v33  ;;  %v18590_v33 = vunpack.i.h.bf16 %v16093_v17  ;;  %v18592_v61 = vunpack.i.l.bf16 %v16093_v17 }
 0x820   : > { %v7334_v58 = vmul.f32 1.442695, %v7291_v39 }
 0x821   : > { %v9724_v63 = vpop.permute.xlu0 %9723 }
 0x822   : > { %v9726_v8 = vunpack.i.h.bf16 %v9724_v63  ;;  %v9725_v38 = vunpack.i.l.bf16 %v9724_v63  ;;  %v7113_v63 = vpop.f32.mrf.mxu2 }
 0x823   : > { %v16197_v24 = vsel %vm7134_vm10, %v7113_v63, -inf  ;;  %v20566_v63 = vrot.slane %v15861_v15, 4 }
 0x824   : > { %v6223_v53 = vrot.slane %v9726_v8, 4  ;;  %v6167_v7 = vrot.slane %v9725_v38, 4  ;;  %v6226_v57 = vsel %vm742_vm0, %v9726_v8, %v6225_v30  ;;  %20564 = vst [vmem:[#allocation406_spill] sm:$0xff] %v16197_v24  ;;  %v16201_v8 = vpop.eup %9855 }
 0x825   : > { %v9739_v9 = vpop.permute.xlu2 %9738  ;;  %v16208_v4 = vpop.eup %9857  ;;  %v16212_v26 = vperm.slane %v6226_v57, %v20343_v51  ;;  %v16231_v57 = vsel %vm7183_vm5, %v16197_v24, -inf }
 0x826   : > { %v9741_v13 = vunpack.i.h.bf16 %v9739_v9  ;;  %v9740_v3 = vunpack.i.l.bf16 %v9739_v9  ;;  %v6170_v9 = vsel %vm742_vm0, %v9725_v38, %v20563_v40  ;;  %v7366_v38 = vmul.f32 1.442695, %v7307_v12  ;;  %20565 = vst [vmem:[#allocation410_spill] sm:$0xff] %v16208_v4  ;;  %v16227_v39 = vpop.eup %9859 }
 0x827   : > { %v6224_v40 = vsel %vm742_vm0, %v6223_v53, %v15865_v34  ;;  %v6168_v62 = vsel %vm742_vm0, %v6167_v7, %v15863_v37  ;;  %v16215_v50 = vperm.slane %v6170_v9, %v20343_v51  ;;  %v20567_v53 = vrot.slane %v15859_v18, 4  ;;  %v16247_v9 = vpop.eup %9861 }
 0x828   : > { %v6111_v43 = vrot.slane %v9741_v13, 4  ;;  %v6055_v54 = vrot.slane %v9740_v3, 4  ;;  %v6114_v34 = vsel %vm742_vm0, %v9741_v13, %v20566_v63  ;;  %9865 = vpow2.f32 %v7366_v38  ;;  %v16265_v28 = vpop.eup %9863 }
 0x829   : > { %v16199_v30 = vpop.permute.xlu0 %9733  ;;  %v6058_v7 = vsel %vm742_vm0, %v9740_v3, %v20567_v53  ;;  %9867 = vpow2.f32 %v7334_v58  ;;  %v16256_v63 = vrot.slane %v18592_v61, 4  ;;  %20569 = vst [vmem:[#allocation237_spill] sm:$0xff] %v16265_v28 }
 0x82a   : > { %v6112_v12 = vsel %vm742_vm0, %v6111_v43, %v15861_v15  ;;  %v6056_v37 = vsel %vm742_vm0, %v6055_v54, %v15859_v18  ;;  %v16234_v43 = vperm.slane %v6224_v40, %v20343_v51  ;;  %v16237_v15 = vperm.slane %v6168_v62, %v20343_v51 }
 0x82b   : > { %v16241_v54 = vrot.slane %v18590_v33, 4  ;;  %v9736_v18 = vunpack.i.h.bf16 %v16199_v30  ;;  %v9735_v3 = vunpack.i.l.bf16 %v16199_v30  ;;  %v6118_v42 = vperm.slane %v6112_v12, %v20343_v51 }
 0x82c   : > { %v6122_v40 = vperm.slane %v6114_v34, %v20343_v51  ;;  %v6062_v62 = vperm.slane %v6056_v37, %v20343_v51  ;;  %v6066_v38 = vperm.slane %v6058_v7, %v20343_v51 }
 0x82d   : > { %v16245_v13 = vpop.permute.xlu2 %9748  ;;  %v6125_v58 = vrot.slane %v9736_v18, 4  ;;  %v6069_v33 = vrot.slane %v9735_v3, 4  ;;  %v6137_v30 = vrot.slane %v6118_v42, 4 }
 0x82e   : > { %20568 = vst [vmem:[#allocation337_spill] sm:$0xff] %v16245_v13  ;;  %v6149_v41 = vrot.slane %v6122_v40, 4  ;;  %v6081_v53 = vrot.slane %v6062_v62, 4  ;;  %v6093_v1 = vrot.slane %v6066_v38, 4  ;;  %v20570_v7 = vunpack.i.h.bf16 %v16245_v13 }
 0x82f   : > { %7245 = vmax.xlane.f32.xlu0 %v16084_v55 }
 0x830   : > { %7248 = vmax.xlane.f32.xlu1 %v16097_v46  ;;  %v16267_v46 = vpop.eup %9865  ;;  %v16273_v0 = vrot.slane %v20570_v7, 4 }
 0x831   : > { %v9744_v55 = vpop.permute.xlu0 %9743  ;;  %v16283_v44 = vpop.eup %9867 }
 0x832   : > { %v9746_v24 = vunpack.i.h.bf16 %v9744_v55  ;;  %v9745_v61 = vunpack.i.l.bf16 %v9744_v55  ;;  %20571 = vst [vmem:[#allocation343_spill] sm:$0xff] %v16273_v0  ;;  %v20572_v55 = vunpack.i.l.bf16 %v16245_v13 }
 0x833   : > { %20574 = vst [vmem:[#allocation255_spill] sm:$0xff] %v16283_v44 }
 0x834   : > { %v6123_v12 = vrot.slane %v9746_v24, 4  ;;  %v6067_v20 = vrot.slane %v9745_v61, 4  ;;  %v6070_v34 = vsel %vm742_vm0, %v9745_v61, %v6069_v33  ;;  %v6126_v37 = vsel %vm742_vm0, %v9746_v24, %v6125_v58 }
 0x835   : > { %v16277_v4 = vrot.slane %v20572_v55, 4  ;;  %v6078_v14 = vperm.slane %v6070_v34, %v20343_v51  ;;  %v6134_v56 = vperm.slane %v6126_v37, %v20343_v51  ;;  %v16281_v28 = vpop.permute.xlu1 %9728 }
 0x836   : > { %v6068_v33 = vsel %vm742_vm0, %v6067_v20, %v9735_v3  ;;  %v6124_v24 = vsel %vm742_vm0, %v6123_v12, %v9736_v18  ;;  %v9731_v61 = vunpack.i.h.bf16 %v16281_v28  ;;  %v9730_v7 = vunpack.i.l.bf16 %v16281_v28 }
 0x837   : > { %20573 = vst [vmem:[#allocation214_spill] sm:$0xff] %v16277_v4  ;;  %v6074_v58 = vperm.slane %v6068_v33, %v20343_v51  ;;  %v6091_v55 = vrot.slane %v6078_v14, 4  ;;  %v6094_v4 = vsel %vm742_vm0, %v6078_v14, %v6093_v1  ;;  %v6130_v34 = vperm.slane %v6124_v24, %v20343_v51  ;;  %7224 = vmax.xlane.f32.xlu0 %v16089_v60 }
 0x838   : > { %v6102_v37 = vperm.slane %v6094_v4, %v20360_v19  ;;  %v6147_v44 = vrot.slane %v6134_v56, 4  ;;  %v6150_v20 = vsel %vm742_vm0, %v6134_v56, %v6149_v41  ;;  %v6235_v3 = vrot.slane %v9731_v61, 4  ;;  %7203 = vmax.xlane.f32.xlu1 %v16138_v16 }
 0x839   : > { %v6079_v18 = vrot.slane %v6074_v58, 4  ;;  %v6082_v28 = vsel %vm742_vm0, %v6074_v58, %v6081_v53  ;;  %v6092_v12 = vsel %vm742_vm0, %v6091_v55, %v6066_v38  ;;  %v6135_v33 = vrot.slane %v6130_v34, 4 }
 0x83a   : > { %v6090_v14 = vperm.slane %v6082_v28, %v20360_v19  ;;  %v6098_v1 = vperm.slane %v6092_v12, %v20360_v19  ;;  %v6109_v24 = vrot.slane %v6102_v37, 4  ;;  %v6138_v60 = vsel %vm742_vm0, %v6130_v34, %v6137_v30 }
 0x83b   : > { %v6080_v4 = vsel %vm742_vm0, %v6079_v18, %v6062_v62  ;;  %v6136_v56 = vsel %vm742_vm0, %v6135_v33, %v6118_v42  ;;  %v6146_v41 = vperm.slane %v6138_v60, %v20360_v19  ;;  %v6148_v16 = vsel %vm742_vm0, %v6147_v44, %v6122_v40 }
 0x83c   : > { %v16306_v53 = vperm.slane %v6080_v4, %v20360_v19  ;;  %v16308_v38 = vrot.slane %v6090_v14, 4  ;;  %v6107_v58 = vrot.slane %v6098_v1, 4  ;;  %v16311_v55 = vsel %vm742_vm0, 0.0, %v6109_v24 }
 0x83d   : > { %v16314_v37 = vperm.slane %v6136_v56, %v20360_v19  ;;  %v6154_v62 = vperm.slane %v6148_v16, %v20360_v19  ;;  %v6158_v42 = vperm.slane %v6150_v20, %v20360_v19  ;;  %v16318_v30 = vrot.slane %v6146_v41, 4  ;;  %v16349_v16 = vpop.permute.xlu0 %9753 }
 0x83e   : > { %v16323_v40 = vsel %vm742_vm0, 0.0, %v16308_v38  ;;  %v16326_v34 = vsel %vm742_vm0, 0.0, %v6107_v58  ;;  %v6506_v18 = vsel %vm742_vm0, %v6109_v24, %v6098_v1  ;;  %v20576_v56 = vunpack.i.l.bf16 %v16093_v17 }
 0x83f   : > { %v16332_v12 = vsel %vm742_vm0, 0.0, %v16318_v30  ;;  %v6163_v20 = vrot.slane %v6154_v62, 4  ;;  %v6165_v33 = vrot.slane %v6158_v42, 4  ;;  %7206 = vmax.xlane.f32.xlu0 %v16192_v25  ;;  %v16337_v60 = vperm.slane %v6506_v18, %v20343_v51 }
 0x840   : > { %7275 = vmax.xlane.f32.xlu1 %v16142_v49  ;;  %v6179_v25 = vrot.slane %v9730_v7, 4  ;;  %v6182_v18 = vsel %vm742_vm0, %v9730_v7, %v16256_v63  ;;  %v20575_v49 = vunpack.i.h.bf16 %v16093_v17  ;;  %v9756_v63 = vunpack.i.h.bf16 %v16349_v16 }
 0x841   : > { %v16343_v1 = vsel %vm742_vm0, 0.0, %v6163_v20  ;;  %v16346_v24 = vsel %vm742_vm0, 0.0, %v6165_v33  ;;  %v6560_v41 = vsel %vm742_vm0, %v6165_v33, %v6154_v62  ;;  %v6190_v62 = vperm.slane %v6182_v18, %v20343_v51 }
 0x842   : > { %v16352_v58 = vperm.slane %v6560_v41, %v20343_v51  ;;  %v6236_v20 = vsel %vm742_vm0, %v6235_v3, %v20575_v49  ;;  %v6180_v4 = vsel %vm742_vm0, %v6179_v25, %v20576_v56  ;;  %v6238_v33 = vsel %vm742_vm0, %v9731_v61, %v16241_v54 }
 0x843   : > { %v6242_v41 = vperm.slane %v6236_v20, %v20343_v51  ;;  %v6186_v42 = vperm.slane %v6180_v4, %v20343_v51  ;;  %v6246_v14 = vperm.slane %v6238_v33, %v20343_v51  ;;  %v6203_v17 = vrot.slane %v6190_v62, 4 }
 0x844   : > { %7221 = vmax.xlane.f32.xlu2 %v16065_v5  ;;  %v20577_v3 = vrot.slane %v16215_v50, 4  ;;  %v20578_v54 = vrot.slane %v16234_v43, 4  ;;  %v20579_v4 = vrot.slane %v16237_v15, 4  ;;  %v5999_v13 = vrot.slane %v9756_v63, 4 }
 0x845   : > { %v6247_v25 = vrot.slane %v6242_v41, 4  ;;  %v6191_v18 = vrot.slane %v6186_v42, 4  ;;  %v6204_v28 = vsel %vm742_vm0, %v6203_v17, %v16215_v50 }
 0x846   : > { %v6206_v56 = vsel %vm742_vm0, %v6190_v62, %v20577_v3  ;;  %v6250_v61 = vsel %vm742_vm0, %v6242_v41, %v20578_v54  ;;  %v6194_v49 = vsel %vm742_vm0, %v6186_v42, %v20579_v4  ;;  %v6259_v3 = vrot.slane %v6246_v14, 4 }
 0x847   : > { %v6214_v20 = vperm.slane %v6206_v56, %v20360_v19  ;;  %v6258_v33 = vperm.slane %v6250_v61, %v20360_v19  ;;  %v6202_v5 = vperm.slane %v6194_v49, %v20360_v19  ;;  %v6248_v62 = vsel %vm742_vm0, %v6247_v25, %v16234_v43  ;;  %7251 = vmax.xlane.f32.xlu0 %v16132_v45 }
 0x848   : > { %v6192_v41 = vsel %vm742_vm0, %v6191_v18, %v16237_v15  ;;  %v6210_v42 = vperm.slane %v6204_v28, %v20360_v19  ;;  %v6254_v56 = vperm.slane %v6248_v62, %v20360_v19  ;;  %7254 = vmax.xlane.f32.xlu1 %v16177_v35  ;;  %v6260_v50 = vsel %vm742_vm0, %v6259_v3, %v16212_v26 }
 0x849   : > { %v6221_v54 = vrot.slane %v6214_v20, 4  ;;  %v6198_v61 = vperm.slane %v6192_v41, %v20360_v19  ;;  %v6217_v4 = vrot.slane %v6202_v5, 4  ;;  %v20580_v43 = vrot.slane %v16212_v26, 4 }
 0x84a   : > { %v6219_v17 = vrot.slane %v6210_v42, 4  ;;  %v6266_v28 = vperm.slane %v6260_v50, %v20360_v19  ;;  %v6271_v49 = vrot.slane %v6254_v56, 4  ;;  %v6273_v20 = vrot.slane %v6258_v33, 4 }
 0x84b   : > { %v6262_v45 = vsel %vm742_vm0, %v6246_v14, %v20580_v43  ;;  %v6222_v15 = vsel %vm742_vm0, 0.0, %v6221_v54  ;;  %v6215_v18 = vrot.slane %v6198_v61, 4  ;;  %v6218_v35 = vsel %vm742_vm0, 0.0, %v6217_v4 }
 0x84c   : > { %v6270_v25 = vperm.slane %v6262_v45, %v20360_v19  ;;  %v6220_v5 = vsel %vm742_vm0, 0.0, %v6219_v17  ;;  %v6275_v62 = vrot.slane %v6266_v28, 4  ;;  %v6603_v26 = vsel %vm742_vm0, %v6217_v4, %v6198_v61  ;;  %7278 = vmax.xlane.f32.xlu2 %v16231_v57 }
 0x84d   : > { %v6216_v14 = vsel %vm742_vm0, 0.0, %v6215_v18  ;;  %v6272_v41 = vsel %vm742_vm0, 0.0, %v6271_v49  ;;  %v6274_v50 = vsel %vm742_vm0, 0.0, %v6273_v20  ;;  %v6607_v43 = vperm.slane %v6603_v26, %v20343_v51 }
 0x84e   : > { %v6277_v3 = vrot.slane %v6270_v25, 4  ;;  %v6276_v45 = vsel %vm742_vm0, 0.0, %v6275_v62  ;;  %v6608_v44 = vrot.slane %v6218_v35, 4  ;;  %v6614_v17 = vsel %vm742_vm0, %v6221_v54, %v6210_v42 }
 0x84f   : > { %v6618_v25 = vperm.slane %v6614_v17, %v20343_v51  ;;  %v6619_v61 = vrot.slane %v6222_v15, 4  ;;  %v6657_v57 = vsel %vm742_vm0, %v6273_v20, %v6254_v56  ;;  %v6662_v4 = vrot.slane %v6274_v50, 4 }
 0x850   : > { %v6278_v33 = vsel %vm742_vm0, 0.0, %v6277_v3  ;;  %v6661_v18 = vperm.slane %v6657_v57, %v20343_v51  ;;  %v6668_v49 = vsel %vm742_vm0, %v6277_v3, %v6266_v28  ;;  %v20581_v35 = vrot.slane %v15857_v32, 4 }
 0x851   : > { %v6673_v7 = vrot.slane %v6278_v33, 4  ;;  %v6620_v26 = vsel %vm742_vm0, %v6619_v61, %v6220_v5  ;;  %v6639_v62 = vrot.slane %v6618_v25, 4  ;;  %v6672_v0 = vperm.slane %v6668_v49, %v20343_v51 }
 0x852   : > { %v6002_v42 = vsel %vm742_vm0, %v9756_v63, %v20581_v35  ;;  %v6624_v54 = vperm.slane %v6620_v26, %v20343_v51  ;;  %v6000_v15 = vsel %vm742_vm0, %v5999_v13, %v15857_v32  ;;  %v20582_v50 = vunpack.i.l.bf16 %v16349_v16 }
 0x853   : > { %v6674_v56 = vsel %vm742_vm0, %v6673_v7, %v6276_v45  ;;  %v16428_v28 = vperm.slane %v6002_v42, %v20343_v51  ;;  %v6693_v5 = vrot.slane %v6672_v0, 4  ;;  %v16432_v3 = vperm.slane %v6000_v15, %v20343_v51 }
 0x854   : > { %v6678_v20 = vperm.slane %v6674_v56, %v20343_v51  ;;  %v5943_v33 = vrot.slane %v20582_v50, 4  ;;  %v20583_v17 = vrot.slane %v15855_v36, 4  ;;  %v20584_v7 = vmov %v20582_v50 }
 0x855   : > { %v6037_v63 = vrot.slane %v16428_v28, 4  ;;  %v7379_v13 = vsel %vm7183_vm5, %v16144_v22, 0.0  ;;  %v7448_v45 = vsel %vm7183_vm5, %v16128_v52, 0.0  ;;  %v6025_v61 = vrot.slane %v16432_v3, 4 }
 0x856   : > { %v5946_v32 = vsel %vm742_vm0, %v20584_v7, %v20583_v17  ;;  %v5944_v57 = vsel %vm742_vm0, %v5943_v33, %v15855_v36  ;;  %7380 = vadd.xlane.f32.xlu0 %v7379_v13  ;;  %7449 = vadd.xlane.f32.xlu1 %v7448_v45  ;;  %v6609_v16 = vsel %vm742_vm0, %v6608_v44, %v6216_v14  ;;  %v6627_v42 = vrot.slane %v6607_v43, 4 }
 0x857   : > { %v16450_v49 = vperm.slane %v5946_v32, %v20343_v51  ;;  %v16454_v26 = vperm.slane %v5944_v57, %v20343_v51  ;;  %v6613_v35 = vperm.slane %v6609_v16, %v20343_v51  ;;  %v6640_v56 = vsel %vm742_vm0, %v6624_v54, %v6639_v62 }
 0x858   : > { %v6648_v50 = vperm.slane %v6640_v56, %v20360_v19  ;;  %v6663_v36 = vsel %vm742_vm0, %v6662_v4, %v6272_v41  ;;  %v6681_v33 = vrot.slane %v6661_v18, 4  ;;  %v6694_v14 = vsel %vm742_vm0, %v6678_v20, %v6693_v5 }
 0x859   : > { %v6628_v7 = vsel %vm742_vm0, %v6613_v35, %v6627_v42  ;;  %v6667_v44 = vperm.slane %v6663_v36, %v20343_v51  ;;  %v6702_v62 = vperm.slane %v6694_v14, %v20360_v19  ;;  %v6625_v45 = vrot.slane %v6613_v35, 4 }
 0x85a   : > { %v6636_v32 = vperm.slane %v6628_v7, %v20360_v19  ;;  %v6653_v13 = vrot.slane %v6648_v50, 4  ;;  %v6637_v16 = vrot.slane %v6624_v54, 4  ;;  %v6691_v41 = vrot.slane %v6678_v20, 4 }
 0x85b   : > { %v6682_v57 = vsel %vm742_vm0, %v6667_v44, %v6681_v33  ;;  %v6679_v56 = vrot.slane %v6667_v44, 4  ;;  %v6707_v42 = vrot.slane %v6702_v62, 4  ;;  %v6626_v36 = vsel %vm742_vm0, %v6625_v45, %v6607_v43 }
 0x85c   : > { %v6654_v4 = vsel %vm742_vm0, %v6653_v13, %v6636_v32  ;;  %v6690_v17 = vperm.slane %v6682_v57, %v20360_v19  ;;  %v6632_v5 = vperm.slane %v6626_v36, %v20360_v19  ;;  %v6638_v7 = vsel %vm742_vm0, %v6637_v16, %v6618_v25 }
 0x85d   : > { %v6733_v15 = vpack.c.bf16 %v6654_v4, %v6654_v4  ;;  %v6680_v14 = vsel %vm742_vm0, %v6679_v56, %v6661_v18  ;;  %v6644_v54 = vperm.slane %v6638_v7, %v20360_v19  ;;  %v6692_v33 = vsel %vm742_vm0, %v6691_v41, %v6672_v0 }
 0x85e   : > { %v6708_v35 = vsel %vm742_vm0, %v6707_v42, %v6690_v17  ;;  %v6686_v20 = vperm.slane %v6680_v14, %v20360_v19  ;;  %7227 = vmax.xlane.f32.xlu0 %v16125_v11  ;;  %v6651_v43 = vrot.slane %v6632_v5, 4  ;;  %v6698_v45 = vperm.slane %v6692_v33, %v20360_v19  ;;  %7230 = vmax.xlane.f32.xlu1 %v16173_v21 }
 0x85f   : > { %v6734_v44 = vpack.c.bf16 %v6708_v35, %v6708_v35  ;;  %v7772_v13 = vunpack.c.l.b16 %v6733_v15  ;;  %v6649_v25 = vrot.slane %v6644_v54, 4  ;;  %v6655_v18 = vrot.slane %v6636_v32, 4 }
 0x860   : > { %v6705_v57 = vrot.slane %v6686_v20, 4  ;;  %v6709_v16 = vrot.slane %v6690_v17, 4  ;;  %v6703_v4 = vrot.slane %v6698_v45, 4  ;;  %v7376_v42 = vsel %vm7183_vm5, %v16121_v29, 0.0 }
 0x861   : > { %v7773_v56 = vunpack.c.l.b16 %v6734_v44  ;;  %v6652_v0 = vsel %vm742_vm0, %v6644_v54, %v6651_v43  ;;  %v6650_v11 = vsel %vm742_vm0, %v6649_v25, %v6632_v5  ;;  %v6656_v15 = vsel %vm742_vm0, %v6648_v50, %v6655_v18  ;;  %7377 = vadd.xlane.f32.xlu2 %v7376_v42 }
 0x862   : > { %v6710_v41 = vsel %vm742_vm0, %v6702_v62, %v6709_v16  ;;  %v6706_v21 = vsel %vm742_vm0, %v6698_v45, %v6705_v57  ;;  %v6704_v32 = vsel %vm742_vm0, %v6703_v4, %v6686_v20  ;;  %v6717_v17 = vpack.c.bf16 %v6650_v11, %v6650_v11 }
 0x863   : > { %v7777_v36 = vpack.c.b16 %v7773_v56, %v7772_v13  ;;  %v6741_v7 = vpack.c.bf16 %v6656_v15, %v6656_v15  ;;  %v6718_v14 = vpack.c.bf16 %v6704_v32, %v6704_v32  ;;  %v6742_v35 = vpack.c.bf16 %v6710_v41, %v6710_v41 }
 0x864   : > { %v6725_v33 = vpack.c.bf16 %v6652_v0, %v6652_v0  ;;  %v6726_v44 = vpack.c.bf16 %v6706_v21, %v6706_v21  ;;  %v7602_v54 = vunpack.c.l.b16 %v6717_v17  ;;  %v20585_v5 = vrot.slane %v16306_v53, 4 }
 0x865   : > { %7798 = vmatpush.bf16.msra.mxu1 %v7777_v36  ;;  %v7857_v43 = vunpack.c.l.b16 %v6741_v7  ;;  %v20586_v62 = vrot.slane %v16314_v37, 4  ;;  %v7603_v13 = vunpack.c.l.b16 %v6718_v14  ;;  %v7858_v25 = vunpack.c.l.b16 %v6742_v35 }
 0x866   : > { %v6104_v50 = vsel %vm742_vm0, 0.0, %v20585_v5  ;;  %v7687_v20 = vunpack.c.l.b16 %v6725_v33  ;;  %v7688_v57 = vunpack.c.l.b16 %v6726_v44  ;;  %v6495_v18 = vsel %vm742_vm0, %v16308_v38, %v16306_v53  ;;  %v16507_v36 = vpop.xlane.xlu2 %7197 }
 0x867   : > { %v6160_v45 = vsel %vm742_vm0, 0.0, %v20586_v62  ;;  %v20587_v16 = vrot.slane %v16323_v40, 4  ;;  %v20588_v4 = vrot.slane %v16311_v55, 4  ;;  %v6531_v0 = vrot.slane %v16337_v60, 4 }
 0x868   : > { %v7607_v11 = vpack.c.b16 %v7603_v13, %v7602_v54  ;;  %v7862_v15 = vpack.c.b16 %v7858_v25, %v7857_v43  ;;  %v7692_v41 = vpack.c.b16 %v7688_v57, %v7687_v20  ;;  %v6499_v21 = vperm.slane %v6495_v18, %v20343_v51 }
 0x869   : > { %v6501_v56 = vsel %vm742_vm0, %v20587_v16, %v6104_v50  ;;  %v6512_v42 = vsel %vm742_vm0, %v20588_v4, %v16326_v34  ;;  %v6549_v40 = vsel %vm742_vm0, %v16318_v30, %v16314_v37  ;;  %v20589_v55 = vrot.slane %v16332_v12, 4 }
 0x86a   : > { %v6505_v53 = vperm.slane %v6501_v56, %v20343_v51  ;;  %v6516_v38 = vperm.slane %v6512_v42, %v20343_v51  ;;  %7628 = vmatpush.bf16.msrb.mxu3 %v7607_v11  ;;  %7883 = vmatpush.bf16.msra.mxu2 %v7862_v15  ;;  %v6519_v32 = vrot.slane %v6499_v21, 4  ;;  %v6553_v17 = vperm.slane %v6549_v40, %v20343_v51 }
 0x86b   : > { %v6555_v34 = vsel %vm742_vm0, %v20589_v55, %v6160_v45  ;;  %v20590_v14 = vrot.slane %v16346_v24, 4  ;;  %7713 = vmatpush.bf16.msra.mxu0 %v7692_v41  ;;  %v6585_v30 = vrot.slane %v16352_v58, 4 }
 0x86c   : > { %v6559_v7 = vperm.slane %v6555_v34, %v20343_v51  ;;  %v6532_v33 = vsel %vm742_vm0, %v6516_v38, %v6531_v0  ;;  %v6517_v12 = vrot.slane %v6505_v53, 4  ;;  %v6520_v44 = vsel %vm742_vm0, %v6505_v53, %v6519_v32 }
 0x86d   : > { %v6566_v35 = vsel %vm742_vm0, %v20590_v14, %v16343_v1  ;;  %v6540_v54 = vperm.slane %v6532_v33, %v20360_v19  ;;  %v6573_v43 = vrot.slane %v6553_v17, 4  ;;  %v6529_v5 = vrot.slane %v6516_v38, 4 }
 0x86e   : > { %v6570_v37 = vperm.slane %v6566_v35, %v20343_v51  ;;  %v6528_v50 = vperm.slane %v6520_v44, %v20360_v19  ;;  %v6518_v1 = vsel %vm742_vm0, %v6517_v12, %v6499_v21  ;;  %v6571_v62 = vrot.slane %v6559_v7, 4  ;;  %v7273_v34 = vpop.xlane.xlu2 %7272  ;;  %v7270_v35 = vpop.xlane.xlu0 %7269 }
 0x86f   : > { %v6545_v45 = vrot.slane %v6540_v54, 4  ;;  %v6574_v13 = vsel %vm742_vm0, %v6559_v7, %v6573_v43  ;;  %v6524_v20 = vperm.slane %v6518_v1, %v20360_v19  ;;  %v6530_v18 = vsel %vm742_vm0, %v6529_v5, %v16337_v60 }
 0x870   : > { %v6586_v24 = vsel %vm742_vm0, %v6570_v37, %v6585_v30  ;;  %v6582_v57 = vperm.slane %v6574_v13, %v20360_v19  ;;  %v6572_v16 = vsel %vm742_vm0, %v6571_v62, %v6553_v17  ;;  %v6583_v56 = vrot.slane %v6570_v37, 4 }
 0x871   : > { %v6594_v25 = vperm.slane %v6586_v24, %v20360_v19  ;;  %v6546_v4 = vsel %vm742_vm0, %v6545_v45, %v6528_v50  ;;  %v6536_v0 = vperm.slane %v6530_v18, %v20360_v19  ;;  %v6543_v11 = vrot.slane %v6524_v20, 4 }
 0x872   : > { %v6731_v15 = vpack.c.bf16 %v6546_v4, %v6546_v4  ;;  %v6578_v41 = vperm.slane %v6572_v16, %v20360_v19  ;;  %v6584_v21 = vsel %vm742_vm0, %v6583_v56, %v16352_v58  ;;  %v6547_v53 = vrot.slane %v6528_v50, 4  ;;  %v7201_v50 = vpop.xlane.xlu1 %7200 }
 0x873   : > { %v6599_v42 = vrot.slane %v6594_v25, 4  ;;  %v6541_v40 = vrot.slane %v6536_v0, 4  ;;  %v6590_v60 = vperm.slane %v6584_v21, %v20360_v19  ;;  %v6601_v55 = vrot.slane %v6582_v57, 4 }
 0x874   : > { %v7770_v17 = vunpack.c.l.b16 %v6731_v15  ;;  %v6597_v7 = vrot.slane %v6578_v41, 4  ;;  %v6548_v14 = vsel %vm742_vm0, %v6540_v54, %v6547_v53  ;;  %v6544_v5 = vsel %vm742_vm0, %v6536_v0, %v6543_v11 }
 0x875   : > { %v6600_v38 = vsel %vm742_vm0, %v6599_v42, %v6582_v57  ;;  %v6542_v33 = vsel %vm742_vm0, %v6541_v40, %v6524_v20  ;;  %v6595_v37 = vrot.slane %v6590_v60, 4  ;;  %v6602_v30 = vsel %vm742_vm0, %v6594_v25, %v6601_v55 }
 0x876   : > { %v6732_v32 = vpack.c.bf16 %v6600_v38, %v6600_v38  ;;  %v6739_v58 = vpack.c.bf16 %v6548_v14, %v6548_v14  ;;  %v6715_v44 = vpack.c.bf16 %v6542_v33, %v6542_v33  ;;  %v6740_v43 = vpack.c.bf16 %v6602_v30, %v6602_v30  ;;  %v9769_v14 = vpop.permute.xlu2 %9768 }
 0x877   : > { %v6596_v24 = vsel %vm742_vm0, %v6595_v37, %v6578_v41  ;;  %v6598_v62 = vsel %vm742_vm0, %v6590_v60, %v6597_v7  ;;  %v6723_v45 = vpack.c.bf16 %v6544_v5, %v6544_v5  ;;  %v7451_v25 = vsel %vm7183_vm5, %v16169_v27, 0.0  ;;  %v16567_v55 = vpop.permute.xlu0 %9763  ;;  %v20591_v37 = vld [vmem:[#allocation368_spill] sm:$0xff] }
 0x878   : > { %v7771_v12 = vunpack.c.l.b16 %v6732_v32  ;;  %v7855_v1 = vunpack.c.l.b16 %v6739_v58  ;;  %v6716_v13 = vpack.c.bf16 %v6596_v24, %v6596_v24  ;;  %v7600_v57 = vunpack.c.l.b16 %v6715_v44  ;;  %7452 = vadd.xlane.f32.xlu2 %v7451_v25 }
 0x879   : > { %v7856_v20 = vunpack.c.l.b16 %v6740_v43  ;;  %v6724_v18 = vpack.c.bf16 %v6598_v62, %v6598_v62  ;;  %v7685_v16 = vunpack.c.l.b16 %v6723_v45  ;;  %v7427_v56 = vsel %vm7183_vm5, %v16188_v2, 0.0  ;;  %v20593_v45 = vld [vmem:[#allocation203_spill] sm:$0xff] }
 0x87a   : > { %v7776_v54 = vpack.c.b16 %v7771_v12, %v7770_v17  ;;  %v7601_v4 = vunpack.c.l.b16 %v6716_v13  ;;  %v7285_v0 = vsub.f32 %v16002_v6, %v7201_v50  ;;  %v7400_v11 = vsel %vm7183_vm5, %v16161_v10, 0.0  ;;  %7428 = vadd.xlane.f32.xlu0 %v7427_v56  ;;  %v9759_v33 = vpop.permute.xlu1 %9758  ;;  %v20592_v50 = vld [vmem:[#allocation237_spill] sm:$0xff] }
 0x87b   : > { %v7861_v42 = vpack.c.b16 %v7856_v20, %v7855_v1  ;;  %v7686_v15 = vunpack.c.l.b16 %v6724_v18  ;;  %7401 = vadd.xlane.f32.xlu1 %v7400_v11  ;;  %v7308_v41 = vsub.f32 %v16009_v48, %v7270_v35  ;;  %v7424_v21 = vsel %vm7183_vm5, %v16134_v23, 0.0  ;;  %v20595_v18 = vld [vmem:[#allocation403_spill] sm:$0xff] }
 0x87c   : > { %7799 = vmatpush.bf16.msra.mxu1 %v7776_v54  ;;  %v7284_v53 = vsub.f32 %v16014_v31, %v16507_v36  ;;  %v7606_v38 = vpack.c.b16 %v7601_v4, %v7600_v57  ;;  %v7322_v40 = vmul.f32 1.442695, %v7285_v0  ;;  %v7382_v6 = vsel %vm7183_vm5, %v16227_v39, 0.0  ;;  %v20597_v4 = vld [vmem:[#allocation343_spill] sm:$0xff] }
 0x87d   : > { %7884 = vmatpush.bf16.msra.mxu2 %v7861_v42  ;;  %v7385_v60 = vsel %vm7183_vm5, %v16201_v8, 0.0  ;;  %v7691_v32 = vpack.c.b16 %v7686_v15, %v7685_v16  ;;  %v7368_v17 = vmul.f32 1.442695, %v7308_v41  ;;  %v7403_v7 = vsel %vm7183_vm5, %v16167_v47, 0.0 }
 0x87e   : > { %v7320_v48 = vmul.f32 1.442695, %v7284_v53  ;;  %7629 = vmatpush.bf16.msrb.mxu3 %v7606_v38  ;;  %9869 = vpow2.f32 %v7322_v40  ;;  %v7309_v31 = vsub.f32 %v16023_v59, %v7273_v34  ;;  %v7457_v36 = vsel %vm7183_vm5, %v16267_v46, 0.0 }
 0x87f   : > { %v7430_v35 = vsel %vm7183_vm5, %v16247_v9, 0.0  ;;  %7714 = vmatpush.bf16.msra.mxu0 %v7691_v32  ;;  %9871 = vpow2.f32 %v7368_v17  ;;  %v16578_v30 = vsel %vm7183_vm5, %v20591_v37, 0.0  ;;  %v9766_v58 = vunpack.i.h.bf16 %v16567_v55 }
 0x880   : > { %v9765_v12 = vunpack.i.l.bf16 %v16567_v55  ;;  %9873 = vpow2.f32 %v7320_v48  ;;  %v7370_v44 = vmul.f32 1.442695, %v7309_v31  ;;  %v9771_v59 = vunpack.i.h.bf16 %v9769_v14  ;;  %7425 = vadd.xlane.f32.xlu2 %v7424_v21 }
 0x881   : > { %v9770_v34 = vunpack.i.l.bf16 %v9769_v14  ;;  %v16584_v43 = vrot.slane %v9766_v58, 4  ;;  %v16592_v24 = vsel %vm7183_vm5, %v20592_v50, 0.0  ;;  %v9761_v1 = vunpack.i.h.bf16 %v9759_v33 }
 0x882   : > { %v16588_v5 = vrot.slane %v9765_v12, 4  ;;  %9875 = vpow2.f32 %v7370_v44  ;;  %v5887_v62 = vrot.slane %v9771_v59, 4  ;;  %v20594_v54 = vrot.slane %v20593_v45, 4  ;;  %7383 = vadd.xlane.f32.xlu0 %v7382_v6 }
 0x883   : > { %v5831_v57 = vrot.slane %v9770_v34, 4  ;;  %7386 = vadd.xlane.f32.xlu1 %v7385_v60  ;;  %v20596_v16 = vrot.slane %v20595_v18, 4  ;;  %v6011_v56 = vrot.slane %v9761_v1, 4  ;;  %v6014_v42 = vsel %vm742_vm0, %v9761_v1, %v20597_v4  ;;  %v20598_v60 = vld [vmem:[#allocation337_spill] sm:$0xff] }
 0x884   : > { %v5890_v13 = vsel %vm742_vm0, %v9771_v59, %v20594_v54  ;;  %v16605_v0 = vpop.eup %9869  ;;  %v5888_v11 = vsel %vm742_vm0, %v5887_v62, %v20593_v45  ;;  %v6022_v21 = vperm.slane %v6014_v42, %v20343_v51  ;;  %v20599_v32 = vunpack.i.h.bf16 %v20598_v60  ;;  %v16637_v54 = vpop.permute.xlu2 %9773 }
 0x885   : > { %v16598_v20 = vperm.slane %v5890_v13, %v20343_v51  ;;  %v5834_v25 = vsel %vm742_vm0, %v9770_v34, %v20596_v16  ;;  %v5832_v15 = vsel %vm742_vm0, %v5831_v57, %v20595_v18  ;;  %v16615_v53 = vpop.eup %9871  ;;  %v16618_v38 = vperm.slane %v5888_v11, %v20343_v51 }
 0x886   : > { %v16612_v41 = vperm.slane %v5834_v25, %v20343_v51  ;;  %v16622_v6 = vperm.slane %v5832_v15, %v20343_v51  ;;  %v6012_v17 = vsel %vm742_vm0, %v6011_v56, %v20599_v32  ;;  %v16627_v48 = vpop.eup %9873  ;;  %v6035_v44 = vrot.slane %v6022_v21, 4  ;;  %v20601_v15 = vld [vmem:[#allocation214_spill] sm:$0xff] }
 0x887   : > { %v5925_v40 = vrot.slane %v16598_v20, 4  ;;  %v6018_v31 = vperm.slane %v6012_v17, %v20343_v51  ;;  %v6038_v59 = vsel %vm742_vm0, %v6022_v21, %v6037_v63  ;;  %v5913_v34 = vrot.slane %v16618_v38, 4  ;;  %v20600_v63 = vld [vmem:[#allocation255_spill] sm:$0xff] }
 0x888   : > { %v5869_v14 = vrot.slane %v16612_v41, 4  ;;  %v5857_v1 = vrot.slane %v16622_v6, 4  ;;  %v6046_v62 = vperm.slane %v6038_v59, %v20360_v19  ;;  %v9760_v45 = vunpack.i.l.bf16 %v9759_v33  ;;  %v16639_v13 = vpop.eup %9875  ;;  %7404 = vadd.xlane.f32.xlu2 %v7403_v7 }
 0x889   : > { %v6023_v57 = vrot.slane %v6018_v31, 4  ;;  %v6026_v18 = vsel %vm742_vm0, %v6018_v31, %v6025_v61  ;;  %v6036_v16 = vsel %vm742_vm0, %v6035_v44, %v16428_v28  ;;  %v7409_v25 = vsel %vm7183_vm5, %v20600_v63, 0.0  ;;  %v20602_v61 = vld [vmem:[#allocation410_spill] sm:$0xff] }
 0x88a   : > { %v6034_v56 = vperm.slane %v6026_v18, %v20360_v19  ;;  %v6042_v4 = vperm.slane %v6036_v16, %v20360_v19  ;;  %v6053_v33 = vrot.slane %v6046_v62, 4  ;;  %v5955_v42 = vrot.slane %v9760_v45, 4  ;;  %7458 = vadd.xlane.f32.xlu0 %v7457_v36 }
 0x88b   : > { %v6024_v11 = vsel %vm742_vm0, %v6023_v57, %v16432_v3  ;;  %v5958_v21 = vsel %vm742_vm0, %v9760_v45, %v20601_v15  ;;  %v16656_v32 = vsel %vm7183_vm5, %v20602_v61, 0.0  ;;  %v9776_v28 = vunpack.i.h.bf16 %v16637_v54  ;;  %7431 = vadd.xlane.f32.xlu1 %v7430_v35 }
 0x88c   : > { %v16660_v17 = vperm.slane %v6024_v11, %v20360_v19  ;;  %v16662_v31 = vrot.slane %v6034_v56, 4  ;;  %v6051_v7 = vrot.slane %v6042_v4, 4  ;;  %v16665_v44 = vsel %vm742_vm0, 0.0, %v6053_v33 }
 0x88d   : > { %v6452_v3 = vsel %vm742_vm0, %v6053_v33, %v6042_v4  ;;  %v20603_v62 = vunpack.i.l.bf16 %v20598_v60  ;;  %v5966_v36 = vperm.slane %v5958_v21, %v20343_v51  ;;  %v20604_v33 = vrot.slane %v16450_v49, 4 }
 0x88e   : > { %v6047_v35 = vrot.slane %v16660_v17, 4  ;;  %v16676_v57 = vsel %vm742_vm0, 0.0, %v16662_v31  ;;  %v16679_v18 = vsel %vm742_vm0, 0.0, %v6051_v7  ;;  %v16682_v16 = vperm.slane %v6452_v3, %v20343_v51 }
 0x88f   : > { %v5956_v45 = vsel %vm742_vm0, %v5955_v42, %v20603_v62  ;;  %v5979_v4 = vrot.slane %v5966_v36, 4  ;;  %v5982_v42 = vsel %vm742_vm0, %v5966_v36, %v20604_v33  ;;  %v5899_v15 = vrot.slane %v9776_v28, 4 }
 0x890   : > { %v5962_v60 = vperm.slane %v5956_v45, %v20343_v51  ;;  %v5990_v11 = vperm.slane %v5982_v42, %v20360_v19  ;;  %v5902_v21 = vsel %vm742_vm0, %v9776_v28, %v16584_v43  ;;  %v9775_v7 = vunpack.i.l.bf16 %v16637_v54  ;;  %7455 = vadd.xlane.f32.xlu2 %v16578_v30 }
 0x891   : > { %v20605_v3 = vrot.slane %v16454_v26, 4  ;;  %v5980_v45 = vsel %vm742_vm0, %v5979_v4, %v16450_v49  ;;  %v5910_v56 = vperm.slane %v5902_v21, %v20343_v51  ;;  %v5900_v43 = vsel %vm742_vm0, %v5899_v15, %v9766_v58 }
 0x892   : > { %v5967_v62 = vrot.slane %v5962_v60, 4  ;;  %v5986_v33 = vperm.slane %v5980_v45, %v20360_v19  ;;  %v5997_v42 = vrot.slane %v5990_v11, 4  ;;  %v5906_v28 = vperm.slane %v5900_v43, %v20343_v51  ;;  %7407 = vadd.xlane.f32.xlu0 %v16592_v24 }
 0x893   : > { %v5970_v59 = vsel %vm742_vm0, %v5962_v60, %v20605_v3  ;;  %v5923_v60 = vrot.slane %v5910_v56, 4  ;;  %v5843_v49 = vrot.slane %v9775_v7, 4  ;;  %7410 = vadd.xlane.f32.xlu1 %v7409_v25 }
 0x894   : > { %v5978_v36 = vperm.slane %v5970_v59, %v20360_v19  ;;  %v5968_v54 = vsel %vm742_vm0, %v5967_v62, %v16454_v26  ;;  %v5995_v11 = vrot.slane %v5986_v33, 4  ;;  %v16715_v21 = vsel %vm742_vm0, 0.0, %v5997_v42 }
 0x895   : > { %v16710_v59 = vperm.slane %v5968_v54, %v20360_v19  ;;  %v6398_v30 = vsel %vm742_vm0, %v5997_v42, %v5986_v33  ;;  %v6403_v26 = vrot.slane %v16715_v21, 4  ;;  %v5911_v58 = vrot.slane %v5906_v28, 4 }
 0x896   : > { %v16712_v4 = vrot.slane %v5978_v36, 4  ;;  %v5844_v15 = vsel %vm742_vm0, %v5843_v49, %v9765_v12  ;;  %v5996_v3 = vsel %vm742_vm0, 0.0, %v5995_v11  ;;  %v16727_v45 = vperm.slane %v6398_v30, %v20343_v51 }
 0x897   : > { %v5991_v24 = vrot.slane %v16710_v59, 4  ;;  %v5846_v36 = vsel %vm742_vm0, %v9775_v7, %v16588_v5  ;;  %v5850_v33 = vperm.slane %v5844_v15, %v20343_v51  ;;  %v5912_v55 = vsel %vm742_vm0, %v5911_v58, %v16618_v38 }
 0x898   : > { %v5994_v62 = vsel %vm742_vm0, 0.0, %v16712_v4  ;;  %v5854_v12 = vperm.slane %v5846_v36, %v20343_v51  ;;  %v5914_v42 = vsel %vm742_vm0, %v5906_v28, %v5913_v34  ;;  %v16739_v43 = vperm.slane %v5912_v55, %v20360_v19  ;;  %7434 = vadd.xlane.f32.xlu2 %v16656_v32 }
 0x899   : > { %v6392_v25 = vrot.slane %v5994_v62, 4  ;;  %v5924_v54 = vsel %vm742_vm0, %v5923_v60, %v16598_v20  ;;  %v5855_v49 = vrot.slane %v5850_v33, 4  ;;  %v5858_v5 = vsel %vm742_vm0, %v5850_v33, %v5857_v1 }
 0x89a   : > { %v5922_v7 = vperm.slane %v5914_v42, %v20360_v19  ;;  %v5926_v11 = vsel %vm742_vm0, %v5910_v56, %v5925_v40  ;;  %v5866_v38 = vperm.slane %v5858_v5, %v20360_v19  ;;  %v5867_v34 = vrot.slane %v5854_v12, 4 }
 0x89b   : > { %v5870_v28 = vsel %vm742_vm0, %v5854_v12, %v5869_v14  ;;  %v5930_v60 = vperm.slane %v5924_v54, %v20360_v19  ;;  %v5856_v1 = vsel %vm742_vm0, %v5855_v49, %v16622_v6  ;;  %v5934_v20 = vperm.slane %v5926_v11, %v20360_v19 }
 0x89c   : > { %v5878_v30 = vperm.slane %v5870_v28, %v20360_v19  ;;  %v16762_v56 = vperm.slane %v5856_v1, %v20360_v19  ;;  %v5868_v58 = vsel %vm742_vm0, %v5867_v34, %v16612_v41  ;;  %v16766_v14 = vrot.slane %v5866_v38, 4 }
 0x89d   : > { %v16768_v15 = vrot.slane %v5922_v7, 4  ;;  %v5874_v32 = vperm.slane %v5868_v58, %v20360_v19  ;;  %v5939_v6 = vrot.slane %v5930_v60, 4  ;;  %v5941_v36 = vrot.slane %v5934_v20, 4 }
 0x89e   : > { %v5885_v62 = vrot.slane %v5878_v30, 4  ;;  %v5879_v33 = vrot.slane %v16762_v56, 4  ;;  %v16774_v55 = vsel %vm742_vm0, 0.0, %v16766_v14  ;;  %v7391_v41 = vsel %vm7183_vm5, %v16605_v0, 0.0 }
 0x89f   : > { %v16778_v12 = vsel %vm742_vm0, 0.0, %v16768_v15  ;;  %v5883_v42 = vrot.slane %v5874_v32, 4  ;;  %v16786_v49 = vsel %vm742_vm0, 0.0, %v5939_v6  ;;  %v16789_v5 = vsel %vm742_vm0, 0.0, %v5941_v36  ;;  %7392 = vadd.xlane.f32.xlu0 %v7391_v41 }
 0x8a0   : > { %v16783_v54 = vsel %vm742_vm0, 0.0, %v5885_v62  ;;  %v6290_v11 = vsel %vm742_vm0, %v5885_v62, %v5874_v32  ;;  %v6344_v30 = vsel %vm742_vm0, %v5941_v36, %v5930_v60  ;;  %v7460_v32 = vsel %vm7183_vm5, %v16615_v53, 0.0 }
 0x8a1   : > { %v16796_v28 = vsel %vm742_vm0, 0.0, %v5883_v42  ;;  %v16799_v1 = vperm.slane %v6290_v11, %v20343_v51  ;;  %v16804_v58 = vperm.slane %v6344_v30, %v20343_v51  ;;  %v7388_v62 = vsel %vm7183_vm5, %v16627_v48, 0.0  ;;  %7461 = vadd.xlane.f32.xlu1 %v7460_v32 }
 0x8a2   : > { %v7463_v6 = vsel %vm7183_vm5, %v16639_v13, 0.0  ;;  %7389 = vadd.xlane.f32.xlu2 %v7388_v62  ;;  %v5992_v41 = vsel %vm742_vm0, 0.0, %v5991_v24  ;;  %v6048_v60 = vsel %vm742_vm0, 0.0, %v6047_v35  ;;  %v6387_v36 = vsel %vm742_vm0, %v16712_v4, %v16710_v59 }
 0x8a3   : > { %v6404_v42 = vsel %vm742_vm0, %v6403_v26, %v5996_v3  ;;  %v6391_v11 = vperm.slane %v6387_v36, %v20343_v51  ;;  %v6393_v30 = vsel %vm742_vm0, %v6392_v25, %v5992_v41  ;;  %v6423_v24 = vrot.slane %v16727_v45, 4 }
 0x8a4   : > { %v6408_v32 = vperm.slane %v6404_v42, %v20343_v51  ;;  %v6397_v62 = vperm.slane %v6393_v30, %v20343_v51  ;;  %v6441_v35 = vsel %vm742_vm0, %v16662_v31, %v16660_v17  ;;  %v20606_v59 = vrot.slane %v16676_v57, 4 }
 0x8a5   : > { %v20607_v21 = vrot.slane %v16665_v44, 4  ;;  %v6411_v3 = vrot.slane %v6391_v11, 4  ;;  %v6445_v41 = vperm.slane %v6441_v35, %v20343_v51  ;;  %v6477_v31 = vrot.slane %v16682_v16, 4 }
 0x8a6   : > { %v6447_v4 = vsel %vm742_vm0, %v20606_v59, %v6048_v60  ;;  %v6424_v25 = vsel %vm742_vm0, %v6408_v32, %v6423_v24  ;;  %v6409_v57 = vrot.slane %v6397_v62, 4  ;;  %v6421_v44 = vrot.slane %v6408_v32, 4 }
 0x8a7   : > { %v6458_v26 = vsel %vm742_vm0, %v20607_v21, %v16679_v18  ;;  %v6451_v36 = vperm.slane %v6447_v4, %v20343_v51  ;;  %v6432_v42 = vperm.slane %v6424_v25, %v20360_v19  ;;  %v6412_v60 = vsel %vm742_vm0, %v6397_v62, %v6411_v3 }
 0x8a8   : > { %v6462_v17 = vperm.slane %v6458_v26, %v20343_v51  ;;  %v6465_v30 = vrot.slane %v6445_v41, 4  ;;  %v6420_v18 = vperm.slane %v6412_v60, %v20360_v19  ;;  %v6410_v35 = vsel %vm742_vm0, %v6409_v57, %v6391_v11 }
 0x8a9   : > { %v6463_v59 = vrot.slane %v6451_v36, 4  ;;  %v6437_v21 = vrot.slane %v6432_v42, 4  ;;  %v6416_v26 = vperm.slane %v6410_v35, %v20360_v19  ;;  %v6422_v20 = vsel %vm742_vm0, %v6421_v44, %v16727_v45 }
 0x8aa   : > { %v6478_v24 = vsel %vm742_vm0, %v6462_v17, %v6477_v31  ;;  %v6466_v4 = vsel %vm742_vm0, %v6451_v36, %v6465_v30  ;;  %7464 = vadd.xlane.f32.xlu2 %v7463_v6  ;;  %v6428_v3 = vperm.slane %v6422_v20, %v20360_v19  ;;  %v16857_v30 = vpop.xlane.xlu0 %7245  ;;  %v6475_v45 = vrot.slane %v6462_v17, 4 }
 0x8ab   : > { %v6486_v25 = vperm.slane %v6478_v24, %v20360_v19  ;;  %v6438_v32 = vsel %vm742_vm0, %v6437_v21, %v6420_v18  ;;  %v6474_v62 = vperm.slane %v6466_v4, %v20360_v19  ;;  %v6464_v31 = vsel %vm742_vm0, %v6463_v59, %v6445_v41  ;;  %v16859_v24 = vpop.xlane.xlu1 %7248 }
 0x8ac   : > { %v6729_v11 = vpack.c.bf16 %v6438_v32, %v6438_v32  ;;  %v6435_v57 = vrot.slane %v6416_v26, 4  ;;  %v6470_v36 = vperm.slane %v6464_v31, %v20360_v19  ;;  %v6433_v35 = vrot.slane %v6428_v3, 4 }
 0x8ad   : > { %v6491_v60 = vrot.slane %v6486_v25, 4  ;;  %v6439_v6 = vrot.slane %v6420_v18, 4  ;;  %v6493_v44 = vrot.slane %v6474_v62, 4  ;;  %v6476_v32 = vsel %vm742_vm0, %v6475_v45, %v16682_v16 }
 0x8ae   : > { %v7768_v4 = vunpack.c.l.b16 %v6729_v11  ;;  %v6489_v34 = vrot.slane %v6470_v36, 4  ;;  %v6436_v20 = vsel %vm742_vm0, %v6428_v3, %v6435_v57  ;;  %v6434_v59 = vsel %vm742_vm0, %v6433_v35, %v6416_v26 }
 0x8af   : > { %v6492_v21 = vsel %vm742_vm0, %v6491_v60, %v6474_v62  ;;  %v6440_v31 = vsel %vm742_vm0, %v6432_v42, %v6439_v6  ;;  %v6482_v38 = vperm.slane %v6476_v32, %v20360_v19  ;;  %v6713_v7 = vpack.c.bf16 %v6434_v59, %v6434_v59 }
 0x8b0   : > { %v6730_v41 = vpack.c.bf16 %v6492_v21, %v6492_v21  ;;  %v6494_v17 = vsel %vm742_vm0, %v6486_v25, %v6493_v44  ;;  %v6737_v18 = vpack.c.bf16 %v6440_v31, %v6440_v31  ;;  %v6721_v60 = vpack.c.bf16 %v6436_v20, %v6436_v20 }
 0x8b1   : > { %v6738_v62 = vpack.c.bf16 %v6494_v17, %v6494_v17  ;;  %v5880_v3 = vsel %vm742_vm0, 0.0, %v5879_v33  ;;  %v6487_v11 = vrot.slane %v6482_v38, 4  ;;  %v7598_v26 = vunpack.c.l.b16 %v6713_v7 }
 0x8b2   : > { %v7769_v40 = vunpack.c.l.b16 %v6730_v41  ;;  %v7853_v57 = vunpack.c.l.b16 %v6737_v18  ;;  %v6490_v16 = vsel %vm742_vm0, %v6482_v38, %v6489_v34  ;;  %v7683_v6 = vunpack.c.l.b16 %v6721_v60  ;;  %v16883_v41 = vpop.xlane.xlu0 %7224 }
 0x8b3   : > { %v7854_v42 = vunpack.c.l.b16 %v6738_v62  ;;  %v6722_v45 = vpack.c.bf16 %v6490_v16, %v6490_v16  ;;  %v6488_v21 = vsel %vm742_vm0, %v6487_v11, %v6470_v36  ;;  %v20608_v25 = vrot.slane %v16739_v43, 4 }
 0x8b4   : > { %v7775_v35 = vpack.c.b16 %v7769_v40, %v7768_v4  ;;  %v6279_v20 = vsel %vm742_vm0, %v16766_v14, %v16762_v56  ;;  %v20609_v33 = vrot.slane %v16774_v55, 4  ;;  %v16885_v40 = vpop.xlane.xlu1 %7203  ;;  %v6714_v38 = vpack.c.bf16 %v6488_v21, %v6488_v21 }
 0x8b5   : > { %v5936_v44 = vsel %vm742_vm0, 0.0, %v20608_v25  ;;  %v7860_v34 = vpack.c.b16 %v7854_v42, %v7853_v57  ;;  %v7684_v36 = vunpack.c.l.b16 %v6722_v45  ;;  %v6283_v4 = vperm.slane %v6279_v20, %v20343_v51 }
 0x8b6   : > { %v6285_v7 = vsel %vm742_vm0, %v20609_v33, %v5880_v3  ;;  %7800 = vmatpush.bf16.msra.mxu1 %v7775_v35  ;;  %v20610_v32 = vrot.slane %v16783_v54, 4  ;;  %v6315_v14 = vrot.slane %v16799_v1, 4  ;;  %v6333_v55 = vsel %vm742_vm0, %v16768_v15, %v16739_v43 }
 0x8b7   : > { %v6289_v59 = vperm.slane %v6285_v7, %v20343_v51  ;;  %v7599_v31 = vunpack.c.l.b16 %v6714_v38  ;;  %7885 = vmatpush.bf16.msra.mxu2 %v7860_v34  ;;  %v7690_v17 = vpack.c.b16 %v7684_v36, %v7683_v6  ;;  %v6303_v62 = vrot.slane %v6283_v4, 4 }
 0x8b8   : > { %v6296_v56 = vsel %vm742_vm0, %v20610_v32, %v16796_v28  ;;  %v6337_v60 = vperm.slane %v6333_v55, %v20343_v51  ;;  %v20611_v3 = vrot.slane %v16778_v12, 4  ;;  %v20612_v28 = vrot.slane %v16789_v5, 4 }
 0x8b9   : > { %v6300_v18 = vperm.slane %v6296_v56, %v20343_v51  ;;  %v6369_v57 = vrot.slane %v16804_v58, 4  ;;  %v7605_v43 = vpack.c.b16 %v7599_v31, %v7598_v26  ;;  %7715 = vmatpush.bf16.msra.mxu0 %v7690_v17  ;;  %v6304_v15 = vsel %vm742_vm0, %v6289_v59, %v6303_v62  ;;  %v20613_v26 = vld [vmem:[#allocation182_spill] sm:$0xff] }
 0x8ba   : > { %v6339_v54 = vsel %vm742_vm0, %v20611_v3, %v5936_v44  ;;  %v6350_v11 = vsel %vm742_vm0, %v20612_v28, %v16786_v49  ;;  %v6312_v42 = vperm.slane %v6304_v15, %v20360_v19  ;;  %v6357_v6 = vrot.slane %v6337_v60, 4  ;;  %v16917_v38 = vpop.xlane.xlu0 %7206 }
 0x8bb   : > { %v6316_v16 = vsel %vm742_vm0, %v6300_v18, %v6315_v14  ;;  %v6343_v35 = vperm.slane %v6339_v54, %v20343_v51  ;;  %v6354_v45 = vperm.slane %v6350_v11, %v20343_v51  ;;  %7630 = vmatpush.bf16.msrb.mxu3 %v7605_v43  ;;  %v6301_v5 = vrot.slane %v6289_v59, 4 }
 0x8bc   : > { %v6324_v12 = vperm.slane %v6316_v16, %v20360_v19  ;;  %v6313_v49 = vrot.slane %v6300_v18, 4  ;;  %v7300_v25 = vsub.f32 %v20613_v26, %v16857_v30  ;;  %v16924_v56 = vpop.xlane.xlu1 %7275  ;;  %v6331_v28 = vrot.slane %v6312_v42, 4 }
 0x8bd   : > { %v6355_v21 = vrot.slane %v6343_v35, 4  ;;  %v6358_v20 = vsel %vm742_vm0, %v6343_v35, %v6357_v6  ;;  %v6370_v33 = vsel %vm742_vm0, %v6354_v45, %v6369_v57  ;;  %v6367_v7 = vrot.slane %v6354_v45, 4  ;;  %v7222_v6 = vpop.xlane.xlu2 %7221 }
 0x8be   : > { %v6329_v44 = vrot.slane %v6324_v12, 4  ;;  %v6366_v34 = vperm.slane %v6358_v20, %v20360_v19  ;;  %v6378_v36 = vperm.slane %v6370_v33, %v20360_v19  ;;  %v6302_v32 = vsel %vm742_vm0, %v6301_v5, %v6283_v4 }
 0x8bf   : > { %v6314_v59 = vsel %vm742_vm0, %v6313_v49, %v16799_v1  ;;  %v6308_v14 = vperm.slane %v6302_v32, %v20360_v19  ;;  %v6356_v31 = vsel %vm742_vm0, %v6355_v21, %v6337_v60  ;;  %v6368_v4 = vsel %vm742_vm0, %v6367_v7, %v16804_v58 }
 0x8c0   : > { %v6330_v30 = vsel %vm742_vm0, %v6329_v44, %v6312_v42  ;;  %v6320_v55 = vperm.slane %v6314_v59, %v20360_v19  ;;  %v6383_v17 = vrot.slane %v6378_v36, 4  ;;  %v6362_v62 = vperm.slane %v6356_v31, %v20360_v19 }
 0x8c1   : > { %v6727_v18 = vpack.c.bf16 %v6330_v30, %v6330_v30  ;;  %v6327_v54 = vrot.slane %v6308_v14, 4  ;;  %v6374_v1 = vperm.slane %v6368_v4, %v20360_v19  ;;  %v6385_v15 = vrot.slane %v6366_v34, 4 }
 0x8c2   : > { %v6325_v3 = vrot.slane %v6320_v55, 4  ;;  %v6384_v11 = vsel %vm742_vm0, %v6383_v17, %v6366_v34  ;;  %v6381_v43 = vrot.slane %v6362_v62, 4  ;;  %v6332_v45 = vsel %vm742_vm0, %v6324_v12, %v6331_v28  ;;  %v16941_v33 = vpop.xlane.xlu0 %7251  ;;  %v20616_v28 = vld [vmem:[#allocation333_spill] sm:$0xff] }
 0x8c3   : > { %v7766_v57 = vunpack.c.l.b16 %v6727_v18  ;;  %v6728_v16 = vpack.c.bf16 %v6384_v11, %v6384_v11  ;;  %v6379_v35 = vrot.slane %v6374_v1, 4  ;;  %v6386_v58 = vsel %vm742_vm0, %v6378_v36, %v6385_v15 }
 0x8c4   : > { %v6326_v60 = vsel %vm742_vm0, %v6325_v3, %v6308_v14  ;;  %v6735_v49 = vpack.c.bf16 %v6332_v45, %v6332_v45  ;;  %v6328_v21 = vsel %vm742_vm0, %v6320_v55, %v6327_v54  ;;  %v6736_v44 = vpack.c.bf16 %v6386_v58, %v6386_v58  ;;  %v20614_v55 = vld [vmem:[#allocation204_spill] sm:$0xff]  ;;  %v7255_v3 = vpop.xlane.xlu1 %7254 }
 0x8c5   : > { %v6711_v5 = vpack.c.bf16 %v6326_v60, %v6326_v60  ;;  %v7767_v26 = vunpack.c.l.b16 %v6728_v16  ;;  %v6380_v42 = vsel %vm742_vm0, %v6379_v35, %v6362_v62  ;;  %v6382_v20 = vsel %vm742_vm0, %v6374_v1, %v6381_v43  ;;  %v20615_v62 = vld [vmem:[#allocation302_spill] sm:$0xff]  ;;  %v20617_v16 = vld [vmem:[#allocation79_spill] sm:$0xff] }
 0x8c6   : > { %v6712_v7 = vpack.c.bf16 %v6380_v42, %v6380_v42  ;;  %v7851_v32 = vunpack.c.l.b16 %v6735_v49  ;;  %v6719_v59 = vpack.c.bf16 %v6328_v21, %v6328_v21  ;;  %v7852_v30 = vunpack.c.l.b16 %v6736_v44  ;;  %v20620_v42 = vld [vmem:[#allocation406_spill] sm:$0xff] }
 0x8c7   : > { %v7596_v34 = vunpack.c.l.b16 %v6711_v5  ;;  %v7774_v12 = vpack.c.b16 %v7767_v26, %v7766_v57  ;;  %v6720_v14 = vpack.c.bf16 %v6382_v20, %v6382_v20  ;;  %v7352_v31 = vmul.f32 1.442695, %v7300_v25  ;;  %v7279_v5 = vpop.xlane.xlu2 %7278 }
 0x8c8   : > { %v7597_v36 = vunpack.c.l.b16 %v6712_v7  ;;  %v7681_v17 = vunpack.c.l.b16 %v6719_v59  ;;  %v7301_v18 = vsub.f32 %v20614_v55, %v16859_v24  ;;  %v7293_v4 = vsub.f32 %v20615_v62, %v16883_v41  ;;  %v20618_v41 = vld [vmem:[#allocation78_spill] sm:$0xff]  ;;  %v20621_v59 = vld [vmem:[#allocation407_spill] sm:$0xff] }
 0x8c9   : > { %7801 = vmatpush.bf16.msra.mxu1 %v7774_v12  ;;  %v7859_v54 = vpack.c.b16 %v7852_v30, %v7851_v32  ;;  %v7682_v1 = vunpack.c.l.b16 %v6720_v14  ;;  %9877 = vpow2.f32 %v7352_v31  ;;  %v7286_v11 = vsub.f32 %v20616_v28, %v16885_v40  ;;  %v20619_v40 = vld [vmem:[#allocation365_spill] sm:$0xff] }
 0x8ca   : > { %v7604_v57 = vpack.c.b16 %v7597_v36, %v7596_v34  ;;  %v7354_v43 = vmul.f32 1.442695, %v7301_v18  ;;  %v7338_v15 = vmul.f32 1.442695, %v7293_v4  ;;  %v7292_v60 = vsub.f32 %v20617_v16, %v7222_v6  ;;  %v7381_v58 = vpop.xlane.xlu0 %7380  ;;  %v20623_v4 = vld [vmem:[#allocation361_spill] sm:$0xff] }
 0x8cb   : > { %7886 = vmatpush.bf16.msra.mxu2 %v7859_v54  ;;  %v7689_v25 = vpack.c.b16 %v7682_v1, %v7681_v17  ;;  %v7324_v24 = vmul.f32 1.442695, %v7286_v11  ;;  %v7310_v35 = vsub.f32 %v20618_v41, %v16924_v56  ;;  %v7287_v21 = vsub.f32 %v20619_v40, %v16917_v38  ;;  %v20622_v17 = vld [vmem:[#allocation360_spill] sm:$0xff]  ;;  %v20624_v41 = vld [vmem:[#allocation411_spill] sm:$0xff] }
 0x8cc   : > { %7631 = vmatpush.bf16.msrb.mxu3 %v7604_v57  ;;  %9879 = vpow2.f32 %v7354_v43  ;;  %v7336_v45 = vmul.f32 1.442695, %v7292_v60  ;;  %v7311_v44 = vsub.f32 %v20620_v42, %v7279_v5  ;;  %v7450_v20 = vpop.xlane.xlu1 %7449  ;;  %v7303_v12 = vsub.f32 %v20621_v59, %v7255_v3 }
 0x8cd   : > { %7716 = vmatpush.bf16.msra.mxu0 %v7689_v25  ;;  %9881 = vpow2.f32 %v7338_v15  ;;  %v7372_v26 = vmul.f32 1.442695, %v7310_v35  ;;  %v7326_v32 = vmul.f32 1.442695, %v7287_v21  ;;  %v7302_v55 = vsub.f32 %v20622_v17, %v16941_v33 }
 0x8ce   : > { %9883 = vpow2.f32 %v7324_v24  ;;  %v7374_v38 = vmul.f32 1.442695, %v7311_v44  ;;  %v7358_v1 = vmul.f32 1.442695, %v7303_v12 }
 0x8cf   : > { %v16952_v49 = vpop.eup %9877  ;;  %9885 = vpow2.f32 %v7336_v45  ;;  %v7356_v57 = vmul.f32 1.442695, %v7302_v55 }
 0x8d0   : > { %v7436_v6 = vsel %vm7183_vm5, %v16952_v49, 0.0  ;;  %9887 = vpow2.f32 %v7372_v26 }
 0x8d1   : > { %7437 = vadd.xlane.f32.xlu0 %v7436_v6  ;;  %9889 = vrcp.f32 %v7381_v58 }
 0x8d2   : > { %v16959_v56 = vpop.eup %9879  ;;  %v7228_v30 = vpop.xlane.xlu0 %7227  ;;  %9891 = vpow2.f32 %v7326_v32 }
 0x8d3   : > { %v16961_v7 = vpop.eup %9881  ;;  %v7439_v34 = vsel %vm7183_vm5, %v16959_v56, 0.0  ;;  %9893 = vpow2.f32 %v7374_v38  ;;  %v7294_v3 = vsub.f32 %v20623_v4, %v7228_v30 }
 0x8d4   : > { %7440 = vadd.xlane.f32.xlu1 %v7439_v34  ;;  %v16966_v14 = vpop.eup %9883  ;;  %v7415_v31 = vsel %vm7183_vm5, %v16961_v7, 0.0  ;;  %v7378_v62 = vpop.xlane.xlu2 %7377 }
 0x8d5   : > { %v16970_v36 = vpop.eup %9885  ;;  %v7394_v54 = vsel %vm7183_vm5, %v16966_v14, 0.0  ;;  %9895 = vrcp.f32 %v7378_v62  ;;  %v7340_v43 = vmul.f32 1.442695, %v7294_v3  ;;  %v7231_v15 = vpop.xlane.xlu1 %7230 }
 0x8d6   : > { %v7412_v18 = vsel %vm7183_vm5, %v16970_v36, 0.0  ;;  %v16979_v28 = vpop.eup %9887  ;;  %9897 = vpow2.f32 %v7358_v1  ;;  %v7295_v35 = vsub.f32 %v20624_v41, %v7231_v15 }
 0x8d7   : > { %7413 = vadd.xlane.f32.xlu2 %v7412_v18  ;;  %v9890_v11 = vpop.eup %9889  ;;  %v7466_v60 = vsel %vm7183_vm5, %v16979_v28, 0.0  ;;  %9899 = vpow2.f32 %v7356_v57 }
 0x8d8   : > { %v7505_v33 = vmul.f32 %v9890_v11, %v16144_v22  ;;  %v16982_v25 = vpop.eup %9891  ;;  %9901 = vpow2.f32 %v7340_v43  ;;  %v7342_v6 = vmul.f32 1.442695, %v7295_v35 }
 0x8d9   : > { %7416 = vadd.xlane.f32.xlu0 %v7415_v31  ;;  %v16984_v16 = vpop.eup %9893  ;;  %v7397_v22 = vsel %vm7183_vm5, %v16982_v25, 0.0 }
 0x8da   : > { %v7537_v45 = vpack.c.bf16 %v7505_v33, %v7505_v33  ;;  %v7469_v58 = vsel %vm7183_vm5, %v16984_v16, 0.0  ;;  %9903 = vpow2.f32 %v7342_v6 }
 0x8db   : > { %v9896_v24 = vpop.eup %9895  ;;  %9905 = vrcp.f32 %v7450_v20 }
 0x8dc   : > { %7395 = vadd.xlane.f32.xlu1 %v7394_v54  ;;  %v7504_v5 = vmul.f32 %v9896_v24, %v16121_v29  ;;  %v16994_v21 = vpop.eup %9897  ;;  %v7577_v26 = vunpack.c.l.b16 %v7537_v45 }
 0x8dd   : > { %v16996_v44 = vpop.eup %9899  ;;  %v7445_v29 = vsel %vm7183_vm5, %v16994_v21, 0.0 }
 0x8de   : > { %v7536_v40 = vpack.c.bf16 %v7504_v5, %v7504_v5  ;;  %v16998_v34 = vpop.eup %9901  ;;  %v7442_v38 = vsel %vm7183_vm5, %v16996_v44, 0.0 }
 0x8df   : > { %7398 = vadd.xlane.f32.xlu2 %v7397_v22  ;;  %v7418_v59 = vsel %vm7183_vm5, %v16998_v34, 0.0 }
 0x8e0   : > { %v7576_v42 = vunpack.c.l.b16 %v7536_v40  ;;  %v17007_v12 = vpop.eup %9903 }
 0x8e1   : > { %7467 = vadd.xlane.f32.xlu0 %v7466_v60  ;;  %v9906_v31 = vpop.eup %9905  ;;  %v7421_v18 = vsel %vm7183_vm5, %v17007_v12, 0.0 }
 0x8e2   : > { %v7584_v32 = vpack.c.b16 %v7577_v26, %v7576_v42  ;;  %v7528_v62 = vmul.f32 %v9906_v31, %v16128_v52 }
 0x8e4   : > { %7470 = vadd.xlane.f32.xlu1 %v7469_v58  ;;  %9237 = vmatmul.msk.bf16.vlgmr.msrb.gmra.mxu3 %vm7183_vm5, %v7584_v32  ;;  %v7560_v3 = vpack.c.bf16 %v7528_v62, %v7528_v62 }
 0x8e6   : > { %v7831_v43 = vunpack.c.l.b16 %v7560_v3 }
 0x8e7   : > { %7443 = vadd.xlane.f32.xlu2 %v7442_v38 }
 0x8e9   : > { %7446 = vadd.xlane.f32.xlu0 %v7445_v29 }
 0x8eb   : > { %v7453_v30 = vpop.xlane.xlu2 %7452 }
 0x8ec   : > { %7419 = vadd.xlane.f32.xlu1 %v7418_v59  ;;  %9907 = vrcp.f32 %v7453_v30 }
 0x8ed   : > { %v7429_v17 = vpop.xlane.xlu0 %7428 }
 0x8ee   : > { %v7402_v55 = vpop.xlane.xlu1 %7401  ;;  %9909 = vrcp.f32 %v7429_v17 }
 0x8ef   : > { %7422 = vadd.xlane.f32.xlu2 %v7421_v18  ;;  %9911 = vrcp.f32 %v7402_v55 }
 0x8f2   : > { %v9908_v4 = vpop.eup %9907 }
 0x8f3   : > { %v7529_v54 = vmul.f32 %v9908_v4, %v16169_v27  ;;  %v7426_v20 = vpop.xlane.xlu2 %7425 }
 0x8f4   : > { %v9910_v1 = vpop.eup %9909  ;;  %9913 = vrcp.f32 %v7426_v20 }
 0x8f5   : > { %v7384_v11 = vpop.xlane.xlu0 %7383  ;;  %v7561_v33 = vpack.c.bf16 %v7529_v54, %v7529_v54  ;;  %v7521_v60 = vmul.f32 %v9910_v1, %v16188_v2  ;;  %v9912_v24 = vpop.eup %9911 }
 0x8f6   : > { %v7387_v57 = vpop.xlane.xlu1 %7386  ;;  %9915 = vrcp.f32 %v7384_v11  ;;  %v7512_v32 = vmul.f32 %v9912_v24, %v16161_v10 }
 0x8f7   : > { %9917 = vrcp.f32 %v7387_v57  ;;  %v7832_v15 = vunpack.c.l.b16 %v7561_v33  ;;  %v7553_v45 = vpack.c.bf16 %v7521_v60, %v7521_v60 }
 0x8f8   : > { %v7544_v55 = vpack.c.bf16 %v7512_v32, %v7512_v32 }
 0x8f9   : > { %v7839_v41 = vpack.c.b16 %v7832_v15, %v7831_v43  ;;  %v7747_v29 = vunpack.c.l.b16 %v7553_v45 }
 0x8fa   : > { %v9914_v52 = vpop.eup %9913  ;;  %v7661_v10 = vunpack.c.l.b16 %v7544_v55 }
 0x8fb   : > { %v7520_v27 = vmul.f32 %v9914_v52, %v16134_v23  ;;  %v7405_v5 = vpop.xlane.xlu2 %7404  ;;  %9249 = vmatmul.msk.bf16.vlgmr.msra.gmra.mxu2 %vm7183_vm5, %v7839_v41 }
 0x8fc   : > { %v9916_v35 = vpop.eup %9915  ;;  %9919 = vrcp.f32 %v7405_v5 }
 0x8fd   : > { %v9918_v22 = vpop.eup %9917  ;;  %v7459_v58 = vpop.xlane.xlu0 %7458  ;;  %v7506_v6 = vmul.f32 %v9916_v35, %v16227_v39  ;;  %v7552_v26 = vpack.c.bf16 %v7520_v27, %v7520_v27 }
 0x8fe   : > { %v7432_v40 = vpop.xlane.xlu1 %7431  ;;  %v7507_v42 = vmul.f32 %v9918_v22, %v16201_v8  ;;  %9921 = vrcp.f32 %v7459_v58 }
 0x8ff   : > { %v7538_v2 = vpack.c.bf16 %v7506_v6, %v7506_v6  ;;  %v7746_v38 = vunpack.c.l.b16 %v7552_v26  ;;  %9923 = vrcp.f32 %v7432_v40 }
 0x900   : > { %v7539_v59 = vpack.c.bf16 %v7507_v42, %v7507_v42 }
 0x901   : > { %v7754_v23 = vpack.c.b16 %v7747_v29, %v7746_v38  ;;  %v7578_v30 = vunpack.c.l.b16 %v7538_v2 }
 0x902   : > { %v7579_v31 = vunpack.c.l.b16 %v7539_v59  ;;  %v9920_v17 = vpop.eup %9919 }
 0x903   : > { %v7513_v18 = vmul.f32 %v9920_v17, %v16167_v47  ;;  %v7456_v62 = vpop.xlane.xlu2 %7455  ;;  %9245 = vmatmul.msk.bf16.vlgmr.msra.gmra.mxu1 %vm7183_vm5, %v7754_v23 }
 0x904   : > { %v7585_v39 = vpack.c.b16 %v7579_v31, %v7578_v30  ;;  %v9922_v8 = vpop.eup %9921  ;;  %9925 = vrcp.f32 %v7456_v62 }
 0x905   : > { %v7408_v4 = vpop.xlane.xlu0 %7407  ;;  %v7545_v54 = vpack.c.bf16 %v7513_v18, %v7513_v18  ;;  %v7531_v1 = vmul.f32 %v9922_v8, %v16267_v46  ;;  %v9924_v11 = vpop.eup %9923 }
 0x906   : > { %v7411_v3 = vpop.xlane.xlu1 %7410  ;;  %9927 = vrcp.f32 %v7408_v4  ;;  %9238 = vmatmul.msk.bf16.gmra.mxu3 %vm7183_vm5, %v7585_v39  ;;  %v7522_v5 = vmul.f32 %v9924_v11, %v16247_v9 }
 0x907   : > { %9929 = vrcp.f32 %v7411_v3  ;;  %v7662_v20 = vunpack.c.l.b16 %v7545_v54  ;;  %v7563_v60 = vpack.c.bf16 %v7531_v1, %v7531_v1 }
 0x908   : > { %v7554_v2 = vpack.c.bf16 %v7522_v5, %v7522_v5 }
 0x909   : > { %v7669_v47 = vpack.c.b16 %v7662_v20, %v7661_v10  ;;  %v7834_v27 = vunpack.c.l.b16 %v7563_v60 }
 0x90a   : > { %v9926_v57 = vpop.eup %9925  ;;  %v7748_v38 = vunpack.c.l.b16 %v7554_v2 }
 0x90b   : > { %v7435_v43 = vpop.xlane.xlu2 %7434  ;;  %9241 = vmatmul.msk.bf16.vlgmr.msra.gmra.mxu0 %vm7183_vm5, %v7669_v47  ;;  %v7530_v15 = vmul.f32 %v9926_v57, %v20591_v37 }
 0x90c   : > { %v9928_v33 = vpop.eup %9927  ;;  %9931 = vrcp.f32 %v7435_v43 }
 0x90d   : > { %v9930_v24 = vpop.eup %9929  ;;  %v7562_v41 = vpack.c.bf16 %v7530_v15, %v7530_v15  ;;  %v7514_v46 = vmul.f32 %v9928_v33, %v20592_v50 }
 0x90e   : > { %v7515_v52 = vmul.f32 %v9930_v24, %v20600_v63 }
 0x90f   : > { %v7833_v45 = vunpack.c.l.b16 %v7562_v41  ;;  %v7546_v37 = vpack.c.bf16 %v7514_v46, %v7514_v46 }
 0x910   : > { %v7547_v58 = vpack.c.bf16 %v7515_v52, %v7515_v52 }
 0x911   : > { %v7840_v22 = vpack.c.b16 %v7834_v27, %v7833_v45  ;;  %v7663_v50 = vunpack.c.l.b16 %v7546_v37 }
 0x912   : > { %v7393_v35 = vpop.xlane.xlu0 %7392  ;;  %v9932_v40 = vpop.eup %9931  ;;  %v7664_v63 = vunpack.c.l.b16 %v7547_v58 }
 0x913   : > { %9933 = vrcp.f32 %v7393_v35  ;;  %9250 = vmatmul.msk.bf16.gmra.mxu2 %vm7183_vm5, %v7840_v22  ;;  %v7523_v42 = vmul.f32 %v9932_v40, %v20602_v61 }
 0x914   : > { %v7462_v6 = vpop.xlane.xlu1 %7461  ;;  %v7670_v23 = vpack.c.b16 %v7664_v63, %v7663_v50 }
 0x915   : > { %v7390_v26 = vpop.xlane.xlu2 %7389  ;;  %v7555_v29 = vpack.c.bf16 %v7523_v42, %v7523_v42 }
 0x916   : > { %9935 = vrcp.f32 %v7390_v26 }
 0x917   : > { %9937 = vrcp.f32 %v7462_v6  ;;  %v7749_v9 = vunpack.c.l.b16 %v7555_v29 }
 0x919   : > { %v9934_v32 = vpop.eup %9933  ;;  %v7755_v30 = vpack.c.b16 %v7749_v9, %v7748_v38 }
 0x91a   : > { %v7509_v59 = vmul.f32 %v9934_v32, %v16605_v0 }
 0x91b   : > { %9242 = vmatmul.msk.bf16.gmra.mxu0 %vm7183_vm5, %v7670_v23  ;;  %9246 = vmatmul.msk.bf16.gmra.mxu1 %vm7183_vm5, %v7755_v30 }
 0x91c   : > { %v9936_v31 = vpop.eup %9935  ;;  %v7541_v18 = vpack.c.bf16 %v7509_v59, %v7509_v59 }
 0x91d   : > { %v7465_v17 = vpop.xlane.xlu2 %7464  ;;  %v9938_v61 = vpop.eup %9937  ;;  %v7508_v55 = vmul.f32 %v9936_v31, %v16627_v48 }
 0x91e   : > { %9939 = vrcp.f32 %v7465_v17  ;;  %v7532_v39 = vmul.f32 %v9938_v61, %v16615_v53  ;;  %v7581_v4 = vunpack.c.l.b16 %v7541_v18 }
 0x91f   : > { %v7540_v62 = vpack.c.bf16 %v7508_v55, %v7508_v55 }
 0x920   : > { %v7564_v10 = vpack.c.bf16 %v7532_v39, %v7532_v39 }
 0x921   : > { %v7580_v8 = vunpack.c.l.b16 %v7540_v62 }
 0x922   : > { %v7835_v1 = vunpack.c.l.b16 %v7564_v10 }
 0x923   : > { %v7586_v0 = vpack.c.b16 %v7581_v4, %v7580_v8 }
 0x924   : > { %v9940_v3 = vpop.eup %9939 }
 0x925   : > { %v7533_v54 = vmul.f32 %v9940_v3, %v16639_v13  ;;  %9239 = vmatmul.msk.bf16.gmra.mxu3 %vm7183_vm5, %v7586_v0 }
 0x927   : > { %v7565_v20 = vpack.c.bf16 %v7533_v54, %v7533_v54 }
 0x929   : > { %v7836_v11 = vunpack.c.l.b16 %v7565_v20 }
 0x92b   : > { %v7841_v47 = vpack.c.b16 %v7836_v11, %v7835_v1 }
 0x92d   : > { %9251 = vmatmul.msk.bf16.gmra.mxu2 %vm7183_vm5, %v7841_v47 }
 0x944   : > { %v7438_v48 = vpop.xlane.xlu0 %7437 }
 0x945   : > { %9941 = vrcp.f32 %v7438_v48 }
 0x947   : > { %v7441_v57 = vpop.xlane.xlu1 %7440 }
 0x948   : > { %9943 = vrcp.f32 %v7441_v57 }
 0x94a   : > { %v7414_v15 = vpop.xlane.xlu2 %7413 }
 0x94b   : > { %v9942_v53 = vpop.eup %9941 }
 0x94c   : > { %v7417_v33 = vpop.xlane.xlu0 %7416  ;;  %v7524_v43 = vmul.f32 %v9942_v53, %v16952_v49 }
 0x94d   : > { %9945 = vrcp.f32 %v7417_v33 }
 0x94e   : > { %v9944_v13 = vpop.eup %9943  ;;  %9947 = vrcp.f32 %v7414_v15  ;;  %v7556_v41 = vpack.c.bf16 %v7524_v43, %v7524_v43 }
 0x94f   : > { %v7396_v60 = vpop.xlane.xlu1 %7395  ;;  %v7525_v24 = vmul.f32 %v9944_v13, %v16959_v56 }
 0x950   : > { %9949 = vrcp.f32 %v7396_v60  ;;  %v7750_v45 = vunpack.c.l.b16 %v7556_v41 }
 0x951   : > { %v7557_v52 = vpack.c.bf16 %v7525_v24, %v7525_v24 }
 0x952   : > { %v7399_v22 = vpop.xlane.xlu2 %7398 }
 0x953   : > { %v9946_v35 = vpop.eup %9945  ;;  %v7751_v27 = vunpack.c.l.b16 %v7557_v52 }
 0x954   : > { %v9948_v46 = vpop.eup %9947  ;;  %v7468_v5 = vpop.xlane.xlu0 %7467  ;;  %v7517_v58 = vmul.f32 %v9946_v35, %v16961_v7 }
 0x955   : > { %v7756_v40 = vpack.c.b16 %v7751_v27, %v7750_v45  ;;  %9951 = vrcp.f32 %v7468_v5  ;;  %v7516_v49 = vmul.f32 %v9948_v46, %v16970_v36 }
 0x956   : > { %v9950_v6 = vpop.eup %9949  ;;  %9953 = vrcp.f32 %v7399_v22  ;;  %v7549_v26 = vpack.c.bf16 %v7517_v58, %v7517_v58 }
 0x957   : > { %9247 = vmatmul.msk.bf16.gmra.mxu1 %vm7183_vm5, %v7756_v40  ;;  %v7471_v56 = vpop.xlane.xlu1 %7470  ;;  %v7548_v37 = vpack.c.bf16 %v7516_v49, %v7516_v49  ;;  %v7510_v63 = vmul.f32 %v9950_v6, %v16966_v14 }
 0x958   : > { %9955 = vrcp.f32 %v7471_v56  ;;  %v7666_v2 = vunpack.c.l.b16 %v7549_v26 }
 0x959   : > { %v7665_v42 = vunpack.c.l.b16 %v7548_v37  ;;  %v7542_v59 = vpack.c.bf16 %v7510_v63, %v7510_v63 }
 0x95a   : > { %v7444_v38 = vpop.xlane.xlu2 %7443 }
 0x95b   : > { %v9952_v29 = vpop.eup %9951  ;;  %v7671_v32 = vpack.c.b16 %v7666_v2, %v7665_v42  ;;  %v7582_v61 = vunpack.c.l.b16 %v7542_v59 }
 0x95c   : > { %v9954_v50 = vpop.eup %9953  ;;  %v7447_v7 = vpop.xlane.xlu0 %7446  ;;  %v7534_v9 = vmul.f32 %v9952_v29, %v16979_v28 }
 0x95d   : > { %9957 = vrcp.f32 %v7447_v7  ;;  %9243 = vmatmul.msk.bf16.gmra.mxu0 %vm7183_vm5, %v7671_v32  ;;  %v7511_v36 = vmul.f32 %v9954_v50, %v16982_v25 }
 0x95e   : > { %v9956_v23 = vpop.eup %9955  ;;  %9959 = vrcp.f32 %v7444_v38  ;;  %v7566_v14 = vpack.c.bf16 %v7534_v9, %v7534_v9 }
 0x95f   : > { %v7420_v30 = vpop.xlane.xlu1 %7419  ;;  %v7543_v31 = vpack.c.bf16 %v7511_v36, %v7511_v36  ;;  %v7535_v17 = vmul.f32 %v9956_v23, %v16984_v16 }
 0x960   : > { %9961 = vrcp.f32 %v7420_v30  ;;  %v7837_v28 = vunpack.c.l.b16 %v7566_v14 }
 0x961   : > { %v7583_v55 = vunpack.c.l.b16 %v7543_v31  ;;  %v7567_v18 = vpack.c.bf16 %v7535_v17, %v7535_v17 }
 0x962   : > { %v7423_v3 = vpop.xlane.xlu2 %7422 }
 0x963   : > { %v9958_v62 = vpop.eup %9957  ;;  %v7587_v39 = vpack.c.b16 %v7583_v55, %v7582_v61  ;;  %v7838_v8 = vunpack.c.l.b16 %v7567_v18  ;;  %9963 = vrcp.f32 %v7423_v3 }
 0x964   : > { %v9960_v4 = vpop.eup %9959  ;;  %v7527_v25 = vmul.f32 %v9958_v62, %v16994_v21 }
 0x965   : > { %9240 = vmatmul.msk.bf16.gmra.mxu3 %vm7183_vm5, %v7587_v39  ;;  %v7842_v0 = vpack.c.b16 %v7838_v8, %v7837_v28  ;;  %v7526_v54 = vmul.f32 %v9960_v4, %v16996_v44 }
 0x966   : > { %v9962_v16 = vpop.eup %9961  ;;  %v7559_v10 = vpack.c.bf16 %v7527_v25, %v7527_v25 }
 0x967   : > { %9252 = vmatmul.msk.bf16.gmra.mxu2 %vm7183_vm5, %v7842_v0  ;;  %v7558_v20 = vpack.c.bf16 %v7526_v54, %v7526_v54  ;;  %v7518_v1 = vmul.f32 %v9962_v16, %v16998_v34  ;;  %v7633_v13 = vpop.f32.mrf.mxu3 }
 0x968   : > { %v7753_v47 = vunpack.c.l.b16 %v7559_v10  ;;  %v7910_v41 = vrot.slane %v7633_v13, 4 }
 0x969   : > { %v7752_v11 = vunpack.c.l.b16 %v7558_v20  ;;  %v9964_v48 = vpop.eup %9963  ;;  %v7550_v21 = vpack.c.bf16 %v7518_v1, %v7518_v1 }
 0x96a   : > { %v7519_v53 = vmul.f32 %v9964_v48, %v17007_v12 }
 0x96b   : > { %v7757_v57 = vpack.c.b16 %v7753_v47, %v7752_v11  ;;  %v7667_v43 = vunpack.c.l.b16 %v7550_v21 }
 0x96c   : > { %v7551_v33 = vpack.c.bf16 %v7519_v53, %v7519_v53 }
 0x96d   : > { %9248 = vmatmul.msk.bf16.gmra.mxu1 %vm7183_vm5, %v7757_v57 }
 0x96e   : > { %v7668_v15 = vunpack.c.l.b16 %v7551_v33 }
 0x96f   : > { %v7635_v45 = vpop.f32.mrf.mxu3 }
 0x970   : > { %v7672_v44 = vpack.c.b16 %v7668_v15, %v7667_v43  ;;  %v7966_v56 = vrot.slane %v7635_v45, 4 }
 0x972   : > { %9244 = vmatmul.msk.bf16.gmra.mxu0 %vm7183_vm5, %v7672_v44 }
 0x97e   : > { %v7888_v34 = vpop.f32.mrf.mxu2 }
 0x97f   : > { %v7920_v27 = vrot.slane %v7888_v34, 4 }
 0x980   : > { %v7803_v60 = vpop.f32.mrf.mxu1 }
 0x981   : > { %v7908_v24 = vrot.slane %v7803_v60, 4  ;;  %v7911_v35 = vsel %vm742_vm0, %v7803_v60, %v7910_v41 }
 0x982   : > { %v7919_v46 = vperm.slane %v7911_v35, %v20343_v51 }
 0x983   : > { %v7909_v52 = vsel %vm742_vm0, %v7908_v24, %v7633_v13 }
 0x984   : > { %v7915_v12 = vperm.slane %v7909_v52, %v20343_v51  ;;  %v7946_v42 = vrot.slane %v7919_v46, 4 }
 0x986   : > { %v7934_v49 = vrot.slane %v7915_v12, 4  ;;  %v7890_v32 = vpop.f32.mrf.mxu2 }
 0x987   : > { %v7976_v17 = vrot.slane %v7890_v32, 4 }
 0x988   : > { %v7718_v5 = vpop.f32.mrf.mxu0  ;;  %v7805_v22 = vpop.f32.mrf.mxu1 }
 0x989   : > { %v7921_v58 = vsel %vm742_vm0, %v7920_v27, %v7718_v5  ;;  %v7922_v40 = vrot.slane %v7718_v5, 4  ;;  %v7964_v26 = vrot.slane %v7805_v22, 4  ;;  %v7967_v7 = vsel %vm742_vm0, %v7805_v22, %v7966_v56  ;;  %v7638_v8 = vpop.f32.mrf.mxu3 }
 0x98a   : > { %v7927_v6 = vperm.slane %v7921_v58, %v20343_v51  ;;  %v7975_v61 = vperm.slane %v7967_v7, %v20343_v51  ;;  %v8022_v48 = vrot.slane %v7638_v8, 4 }
 0x98b   : > { %v7923_v37 = vsel %vm742_vm0, %v7888_v34, %v7922_v40  ;;  %v7965_v59 = vsel %vm742_vm0, %v7964_v26, %v7635_v45 }
 0x98c   : > { %v7931_v2 = vperm.slane %v7923_v37, %v20343_v51  ;;  %v7932_v63 = vrot.slane %v7927_v6, 4  ;;  %v7935_v29 = vsel %vm742_vm0, %v7927_v6, %v7934_v49  ;;  %v7971_v28 = vperm.slane %v7965_v59, %v20343_v51 }
 0x98d   : > { %v7943_v50 = vperm.slane %v7935_v29, %v20360_v19  ;;  %v8002_v47 = vrot.slane %v7975_v61, 4 }
 0x98e   : > { %v7933_v38 = vsel %vm742_vm0, %v7932_v63, %v7915_v12  ;;  %v7944_v9 = vrot.slane %v7931_v2, 4  ;;  %v7947_v36 = vsel %vm742_vm0, %v7931_v2, %v7946_v42  ;;  %v7990_v11 = vrot.slane %v7971_v28, 4 }
 0x98f   : > { %v7939_v23 = vperm.slane %v7933_v38, %v20360_v19  ;;  %v7955_v30 = vperm.slane %v7947_v36, %v20360_v19  ;;  %v7958_v31 = vrot.slane %v7943_v50, 4 }
 0x990   : > { %v7945_v14 = vsel %vm742_vm0, %v7944_v9, %v7919_v46  ;;  %v7720_v55 = vpop.f32.mrf.mxu0 }
 0x991   : > { %v7956_v18 = vrot.slane %v7939_v23, 4  ;;  %v7959_v62 = vsel %vm742_vm0, 0.0, %v7958_v31  ;;  %v7962_v39 = vrot.slane %v7955_v30, 4  ;;  %v7951_v4 = vperm.slane %v7945_v14, %v20360_v19  ;;  %v7640_v42 = vpop.f32.mrf.mxu3 }
 0x992   : > { %v8361_v3 = vrot.slane %v7959_v62, 4  ;;  %v7978_v25 = vrot.slane %v7720_v55, 4  ;;  %v8356_v54 = vsel %vm742_vm0, %v7958_v31, %v7939_v23  ;;  %v7977_v16 = vsel %vm742_vm0, %v7976_v17, %v7720_v55 }
 0x993   : > { %v7957_v0 = vsel %vm742_vm0, 0.0, %v7956_v18  ;;  %v17081_v10 = vsel %vm742_vm0, 0.0, %v7962_v39  ;;  %v7960_v57 = vrot.slane %v7951_v4, 4  ;;  %v17086_v53 = vperm.slane %v8356_v54, %v20343_v51 }
 0x994   : > { %v8362_v20 = vsel %vm742_vm0, %v8361_v3, %v7957_v0  ;;  %v7979_v1 = vsel %vm742_vm0, %v7890_v32, %v7978_v25  ;;  %v7983_v21 = vperm.slane %v7977_v16, %v20343_v51  ;;  %v8367_v44 = vsel %vm742_vm0, %v7962_v39, %v7951_v4 }
 0x995   : > { %v7987_v33 = vperm.slane %v7979_v1, %v20343_v51  ;;  %v17091_v15 = vperm.slane %v8362_v20, %v20343_v51  ;;  %v8372_v13 = vrot.slane %v17081_v10, 4  ;;  %v17106_v2 = vsel %vm742_vm0, 0.0, %v7960_v57 }
 0x996   : > { %v7893_v43 = vpop.f32.mrf.mxu2  ;;  %v7988_v24 = vrot.slane %v7983_v21, 4  ;;  %v7991_v41 = vsel %vm742_vm0, %v7983_v21, %v7990_v11  ;;  %v17109_v63 = vperm.slane %v8367_v44, %v20343_v51  ;;  %v8380_v36 = vrot.slane %v17086_v53, 4 }
 0x997   : > { %v8032_v60 = vrot.slane %v7893_v43, 4  ;;  %v8000_v34 = vrot.slane %v7987_v33, 4  ;;  %v8003_v52 = vsel %vm742_vm0, %v7987_v33, %v8002_v47  ;;  %v7999_v45 = vperm.slane %v7991_v41, %v20360_v19 }
 0x998   : > { %v7723_v35 = vpop.f32.mrf.mxu0  ;;  %v7808_v12 = vpop.f32.mrf.mxu1  ;;  %v8011_v27 = vperm.slane %v8003_v52, %v20360_v19  ;;  %v7989_v22 = vsel %vm742_vm0, %v7988_v24, %v7971_v28  ;;  %v8078_v23 = vrot.slane %v7640_v42, 4  ;;  %v8378_v17 = vrot.slane %v17091_v15, 4 }
 0x999   : > { %v8033_v46 = vsel %vm742_vm0, %v8032_v60, %v7723_v35  ;;  %v8034_v5 = vrot.slane %v7723_v35, 4  ;;  %v8001_v58 = vsel %vm742_vm0, %v8000_v34, %v7975_v61  ;;  %v8020_v49 = vrot.slane %v7808_v12, 4 }
 0x99a   : > { %v8039_v40 = vperm.slane %v8033_v46, %v20343_v51  ;;  %v7995_v6 = vperm.slane %v7989_v22, %v20360_v19  ;;  %v8007_v26 = vperm.slane %v8001_v58, %v20360_v19  ;;  %v8014_v56 = vrot.slane %v7999_v45, 4 }
 0x99b   : > { %v8018_v37 = vrot.slane %v8011_v27, 4  ;;  %v8035_v29 = vsel %vm742_vm0, %v7893_v43, %v8034_v5  ;;  %v8021_v32 = vsel %vm742_vm0, %v8020_v49, %v7638_v8  ;;  %v8023_v9 = vsel %vm742_vm0, %v7808_v12, %v8022_v48 }
 0x99c   : > { %v8012_v50 = vrot.slane %v7995_v6, 4  ;;  %v8015_v7 = vsel %vm742_vm0, 0.0, %v8014_v56  ;;  %v8016_v38 = vrot.slane %v8007_v26, 4  ;;  %v8044_v30 = vrot.slane %v8039_v40, 4 }
 0x99d   : > { %v17117_v59 = vsel %vm742_vm0, 0.0, %v8018_v37  ;;  %v8410_v14 = vsel %vm742_vm0, %v8014_v56, %v7995_v6  ;;  %v8415_v61 = vrot.slane %v8015_v7, 4  ;;  %v8421_v55 = vsel %vm742_vm0, %v8018_v37, %v8007_v26 }
 0x99e   : > { %v7895_v31 = vpop.f32.mrf.mxu2  ;;  %v8013_v18 = vsel %vm742_vm0, 0.0, %v8012_v50  ;;  %v8043_v62 = vperm.slane %v8035_v29, %v20343_v51  ;;  %v8027_v39 = vperm.slane %v8021_v32, %v20343_v51  ;;  %v8031_v28 = vperm.slane %v8023_v9, %v20343_v51 }
 0x99f   : > { %v17127_v4 = vsel %vm742_vm0, 0.0, %v8016_v38  ;;  %v8426_v3 = vrot.slane %v17117_v59, 4  ;;  %v8088_v25 = vrot.slane %v7895_v31, 4  ;;  %v17132_v11 = vperm.slane %v8410_v14, %v20343_v51 }
 0x9a0   : > { %v7725_v8 = vpop.f32.mrf.mxu0  ;;  %v8056_v54 = vrot.slane %v8043_v62, 4  ;;  %v8045_v16 = vsel %vm742_vm0, %v8044_v30, %v8027_v39  ;;  %v8046_v20 = vrot.slane %v8027_v39, 4  ;;  %v8058_v1 = vrot.slane %v8031_v28, 4  ;;  %v7810_v21 = vpop.f32.mrf.mxu1 }
 0x9a1   : > { %v8090_v0 = vrot.slane %v7725_v8, 4  ;;  %v8416_v47 = vsel %vm742_vm0, %v8415_v61, %v8013_v18  ;;  %v8089_v48 = vsel %vm742_vm0, %v8088_v25, %v7725_v8  ;;  %v8051_v43 = vperm.slane %v8045_v16, %v20360_v19 }
 0x9a2   : > { %v8047_v33 = vsel %vm742_vm0, %v8039_v40, %v8046_v20  ;;  %v8057_v44 = vsel %vm742_vm0, %v8056_v54, %v8031_v28  ;;  %v8059_v60 = vsel %vm742_vm0, %v8043_v62, %v8058_v1  ;;  %v8095_v52 = vperm.slane %v8089_v48, %v20343_v51 }
 0x9a3   : > { %v8091_v57 = vsel %vm742_vm0, %v7895_v31, %v8090_v0  ;;  %v8055_v24 = vperm.slane %v8047_v33, %v20360_v19  ;;  %v8063_v41 = vperm.slane %v8057_v44, %v20360_v19  ;;  %v8067_v34 = vperm.slane %v8059_v60, %v20360_v19 }
 0x9a4   : > { %v17146_v35 = vperm.slane %v8416_v47, %v20343_v51  ;;  %v8099_v12 = vperm.slane %v8091_v57, %v20343_v51  ;;  %v8076_v45 = vrot.slane %v7810_v21, 4  ;;  %v8079_v27 = vsel %vm742_vm0, %v7810_v21, %v8078_v23 }
 0x9a5   : > { %v17151_v46 = vperm.slane %v8421_v55, %v20343_v51  ;;  %v8070_v5 = vrot.slane %v8055_v24, 4  ;;  %v8072_v22 = vrot.slane %v8063_v41, 4  ;;  %v8074_v58 = vrot.slane %v8067_v34, 4 }
 0x9a6   : > { %v8068_v40 = vrot.slane %v8051_v43, 4  ;;  %v8112_v49 = vrot.slane %v8099_v12, 4  ;;  %v8077_v6 = vsel %vm742_vm0, %v8076_v45, %v7640_v42  ;;  %v8087_v26 = vperm.slane %v8079_v27, %v20343_v51 }
 0x9a7   : > { %v8434_v56 = vrot.slane %v17132_v11, 4  ;;  %v8071_v37 = vsel %vm742_vm0, 0.0, %v8070_v5  ;;  %v8075_v29 = vsel %vm742_vm0, 0.0, %v8074_v58  ;;  %v8100_v32 = vrot.slane %v8095_v52, 4 }
 0x9a8   : > { %v8432_v50 = vrot.slane %v17146_v35, 4  ;;  %v8073_v7 = vsel %vm742_vm0, 0.0, %v8072_v22  ;;  %v8464_v38 = vsel %vm742_vm0, %v8070_v5, %v8051_v43  ;;  %v8480_v9 = vrot.slane %v8075_v29, 4 }
 0x9a9   : > { %v8475_v23 = vsel %vm742_vm0, %v8074_v58, %v8063_v41  ;;  %v8083_v42 = vperm.slane %v8077_v6, %v20343_v51  ;;  %v8113_v30 = vsel %vm742_vm0, %v8112_v49, %v8087_v26  ;;  %v8114_v31 = vrot.slane %v8087_v26, 4 }
 0x9aa   : > { %v8069_v14 = vsel %vm742_vm0, 0.0, %v8068_v40  ;;  %v8469_v61 = vrot.slane %v8071_v37, 4  ;;  %v8119_v55 = vperm.slane %v8113_v30, %v20360_v19  ;;  %v8373_v18 = vsel %vm742_vm0, %v8372_v13, %v17106_v2 }
 0x9ab   : > { %v17171_v62 = vperm.slane %v8464_v38, %v20343_v51  ;;  %v8481_v39 = vsel %vm742_vm0, %v8480_v9, %v8073_v7  ;;  %v8101_v28 = vsel %vm742_vm0, %v8100_v32, %v8083_v42  ;;  %v8102_v8 = vrot.slane %v8083_v42, 4 }
 0x9ac   : > { %v17176_v25 = vperm.slane %v8475_v23, %v20343_v51  ;;  %v8107_v0 = vperm.slane %v8101_v28, %v20360_v19  ;;  %v8115_v54 = vsel %vm742_vm0, %v8099_v12, %v8114_v31  ;;  %v8128_v16 = vrot.slane %v8119_v55, 4 }
 0x9ad   : > { %v8103_v10 = vsel %vm742_vm0, %v8095_v52, %v8102_v8  ;;  %v8123_v13 = vperm.slane %v8115_v54, %v20360_v19  ;;  %v8377_v2 = vperm.slane %v8373_v18, %v20343_v51  ;;  %v8381_v20 = vsel %vm742_vm0, %v17091_v15, %v8380_v36 }
 0x9ae   : > { %v8470_v1 = vsel %vm742_vm0, %v8469_v61, %v8069_v14  ;;  %v17189_v47 = vperm.slane %v8481_v39, %v20343_v51  ;;  %v8111_v48 = vperm.slane %v8103_v10, %v20360_v19  ;;  %v8124_v57 = vrot.slane %v8107_v0, 4 }
 0x9af   : > { %v8130_v21 = vrot.slane %v8123_v13, 4  ;;  %v8392_v33 = vrot.slane %v17109_v63, 4  ;;  %v8427_v43 = vsel %vm742_vm0, %v8426_v3, %v17127_v4  ;;  %v8435_v44 = vsel %vm742_vm0, %v17146_v35, %v8434_v56 }
 0x9b0   : > { %v8126_v36 = vrot.slane %v8111_v48, 4  ;;  %v8129_v60 = vsel %vm742_vm0, 0.0, %v8128_v16  ;;  %v8389_v24 = vperm.slane %v8381_v20, %v20360_v19  ;;  %v8431_v41 = vperm.slane %v8427_v43, %v20343_v51 }
 0x9b1   : > { %v8131_v34 = vsel %vm742_vm0, 0.0, %v8130_v21  ;;  %v8529_v52 = vsel %vm742_vm0, %v8130_v21, %v8119_v55  ;;  %v8393_v12 = vsel %vm742_vm0, %v8377_v2, %v8392_v33  ;;  %v8443_v59 = vperm.slane %v8435_v44, %v20360_v19 }
 0x9b2   : > { %v8127_v4 = vsel %vm742_vm0, 0.0, %v8126_v36  ;;  %v8518_v3 = vsel %vm742_vm0, %v8126_v36, %v8107_v0  ;;  %v17209_v45 = vperm.slane %v8529_v52, %v20343_v51  ;;  %v8534_v27 = vrot.slane %v8131_v34, 4 }
 0x9b3   : > { %v8500_v5 = vrot.slane %v17176_v25, 4  ;;  %v8523_v22 = vrot.slane %v8127_v4, 4  ;;  %v8401_v58 = vperm.slane %v8393_v12, %v20360_v19  ;;  %v8446_v40 = vrot.slane %v17151_v46, 4 }
 0x9b4   : > { %v8535_v49 = vsel %vm742_vm0, %v8534_v27, %v8129_v60  ;;  %v8408_v6 = vrot.slane %v8389_v24, 4  ;;  %v8462_v26 = vrot.slane %v8443_v59, 4  ;;  %v8379_v56 = vsel %vm742_vm0, %v8378_v17, %v17086_v53 }
 0x9b5   : > { %v8125_v37 = vsel %vm742_vm0, 0.0, %v8124_v57  ;;  %v8522_v29 = vperm.slane %v8518_v3, %v20343_v51  ;;  %v8554_v32 = vrot.slane %v17209_v45, 4  ;;  %v8447_v7 = vsel %vm742_vm0, %v8431_v41, %v8446_v40 }
 0x9b6   : > { %v8455_v38 = vperm.slane %v8447_v7, %v20360_v19  ;;  %v8406_v9 = vrot.slane %v8401_v58, 4  ;;  %v17225_v23 = vperm.slane %v8379_v56, %v20360_v19  ;;  %v8390_v42 = vrot.slane %v8377_v2, 4 }
 0x9b7   : > { %v8524_v30 = vsel %vm742_vm0, %v8523_v22, %v8125_v37  ;;  %v8539_v15 = vperm.slane %v8535_v49, %v20343_v51  ;;  %v8433_v53 = vsel %vm742_vm0, %v8432_v50, %v17132_v11  ;;  %v8444_v17 = vrot.slane %v8431_v41, 4 }
 0x9b8   : > { %v8409_v31 = vsel %vm742_vm0, %v8401_v58, %v8408_v6  ;;  %v8463_v14 = vsel %vm742_vm0, %v8455_v38, %v8462_v26  ;;  %v8460_v61 = vrot.slane %v8455_v38, 4  ;;  %v8391_v55 = vsel %vm742_vm0, %v8390_v42, %v17109_v63  ;;  %v7898_v38 = vpop.f32.mrf.mxu2 }
 0x9b9   : > { %v9787_v18 = vpack.i.bf16 %v8463_v14, %v8409_v31  ;;  %v17238_v39 = vperm.slane %v8391_v55, %v20360_v19  ;;  %v8404_v28 = vrot.slane %v17225_v23, 4  ;;  %v17242_v8 = vperm.slane %v8433_v53, %v20360_v19 }
 0x9ba   : > { %v8498_v11 = vrot.slane %v17189_v47, 4  ;;  %v8407_v35 = vsel %vm742_vm0, %v8406_v9, %v8389_v24  ;;  %v8461_v50 = vsel %vm742_vm0, %v8460_v61, %v8443_v59  ;;  %v8445_v0 = vsel %vm742_vm0, %v8444_v17, %v17151_v46 }
 0x9bb   : > { %9788 = vrot.lane.b32.xlu2 %v9787_v18, %s10106_s13  ;;  %v9782_v63 = vpack.i.bf16 %v8461_v50, %v8407_v35  ;;  %v8405_v54 = vsel %vm742_vm0, %v17238_v39, %v8404_v28  ;;  %v17253_v16 = vperm.slane %v8445_v0, %v20360_v19  ;;  %v8458_v10 = vrot.slane %v17242_v8, 4 }
 0x9bc   : > { %v8474_v13 = vperm.slane %v8470_v1, %v20343_v51  ;;  %v8488_v2 = vrot.slane %v17171_v62, 4  ;;  %v8501_v20 = vsel %vm742_vm0, %v17189_v47, %v8500_v5  ;;  %v8528_v46 = vperm.slane %v8524_v30, %v20343_v51 }
 0x9bd   : > { %9783 = vrot.lane.b32.xlu1 %v9782_v63, %s10105_s12  ;;  %v8459_v48 = vsel %vm742_vm0, %v17253_v16, %v8458_v10  ;;  %v8509_v57 = vperm.slane %v8501_v20, %v20360_v19  ;;  %v8542_v21 = vrot.slane %v8522_v29, 4  ;;  %v8555_v33 = vsel %vm742_vm0, %v8539_v15, %v8554_v32 }
 0x9be   : > { %v9777_v43 = vpack.i.bf16 %v8459_v48, %v8405_v54  ;;  %v8489_v1 = vsel %vm742_vm0, %v8474_v13, %v8488_v2  ;;  %v8563_v44 = vperm.slane %v8555_v33, %v20360_v19  ;;  %v8486_v36 = vrot.slane %v8474_v13, 4 }
 0x9bf   : > { %v8552_v60 = vrot.slane %v8539_v15, 4  ;;  %v8497_v47 = vperm.slane %v8489_v1, %v20360_v19  ;;  %v8514_v24 = vrot.slane %v8509_v57, 4  ;;  %v8543_v41 = vsel %vm742_vm0, %v8528_v46, %v8542_v21 }
 0x9c0   : > { %9778 = vrot.lane.b32.xlu0 %v9777_v43, %s10104_s11  ;;  %v8551_v34 = vperm.slane %v8543_v41, %v20360_v19  ;;  %v8568_v52 = vrot.slane %v8563_v44, 4  ;;  %v8487_v12 = vsel %vm742_vm0, %v8486_v36, %v17171_v62  ;;  %v8540_v4 = vrot.slane %v8528_v46, 4  ;;  %v7900_v20 = vpop.f32.mrf.mxu2 }
 0x9c1   : > { %v17275_v59 = vperm.slane %v8487_v12, %v20360_v19  ;;  %v8515_v3 = vsel %vm742_vm0, %v8514_v24, %v8497_v47  ;;  %v8499_v22 = vsel %vm742_vm0, %v8498_v11, %v17176_v25  ;;  %v8553_v40 = vsel %vm742_vm0, %v8552_v60, %v17209_v45 }
 0x9c2   : > { %v8569_v27 = vsel %vm742_vm0, %v8568_v52, %v8551_v34  ;;  %v8541_v58 = vsel %vm742_vm0, %v8540_v4, %v8522_v29  ;;  %v17290_v6 = vperm.slane %v8499_v22, %v20360_v19  ;;  %v17293_v26 = vperm.slane %v8553_v40, %v20360_v19  ;;  %v7643_v29 = vpop.f32.mrf.mxu3 }
 0x9c3   : > { %v9797_v5 = vpack.i.bf16 %v8569_v27, %v8515_v3  ;;  %v8512_v49 = vrot.slane %v17275_v59, 4  ;;  %v17286_v62 = vperm.slane %v8541_v58, %v20360_v19  ;;  %v8570_v32 = vrot.slane %v8551_v34, 4 }
 0x9c4   : > { %v8516_v7 = vrot.slane %v8497_v47, 4  ;;  %v8134_v15 = vrot.slane %v7643_v29, 4  ;;  %v8144_v55 = vrot.slane %v7898_v38, 4  ;;  %v8200_v47 = vrot.slane %v7900_v20, 4 }
 0x9c5   : > { %9798 = vrot.lane.b32.xlu1 %v9797_v5, %s10105_s12  ;;  %v8566_v25 = vrot.slane %v17286_v62, 4  ;;  %v8513_v56 = vsel %vm742_vm0, %v17290_v6, %v8512_v49  ;;  %v8571_v9 = vsel %vm742_vm0, %v8563_v44, %v8570_v32 }
 0x9c6   : > { %v8517_v53 = vsel %vm742_vm0, %v8509_v57, %v8516_v7 }
 0x9c7   : > { %v8567_v45 = vsel %vm742_vm0, %v17293_v26, %v8566_v25  ;;  %v9802_v17 = vpack.i.bf16 %v8571_v9, %v8517_v53 }
 0x9c8   : > { %v9792_v37 = vpack.i.bf16 %v8567_v45, %v8513_v56 }
 0x9ca   : > { %9793 = vrot.lane.b32.xlu0 %v9792_v37, %s10104_s11  ;;  %v7645_v18 = vpop.f32.mrf.mxu3 }
 0x9cb   : > { %v8190_v10 = vrot.slane %v7645_v18, 4 }
 0x9d2   : > { %9803 = vrot.lane.b32.xlu0 %v9802_v17, %s10106_s13 }
 0x9d4   : > { %v7813_v42 = vpop.f32.mrf.mxu1 }
 0x9d5   : > { %v8132_v30 = vrot.slane %v7813_v42, 4  ;;  %v8135_v14 = vsel %vm742_vm0, %v7813_v42, %v8134_v15 }
 0x9d6   : > { %v8143_v11 = vperm.slane %v8135_v14, %v20343_v51 }
 0x9d7   : > { %v8133_v31 = vsel %vm742_vm0, %v8132_v30, %v7643_v29 }
 0x9d8   : > { %v8139_v61 = vperm.slane %v8133_v31, %v20343_v51  ;;  %v8170_v21 = vrot.slane %v8143_v11, 4 }
 0x9da   : > { %v7728_v28 = vpop.f32.mrf.mxu0  ;;  %v8158_v0 = vrot.slane %v8139_v61, 4 }
 0x9db   : > { %v8145_v35 = vsel %vm742_vm0, %v8144_v55, %v7728_v28  ;;  %v8146_v50 = vrot.slane %v7728_v28, 4 }
 0x9dc   : > { %v7815_v63 = vpop.f32.mrf.mxu1  ;;  %v8151_v54 = vperm.slane %v8145_v35, %v20343_v51 }
 0x9dd   : > { %v8188_v13 = vrot.slane %v7815_v63, 4  ;;  %v8147_v2 = vsel %vm742_vm0, %v7898_v38, %v8146_v50  ;;  %v8191_v43 = vsel %vm742_vm0, %v7815_v63, %v8190_v10 }
 0x9de   : > { %v8155_v46 = vperm.slane %v8147_v2, %v20343_v51  ;;  %v8156_v48 = vrot.slane %v8151_v54, 4  ;;  %v8159_v57 = vsel %vm742_vm0, %v8151_v54, %v8158_v0  ;;  %v8199_v52 = vperm.slane %v8191_v43, %v20343_v51 }
 0x9df   : > { %v8189_v33 = vsel %vm742_vm0, %v8188_v13, %v7645_v18  ;;  %v8167_v1 = vperm.slane %v8159_v57, %v20360_v19 }
 0x9e0   : > { %v8195_v44 = vperm.slane %v8189_v33, %v20343_v51  ;;  %v8157_v36 = vsel %vm742_vm0, %v8156_v48, %v8139_v61  ;;  %v8168_v60 = vrot.slane %v8155_v46, 4  ;;  %v8171_v41 = vsel %vm742_vm0, %v8155_v46, %v8170_v21 }
 0x9e1   : > { %v8163_v24 = vperm.slane %v8157_v36, %v20360_v19  ;;  %v8182_v34 = vrot.slane %v8167_v1, 4  ;;  %v8179_v3 = vperm.slane %v8171_v41, %v20360_v19  ;;  %v8226_v14 = vrot.slane %v8199_v52, 4 }
 0x9e2   : > { %v8214_v12 = vrot.slane %v8195_v44, 4  ;;  %v8169_v4 = vsel %vm742_vm0, %v8168_v60, %v8143_v11  ;;  %v7730_v27 = vpop.f32.mrf.mxu0 }
 0x9e3   : > { %v8175_v5 = vperm.slane %v8169_v4, %v20360_v19  ;;  %v8180_v22 = vrot.slane %v8163_v24, 4  ;;  %v8183_v58 = vsel %vm742_vm0, 0.0, %v8182_v34  ;;  %v8572_v40 = vsel %vm742_vm0, %v8182_v34, %v8163_v24 }
 0x9e4   : > { %v8186_v49 = vrot.slane %v8179_v3, 4  ;;  %v17327_v25 = vperm.slane %v8572_v40, %v20343_v51  ;;  %v8577_v56 = vrot.slane %v8183_v58, 4  ;;  %v8201_v45 = vsel %vm742_vm0, %v8200_v47, %v7730_v27 }
 0x9e5   : > { %v8181_v37 = vsel %vm742_vm0, 0.0, %v8180_v22  ;;  %v8184_v29 = vrot.slane %v8175_v5, 4  ;;  %v8202_v32 = vrot.slane %v7730_v27, 4  ;;  %v8207_v7 = vperm.slane %v8201_v45, %v20343_v51 }
 0x9e6   : > { %v8187_v38 = vsel %vm742_vm0, 0.0, %v8186_v49  ;;  %v8578_v9 = vsel %vm742_vm0, %v8577_v56, %v8181_v37  ;;  %v8583_v42 = vsel %vm742_vm0, %v8186_v49, %v8175_v5  ;;  %v8596_v30 = vrot.slane %v17327_v25, 4 }
 0x9e7   : > { %v8185_v15 = vsel %vm742_vm0, 0.0, %v8184_v29  ;;  %v17338_v53 = vperm.slane %v8578_v9, %v20343_v51  ;;  %v17341_v17 = vperm.slane %v8583_v42, %v20343_v51  ;;  %v8588_v31 = vrot.slane %v8187_v38, 4 }
 0x9e8   : > { %v8203_v61 = vsel %vm742_vm0, %v7900_v20, %v8202_v32  ;;  %v8212_v55 = vrot.slane %v8207_v7, 4  ;;  %v8215_v18 = vsel %vm742_vm0, %v8207_v7, %v8214_v12  ;;  %v7648_v28 = vpop.f32.mrf.mxu3 }
 0x9e9   : > { %v8594_v11 = vrot.slane %v17338_v53, 4  ;;  %v8211_v35 = vperm.slane %v8203_v61, %v20343_v51  ;;  %v8223_v50 = vperm.slane %v8215_v18, %v20360_v19  ;;  %v8246_v0 = vrot.slane %v7648_v28, 4 }
 0x9ea   : > { %v8213_v63 = vsel %vm742_vm0, %v8212_v55, %v8195_v44  ;;  %v7903_v54 = vpop.f32.mrf.mxu2  ;;  %v7818_v10 = vpop.f32.mrf.mxu1  ;;  %v8589_v13 = vsel %vm742_vm0, %v8588_v31, %v8185_v15  ;;  %v8597_v2 = vsel %vm742_vm0, %v17338_v53, %v8596_v30  ;;  %v8608_v20 = vrot.slane %v17341_v17, 4 }
 0x9eb   : > { %v8219_v46 = vperm.slane %v8213_v63, %v20360_v19  ;;  %v8224_v48 = vrot.slane %v8211_v35, 4  ;;  %v8227_v57 = vsel %vm742_vm0, %v8211_v35, %v8226_v14  ;;  %v8238_v21 = vrot.slane %v8223_v50, 4 }
 0x9ec   : > { %v8235_v33 = vperm.slane %v8227_v57, %v20360_v19  ;;  %v8256_v43 = vrot.slane %v7903_v54, 4  ;;  %v8244_v1 = vrot.slane %v7818_v10, 4  ;;  %v8247_v44 = vsel %vm742_vm0, %v7818_v10, %v8246_v0 }
 0x9ed   : > { %v8225_v36 = vsel %vm742_vm0, %v8224_v48, %v8199_v52  ;;  %v8236_v60 = vrot.slane %v8219_v46, 4  ;;  %v8239_v47 = vsel %vm742_vm0, 0.0, %v8238_v21  ;;  %v8626_v24 = vsel %vm742_vm0, %v8238_v21, %v8219_v46 }
 0x9ee   : > { %v8231_v41 = vperm.slane %v8225_v36, %v20360_v19  ;;  %v8242_v34 = vrot.slane %v8235_v33, 4  ;;  %v17362_v12 = vperm.slane %v8626_v24, %v20343_v51  ;;  %v8631_v4 = vrot.slane %v8239_v47, 4 }
 0x9ef   : > { %v8237_v3 = vsel %vm742_vm0, 0.0, %v8236_v60  ;;  %v8245_v27 = vsel %vm742_vm0, %v8244_v1, %v7648_v28  ;;  %v8255_v5 = vperm.slane %v8247_v44, %v20343_v51  ;;  %v17368_v52 = vperm.slane %v8589_v13, %v20343_v51  ;;  %v7733_v7 = vpop.f32.mrf.mxu0 }
 0x9f0   : > { %v8240_v22 = vrot.slane %v8231_v41, 4  ;;  %v8243_v58 = vsel %vm742_vm0, 0.0, %v8242_v34  ;;  %v8632_v40 = vsel %vm742_vm0, %v8631_v4, %v8237_v3  ;;  %v8637_v49 = vsel %vm742_vm0, %v8242_v34, %v8231_v41  ;;  %v7650_v56 = vpop.f32.mrf.mxu3 }
 0x9f1   : > { %v17374_v45 = vperm.slane %v8632_v40, %v20343_v51  ;;  %v17377_v37 = vperm.slane %v8637_v49, %v20343_v51  ;;  %v8642_v29 = vrot.slane %v8243_v58, 4  ;;  %v8650_v32 = vrot.slane %v17362_v12, 4 }
 0x9f2   : > { %v8241_v38 = vsel %vm742_vm0, 0.0, %v8240_v22  ;;  %v8251_v9 = vperm.slane %v8245_v27, %v20343_v51  ;;  %v8282_v42 = vrot.slane %v8255_v5, 4  ;;  %v8302_v30 = vrot.slane %v7650_v56, 4  ;;  %v17382_v15 = vpop.f32.mrf.mxu2  ;;  %v7820_v31 = vpop.f32.mrf.mxu1 }
 0x9f3   : > { %v8648_v14 = vrot.slane %v17374_v45, 4  ;;  %v8312_v61 = vrot.slane %v17382_v15, 4  ;;  %v8257_v55 = vsel %vm742_vm0, %v8256_v43, %v7733_v7  ;;  %v8258_v18 = vrot.slane %v7733_v7, 4 }
 0x9f4   : > { %v8270_v28 = vrot.slane %v8251_v9, 4  ;;  %v8263_v35 = vperm.slane %v8257_v55, %v20343_v51  ;;  %v8300_v50 = vrot.slane %v7820_v31, 4  ;;  %v8303_v0 = vsel %vm742_vm0, %v7820_v31, %v8302_v30  ;;  %v9322_v30 = vld [vmem:[#allocation5 + $0x38] sm:$0xff] }
 0x9f5   : > { %v8259_v63 = vsel %vm742_vm0, %v7903_v54, %v8258_v18  ;;  %v17391_v10 = vperm.slane %v8303_v0, %v20343_v51  ;;  %v17394_v13 = vperm.slane %v8597_v2, %v20360_v19  ;;  %v8609_v46 = vsel %vm742_vm0, %v17368_v52, %v8608_v20  ;;  %8977 = vmatpush.bf16.msra.mxu3 %v9322_v30  ;;  %v9321_v0 = vld [vmem:[#allocation5 + $0x30] sm:$0xff] }
 0x9f6   : > { %v8267_v48 = vperm.slane %v8259_v63, %v20343_v51  ;;  %v8268_v57 = vrot.slane %v8263_v35, 4  ;;  %v8271_v21 = vsel %vm742_vm0, %v8263_v35, %v8270_v28  ;;  %v8301_v33 = vsel %vm742_vm0, %v8300_v50, %v7650_v56 }
 0x9f7   : > { %v8279_v43 = vperm.slane %v8271_v21, %v20360_v19  ;;  %v8307_v54 = vperm.slane %v8301_v33, %v20343_v51  ;;  %v8338_v1 = vrot.slane %v17391_v10, 4  ;;  %v8617_v44 = vperm.slane %v8609_v46, %v20360_v19  ;;  %v7735_v55 = vpop.f32.mrf.mxu0 }
 0x9f8   : > { %v8269_v2 = vsel %vm742_vm0, %v8268_v57, %v8251_v9  ;;  %v8280_v36 = vrot.slane %v8267_v48, 4  ;;  %v8283_v20 = vsel %vm742_vm0, %v8267_v48, %v8282_v42  ;;  %v8624_v60 = vrot.slane %v17394_v13, 4 }
 0x9f9   : > { %v8275_v47 = vperm.slane %v8269_v2, %v20360_v19  ;;  %v8291_v24 = vperm.slane %v8283_v20, %v20360_v19  ;;  %v8294_v41 = vrot.slane %v8279_v43, 4  ;;  %v8326_v34 = vrot.slane %v8307_v54, 4  ;;  %8978 = vmatpush.bf16.msra.mxu3 %v9321_v0 }
 0x9fa   : > { %v8281_v4 = vsel %vm742_vm0, %v8280_v36, %v8255_v5  ;;  %v8625_v3 = vsel %vm742_vm0, %v8617_v44, %v8624_v60  ;;  %v8643_v27 = vsel %vm742_vm0, %v8642_v29, %v8241_v38  ;;  %v8651_v22 = vsel %vm742_vm0, %v17374_v45, %v8650_v32 }
 0x9fb   : > { %v8287_v58 = vperm.slane %v8281_v4, %v20360_v19  ;;  %v8292_v40 = vrot.slane %v8275_v47, 4  ;;  %v8295_v49 = vsel %vm742_vm0, 0.0, %v8294_v41  ;;  %v8298_v56 = vrot.slane %v8291_v24, 4 }
 0x9fc   : > { %v8680_v7 = vsel %vm742_vm0, %v8294_v41, %v8275_v47  ;;  %v8685_v9 = vrot.slane %v8295_v49, 4  ;;  %v17419_v42 = vperm.slane %v8643_v27, %v20343_v51  ;;  %v8659_v5 = vperm.slane %v8651_v22, %v20360_v19  ;;  %v9320_v27 = vld [vmem:[#allocation5 + $0x28] sm:$0xff] }
 0x9fd   : > { %v8293_v29 = vsel %vm742_vm0, 0.0, %v8292_v40  ;;  %v8296_v38 = vrot.slane %v8287_v58, 4  ;;  %v17424_v32 = vsel %vm742_vm0, 0.0, %v8298_v56  ;;  %v17427_v31 = vperm.slane %v8680_v7, %v20343_v51  ;;  %8979 = vmatpush.bf16.msra.mxu3 %v9320_v27 }
 0x9fe   : > { %v8686_v18 = vsel %vm742_vm0, %v8685_v9, %v8293_v29  ;;  %v8691_v28 = vsel %vm742_vm0, %v8298_v56, %v8287_v58  ;;  %v8696_v35 = vrot.slane %v17424_v32, 4  ;;  %v8662_v50 = vrot.slane %v17377_v37, 4  ;;  %v9319_v56 = vld [vmem:[#allocation5 + $0x20] sm:$0xff] }
 0x9ff   : > { %v17434_v63 = vsel %vm742_vm0, 0.0, %v8296_v38  ;;  %v17437_v46 = vperm.slane %v8686_v18, %v20343_v51  ;;  %v17440_v48 = vperm.slane %v8691_v28, %v20343_v51  ;;  %v8704_v57 = vrot.slane %v17427_v31, 4 }
 0xa00   : > { %v8663_v21 = vsel %vm742_vm0, %v17419_v42, %v8662_v50  ;;  %v8678_v33 = vrot.slane %v8659_v5, 4  ;;  %v8313_v43 = vsel %vm742_vm0, %v8312_v61, %v7735_v55  ;;  %v8314_v2 = vrot.slane %v7735_v55, 4 }
 0xa01   : > { %v8702_v36 = vrot.slane %v17437_v46, 4  ;;  %v8671_v20 = vperm.slane %v8663_v21, %v20360_v19  ;;  %v8319_v60 = vperm.slane %v8313_v43, %v20343_v51  ;;  %v8622_v47 = vrot.slane %v8617_v44, 4  ;;  %8980 = vmatpush.bf16.msra.mxu3 %v9319_v56 }
 0xa02   : > { %v8315_v24 = vsel %vm742_vm0, %v17382_v15, %v8314_v2  ;;  %v8595_v41 = vsel %vm742_vm0, %v8594_v11, %v17327_v25  ;;  %v8606_v4 = vrot.slane %v17368_v52, 4  ;;  %v8649_v61 = vsel %vm742_vm0, %v8648_v14, %v17362_v12 }
 0xa03   : > { %v8679_v22 = vsel %vm742_vm0, %v8671_v20, %v8678_v33  ;;  %v8323_v44 = vperm.slane %v8315_v24, %v20343_v51  ;;  %v8324_v58 = vrot.slane %v8319_v60, 4  ;;  %v8327_v15 = vsel %vm742_vm0, %v8319_v60, %v8326_v34  ;;  %v9318_v33 = vld [vmem:[#allocation5 + $0x18] sm:$0xff] }
 0xa04   : > { %v9817_v40 = vpack.i.bf16 %v8679_v22, %v8625_v3  ;;  %v8335_v53 = vperm.slane %v8327_v15, %v20360_v19  ;;  %v8623_v25 = vsel %vm742_vm0, %v8622_v47, %v17394_v13  ;;  %v8676_v11 = vrot.slane %v8671_v20, 4 }
 0xa05   : > { %v8325_v52 = vsel %vm742_vm0, %v8324_v58, %v8307_v54  ;;  %v8336_v45 = vrot.slane %v8323_v44, 4  ;;  %v8339_v12 = vsel %vm742_vm0, %v8323_v44, %v8338_v1  ;;  %v17471_v14 = vperm.slane %v8595_v41, %v20360_v19  ;;  %8981 = vmatpush.bf16.msra.mxu3 %v9318_v33 }
 0xa06   : > { %9818 = vrot.lane.b32.xlu0 %v9817_v40, %s10106_s13  ;;  %v8331_v34 = vperm.slane %v8325_v52, %v20360_v19  ;;  %v8347_v3 = vperm.slane %v8339_v12, %v20360_v19  ;;  %v8350_v49 = vrot.slane %v8335_v53, 4  ;;  %v8677_v13 = vsel %vm742_vm0, %v8676_v11, %v8659_v5 }
 0xa07   : > { %v8337_v54 = vsel %vm742_vm0, %v8336_v45, %v17391_v10  ;;  %v9812_v7 = vpack.i.bf16 %v8677_v13, %v8623_v25  ;;  %v8607_v1 = vsel %vm742_vm0, %v8606_v4, %v17341_v17  ;;  %v8620_v9 = vrot.slane %v17471_v14, 4  ;;  %v9317_v25 = vld [vmem:[#allocation5 + $0x10] sm:$0xff] }
 0xa08   : > { %v8343_v30 = vperm.slane %v8337_v54, %v20360_v19  ;;  %v8348_v29 = vrot.slane %v8331_v34, 4  ;;  %v8351_v38 = vsel %vm742_vm0, 0.0, %v8350_v49  ;;  %v8354_v55 = vrot.slane %v8347_v3, 4 }
 0xa09   : > { %v8734_v18 = vsel %vm742_vm0, %v8350_v49, %v8331_v34  ;;  %v8739_v5 = vrot.slane %v8351_v38, 4  ;;  %9813 = vrot.lane.b32.xlu1 %v9812_v7, %s10105_s12  ;;  %v17487_v28 = vperm.slane %v8607_v1, %v20360_v19  ;;  %v17490_v10 = vperm.slane %v8649_v61, %v20360_v19  ;;  %8982 = vmatpush.bf16.msra.mxu3 %v9317_v25 }
 0xa0a   : > { %v8349_v17 = vsel %vm742_vm0, 0.0, %v8348_v29  ;;  %v8352_v50 = vrot.slane %v8343_v30, 4  ;;  %v8355_v0 = vsel %vm742_vm0, 0.0, %v8354_v55  ;;  %v8738_v21 = vperm.slane %v8734_v18, %v20343_v51 }
 0xa0b   : > { %v8740_v43 = vsel %vm742_vm0, %v8739_v5, %v8349_v17  ;;  %v8745_v2 = vsel %vm742_vm0, %v8354_v55, %v8343_v30  ;;  %v8750_v20 = vrot.slane %v8355_v0, 4  ;;  %v8621_v60 = vsel %vm742_vm0, %v17487_v28, %v8620_v9 }
 0xa0c   : > { %v8353_v47 = vsel %vm742_vm0, 0.0, %v8352_v50  ;;  %v8744_v24 = vperm.slane %v8740_v43, %v20343_v51  ;;  %v8749_v41 = vperm.slane %v8745_v2, %v20343_v51  ;;  %v8758_v4 = vrot.slane %v8738_v21, 4 }
 0xa0d   : > { %v8751_v61 = vsel %vm742_vm0, %v8750_v20, %v8353_v47  ;;  %v8660_v27 = vrot.slane %v17419_v42, 4  ;;  %v8674_v22 = vrot.slane %v17490_v10, 4  ;;  %v8697_v44 = vsel %vm742_vm0, %v8696_v35, %v17434_v63 }
 0xa0e   : > { %v8756_v58 = vrot.slane %v8744_v24, 4  ;;  %v8701_v15 = vperm.slane %v8697_v44, %v20343_v51  ;;  %v8705_v40 = vsel %vm742_vm0, %v17437_v46, %v8704_v57  ;;  %v8716_v53 = vrot.slane %v17440_v48, 4 }
 0xa0f   : > { %v8661_v42 = vsel %vm742_vm0, %v8660_v27, %v17377_v37  ;;  %v8713_v11 = vperm.slane %v8705_v40, %v20360_v19  ;;  %v8755_v32 = vperm.slane %v8751_v61, %v20343_v51  ;;  %v8759_v35 = vsel %vm742_vm0, %v8744_v24, %v8758_v4 }
 0xa10   : > { %v17521_v63 = vperm.slane %v8661_v42, %v20360_v19  ;;  %v8717_v52 = vsel %vm742_vm0, %v8701_v15, %v8716_v53  ;;  %v8767_v45 = vperm.slane %v8759_v35, %v20360_v19  ;;  %v8770_v57 = vrot.slane %v8749_v41, 4 }
 0xa11   : > { %v8725_v12 = vperm.slane %v8717_v52, %v20360_v19  ;;  %v8732_v34 = vrot.slane %v8713_v11, 4  ;;  %v8703_v37 = vsel %vm742_vm0, %v8702_v36, %v17427_v31  ;;  %v8714_v3 = vrot.slane %v8701_v15, 4 }
 0xa12   : > { %v8675_v51 = vsel %vm742_vm0, %v17521_v63, %v8674_v22  ;;  %v8771_v49 = vsel %vm742_vm0, %v8755_v32, %v8770_v57  ;;  %v8786_v13 = vrot.slane %v8767_v45, 4  ;;  %v17534_v56 = vperm.slane %v8703_v37, %v20360_v19 }
 0xa13   : > { %v9807_v54 = vpack.i.bf16 %v8675_v51, %v8621_v60  ;;  %v8779_v7 = vperm.slane %v8771_v49, %v20360_v19  ;;  %v8730_v1 = vrot.slane %v8725_v12, 4  ;;  %v8715_v46 = vsel %vm742_vm0, %v8714_v3, %v17440_v48  ;;  %v9316_v60 = vld [vmem:[#allocation5 + $0x8] sm:$0xff] }
 0xa14   : > { %v8757_v31 = vsel %vm742_vm0, %v8756_v58, %v8738_v21  ;;  %v8768_v36 = vrot.slane %v8755_v32, 4  ;;  %v8733_v9 = vsel %vm742_vm0, %v8725_v12, %v8732_v34  ;;  %v8728_v38 = vrot.slane %v17534_v56, 4  ;;  %8983 = vmatpush.bf16.msra.mxu3 %v9316_v60 }
 0xa15   : > { %9808 = vrot.lane.b32.xlu2 %v9807_v54, %s10104_s11  ;;  %v8787_v30 = vsel %vm742_vm0, %v8779_v7, %v8786_v13  ;;  %v8784_v29 = vrot.slane %v8779_v7, 4  ;;  %v17545_v18 = vperm.slane %v8715_v46, %v20360_v19  ;;  %v17548_v5 = vperm.slane %v8757_v31, %v20360_v19  ;;  %v9789_v27 = vpop.permute.xlu2 %9788 }
 0xa16   : > { %v9832_v55 = vpack.i.bf16 %v8787_v30, %v8733_v9  ;;  %v8769_v48 = vsel %vm742_vm0, %v8768_v36, %v8749_v41  ;;  %v8731_v17 = vsel %vm742_vm0, %v8730_v1, %v8713_v11  ;;  %v8618_v47 = vrot.slane %v17487_v28, 4 }
 0xa17   : > { %v8785_v50 = vsel %vm742_vm0, %v8784_v29, %v8767_v45  ;;  %v17554_v0 = vperm.slane %v8769_v48, %v20360_v19  ;;  %v8782_v33 = vrot.slane %v17548_v5, 4  ;;  %v8729_v43 = vsel %vm742_vm0, %v17545_v18, %v8728_v38  ;;  %v9315_v19 = vld [vmem:[#allocation5] sm:$0xff] }
 0xa18   : > { %9833 = vrot.lane.b32.xlu0 %v9832_v55, %s10106_s13  ;;  %v9827_v21 = vpack.i.bf16 %v8785_v50, %v8731_v17  ;;  %8984 = vmatpush.bf16.msra.mxu3 %v9315_v19  ;;  %v8619_v24 = vsel %vm742_vm0, %v8618_v47, %v17471_v14  ;;  %v8402_v4 = vrot.slane %v17238_v39, 4  ;;  %v8456_v61 = vrot.slane %v17253_v16, 4  ;;  %s9323_s13 = sshll.u32 %s10163_s22, 6 }
 0xa19   : > { %v8783_v2 = vsel %vm742_vm0, %v17554_v0, %v8782_v33  ;;  %v9791_v25 = vunpack.i.h.bf16 %v9789_v27  ;;  %v9790_v14 = vunpack.i.l.bf16 %v9789_v27  ;;  %v8564_v45 = vrot.slane %v17293_v26, 4  ;;  %s9026_s30 = scalar_lea.hbm %s17649_s5, %s9323_s13 }
 0xa1a   : > { %9828 = vrot.lane.b32.xlu1 %v9827_v21, %s10105_s12  ;;  %v9822_v20 = vpack.i.bf16 %v8783_v2, %v8729_v43  ;;  %v8403_v53 = vsel %vm742_vm0, %v8402_v4, %v17225_v23  ;;  %v8457_v28 = vsel %vm742_vm0, %v8456_v61, %v17242_v8  ;;  %v8510_v8 = vrot.slane %v17290_v6, 4  ;;  %s9029_s8 = sshll.u32 %s9026_s30, 4  ;;  %s9030_s8 = int_to_ptr.hbm [resolvable:$true] %s9029_s8 }
 0xa1b   : > { %v8565_v3 = vsel %vm742_vm0, %v8564_v45, %v17286_v62  ;;  %v8672_v9 = vrot.slane %v17521_v63, 4  ;;  %v8780_v4 = vrot.slane %v17554_v0, 4  ;;  %s10039_s10 = sshra.s32 %s9030_s8, 4  ;;  %s10040_s10 = int_to_ptr.hbm [resolvable:$true] %s10039_s10 }
 0xa1c   : > { %v8511_v37 = vsel %vm742_vm0, %v8510_v8, %v17275_v59  ;;  %s10041_s15 = scalar_lea.hbm %s10040_s10, 64  ;;  %p10046_p3 = scmp.lt.s32.totalorder %s10040_s10, %s17649_s5 }
 0xa1d   : > { %9823 = vrot.lane.b32.xlu2 %v9822_v20, %s10104_s11  ;;  %v8673_v48 = vsel %vm742_vm0, %v8672_v9, %v17490_v10  ;;  %v8726_v10 = vrot.slane %v17545_v18, 4  ;;  %s9122_s11 = sshll.u32 %s249_s6, 6  ;;  %p10042_p0 = scmp.ne.s32.totalorder %s10040_s10, %s10041_s15 }
 0xa1e   : > { %s251_s12 = scalar_lea.vmem [#allocation7], %s9122_s11  ;;  %p10047_p4 = scmp.lt.s32.totalorder %s10045_s17, %s10041_s15 }
 0xa1f   : > { %s9027_s7 = sshll.u32 %s251_s12, 4  ;;  %p10043_p1 = pnand %p10042_p0, %p10180_p5  ;;  %s9028_s7 = int_to_ptr.vmem [resolvable:$true] %s9027_s7 }
 0xa20   : > { %p10048_p7 = por %p10047_p4, %p10046_p3 }
 0xa21   : > { %p10044_p2 = pneg %p10043_p1 }
 0xa23   : > { %p10049_p8 = pnand %p10048_p7, %p10044_p2 }
 0xa2f   : > { %v9784_v41 = vpop.permute.xlu1 %9783 }
 0xa30   : > { %v9786_v22 = vunpack.i.h.bf16 %v9784_v41  ;;  %v9785_v44 = vunpack.i.l.bf16 %v9784_v41 }
 0xa32   : > { %v9779_v58 = vpop.permute.xlu0 %9778 }
 0xa33   : > { %v9781_v15 = vunpack.i.h.bf16 %v9779_v58  ;;  %v9780_v40 = vunpack.i.l.bf16 %v9779_v58  ;;  %v8781_v58 = vsel %vm742_vm0, %v8780_v4, %v17548_v5 }
 0xa35   : > { %v8885_v42 = vsel %vm6783_vm2, %v8457_v28, %v9781_v15  ;;  %v8884_v39 = vsel %vm6783_vm2, %v8403_v53, %v9780_v40 }
 0xa36   : > { %v8893_v16 = vsel %vm7183_vm5, %v8885_v42, %v9786_v22  ;;  %v8892_v11 = vsel %vm7183_vm5, %v8884_v39, %v9785_v44  ;;  %v8727_v44 = vsel %vm742_vm0, %v8726_v10, %v17534_v56 }
 0xa37   : > { %v8901_v32 = vsel %vm8900_vm12, %v8892_v11, %v9790_v14  ;;  %v8902_v35 = vsel %vm8900_vm12, %v8893_v16, %v9791_v25  ;;  %v9799_v34 = vpop.permute.xlu1 %9798 }
 0xa38   : > { %v8909_v52 = vpack.c.bf16 %v8902_v35, %v8901_v32  ;;  %v9801_v13 = vunpack.i.h.bf16 %v9799_v34  ;;  %v9800_v54 = vunpack.i.l.bf16 %v9799_v34 }
 0xa3a   : > { %8985 = vmatmul.bf16.vlgmr.msra.gmra.mxu3 %v8909_v52 }
 0xa3c   : > { %v9794_v23 = vpop.permute.xlu0 %9793 }
 0xa3d   : > { %v9796_v57 = vunpack.i.h.bf16 %v9794_v23  ;;  %v9795_v12 = vunpack.i.l.bf16 %v9794_v23 }
 0xa3f   : > { %v8887_v51 = vsel %vm6783_vm2, %v8565_v3, %v9796_v57  ;;  %v8886_v49 = vsel %vm6783_vm2, %v8511_v37, %v9795_v12 }
 0xa40   : > { %v8894_v26 = vsel %vm7183_vm5, %v8886_v49, %v9800_v54  ;;  %v8895_v46 = vsel %vm7183_vm5, %v8887_v51, %v9801_v13 }
 0xa44   : > { %v9804_v7 = vpop.permute.xlu0 %9803 }
 0xa45   : > { %v9806_v1 = vunpack.i.h.bf16 %v9804_v7  ;;  %v9805_v6 = vunpack.i.l.bf16 %v9804_v7 }
 0xa47   : > { %v8903_v31 = vsel %vm8900_vm12, %v8894_v26, %v9805_v6  ;;  %v8904_v59 = vsel %vm8900_vm12, %v8895_v46, %v9806_v1 }
 0xa48   : > { %v8910_v36 = vpack.c.bf16 %v8904_v59, %v8903_v31 }
 0xa4a   : > { %8990 = vmatmul.bf16.gmra.mxu3 %v8910_v36 }
 0xa6f   : > { %v9809_v62 = vpop.permute.xlu2 %9808 }
 0xa70   : > { %v9811_v30 = vunpack.i.h.bf16 %v9809_v62  ;;  %v9810_v29 = vunpack.i.l.bf16 %v9809_v62 }
 0xa72   : > { %v8888_v21 = vsel %vm6783_vm2, %v8619_v24, %v9810_v29  ;;  %v8889_v33 = vsel %vm6783_vm2, %v8673_v48, %v9811_v30 }
 0xa77   : > { %v9824_v41 = vpop.permute.xlu2 %9823 }
 0xa78   : > { %v9819_v38 = vpop.permute.xlu0 %9818  ;;  %v9826_v24 = vunpack.i.h.bf16 %v9824_v41  ;;  %v9825_v61 = vunpack.i.l.bf16 %v9824_v41 }
 0xa79   : > { %v9821_v43 = vunpack.i.h.bf16 %v9819_v38  ;;  %v9820_v2 = vunpack.i.l.bf16 %v9819_v38 }
 0xa7a   : > { %v8890_v53 = vsel %vm6783_vm2, %v8727_v44, %v9825_v61  ;;  %v8891_v28 = vsel %vm6783_vm2, %v8781_v58, %v9826_v24 }
 0xa7b   : > { %v9814_v55 = vpop.permute.xlu1 %9813 }
 0xa7c   : > { %v9816_v17 = vunpack.i.h.bf16 %v9814_v55  ;;  %v9815_v50 = vunpack.i.l.bf16 %v9814_v55 }
 0xa7e   : > { %v8896_v20 = vsel %vm7183_vm5, %v8888_v21, %v9815_v50  ;;  %v8897_v60 = vsel %vm7183_vm5, %v8889_v33, %v9816_v17 }
 0xa7f   : > { %v8905_v63 = vsel %vm8900_vm12, %v8896_v20, %v9820_v2  ;;  %v8906_v19 = vsel %vm8900_vm12, %v8897_v60, %v9821_v43 }
 0xa80   : > { %v8911_v47 = vpack.c.bf16 %v8906_v19, %v8905_v63 }
 0xa82   : > { %8995 = vmatmul.bf16.gmra.mxu3 %v8911_v47 }
 0xa8a   : > { %v9834_v27 = vpop.permute.xlu0 %9833 }
 0xa8b   : > { %v9836_v18 = vunpack.i.h.bf16 %v9834_v27  ;;  %v9835_v25 = vunpack.i.l.bf16 %v9834_v27 }
 0xa8c   : > { %v9829_v22 = vpop.permute.xlu1 %9828 }
 0xa8d   : > { %v9831_v15 = vunpack.i.h.bf16 %v9829_v22  ;;  %v9830_v40 = vunpack.i.l.bf16 %v9829_v22 }
 0xa8f   : > { %v8898_v0 = vsel %vm7183_vm5, %v8890_v53, %v9830_v40  ;;  %v8899_v14 = vsel %vm7183_vm5, %v8891_v28, %v9831_v15 }
 0xa90   : > { %v8907_v42 = vsel %vm8900_vm12, %v8898_v0, %v9835_v25  ;;  %v8908_v39 = vsel %vm8900_vm12, %v8899_v14, %v9836_v18 }
 0xa91   : > { %v8912_v56 = vpack.c.bf16 %v8908_v39, %v8907_v42 }
 0xa93   : > { %9000 = vmatmul.bf16.gmra.mxu3 %v8912_v56 }
 0xabd   : > { %v8986_v5 = vpop.f32.mrf.mxu3 }
 0xabe   : > { %9006 = vst [vmem:[%s251_s12] sm:$0xff] %v8986_v5 }
 0xac5   : > { %v8988_v16 = vpop.f32.mrf.mxu3 }
 0xac6   : > { %9007 = vst [vmem:[%s251_s12 + $0x8] sm:$0xff] %v8988_v16 }
 0xacd   : > { %v8991_v11 = vpop.f32.mrf.mxu3 }
 0xace   : > { %9008 = vst [vmem:[%s251_s12 + $0x10] sm:$0xff] %v8991_v11 }
 0xad5   : > { %v8993_v32 = vpop.f32.mrf.mxu3 }
 0xad6   : > { %9009 = vst [vmem:[%s251_s12 + $0x18] sm:$0xff] %v8993_v32 }
 0xb05   : > { %v8996_v35 = vpop.f32.mrf.mxu3 }
 0xb06   : > { %9010 = vst [vmem:[%s251_s12 + $0x20] sm:$0xff] %v8996_v35 }
 0xb0d   : > { %v8998_v52 = vpop.f32.mrf.mxu3 }
 0xb0e   : > { %9011 = vst [vmem:[%s251_s12 + $0x28] sm:$0xff] %v8998_v52 }
 0xb16   : > { %v9001_v23 = vpop.f32.mrf.mxu3 }
 0xb17   : > { %9012 = vst [vmem:[%s251_s12 + $0x30] sm:$0xff] %v9001_v23 }
 0xb1e   : > { %v9003_v8 = vpop.f32.mrf.mxu3 }
 0xb1f   : > { %9013 = vst [vmem:[%s251_s12 + $0x38] sm:$0xff] %v9003_v8 }
 0xb20   : > { %10052 = shalt.err (!%p10049_p8)
}
 0xb21   : > { %s10110_s6 = smov 128   ;;  %s10111_s11 = smov 8  }
 0xb22   : > { %9332 = dma.vmem_to_hbm [thread:$0]  (%p10180_p5), %s9028_s7, 1024, %s9030_s8, %s9015_s9, %s10110_s6, %s10110_s6, %s10111_s11  }
 0xb23 PF: > { %p9349_p9 = scmp.ge.s32.totalorder %s10095_s21, 2  ;;  %s9044_s12 = sand.u32 1, %s10083_s18  }
 0xb24   : > { %s9045_s13 = scalar_lea.sflag [#allocation4], %s9044_s12 }
 0xb25   : > { %p9342_p10 = pnand %p9349_p9, %p10184_p6 }
 0xb27   : > { %p9343_p11 = pneg %p9342_p10 }
 0xb29   : > { %10078 = dma.done.wait (%p9343_p11), %s9045_s13, 1024  }
 0xb2a   : > { %10080 = vsyncadd (%p9343_p11), %s9045_s13, 4294966272  ;;  %p17_p12 = scmp.ge.s32.totalorder %s10167_s24, 4   ;;  %s20625_s18 = smov %s10087_s19 }
 0xb2b   : > { %s20626_s19 = smov %s10091_s20  ;;  %s20627_s20 = smov %s10178_s27 }
 0xb2c   : > { %s20628_s21 = smov %s10167_s24  ;;  %19 = sbr.rel (!%p17_p12) target bundleno = 5 (0x5), region = 84 }
 0xb31   :  { %9051 = vsyncpa [#allocation3], 1 }
 0xb32   :  { %9053 = vsyncpa [#allocation3 + $0x1], 1 }
 0xb33   :  { %9054 = vsyncpa [#allocation6], 1 }
 0xb34   :  { %9055 = vsyncpa [#allocation4], 1 }
 0xb35   :  { %9057 = vsyncpa [#allocation4 + $0x1], 1 }

</bundles_post_ra>
